<compile_context>
chip_gen: v6e
topology: v6e:2x2x1
jax: 0.10.0
libtpu: 0.0.40
codegen_flags: <defaults>
</compile_context>

<pallas_src>
import jax
import jax.numpy as jnp
from jax.experimental import pallas as pl
from jax.experimental.pallas import tpu as pltpu

IMG_SHAPE = (3, 64, 64)
IN_DIM = IMG_SHAPE[0] * IMG_SHAPE[1] * IMG_SHAPE[2]   # 12288
H1, H2, OUT = 512, 256, 1
LEAKY_SLOPE = 0.2


def _leaky_relu(x):
    return jnp.where(x > 0, x, LEAKY_SLOPE * x)


def _sigmoid(x):
    # stable everywhere; lowers to the EUP tanh unit
    return 0.5 * (jnp.tanh(0.5 * x) + 1.0)


# --------------------------------------------------------------------------
# Fused kernel (n_split=1): layer-1 weight streaming over a K-only reduction
# grid, with the tiny tail (512->256->1 + sigmoid) executed in the last step.
# --------------------------------------------------------------------------
def fused_kernel(x_ref, w1_ref, b1_ref, w2_ref, b2_ref, w3t_ref, b3_ref,
                 out_ref, acc_ref):
    k = pl.program_id(0)

    @pl.when(k == 0)
    def _():
        acc_ref[...] = jnp.zeros_like(acc_ref)

    # (B, tk) bf16 @ (tk, 512) bf16 -> f32 accumulator
    acc_ref[...] += jnp.dot(x_ref[...], w1_ref[...],
                            preferred_element_type=jnp.float32)

    @pl.when(k == pl.num_programs(0) - 1)
    def _():
        h1 = _leaky_relu(acc_ref[...] + b1_ref[...])
        h2 = _leaky_relu(
            jnp.dot(h1, w2_ref[...], preferred_element_type=jnp.float32)
            + b2_ref[...])
        # 1-wide output layer as multiply + lane reduction (w3 stored as row).
        logits = jnp.sum(h2 * w3t_ref[...], axis=-1, keepdims=True) + b3_ref[...]
        out_ref[...] = _sigmoid(logits).astype(out_ref.dtype)


# --------------------------------------------------------------------------
# Split-path kernels (n_split>1, intended for v7x dual-TensorCore streaming).
# Layer 1 accumulates directly into the resident f32 output block.
# --------------------------------------------------------------------------
def layer1_split_kernel(x_ref, w1_ref, b1_ref, h1_ref):
    k = pl.program_id(1)

    @pl.when(k == 0)
    def _():
        h1_ref[...] = jnp.zeros_like(h1_ref)

    h1_ref[...] += jnp.dot(x_ref[...], w1_ref[...],
                           preferred_element_type=jnp.float32)

    @pl.when(k == pl.num_programs(1) - 1)
    def _():
        h1_ref[...] = _leaky_relu(h1_ref[...] + b1_ref[...])


def tail_kernel(h1_ref, w2_ref, b2_ref, w3t_ref, b3_ref, out_ref):
    h2 = _leaky_relu(
        jnp.dot(h1_ref[...], w2_ref[...], preferred_element_type=jnp.float32)
        + b2_ref[...])
    logits = jnp.sum(h2 * w3t_ref[...], axis=-1, keepdims=True) + b3_ref[...]
    out_ref[...] = _sigmoid(logits).astype(out_ref.dtype)


# --------------------------------------------------------------------------
# One-time parameter preparation (hoisted out of the per-forward path).
# --------------------------------------------------------------------------
def prepare_params(params, *, n_split=1):
    """Cast W1 to bf16 ONCE, optionally pre-reorder it into contiguous column
    halves (n_split, K, H1//n_split) for dual-TC streaming, and store W3 as a
    (1, 256) row vector."""
    w1, b1, w2, b2, w3, b3 = params
    assert H1 % n_split == 0
    nh = H1 // n_split
    w1_bf16 = w1.astype(jnp.bfloat16)                 # (12288, 512)
    if n_split == 1:
        w1_prep = w1_bf16
    else:
        # contiguous halves: (n_split, 12288, nh)
        w1_prep = jnp.transpose(w1_bf16.reshape(IN_DIM, n_split, nh), (1, 0, 2))
    w3t = w3.reshape(1, H2)                           # (1, 256)
    return (w1_prep, b1, w2, b2, w3t, b3)


def discriminator_forward(img, prepped, *, tk=6144, n_split=1):
    """img: (B, 3, 64, 64) float32 (NCHW, same as PyTorch).
    `prepped` must come from prepare_params(..., n_split=n_split)."""
    w1, b1, w2, b2, w3t, b3 = prepped
    B = img.shape[0]
    x = img.reshape(B, -1).astype(jnp.bfloat16)       # (B, 12288) row-major flatten
    K = x.shape[1]
    assert K == IN_DIM and K % tk == 0 and tk % 128 == 0
    nh = H1 // n_split
    assert nh % 128 == 0

    cparams = pltpu.CompilerParams(
        dimension_semantics=(("arbitrary",) if n_split == 1
                             else ("parallel", "arbitrary")),
        vmem_limit_bytes=32 * 1024 * 1024,
    )

    if n_split == 1:
        # Single fused kernel: W1 streamed in contiguous full-width K tiles,
        # tail fused into the last grid step (no second launch, no h1 HBM hop).
        return pl.pallas_call(
            fused_kernel,
            out_shape=jax.ShapeDtypeStruct((B, OUT), jnp.float32),
            grid_spec=pltpu.PrefetchScalarGridSpec(
                num_scalar_prefetch=0,
                grid=(K // tk,),
                in_specs=[
                    pl.BlockSpec((B, tk), lambda k: (0, k)),    # x K-tile (bf16)
                    pl.BlockSpec((tk, H1), lambda k: (k, 0)),   # W1 K-tile (bf16)
                    pl.BlockSpec((1, H1), lambda k: (0, 0)),    # b1 (resident)
                    pl.BlockSpec((H1, H2), lambda k: (0, 0)),   # W2 (resident)
                    pl.BlockSpec((1, H2), lambda k: (0, 0)),    # b2
                    pl.BlockSpec((1, H2), lambda k: (0, 0)),    # w3 row
                    pl.BlockSpec((1, OUT), lambda k: (0, 0)),   # b3
                ],
                out_specs=pl.BlockSpec((B, OUT), lambda k: (0, 0)),
                scratch_shapes=[pltpu.VMEM((B, H1), jnp.float32)],
            ),
            compiler_params=cparams,
        )(x, w1, b1, w2, b2, w3t, b3)

    # n_split > 1 (v7x): leading "parallel" axis streams one contiguous W1
    # half per TensorCore; h1 accumulates directly in the f32 output block.
    h1 = pl.pallas_call(
        layer1_split_kernel,
        out_shape=jax.ShapeDtypeStruct((B, H1), jnp.float32),
        grid_spec=pltpu.PrefetchScalarGridSpec(
            num_scalar_prefetch=0,
            grid=(n_split, K // tk),
            in_specs=[
                pl.BlockSpec((B, tk), lambda j, k: (0, k)),            # x K-tile
                pl.BlockSpec((None, tk, nh), lambda j, k: (j, k, 0)),  # W1 half (contiguous)
                pl.BlockSpec((1, nh), lambda j, k: (0, j)),            # b1 half
            ],
            out_specs=pl.BlockSpec((B, nh), lambda j, k: (0, j)),
        ),
        compiler_params=cparams,
    )(x, w1, b1)

    # Tiny tail micro-kernel: everything fits in VMEM, single step, no grid.
    return pl.pallas_call(
        tail_kernel,
        out_shape=jax.ShapeDtypeStruct((B, OUT), jnp.float32),
    )(h1, w2, b2, w3t, b3)


# --------------------------------------------------------------------------
# Params / references
# --------------------------------------------------------------------------
def init_params(key):
    """PyTorch nn.Linear default init: U(-1/sqrt(fan_in), 1/sqrt(fan_in)).
    Weights stored (in, out) so forward is x @ W + b (== torch x @ W.T)."""
    ks = jax.random.split(key, 6)

    def lin(kw, kb, fan_in, fan_out):
        bound = 1.0 / jnp.sqrt(jnp.float32(fan_in))
        w = jax.random.uniform(kw, (fan_in, fan_out), jnp.float32, -bound, bound)
        b = jax.random.uniform(kb, (1, fan_out), jnp.float32, -bound, bound)
        return w, b

    w1, b1 = lin(ks[0], ks[1], IN_DIM, H1)
    w2, b2 = lin(ks[2], ks[3], H1, H2)
    w3, b3 = lin(ks[4], ks[5], H2, OUT)
    return (w1, b1, w2, b2, w3, b3)


def reference_forward_f32(img, params):
    w1, b1, w2, b2, w3, b3 = params
    x = img.reshape(img.shape[0], -1)
    h1 = _leaky_relu(x @ w1 + b1)
    h2 = _leaky_relu(h1 @ w2 + b2)
    return jax.nn.sigmoid(h2 @ w3 + b3)


def reference_forward_bf16(img, params):
    """Reference with the same bf16 layer-1 precision as the kernel."""
    w1, b1, w2, b2, w3, b3 = params
    x = img.reshape(img.shape[0], -1).astype(jnp.bfloat16)
    h1 = _leaky_relu(
        jnp.dot(x, w1.astype(jnp.bfloat16),
                preferred_element_type=jnp.float32) + b1)
    h2 = _leaky_relu(h1 @ w2 + b2)
    return jax.nn.sigmoid(h2 @ w3 + b3)


if __name__ == "__main__":
    key = jax.random.PRNGKey(0)
    k_img, k_par = jax.random.split(key)

    B = 2
    img = jax.random.normal(k_img, (B,) + IMG_SHAPE, dtype=jnp.float32)
    params = init_params(k_par)

    ref_bf16 = reference_forward_bf16(img, params)
    ref_f32 = reference_forward_f32(img, params)

    # Default path: single fused kernel (n_split=1) — v5e/v6e, safe everywhere.
    prepped1 = prepare_params(params, n_split=1)
    out1 = discriminator_forward(img, prepped1, tk=6144, n_split=1)
    out1 = jax.block_until_ready(out1)
    assert out1.shape == (B, OUT)
    assert jnp.allclose(out1, ref_bf16, atol=1e-3), (out1, ref_bf16)
    assert jnp.allclose(out1, ref_f32, atol=2e-2), (out1, ref_f32)

    # Split path: contiguous W1 halves on a leading "parallel" axis (v7x).
    prepped2 = prepare_params(params, n_split=2)
    out2 = discriminator_forward(img, prepped2, tk=6144, n_split=2)
    out2 = jax.block_until_ready(out2)
    assert jnp.allclose(out2, ref_bf16, atol=1e-3), (out2, ref_bf16)
    assert jnp.allclose(out2, out1, atol=1e-4), (out2, out1)

    print("KERNEL_OK")
</pallas_src>

<mosaic_0001>
module attributes {stable_mosaic.version = 11 : i64} {
  func.func @fused_kernel(%arg0: i32, %arg1: memref<2x6144xbf16, #tpu.memory_space<vmem>>, %arg2: memref<6144x512xbf16, #tpu.memory_space<vmem>>, %arg3: memref<1x512xf32, #tpu.memory_space<vmem>>, %arg4: memref<512x256xf32, #tpu.memory_space<vmem>>, %arg5: memref<1x256xf32, #tpu.memory_space<vmem>>, %arg6: memref<1x256xf32, #tpu.memory_space<vmem>>, %arg7: memref<1x1xf32, #tpu.memory_space<vmem>>, %arg8: memref<2x1xf32, #tpu.memory_space<vmem>>, %arg9: memref<2x512xf32, #tpu.memory_space<vmem>>) attributes {dimension_semantics = [#tpu.dimension_semantics<arbitrary>], iteration_bounds = array<i64: 2>, scalar_prefetch = 0 : i64, scratch_operands = 1 : i64, tpu.core_type = #tpu.core_type<tc>, window_params = [{transform_indices = @transform_0, window_bounds = array<i64: 2, 6144>}, {transform_indices = @transform_1, window_bounds = array<i64: 6144, 512>}, {pipeline_mode = #tpu.pipeline_mode<synchronous>, transform_indices = @transform_2, window_bounds = array<i64: 1, 512>}, {pipeline_mode = #tpu.pipeline_mode<synchronous>, transform_indices = @transform_3, window_bounds = array<i64: 512, 256>}, {pipeline_mode = #tpu.pipeline_mode<synchronous>, transform_indices = @transform_4, window_bounds = array<i64: 1, 256>}, {pipeline_mode = #tpu.pipeline_mode<synchronous>, transform_indices = @transform_5, window_bounds = array<i64: 1, 256>}, {pipeline_mode = #tpu.pipeline_mode<synchronous>, transform_indices = @transform_6, window_bounds = array<i64: 1, 1>}, {pipeline_mode = #tpu.pipeline_mode<synchronous>, transform_indices = @transform_7, window_bounds = array<i64: 2, 1>}]} {
    %c0_i32 = arith.constant 0 : i32
    %0 = arith.cmpi eq, %arg0, %c0_i32 : i32
    %1 = arith.extui %0 : i1 to i32
    %c0_i32_0 = arith.constant 0 : i32
    %2 = arith.cmpi ne, %1, %c0_i32_0 : i32
    scf.if %2 {
      %cst_9 = arith.constant 0.000000e+00 : f32
      %12 = vector.broadcast %cst_9 : f32 to vector<2x512xf32>
      %c0_10 = arith.constant 0 : index
      %c0_11 = arith.constant 0 : index
      %13 = vector.load %arg9[%c0_10, %c0_11] : memref<2x512xf32, #tpu.memory_space<vmem>>, vector<2x512xf32>
      tpu.vector_store %arg9[%c0_10, %c0_11], %12 {strides = array<i32>} : memref<2x512xf32, #tpu.memory_space<vmem>>, vector<2x512xf32>,
    } else {
    }
    %c0 = arith.constant 0 : index
    %c0_1 = arith.constant 0 : index
    %3 = vector.load %arg9[%c0, %c0_1] : memref<2x512xf32, #tpu.memory_space<vmem>>, vector<2x512xf32>
    %c0_2 = arith.constant 0 : index
    %c0_3 = arith.constant 0 : index
    %4 = vector.load %arg1[%c0_2, %c0_3] : memref<2x6144xbf16, #tpu.memory_space<vmem>>, vector<2x6144xbf16>
    %c0_4 = arith.constant 0 : index
    %c0_5 = arith.constant 0 : index
    %5 = vector.load %arg2[%c0_4, %c0_5] : memref<6144x512xbf16, #tpu.memory_space<vmem>>, vector<6144x512xbf16>
    %cst = arith.constant dense<0.000000e+00> : vector<2x512xf32>
    %6 = tpu.matmul %4, %5, %cst {dimension_numbers = #tpu.dot_dimension_numbers<[1], [0], [0], [1], [0, 0, 1, 1], [], []>} : vector<2x6144xbf16>, vector<6144x512xbf16>, vector<2x512xf32> -> vector<2x512xf32>
    %7 = arith.addf %3, %6 : vector<2x512xf32>
    %c0_6 = arith.constant 0 : index
    %c0_7 = arith.constant 0 : index
    %8 = vector.load %arg9[%c0_6, %c0_7] : memref<2x512xf32, #tpu.memory_space<vmem>>, vector<2x512xf32>
    tpu.vector_store %arg9[%c0_6, %c0_7], %7 {strides = array<i32>} : memref<2x512xf32, #tpu.memory_space<vmem>>, vector<2x512xf32>,
    %c1_i32 = arith.constant 1 : i32
    %9 = arith.cmpi eq, %arg0, %c1_i32 : i32
    %10 = arith.extui %9 : i1 to i32
    %c0_i32_8 = arith.constant 0 : i32
    %11 = arith.cmpi ne, %10, %c0_i32_8 : i32
    scf.if %11 {
      %c0_9 = arith.constant 0 : index
      %c0_10 = arith.constant 0 : index
      %12 = vector.load %arg9[%c0_9, %c0_10] : memref<2x512xf32, #tpu.memory_space<vmem>>, vector<2x512xf32>
      %c0_11 = arith.constant 0 : index
      %c0_12 = arith.constant 0 : index
      %13 = vector.load %arg3[%c0_11, %c0_12] : memref<1x512xf32, #tpu.memory_space<vmem>>, vector<1x512xf32>
      %14 = vector.broadcast %13 : vector<1x512xf32> to vector<2x512xf32>
      %15 = arith.addf %12, %14 : vector<2x512xf32>
      %cst_13 = arith.constant 0.000000e+00 : f32
      %16 = vector.broadcast %cst_13 : f32 to vector<2x512xf32>
      %17 = arith.cmpf ogt, %15, %16 : vector<2x512xf32>
      %cst_14 = arith.constant 2.000000e-01 : f32
      %18 = vector.broadcast %cst_14 : f32 to vector<2x512xf32>
      %19 = arith.mulf %18, %15 : vector<2x512xf32>
      %20 = arith.select %17, %15, %19 : vector<2x512xi1>, vector<2x512xf32>
      %c0_15 = arith.constant 0 : index
      %c0_16 = arith.constant 0 : index
      %21 = vector.load %arg4[%c0_15, %c0_16] : memref<512x256xf32, #tpu.memory_space<vmem>>, vector<512x256xf32>
      %cst_17 = arith.constant dense<0.000000e+00> : vector<2x256xf32>
      %22 = tpu.matmul %20, %21, %cst_17 {dimension_numbers = #tpu.dot_dimension_numbers<[1], [0], [0], [1], [0, 0, 1, 1], [], []>} : vector<2x512xf32>, vector<512x256xf32>, vector<2x256xf32> -> vector<2x256xf32>
      %c0_18 = arith.constant 0 : index
      %c0_19 = arith.constant 0 : index
      %23 = vector.load %arg5[%c0_18, %c0_19] : memref<1x256xf32, #tpu.memory_space<vmem>>, vector<1x256xf32>
      %24 = vector.broadcast %23 : vector<1x256xf32> to vector<2x256xf32>
      %25 = arith.addf %22, %24 : vector<2x256xf32>
      %cst_20 = arith.constant 0.000000e+00 : f32
      %26 = vector.broadcast %cst_20 : f32 to vector<2x256xf32>
      %27 = arith.cmpf ogt, %25, %26 : vector<2x256xf32>
      %cst_21 = arith.constant 2.000000e-01 : f32
      %28 = vector.broadcast %cst_21 : f32 to vector<2x256xf32>
      %29 = arith.mulf %28, %25 : vector<2x256xf32>
      %30 = arith.select %27, %25, %29 : vector<2x256xi1>, vector<2x256xf32>
      %c0_22 = arith.constant 0 : index
      %c0_23 = arith.constant 0 : index
      %31 = vector.load %arg6[%c0_22, %c0_23] : memref<1x256xf32, #tpu.memory_space<vmem>>, vector<1x256xf32>
      %32 = vector.broadcast %31 : vector<1x256xf32> to vector<2x256xf32>
      %33 = arith.mulf %30, %32 : vector<2x256xf32>
      %cst_24 = arith.constant dense<0.000000e+00> : vector<2xf32>
      %34 = vector.multi_reduction <add>, %33, %cst_24 [1] : vector<2x256xf32> to vector<2xf32>
      %35 = vector.shape_cast %34 : vector<2xf32> to vector<2x1xf32>
      %c0_25 = arith.constant 0 : index
      %c0_26 = arith.constant 0 : index
      %36 = vector.load %arg7[%c0_25, %c0_26] : memref<1x1xf32, #tpu.memory_space<vmem>>, vector<1x1xf32>
      %37 = vector.broadcast %36 : vector<1x1xf32> to vector<2x1xf32>
      %38 = arith.addf %35, %37 : vector<2x1xf32>
      %cst_27 = arith.constant 5.000000e-01 : f32
      %39 = vector.broadcast %cst_27 : f32 to vector<2x1xf32>
      %40 = arith.mulf %39, %38 : vector<2x1xf32>
      %41 = math.tanh %40 : vector<2x1xf32>
      %cst_28 = arith.constant 1.000000e+00 : f32
      %42 = vector.broadcast %cst_28 : f32 to vector<2x1xf32>
      %43 = arith.addf %41, %42 : vector<2x1xf32>
      %cst_29 = arith.constant 5.000000e-01 : f32
      %44 = vector.broadcast %cst_29 : f32 to vector<2x1xf32>
      %45 = arith.mulf %44, %43 : vector<2x1xf32>
      %c0_30 = arith.constant 0 : index
      %c0_31 = arith.constant 0 : index
      %46 = vector.load %arg8[%c0_30, %c0_31] : memref<2x1xf32, #tpu.memory_space<vmem>>, vector<2x1xf32>
      tpu.vector_store %arg8[%c0_30, %c0_31], %45 {strides = array<i32>} : memref<2x1xf32, #tpu.memory_space<vmem>>, vector<2x1xf32>,
    } else {
    }
    return
  }
  func.func @transform_0(%arg0: i32) -> (i32, i32) {
    %c0_i32 = arith.constant 0 : i32
    %c0_i32_0 = arith.constant 0 : i32
    return %c0_i32, %arg0 : i32, i32
  }
  func.func @transform_1(%arg0: i32) -> (i32, i32) {
    %c0_i32 = arith.constant 0 : i32
    %c0_i32_0 = arith.constant 0 : i32
    return %arg0, %c0_i32 : i32, i32
  }
  func.func @transform_2(%arg0: i32) -> (i32, i32) {
    %c0_i32 = arith.constant 0 : i32
    %c0_i32_0 = arith.constant 0 : i32
    %c0_i32_1 = arith.constant 0 : i32
    return %c0_i32, %c0_i32_0 : i32, i32
  }
  func.func @transform_3(%arg0: i32) -> (i32, i32) {
    %c0_i32 = arith.constant 0 : i32
    %c0_i32_0 = arith.constant 0 : i32
    %c0_i32_1 = arith.constant 0 : i32
    return %c0_i32, %c0_i32_0 : i32, i32
  }
  func.func @transform_4(%arg0: i32) -> (i32, i32) {
    %c0_i32 = arith.constant 0 : i32
    %c0_i32_0 = arith.constant 0 : i32
    %c0_i32_1 = arith.constant 0 : i32
    return %c0_i32, %c0_i32_0 : i32, i32
  }
  func.func @transform_5(%arg0: i32) -> (i32, i32) {
    %c0_i32 = arith.constant 0 : i32
    %c0_i32_0 = arith.constant 0 : i32
    %c0_i32_1 = arith.constant 0 : i32
    return %c0_i32, %c0_i32_0 : i32, i32
  }
  func.func @transform_6(%arg0: i32) -> (i32, i32) {
    %c0_i32 = arith.constant 0 : i32
    %c0_i32_0 = arith.constant 0 : i32
    %c0_i32_1 = arith.constant 0 : i32
    return %c0_i32, %c0_i32_0 : i32, i32
  }
  func.func @transform_7(%arg0: i32) -> (i32, i32) {
    %c0_i32 = arith.constant 0 : i32
    %c0_i32_0 = arith.constant 0 : i32
    %c0_i32_1 = arith.constant 0 : i32
    return %c0_i32, %c0_i32_0 : i32, i32
  }
}

</mosaic_0001>

<bundles_post_ra>
// kernel: tpu_custom_call.1
= control target key start
LH: loop header
LB: loop body
LE: loop exit
PB: predicated region body
PF: predicated region fallthrough
CT: control target
= control target key end

     0   :  { %s18947_s0 = inlined_call_operand.hbm [shape: bf16[2,12288], index: 0, kind: input, shape index: {}]   ;;  %s18948_s1 = inlined_call_operand.hbm [shape: bf16[12288,512], index: 1, kind: input, shape index: {}]   ;;  %s18949_s2 = inlined_call_operand.hbm [shape: f32[1,512], index: 2, kind: input, shape index: {}]   ;;  %s18950_s3 = inlined_call_operand.hbm [shape: f32[512,256], index: 3, kind: input, shape index: {}]   ;;  %s18951_s4 = inlined_call_operand.hbm [shape: f32[1,256], index: 4, kind: input, shape index: {}]   ;;  %s18952_s5 = inlined_call_operand.hbm [shape: f32[1,256], index: 5, kind: input, shape index: {}]   ;;  %s18953_s6 = inlined_call_operand.<no memory space> [shape: f32[1,1], index: 6, kind: input, shape index: {}]   ;;  %s18954_s7 = inlined_call_operand.vmem [shape: f32[2,1], index: 7, kind: output, shape index: {}]  }
   0x1   :  { %v12_v0 = vstv %s18953_s6 }
   0x2   :  { %13 = vst [vmem:[#allocation3] sm:$0x1] %v12_v0 }
   0x3   :  { %14 = vsyncpa [#allocation5], 0 }
   0x4   :  { %16 = vsyncpa [#allocation5 + $0x1], 0 }
   0x5   :  { %17 = vsyncpa [#allocation7], 0 }
   0x6   :  { %19 = vsyncpa [#allocation7 + $0x1], 0 }
   0x7   :  { %20 = vsyncpa [#allocation10], 0 }
   0x8   :  { %21 = vsyncpa [#allocation13], 0  ;;  %s16668_s26 = smov 0   ;;  %s16670_s27 = smov 0  }
   0x9   :  { %s16672_s28 = smov 0   ;;  %s16674_s29 = smov 0  }
   0xa LB: > { %s16614_s6 = smov [#allocation8]   ;;  %s16689_s8 = sadd.s32 4294967295, %s16612_s29   ;;  %s16612_s29 = sphi %s16674_s29, %s18990_s29   ;;  %s16608_s28 = sphi %s16672_s28, %s18989_s28   ;;  %s16604_s27 = sphi %s16670_s27, %s18988_s27   ;;  %s16600_s26 = sphi %s16668_s26, %s18987_s26  }
   0xb   : > { %s223_s30 = sshll.u32 %s16614_s6, 4  ;;  %p12437_p0 = scmp.ge.s32.totalorder %s16612_s29, 1  ;;  %s224_s30 = int_to_ptr.vmem [resolvable:$true] %s223_s30 }
   0xc   : > { %p18956_p1 = scmp.eq.s32.totalorder %s16689_s8, 0  ;;  %p210_p2 = scmp.lt.s32.totalorder %s16612_s29, 3 }
   0xd   : > { %s16615_s10 = smov [#allocation9]   ;;  %s16616_s13 = smov [#allocation11]  }
   0xe   : > { %p16695_p4 = pnand %p12437_p0, %p210_p2  ;;  %s233_s11 = sshll.u32 %s16615_s10, 4  ;;  %s16701_s11 = int_to_ptr.vmem [resolvable:$true] %s233_s11 }
   0xf   : > { %s247_s14 = sshll.u32 %s16616_s13, 4  ;;  %s16413_s15 = scalar_lea.vmem %s224_s30, 64  ;;  %s16709_s14 = int_to_ptr.vmem [resolvable:$true] %s247_s14 }
  0x10   : > { %s18964_s9 = scalar_select %p16695_p4, 1, 0 }
  0x11   : > { %p14020_p5 = pneg %p16695_p4  ;;  %p16414_p8 = scmp.ne.s32.totalorder %s224_s30, %s16413_s15 }
  0x12   : > { %p16421_p11 = scmp.lt.s32.totalorder %s224_s30, %s224_s30  ;;  %p16422_p12 = scmp.lt.s32.totalorder %s16413_s15, %s16413_s15 }
  0x13   : > { %p16705_p6 = pnand %p14020_p5, %p18956_p1 }
  0x14   : > { %p16423_p13 = por %p16422_p12, %p16421_p11 }
  0x15   : > { %p16404_p7 = pneg %p16705_p6 }
  0x17   : > { %p16416_p9 = pnand %p16414_p8, %p16404_p7 }
  0x19   : > { %p16417_p10 = pneg %p16416_p9 }
  0x1b   : > { %p16424_p0 = pnand %p16423_p13, %p16417_p10 }
  0x1d   : > { %16427 = shalt.err (!%p16424_p0)
}
  0x1e   : > { %14023 = dma.hbm_to_vmem [thread:$0]  (!%p16705_p6), %s18949_s2, 64, %s224_s30, [#allocation7]  }
  0x1f   : > { %s16439_s18 = scalar_lea.vmem %s16701_s11, 16384  ;;  %p16447_p9 = scmp.lt.s32.totalorder %s16701_s11, %s16701_s11 }
  0x20   : > { %p16440_p2 = scmp.ne.s32.totalorder %s16701_s11, %s16439_s18  ;;  %p16448_p10 = scmp.lt.s32.totalorder %s16439_s18, %s16439_s18 }
  0x22   : > { %p16442_p5 = pnand %p16440_p2, %p16404_p7  ;;  %p16449_p11 = por %p16448_p10, %p16447_p9 }
  0x24   : > { %p16443_p8 = pneg %p16442_p5 }
  0x26   : > { %p16450_p12 = pnand %p16449_p11, %p16443_p8 }
  0x28   : > { %16453 = shalt.err (!%p16450_p12)
}
  0x29   : > { %s18955_s19 = smov 256   ;;  %s16618_s20 = smov 16  }
  0x2a   : > { %14026 = dma.hbm_to_vmem [thread:$0]  (!%p16705_p6), %s18950_s3, 16384, %s16701_s11, [#allocation10], %s18955_s19, %s18955_s19, %s16618_s20  }
  0x2b   : > { %s16465_s23 = scalar_lea.vmem %s16709_s14, 32  ;;  %p16473_p5 = scmp.lt.s32.totalorder %s16709_s14, %s16709_s14 }
  0x2c   : > { %p16466_p13 = scmp.ne.s32.totalorder %s16709_s14, %s16465_s23  ;;  %p16474_p8 = scmp.lt.s32.totalorder %s16465_s23, %s16465_s23 }
  0x2e   : > { %p16468_p0 = pnand %p16466_p13, %p16404_p7  ;;  %p16475_p9 = por %p16474_p8, %p16473_p5 }
  0x30   : > { %p16469_p2 = pneg %p16468_p0 }
  0x32   : > { %p16476_p10 = pnand %p16475_p9, %p16469_p2 }
  0x34   : > { %16479 = shalt.err (!%p16476_p10)
}
  0x35   : > { %14029 = dma.hbm_to_vmem [thread:$0]  (!%p16705_p6), %s18951_s4, 32, %s16709_s14, [#allocation10]  }
  0x36   : > { %s16619_s6 = smov [#allocation12]  }
  0x37   : > { %s258_s30 = sshll.u32 %s16619_s6, 4  ;;  %s259_s30 = int_to_ptr.vmem [resolvable:$true] %s258_s30 }
  0x38   : > { %s16491_s10 = scalar_lea.vmem %s259_s30, 32  ;;  %p16499_p0 = scmp.lt.s32.totalorder %s259_s30, %s259_s30 }
  0x39   : > { %p16492_p11 = scmp.ne.s32.totalorder %s259_s30, %s16491_s10  ;;  %p16500_p2 = scmp.lt.s32.totalorder %s16491_s10, %s16491_s10 }
  0x3b   : > { %p16494_p12 = pnand %p16492_p11, %p16404_p7  ;;  %p16501_p5 = por %p16500_p2, %p16499_p0 }
  0x3d   : > { %p16495_p13 = pneg %p16494_p12 }
  0x3f   : > { %p16502_p8 = pnand %p16501_p5, %p16495_p13 }
  0x41   : > { %16505 = shalt.err (!%p16502_p8)
}
  0x42   : > { %14032 = dma.hbm_to_vmem [thread:$0]  (!%p16705_p6), %s18952_s5, 32, %s259_s30, [#allocation13]  }
  0x43   : > { %s16759_s14 = sadd.s32 1, %s16612_s29   ;;  %s34_s12 = sadd.s32 1, %s16608_s28 }
  0x44   : > { %s31_s15 = ssub.s32 %s16612_s29, %s16759_s14  ;;  %p41_p7 = scmp.ne.s32.totalorder %s16608_s28, %s16604_s27 }
  0x45   : > { %p32_p9 = scmp.eq.s32.totalorder %s31_s15, 0  ;;  %p42_p10 = scmp.eq.s32.totalorder %s16612_s29, 0 }
  0x46   : > { %p47_p11 = scmp.ne.s32.totalorder %s16604_s27, %s16600_s26  ;;  %p14044_p12 = scmp.lt.s32.totalorder %s16612_s29, 2 }
  0x47   : > { %s16771_s16 = scalar_select %p32_p9, %s16608_s28, %s34_s12  }
  0x48   : > { %p43_p13 = por %p42_p10, %p41_p7  ;;  %p16775_p0 = por %p18956_p1, %p47_p11 }
  0x49   : > { %s16780_s18 = sand.u32 1, %s16608_s28   ;;  %s13992_s21 = smul.u32 768, %s16612_s29 }
  0x4a   : > { %s18966_s17 = scalar_select %p16775_p0, 1, 0 }
  0x4b   : > { %s13996_s22 = smul.u32 48, %s16780_s18  ;;  %s16787_s26 = scalar_lea.hbm %s18947_s0, %s13992_s21 }
  0x4c   : > { %p16789_p6 = pnand %p14044_p12, %p43_p13  ;;  %s13997_s6 = smul.u32 12288, %s16780_s18 }
  0x4d   : > { %s276_s30 = scalar_lea.vmem [#allocation4], %s13996_s22  ;;  %s273_s11 = scalar_lea.sflag [#allocation5], %s16780_s18 }
  0x4e   : > { %s284_s10 = sshll.u32 %s276_s30, 4  ;;  %s16506_s13 = scalar_lea.hbm %s16787_s26, 768  ;;  %s285_s10 = int_to_ptr.vmem [resolvable:$true] %s284_s10 }
  0x4f   : > { %p16507_p2 = scmp.ne.s32.totalorder %s16787_s26, %s16506_s13  ;;  %p16508_p5 = pneg %p16789_p6 }
  0x50   : > { %s16511_s21 = scalar_lea.hbm %s18947_s0, 1536  ;;  %p16512_p9 = scmp.lt.s32.totalorder %s16787_s26, %s18947_s0 }
  0x51   : > { %p16509_p8 = pnand %p16508_p5, %p16507_p2  ;;  %p16513_p10 = scmp.lt.s32.totalorder %s16511_s21, %s16506_s13 }
  0x53   : > { %p16510_p7 = pneg %p16509_p8  ;;  %p16514_p11 = por %p16513_p10, %p16512_p9 }
  0x55   : > { %p16515_p12 = pnand %p16514_p11, %p16510_p7 }
  0x57   : > { %16518 = shalt.err (!%p16515_p12)
}
  0x58   : > { %s16519_s22 = scalar_lea.vmem %s285_s10, 768  ;;  %s16620_s30 = smov [#allocation4]  }
  0x59   : > { %p16520_p13 = scmp.ne.s32.totalorder %s285_s10, %s16519_s22  ;;  %s16524_s19 = sshll.u32 %s16620_s30, 4  ;;  %s16525_s19 = int_to_ptr.vmem [resolvable:$false] %s16524_s19 }
  0x5a   : > { %s16526_s12 = scalar_lea.vmem %s16525_s19, 1536  ;;  %p16527_p8 = scmp.lt.s32.totalorder %s285_s10, %s16525_s19 }
  0x5b   : > { %p16522_p3 = pnand %p16520_p13, %p16508_p5  ;;  %p16528_p1 = scmp.lt.s32.totalorder %s16526_s12, %s16519_s22 }
  0x5d   : > { %p16523_p2 = pneg %p16522_p3  ;;  %p16529_p0 = por %p16528_p1, %p16527_p8 }
  0x5f   : > { %p16530_p4 = pnand %p16529_p0, %p16523_p2 }
  0x61   : > { %16533 = shalt.err (!%p16530_p4)
}
  0x62   : > { %14036 = dma.hbm_to_vmem [thread:$0]  (!%p16789_p6), %s16787_s26, 768, %s285_s10, %s273_s11  }
  0x63   : > { %s295_s13 = scalar_lea.vmem [#allocation6], %s13997_s6  ;;  %s291_s21 = sand.u32 1, %s16612_s29  }
  0x64   : > { %s303_s15 = sshll.u32 %s295_s13, 4  ;;  %s13995_s23 = smul.u32 196608, %s16612_s29  ;;  %s16818_s15 = int_to_ptr.vmem [resolvable:$true] %s303_s15 }
  0x65   : > { %s292_s30 = scalar_lea.sflag [#allocation7], %s291_s21  ;;  %s16539_s6 = scalar_lea.hbm %s18948_s1, 393216 }
  0x66   : > { %s16824_s22 = scalar_lea.hbm %s18948_s1, %s13995_s23 }
  0x67   : > { %s16534_s12 = scalar_lea.hbm %s16824_s22, 196608  ;;  %p16540_p0 = scmp.lt.s32.totalorder %s16824_s22, %s18948_s1 }
  0x68   : > { %p16535_p1 = scmp.ne.s32.totalorder %s16824_s22, %s16534_s12  ;;  %p16541_p7 = scmp.lt.s32.totalorder %s16539_s6, %s16534_s12 }
  0x6a   : > { %p16537_p3 = pnand %p16535_p1, %p16508_p5  ;;  %p16542_p9 = por %p16541_p7, %p16540_p0 }
  0x6c   : > { %p16538_p4 = pneg %p16537_p3 }
  0x6e   : > { %p16543_p10 = pnand %p16542_p9, %p16538_p4 }
  0x70   : > { %16546 = shalt.err (!%p16543_p10)
}
  0x71   : > { %s16547_s11 = scalar_lea.vmem %s16818_s15, 196608  ;;  %s16621_s13 = smov [#allocation6]  }
  0x72   : > { %p16548_p11 = scmp.ne.s32.totalorder %s16818_s15, %s16547_s11  ;;  %s16552_s21 = sshll.u32 %s16621_s13, 4  ;;  %s16553_s21 = int_to_ptr.vmem [resolvable:$false] %s16552_s21 }
  0x73   : > { %s16554_s23 = scalar_lea.vmem %s16553_s21, 393216  ;;  %p16555_p2 = scmp.lt.s32.totalorder %s16818_s15, %s16553_s21 }
  0x74   : > { %p16550_p12 = pnand %p16548_p11, %p16508_p5  ;;  %p16556_p8 = scmp.lt.s32.totalorder %s16554_s23, %s16547_s11 }
  0x76   : > { %p16551_p13 = pneg %p16550_p12  ;;  %p16557_p1 = por %p16556_p8, %p16555_p2 }
  0x78   : > { %p16558_p3 = pnand %p16557_p1, %p16551_p13 }
  0x7a   : > { %16561 = shalt.err (!%p16558_p3)
}
  0x7b   : > { %s18968_s19 = smov 256   ;;  %p18969_p5 = scmp.ne.s32.totalorder %s18964_s9, 0 }
  0x7c   : > { %14039 = dma.hbm_to_vmem [thread:$0]  (!%p16789_p6), %s16824_s22, 196608, %s16818_s15, %s292_s30, %s18968_s19, %s18968_s19, %s16618_s20  }
  0x7d   : > { %315 = sbr.rel (%p18969_p5) target bundleno = 2337 (0x921), region = 48 }
  0x82   : > { %s317_s24 = sand.u32 1, %s16604_s27   ;;  %p18970_p4 = scmp.ne.s32.totalorder %s18966_s17, 0 }
  0x83   : > { %s13998_s12 = smul.u32 48, %s317_s24  ;;  %s318_s18 = scalar_lea.sflag [#allocation5], %s317_s24 }
  0x85   : > { %s16854_s26 = scalar_lea.vmem [#allocation4], %s13998_s12 }
  0x86   : > { %16579 = dma.done.wait (%p18970_p4), %s318_s18, 768  }
  0x87   : > { %16581 = vsyncadd (%p18970_p4), %s318_s18, 4294966528  ;;  %s326_s25 = sand.u32 1, %s16689_s8   ;;  %s13999_s6 = smul.u32 12288, %s317_s24 }
  0x88   : > { %s327_s20 = scalar_lea.sflag [#allocation7], %s326_s25 }
  0x89   : > { %s16861_s15 = scalar_lea.vmem [#allocation6], %s13999_s6 }
  0x8a   : > { %16583 = dma.done.wait (%p18970_p4), %s327_s20, 196608  }
  0x8b   : > { %16585 = vsyncadd (%p18970_p4), %s327_s20, 4294770688  ;;  %p18971_p6 = scmp.eq.s32.totalorder %s16689_s8, 0 }
  0x8d   : > { %16587 = dma.done.wait (%p18971_p6), [#allocation7], 64   ;;  %p18972_p0 = pmov %p18971_p6 }
  0x8f   : > { %16589 = vsyncadd (%p18972_p0), [#allocation7], 4294967232  ;;  %p18973_p7 = pmov %p18972_p0 }
  0x90   : > { %p18974_p9 = pmov %p18972_p0 }
  0x91   : > { %16591 = dma.done.wait (%p18973_p7), [#allocation10], 16416  }
  0x92   : > { %16593 = vsyncadd (%p18974_p9), [#allocation10], 4294950880  ;;  %p18975_p10 = pmov %p18972_p0 }
  0x93   : > { %p18976_p11 = pmov %p18972_p0 }
  0x94   : > { %16595 = dma.done.wait (%p18975_p10), [#allocation13], 32  }
  0x95   : > { %16597 = vsyncadd (%p18976_p11), [#allocation13], 4294967264  ;;  %p18977_p12 = scmp.ne.s32.totalorder %s16689_s8, 0 }
  0x97   : > { %382 = sbr.rel (%p18977_p12) target bundleno = 158 (0x9e), region = 76 }
  0x9c   : > { %v16622_v1 = vmov 0.0  }
  0x9d   : > { %383 = vst [vmem:[#allocation2] sm:$0xff] %v16622_v1 }
  0x9e PF: > { %v14090_v2 = vld [vmem:[%s16861_s15 + $0xe4] ss:$16 sps:$4 sm:$0xff]   ;;  %v14094_v4 = vld [vmem:[%s16861_s15 + $0xe0] ss:$16 sps:$4 sm:$0xff]   ;;  %v16623_v38 = vmov 1966171168   ;;  %v1937_v40 = vlaneseq }
  0x9f   : > { %v14092_v3 = vld [vmem:[%s16861_s15 + $0x2e4] ss:$16 sps:$4 sm:$0xff]   ;;  %9955 = vmatprep.subr.bf16.mxu0 %v14090_v2  ;;  %v14095_v5 = vld [vmem:[%s16861_s15 + $0x2e0] ss:$16 sps:$4 sm:$0xff]   ;;  %v1935_v39 = vunpack.c.l.s4 %v16623_v38  ;;  %p13988_p13 = scmp.ne.s32.totalorder %s16689_s8, 1 }
  0xa0   : > { %9996 = vmatprep.subr.bf16.mxu1 %v14092_v3  ;;  %v14096_v6 = vld [vmem:[%s16861_s15 + $0xc4] ss:$16 sps:$4 sm:$0xff]   ;;  %9956 = vmatpush1.bf16.msra.mxu0 %v14094_v4  ;;  %v14100_v8 = vld [vmem:[%s16861_s15 + $0xc0] ss:$16 sps:$4 sm:$0xff]   ;;  %v16920_v45 = vshrl.u32 %v1937_v40, 7 }
  0xa1   : > { %9997 = vmatpush1.bf16.msra.mxu1 %v14095_v5  ;;  %v14098_v7 = vld [vmem:[%s16861_s15 + $0x2c4] ss:$16 sps:$4 sm:$0xff]   ;;  %9957 = vmatprep.subr.bf16.mxu0 %v14096_v6  ;;  %v14101_v9 = vld [vmem:[%s16861_s15 + $0x2c0] ss:$16 sps:$4 sm:$0xff]   ;;  %v1936_v44 = vunpack.c.0.s8 %v1935_v39 }
  0xa2   : > { %9998 = vmatprep.subr.bf16.mxu1 %v14098_v7  ;;  %v14102_v10 = vld [vmem:[%s16861_s15 + $0xa4] ss:$16 sps:$4 sm:$0xff]   ;;  %v14106_v12 = vld [vmem:[%s16861_s15 + $0xa0] ss:$16 sps:$4 sm:$0xff]   ;;  %18978 = vst [vmem:[#allocation19_spill] sm:$0xff] %v16920_v45 }
  0xa3   : > { %v14104_v11 = vld [vmem:[%s16861_s15 + $0x2a4] ss:$16 sps:$4 sm:$0xff]   ;;  %v14107_v13 = vld [vmem:[%s16861_s15 + $0x2a0] ss:$16 sps:$4 sm:$0xff]   ;;  %v16928_v51 = vsub.s32 %v1936_v44, %v16920_v45 }
  0xa4   : > { %9958 = vmatpush1.bf16.msra.mxu0 %v14100_v8  ;;  %v14108_v14 = vld [vmem:[%s16861_s15 + $0x84] ss:$16 sps:$4 sm:$0xff]   ;;  %v14112_v16 = vld [vmem:[%s16861_s15 + $0x80] ss:$16 sps:$4 sm:$0xff]  }
  0xa5   : > { %9999 = vmatpush1.bf16.msra.mxu1 %v14101_v9  ;;  %9959 = vmatprep.subr.bf16.mxu0 %v14102_v10  ;;  %v14110_v15 = vld [vmem:[%s16861_s15 + $0x284] ss:$16 sps:$4 sm:$0xff]   ;;  %v14113_v17 = vld [vmem:[%s16861_s15 + $0x280] ss:$16 sps:$4 sm:$0xff]  }
  0xa6   : > { %10000 = vmatprep.subr.bf16.mxu1 %v14104_v11  ;;  %v14114_v18 = vld [vmem:[%s16861_s15 + $0x64] ss:$16 sps:$4 sm:$0xff]   ;;  %v14118_v20 = vld [vmem:[%s16861_s15 + $0x60] ss:$16 sps:$4 sm:$0xff]  }
  0xa7   : > { %v14116_v19 = vld [vmem:[%s16861_s15 + $0x264] ss:$16 sps:$4 sm:$0xff]   ;;  %v14119_v21 = vld [vmem:[%s16861_s15 + $0x260] ss:$16 sps:$4 sm:$0xff]  }
  0xa8   : > { %9960 = vmatpush1.bf16.msra.mxu0 %v14106_v12  ;;  %v14120_v22 = vld [vmem:[%s16861_s15 + $0x44] ss:$16 sps:$4 sm:$0xff]   ;;  %v14124_v24 = vld [vmem:[%s16861_s15 + $0x40] ss:$16 sps:$4 sm:$0xff]  }
  0xa9   : > { %10001 = vmatpush1.bf16.msra.mxu1 %v14107_v13  ;;  %9961 = vmatprep.subr.bf16.mxu0 %v14108_v14  ;;  %v14122_v23 = vld [vmem:[%s16861_s15 + $0x244] ss:$16 sps:$4 sm:$0xff]   ;;  %v14125_v25 = vld [vmem:[%s16861_s15 + $0x240] ss:$16 sps:$4 sm:$0xff]  }
  0xaa   : > { %10002 = vmatprep.subr.bf16.mxu1 %v14110_v15  ;;  %v14126_v26 = vld [vmem:[%s16861_s15 + $0x24] ss:$16 sps:$4 sm:$0xff]   ;;  %v14130_v28 = vld [vmem:[%s16861_s15 + $0x20] ss:$16 sps:$4 sm:$0xff]  }
  0xab   : > { %v14128_v27 = vld [vmem:[%s16861_s15 + $0x224] ss:$16 sps:$4 sm:$0xff]   ;;  %v14131_v29 = vld [vmem:[%s16861_s15 + $0x220] ss:$16 sps:$4 sm:$0xff]  }
  0xac   : > { %9962 = vmatpush1.bf16.msra.mxu0 %v14112_v16  ;;  %v14132_v30 = vld [vmem:[%s16861_s15 + $0x4] ss:$16 sps:$4 sm:$0xff]   ;;  %v14136_v32 = vld [vmem:[%s16861_s15] ss:$16 sps:$4 sm:$0xff]  }
  0xad   : > { %10003 = vmatpush1.bf16.msra.mxu1 %v14113_v17  ;;  %9963 = vmatprep.subr.bf16.mxu0 %v14114_v18  ;;  %v14134_v31 = vld [vmem:[%s16861_s15 + $0x204] ss:$16 sps:$4 sm:$0xff]   ;;  %v14137_v33 = vld [vmem:[%s16861_s15 + $0x200] ss:$16 sps:$4 sm:$0xff]  }
  0xae   : > { %10004 = vmatprep.subr.bf16.mxu1 %v14116_v19  ;;  %v14138_v34 = vld [vmem:[%s16861_s15 + $0x1e4] ss:$16 sps:$4 sm:$0xff]   ;;  %v14142_v36 = vld [vmem:[%s16861_s15 + $0x1e0] ss:$16 sps:$4 sm:$0xff]  }
  0xaf   : > { %v14140_v35 = vld [vmem:[%s16861_s15 + $0x3e4] ss:$16 sps:$4 sm:$0xff]   ;;  %v14143_v37 = vld [vmem:[%s16861_s15 + $0x3e0] ss:$16 sps:$4 sm:$0xff]  }
  0xb0   : > { %9964 = vmatpush1.bf16.msra.mxu0 %v14118_v20  ;;  %v14144_v41 = vld [vmem:[%s16861_s15 + $0x1c4] ss:$16 sps:$4 sm:$0xff]   ;;  %v14148_v43 = vld [vmem:[%s16861_s15 + $0x1c0] ss:$16 sps:$4 sm:$0xff]  }
  0xb1   : > { %10005 = vmatpush1.bf16.msra.mxu1 %v14119_v21  ;;  %9965 = vmatprep.subr.bf16.mxu0 %v14120_v22  ;;  %v14146_v42 = vld [vmem:[%s16861_s15 + $0x3c4] ss:$16 sps:$4 sm:$0xff]   ;;  %v14149_v46 = vld [vmem:[%s16861_s15 + $0x3c0] ss:$16 sps:$4 sm:$0xff]  }
  0xb2   : > { %10006 = vmatprep.subr.bf16.mxu1 %v14122_v23  ;;  %v14150_v47 = vld [vmem:[%s16861_s15 + $0x1a4] ss:$16 sps:$4 sm:$0xff]   ;;  %v14154_v49 = vld [vmem:[%s16861_s15 + $0x1a0] ss:$16 sps:$4 sm:$0xff]  }
  0xb3   : > { %v14152_v48 = vld [vmem:[%s16861_s15 + $0x3a4] ss:$16 sps:$4 sm:$0xff]   ;;  %v14155_v50 = vld [vmem:[%s16861_s15 + $0x3a0] ss:$16 sps:$4 sm:$0xff]  }
  0xb4   : > { %9966 = vmatpush1.bf16.msra.mxu0 %v14124_v24  ;;  %v14156_v52 = vld [vmem:[%s16861_s15 + $0x184] ss:$16 sps:$4 sm:$0xff]   ;;  %v14160_v55 = vld [vmem:[%s16861_s15 + $0x180] ss:$16 sps:$4 sm:$0xff]  }
  0xb5   : > { %10007 = vmatpush1.bf16.msra.mxu1 %v14125_v25  ;;  %9967 = vmatprep.subr.bf16.mxu0 %v14126_v26  ;;  %v14158_v53 = vld [vmem:[%s16861_s15 + $0x384] ss:$16 sps:$4 sm:$0xff]   ;;  %v14161_v57 = vld [vmem:[%s16861_s15 + $0x380] ss:$16 sps:$4 sm:$0xff]  }
  0xb6   : > { %10008 = vmatprep.subr.bf16.mxu1 %v14128_v27  ;;  %v385_v54 = vld [vmem:[%s16854_s26] sm:$0xff] }
  0xb7   : > { %v1940_v56 = vrot.slane %v385_v54, %v16928_v51  ;;  %v14162_v58 = vld [vmem:[%s16861_s15 + $0x164] ss:$16 sps:$4 sm:$0xff]   ;;  %v14166_v61 = vld [vmem:[%s16861_s15 + $0x160] ss:$16 sps:$4 sm:$0xff]   ;;  %v1933_v3 = vcombine.high %v385_v54, %v385_v54 }
  0xb8   : > { %9968 = vmatpush1.bf16.msra.mxu0 %v14130_v28  ;;  %v14164_v59 = vld [vmem:[%s16861_s15 + $0x364] ss:$16 sps:$4 sm:$0xff]   ;;  %v14167_v63 = vld [vmem:[%s16861_s15 + $0x360] ss:$16 sps:$4 sm:$0xff]  }
  0xb9   : > { %10009 = vmatpush1.bf16.msra.mxu1 %v14131_v29  ;;  %9969 = vmatprep.subr.bf16.mxu0 %v14132_v30  ;;  %v1948_v60 = vcombine.high %v1940_v56, %v1940_v56  ;;  %v14168_v0 = vld [vmem:[%s16861_s15 + $0x144] ss:$16 sps:$4 sm:$0xff]   ;;  %v14172_v4 = vld [vmem:[%s16861_s15 + $0x140] ss:$16 sps:$4 sm:$0xff]   ;;  %v16956_v8 = vrot.slane %v1933_v3, %v16928_v51  ;;  %v16966_v15 = vrot.slane %v1940_v56, %v16928_v51 }
  0xba   : > { %10010 = vmatprep.subr.bf16.mxu1 %v14134_v31  ;;  %v14170_v1 = vld [vmem:[%s16861_s15 + $0x344] ss:$16 sps:$4 sm:$0xff]   ;;  %v14173_v5 = vld [vmem:[%s16861_s15 + $0x340] ss:$16 sps:$4 sm:$0xff]  }
  0xbb   : > { %v16940_v62 = vrot.slane %v1948_v60, %v16928_v51  ;;  %v14174_v6 = vld [vmem:[%s16861_s15 + $0x124] ss:$16 sps:$4 sm:$0xff]   ;;  %v14178_v9 = vld [vmem:[%s16861_s15 + $0x120] ss:$16 sps:$4 sm:$0xff]   ;;  %v1949_v13 = vcombine.high %v16956_v8, %v16956_v8  ;;  %v16976_v20 = vcombine.high %v16966_v15, %v16966_v15 }
  0xbc   : > { %9970 = vmatpush1.bf16.msra.mxu0 %v14136_v32  ;;  %v14176_v7 = vld [vmem:[%s16861_s15 + $0x324] ss:$16 sps:$4 sm:$0xff]   ;;  %v14179_v10 = vld [vmem:[%s16861_s15 + $0x320] ss:$16 sps:$4 sm:$0xff]  }
  0xbd   : > { %10011 = vmatpush1.bf16.msra.mxu1 %v14137_v33  ;;  %9971 = vmatprep.subr.bf16.mxu0 %v14138_v34  ;;  %v16947_v2 = vcombine.high %v16940_v62, %v16940_v62  ;;  %v14180_v11 = vld [vmem:[%s16861_s15 + $0x104] ss:$16 sps:$4 sm:$0xff]   ;;  %v14184_v14 = vld [vmem:[%s16861_s15 + $0x100] ss:$16 sps:$4 sm:$0xff]   ;;  %v16972_v19 = vrot.slane %v1949_v13, %v16928_v51 }
  0xbe   : > { %10012 = vmatprep.subr.bf16.mxu1 %v14140_v35  ;;  %9987 = vmatprep.mubr.bf16.mxu0 %v16940_v62  ;;  %v14182_v12 = vld [vmem:[%s16861_s15 + $0x304] ss:$16 sps:$4 sm:$0xff]   ;;  %v14185_v16 = vld [vmem:[%s16861_s15 + $0x300] ss:$16 sps:$4 sm:$0xff]  }
  0xbf   : > { %10028 = vmatprep.mubr.bf16.mxu1 %v16947_v2  ;;  %v14188_v17 = vld [vmem:[%s16861_s15 + $0x4e4] ss:$16 sps:$4 sm:$0xff]   ;;  %v14186_v21 = vld [vmem:[%s16861_s15 + $0x4e0] ss:$16 sps:$4 sm:$0xff]   ;;  %v16984_v25 = vcombine.high %v16972_v19, %v16972_v19 }
  0xc0   : > { %9972 = vmatpush2.bf16.msra.mxu0 %v14142_v36  ;;  %v14191_v18 = vld [vmem:[%s16861_s15 + $0x6e4] ss:$16 sps:$4 sm:$0xff]   ;;  %v14189_v22 = vld [vmem:[%s16861_s15 + $0x6e0] ss:$16 sps:$4 sm:$0xff]  }
  0xc1   : > { %10013 = vmatpush2.bf16.msra.mxu1 %v14143_v37  ;;  %9973 = vmatprep.subr.bf16.mxu0 %v14144_v41  ;;  %v14194_v23 = vld [vmem:[%s16861_s15 + $0x4c4] ss:$16 sps:$4 sm:$0xff]   ;;  %v14192_v26 = vld [vmem:[%s16861_s15 + $0x4c0] ss:$16 sps:$4 sm:$0xff]  }
  0xc2   : > { %10014 = vmatprep.subr.bf16.mxu1 %v14146_v42  ;;  %v14197_v24 = vld [vmem:[%s16861_s15 + $0x6c4] ss:$16 sps:$4 sm:$0xff]   ;;  %v14195_v27 = vld [vmem:[%s16861_s15 + $0x6c0] ss:$16 sps:$4 sm:$0xff]  }
  0xc3   : > { %v14200_v28 = vld [vmem:[%s16861_s15 + $0x4a4] ss:$16 sps:$4 sm:$0xff]   ;;  %v14198_v30 = vld [vmem:[%s16861_s15 + $0x4a0] ss:$16 sps:$4 sm:$0xff]  }
  0xc4   : > { %9974 = vmatpush2.bf16.msra.mxu0 %v14148_v43  ;;  %v14203_v29 = vld [vmem:[%s16861_s15 + $0x6a4] ss:$16 sps:$4 sm:$0xff]   ;;  %v14201_v31 = vld [vmem:[%s16861_s15 + $0x6a0] ss:$16 sps:$4 sm:$0xff]  }
  0xc5   : > { %10015 = vmatpush2.bf16.msra.mxu1 %v14149_v46  ;;  %9975 = vmatprep.subr.bf16.mxu0 %v14150_v47  ;;  %v14206_v32 = vld [vmem:[%s16861_s15 + $0x484] ss:$16 sps:$4 sm:$0xff]   ;;  %v14204_v34 = vld [vmem:[%s16861_s15 + $0x480] ss:$16 sps:$4 sm:$0xff]  }
  0xc6   : > { %10016 = vmatprep.subr.bf16.mxu1 %v14152_v48  ;;  %v14209_v33 = vld [vmem:[%s16861_s15 + $0x684] ss:$16 sps:$4 sm:$0xff]   ;;  %v14207_v35 = vld [vmem:[%s16861_s15 + $0x680] ss:$16 sps:$4 sm:$0xff]  }
  0xc7   : > { %v14212_v36 = vld [vmem:[%s16861_s15 + $0x464] ss:$16 sps:$4 sm:$0xff]   ;;  %v14210_v38 = vld [vmem:[%s16861_s15 + $0x460] ss:$16 sps:$4 sm:$0xff]  }
  0xc8   : > { %9976 = vmatpush2.bf16.msra.mxu0 %v14154_v49  ;;  %v14215_v37 = vld [vmem:[%s16861_s15 + $0x664] ss:$16 sps:$4 sm:$0xff]   ;;  %v14213_v39 = vld [vmem:[%s16861_s15 + $0x660] ss:$16 sps:$4 sm:$0xff]  }
  0xc9   : > { %10017 = vmatpush2.bf16.msra.mxu1 %v14155_v50  ;;  %9977 = vmatprep.subr.bf16.mxu0 %v14156_v52  ;;  %v14218_v40 = vld [vmem:[%s16861_s15 + $0x444] ss:$16 sps:$4 sm:$0xff]   ;;  %v14216_v42 = vld [vmem:[%s16861_s15 + $0x440] ss:$16 sps:$4 sm:$0xff]  }
  0xca   : > { %10018 = vmatprep.subr.bf16.mxu1 %v14158_v53  ;;  %v14221_v41 = vld [vmem:[%s16861_s15 + $0x644] ss:$16 sps:$4 sm:$0xff]   ;;  %v14219_v43 = vld [vmem:[%s16861_s15 + $0x640] ss:$16 sps:$4 sm:$0xff]  }
  0xcb   : > { %v14224_v44 = vld [vmem:[%s16861_s15 + $0x424] ss:$16 sps:$4 sm:$0xff]   ;;  %v14222_v47 = vld [vmem:[%s16861_s15 + $0x420] ss:$16 sps:$4 sm:$0xff]  }
  0xcc   : > { %9978 = vmatpush2.bf16.msra.mxu0 %v14160_v55  ;;  %v14227_v46 = vld [vmem:[%s16861_s15 + $0x624] ss:$16 sps:$4 sm:$0xff]   ;;  %v14225_v48 = vld [vmem:[%s16861_s15 + $0x620] ss:$16 sps:$4 sm:$0xff]  }
  0xcd   : > { %10019 = vmatpush2.bf16.msra.mxu1 %v14161_v57  ;;  %9979 = vmatprep.subr.bf16.mxu0 %v14162_v58  ;;  %v14230_v49 = vld [vmem:[%s16861_s15 + $0x404] ss:$16 sps:$4 sm:$0xff]   ;;  %v14228_v52 = vld [vmem:[%s16861_s15 + $0x400] ss:$16 sps:$4 sm:$0xff]  }
  0xce   : > { %10020 = vmatprep.subr.bf16.mxu1 %v14164_v59  ;;  %v14233_v50 = vld [vmem:[%s16861_s15 + $0x604] ss:$16 sps:$4 sm:$0xff]   ;;  %v14231_v53 = vld [vmem:[%s16861_s15 + $0x600] ss:$16 sps:$4 sm:$0xff]  }
  0xcf   : > { %v14236_v54 = vld [vmem:[%s16861_s15 + $0x5e4] ss:$16 sps:$4 sm:$0xff]   ;;  %v14234_v56 = vld [vmem:[%s16861_s15 + $0x5e0] ss:$16 sps:$4 sm:$0xff]  }
  0xd0   : > { %9980 = vmatpush2.bf16.msra.mxu0 %v14166_v61  ;;  %v14239_v55 = vld [vmem:[%s16861_s15 + $0x7e4] ss:$16 sps:$4 sm:$0xff]   ;;  %v14237_v57 = vld [vmem:[%s16861_s15 + $0x7e0] ss:$16 sps:$4 sm:$0xff]  }
  0xd1   : > { %10021 = vmatpush2.bf16.msra.mxu1 %v14167_v63  ;;  %9981 = vmatprep.subr.bf16.mxu0 %v14168_v0  ;;  %v14242_v58 = vld [vmem:[%s16861_s15 + $0x5c4] ss:$16 sps:$4 sm:$0xff]   ;;  %v14240_v60 = vld [vmem:[%s16861_s15 + $0x5c0] ss:$16 sps:$4 sm:$0xff]  }
  0xd2   : > { %10022 = vmatprep.subr.bf16.mxu1 %v14170_v1  ;;  %v14245_v59 = vld [vmem:[%s16861_s15 + $0x7c4] ss:$16 sps:$4 sm:$0xff]   ;;  %v14243_v61 = vld [vmem:[%s16861_s15 + $0x7c0] ss:$16 sps:$4 sm:$0xff]  }
  0xd3   : > { %v14248_v63 = vld [vmem:[%s16861_s15 + $0x5a4] ss:$16 sps:$4 sm:$0xff]   ;;  %v14246_v1 = vld [vmem:[%s16861_s15 + $0x5a0] ss:$16 sps:$4 sm:$0xff]  }
  0xd4   : > { %9982 = vmatpush2.bf16.msra.mxu0 %v14172_v4  ;;  %v14251_v0 = vld [vmem:[%s16861_s15 + $0x7a4] ss:$16 sps:$4 sm:$0xff]   ;;  %v14249_v3 = vld [vmem:[%s16861_s15 + $0x7a0] ss:$16 sps:$4 sm:$0xff]  }
  0xd5   : > { %10023 = vmatpush2.bf16.msra.mxu1 %v14173_v5  ;;  %9983 = vmatprep.subr.bf16.mxu0 %v14174_v6  ;;  %v14254_v4 = vld [vmem:[%s16861_s15 + $0x584] ss:$16 sps:$4 sm:$0xff]   ;;  %v14252_v6 = vld [vmem:[%s16861_s15 + $0x580] ss:$16 sps:$4 sm:$0xff]  }
  0xd6   : > { %10024 = vmatprep.subr.bf16.mxu1 %v14176_v7  ;;  %v14257_v5 = vld [vmem:[%s16861_s15 + $0x784] ss:$16 sps:$4 sm:$0xff]   ;;  %v14255_v7 = vld [vmem:[%s16861_s15 + $0x780] ss:$16 sps:$4 sm:$0xff]  }
  0xd7   : > { %v14266_v13 = vld [vmem:[%s16861_s15 + $0x544] ss:$16 sps:$4 sm:$0xff]   ;;  %v15070_v45 = vld [vmem:[%s16861_s15 + $0x2aa0] ss:$16 sps:$4 sm:$0xff]  }
  0xd8   : > { %9984 = vmatpush2.bf16.msra.mxu0 %v14178_v9  ;;  %v14260_v9 = vld [vmem:[%s16861_s15 + $0x564] ss:$16 sps:$4 sm:$0xff]  }
  0xd9   : > { %10025 = vmatpush2.bf16.msra.mxu1 %v14179_v10  ;;  %9985 = vmatprep.subr.bf16.mxu0 %v14180_v11  ;;  %v14263_v10 = vld [vmem:[%s16861_s15 + $0x764] ss:$16 sps:$4 sm:$0xff]   ;;  %v14258_v11 = vld [vmem:[%s16861_s15 + $0x560] ss:$16 sps:$4 sm:$0xff]  }
  0xda   : > { %10026 = vmatprep.subr.bf16.mxu1 %v14182_v12  ;;  %v14261_v12 = vld [vmem:[%s16861_s15 + $0x760] ss:$16 sps:$4 sm:$0xff]  }
  0xdc   : > { %9986 = vmatpush2.bf16.msra.mxu0 %v14184_v14  ;;  %v14269_v14 = vld [vmem:[%s16861_s15 + $0x744] ss:$16 sps:$4 sm:$0xff]  }
  0xdd   : > { %10027 = vmatpush2.bf16.msra.mxu1 %v14185_v16  ;;  %10037 = vmatprep.subr.bf16.mxu0 %v14188_v17  ;;  %v14264_v16 = vld [vmem:[%s16861_s15 + $0x540] ss:$16 sps:$4 sm:$0xff]  }
  0xde   : > { %10078 = vmatprep.subr.bf16.mxu1 %v14191_v18  ;;  %v14267_v17 = vld [vmem:[%s16861_s15 + $0x740] ss:$16 sps:$4 sm:$0xff]   ;;  %v14272_v18 = vld [vmem:[%s16861_s15 + $0x524] ss:$16 sps:$4 sm:$0xff]  }
  0xdf   : > { %9988 = vmatmul.mubr.bf16.vlgmr.msra.gmra.mxu0 %v16966_v15 }
  0xe0   : > { %10029 = vmatmul.mubr.bf16.vlgmr.msra.gmra.mxu1 %v16976_v20  ;;  %10038 = vmatpush1.bf16.msra.mxu0 %v14186_v21  ;;  %v14275_v21 = vld [vmem:[%s16861_s15 + $0x724] ss:$16 sps:$4 sm:$0xff]  }
  0xe1   : > { %10079 = vmatpush1.bf16.msra.mxu1 %v14189_v22  ;;  %10039 = vmatprep.subr.bf16.mxu0 %v14194_v23  ;;  %v14270_v22 = vld [vmem:[%s16861_s15 + $0x520] ss:$16 sps:$4 sm:$0xff]  }
  0xe2   : > { %10080 = vmatprep.subr.bf16.mxu1 %v14197_v24  ;;  %10069 = vmatprep.mubr.bf16.mxu0 %v16972_v19  ;;  %v14273_v23 = vld [vmem:[%s16861_s15 + $0x720] ss:$16 sps:$4 sm:$0xff]   ;;  %v14278_v24 = vld [vmem:[%s16861_s15 + $0x504] ss:$16 sps:$4 sm:$0xff]  }
  0xe3   : > { %10110 = vmatprep.mubr.bf16.mxu1 %v16984_v25 }
  0xe4   : > { %10040 = vmatpush1.bf16.msra.mxu0 %v14192_v26  ;;  %v14281_v26 = vld [vmem:[%s16861_s15 + $0x704] ss:$16 sps:$4 sm:$0xff]  }
  0xe5   : > { %10081 = vmatpush1.bf16.msra.mxu1 %v14195_v27  ;;  %10041 = vmatprep.subr.bf16.mxu0 %v14200_v28  ;;  %v14276_v27 = vld [vmem:[%s16861_s15 + $0x500] ss:$16 sps:$4 sm:$0xff]   ;;  %v17049_v28 = vrot.slane %v16956_v8, %v16928_v51 }
  0xe6   : > { %10082 = vmatprep.subr.bf16.mxu1 %v14203_v29  ;;  %v14279_v29 = vld [vmem:[%s16861_s15 + $0x700] ss:$16 sps:$4 sm:$0xff]  }
  0xe7   : > { %v14286_v8 = vld [vmem:[%s16861_s15 + $0xae0] ss:$16 sps:$4 sm:$0xff]  }
  0xe8   : > { %10042 = vmatpush1.bf16.msra.mxu0 %v14198_v30  ;;  %v14285_v30 = vld [vmem:[%s16861_s15 + $0x8e4] ss:$16 sps:$4 sm:$0xff]  }
  0xe9   : > { %10083 = vmatpush1.bf16.msra.mxu1 %v14201_v31  ;;  %10043 = vmatprep.subr.bf16.mxu0 %v14206_v32  ;;  %v14288_v31 = vld [vmem:[%s16861_s15 + $0xae4] ss:$16 sps:$4 sm:$0xff]   ;;  %v17056_v32 = vcombine.high %v17049_v28, %v17049_v28 }
  0xea   : > { %10084 = vmatprep.subr.bf16.mxu1 %v14209_v33  ;;  %v14283_v33 = vld [vmem:[%s16861_s15 + $0x8e0] ss:$16 sps:$4 sm:$0xff]  }
  0xec   : > { %10044 = vmatpush1.bf16.msra.mxu0 %v14204_v34  ;;  %v17061_v34 = vld [vmem:[%s16854_s26 + $0x8] sm:$0xff] }
  0xed   : > { %10085 = vmatpush1.bf16.msra.mxu1 %v14207_v35  ;;  %10045 = vmatprep.subr.bf16.mxu0 %v14212_v36  ;;  %v14291_v35 = vld [vmem:[%s16861_s15 + $0x8c4] ss:$16 sps:$4 sm:$0xff]  }
  0xee   : > { %10086 = vmatprep.subr.bf16.mxu1 %v14215_v37  ;;  %v14294_v36 = vld [vmem:[%s16861_s15 + $0xac4] ss:$16 sps:$4 sm:$0xff]   ;;  %v17067_v37 = vrot.slane %v17061_v34, %v16928_v51 }
  0xf0   : > { %10046 = vmatpush1.bf16.msra.mxu0 %v14210_v38  ;;  %v1997_v38 = vcombine.high %v17067_v37, %v17067_v37 }
  0xf1   : > { %10087 = vmatpush1.bf16.msra.mxu1 %v14213_v39  ;;  %10047 = vmatprep.subr.bf16.mxu0 %v14218_v40  ;;  %v14289_v39 = vld [vmem:[%s16861_s15 + $0x8c0] ss:$16 sps:$4 sm:$0xff]  }
  0xf2   : > { %10088 = vmatprep.subr.bf16.mxu1 %v14221_v41  ;;  %v14292_v40 = vld [vmem:[%s16861_s15 + $0xac0] ss:$16 sps:$4 sm:$0xff]   ;;  %v14297_v41 = vld [vmem:[%s16861_s15 + $0x8a4] ss:$16 sps:$4 sm:$0xff]  }
  0xf4   : > { %10048 = vmatpush1.bf16.msra.mxu0 %v14216_v42  ;;  %v14300_v42 = vld [vmem:[%s16861_s15 + $0xaa4] ss:$16 sps:$4 sm:$0xff]  }
  0xf5   : > { %10089 = vmatpush1.bf16.msra.mxu1 %v14219_v43  ;;  %10049 = vmatprep.subr.bf16.mxu0 %v14224_v44  ;;  %v17078_v43 = vrot.slane %v1997_v38, %v16928_v51  ;;  %v14361_v38 = vld [vmem:[%s16861_s15 + $0x940] ss:$16 sps:$4 sm:$0xff]  }
  0xf6   : > { %10090 = vmatprep.subr.bf16.mxu1 %v14227_v46  ;;  %v14295_v46 = vld [vmem:[%s16861_s15 + $0x8a0] ss:$16 sps:$4 sm:$0xff]  }
  0xf7   : > { %v17083_v44 = vcombine.high %v17078_v43, %v17078_v43 }
  0xf8   : > { %10050 = vmatpush1.bf16.msra.mxu0 %v14222_v47  ;;  %v14298_v47 = vld [vmem:[%s16861_s15 + $0xaa0] ss:$16 sps:$4 sm:$0xff]  }
  0xf9   : > { %10091 = vmatpush1.bf16.msra.mxu1 %v14225_v48  ;;  %10051 = vmatprep.subr.bf16.mxu0 %v14230_v49  ;;  %v14303_v48 = vld [vmem:[%s16861_s15 + $0x884] ss:$16 sps:$4 sm:$0xff]  }
  0xfa   : > { %10092 = vmatprep.subr.bf16.mxu1 %v14233_v50  ;;  %v14306_v49 = vld [vmem:[%s16861_s15 + $0xa84] ss:$16 sps:$4 sm:$0xff]   ;;  %v14301_v50 = vld [vmem:[%s16861_s15 + $0x880] ss:$16 sps:$4 sm:$0xff]  }
  0xfc   : > { %10052 = vmatpush1.bf16.msra.mxu0 %v14228_v52  ;;  %v14304_v52 = vld [vmem:[%s16861_s15 + $0xa80] ss:$16 sps:$4 sm:$0xff]  }
  0xfd   : > { %10093 = vmatpush1.bf16.msra.mxu1 %v14231_v53  ;;  %10053 = vmatprep.subr.bf16.mxu0 %v14236_v54  ;;  %v14309_v53 = vld [vmem:[%s16861_s15 + $0x864] ss:$16 sps:$4 sm:$0xff]  }
  0xfe   : > { %10094 = vmatprep.subr.bf16.mxu1 %v14239_v55  ;;  %v14312_v54 = vld [vmem:[%s16861_s15 + $0xa64] ss:$16 sps:$4 sm:$0xff]   ;;  %v14307_v55 = vld [vmem:[%s16861_s15 + $0x860] ss:$16 sps:$4 sm:$0xff]  }
 0x100   : > { %10054 = vmatpush2.bf16.msra.mxu0 %v14234_v56  ;;  %v14310_v56 = vld [vmem:[%s16861_s15 + $0xa60] ss:$16 sps:$4 sm:$0xff]  }
 0x101   : > { %10095 = vmatpush2.bf16.msra.mxu1 %v14237_v57  ;;  %10055 = vmatprep.subr.bf16.mxu0 %v14242_v58  ;;  %v14315_v57 = vld [vmem:[%s16861_s15 + $0x844] ss:$16 sps:$4 sm:$0xff]  }
 0x102   : > { %10096 = vmatprep.subr.bf16.mxu1 %v14245_v59  ;;  %v14318_v58 = vld [vmem:[%s16861_s15 + $0xa44] ss:$16 sps:$4 sm:$0xff]   ;;  %v14313_v59 = vld [vmem:[%s16861_s15 + $0x840] ss:$16 sps:$4 sm:$0xff]  }
 0x104   : > { %10056 = vmatpush2.bf16.msra.mxu0 %v14240_v60  ;;  %v14316_v60 = vld [vmem:[%s16861_s15 + $0xa40] ss:$16 sps:$4 sm:$0xff]  }
 0x105   : > { %10097 = vmatpush2.bf16.msra.mxu1 %v14243_v61  ;;  %10057 = vmatprep.subr.bf16.mxu0 %v14248_v63  ;;  %v14321_v61 = vld [vmem:[%s16861_s15 + $0x824] ss:$16 sps:$4 sm:$0xff]  }
 0x106   : > { %10098 = vmatprep.subr.bf16.mxu1 %v14251_v0  ;;  %v14324_v63 = vld [vmem:[%s16861_s15 + $0xa24] ss:$16 sps:$4 sm:$0xff]   ;;  %v14319_v0 = vld [vmem:[%s16861_s15 + $0x820] ss:$16 sps:$4 sm:$0xff]  }
 0x108   : > { %10058 = vmatpush2.bf16.msra.mxu0 %v14246_v1  ;;  %v14322_v1 = vld [vmem:[%s16861_s15 + $0xa20] ss:$16 sps:$4 sm:$0xff]  }
 0x109   : > { %10099 = vmatpush2.bf16.msra.mxu1 %v14249_v3  ;;  %10059 = vmatprep.subr.bf16.mxu0 %v14254_v4  ;;  %v14327_v3 = vld [vmem:[%s16861_s15 + $0x804] ss:$16 sps:$4 sm:$0xff]  }
 0x10a   : > { %10100 = vmatprep.subr.bf16.mxu1 %v14257_v5  ;;  %v14330_v4 = vld [vmem:[%s16861_s15 + $0xa04] ss:$16 sps:$4 sm:$0xff]   ;;  %v14325_v5 = vld [vmem:[%s16861_s15 + $0x800] ss:$16 sps:$4 sm:$0xff]  }
 0x10c   : > { %10060 = vmatpush2.bf16.msra.mxu0 %v14252_v6  ;;  %v14328_v6 = vld [vmem:[%s16861_s15 + $0xa00] ss:$16 sps:$4 sm:$0xff]  }
 0x10d   : > { %10101 = vmatpush2.bf16.msra.mxu1 %v14255_v7  ;;  %10061 = vmatprep.subr.bf16.mxu0 %v14260_v9  ;;  %v14333_v7 = vld [vmem:[%s16861_s15 + $0x9e4] ss:$16 sps:$4 sm:$0xff]  }
 0x10e   : > { %10102 = vmatprep.subr.bf16.mxu1 %v14263_v10  ;;  %v14336_v9 = vld [vmem:[%s16861_s15 + $0xbe4] ss:$16 sps:$4 sm:$0xff]   ;;  %v14331_v10 = vld [vmem:[%s16861_s15 + $0x9e0] ss:$16 sps:$4 sm:$0xff]  }
 0x110   : > { %10062 = vmatpush2.bf16.msra.mxu0 %v14258_v11  ;;  %v14334_v11 = vld [vmem:[%s16861_s15 + $0xbe0] ss:$16 sps:$4 sm:$0xff]  }
 0x111   : > { %10103 = vmatpush2.bf16.msra.mxu1 %v14261_v12  ;;  %10063 = vmatprep.subr.bf16.mxu0 %v14266_v13  ;;  %v14339_v12 = vld [vmem:[%s16861_s15 + $0x9c4] ss:$16 sps:$4 sm:$0xff]  }
 0x112   : > { %10104 = vmatprep.subr.bf16.mxu1 %v14269_v14  ;;  %v14342_v13 = vld [vmem:[%s16861_s15 + $0xbc4] ss:$16 sps:$4 sm:$0xff]   ;;  %v14337_v14 = vld [vmem:[%s16861_s15 + $0x9c0] ss:$16 sps:$4 sm:$0xff]  }
 0x114   : > { %10064 = vmatpush2.bf16.msra.mxu0 %v14264_v16  ;;  %v14340_v16 = vld [vmem:[%s16861_s15 + $0xbc0] ss:$16 sps:$4 sm:$0xff]  }
 0x115   : > { %10105 = vmatpush2.bf16.msra.mxu1 %v14267_v17  ;;  %10065 = vmatprep.subr.bf16.mxu0 %v14272_v18  ;;  %v14345_v17 = vld [vmem:[%s16861_s15 + $0x9a4] ss:$16 sps:$4 sm:$0xff]  }
 0x116   : > { %10106 = vmatprep.subr.bf16.mxu1 %v14275_v21  ;;  %v14348_v18 = vld [vmem:[%s16861_s15 + $0xba4] ss:$16 sps:$4 sm:$0xff]   ;;  %v14343_v21 = vld [vmem:[%s16861_s15 + $0x9a0] ss:$16 sps:$4 sm:$0xff]  }
 0x118   : > { %10066 = vmatpush2.bf16.msra.mxu0 %v14270_v22  ;;  %v14346_v22 = vld [vmem:[%s16861_s15 + $0xba0] ss:$16 sps:$4 sm:$0xff]  }
 0x119   : > { %10107 = vmatpush2.bf16.msra.mxu1 %v14273_v23  ;;  %10067 = vmatprep.subr.bf16.mxu0 %v14278_v24  ;;  %v14351_v23 = vld [vmem:[%s16861_s15 + $0x984] ss:$16 sps:$4 sm:$0xff]  }
 0x11a   : > { %10108 = vmatprep.subr.bf16.mxu1 %v14281_v26  ;;  %v14354_v24 = vld [vmem:[%s16861_s15 + $0xb84] ss:$16 sps:$4 sm:$0xff]   ;;  %v14349_v26 = vld [vmem:[%s16861_s15 + $0x980] ss:$16 sps:$4 sm:$0xff]  }
 0x11c   : > { %10068 = vmatpush2.bf16.msra.mxu0 %v14276_v27  ;;  %v14352_v27 = vld [vmem:[%s16861_s15 + $0xb80] ss:$16 sps:$4 sm:$0xff]  }
 0x11d   : > { %10109 = vmatpush2.bf16.msra.mxu1 %v14279_v29  ;;  %10119 = vmatprep.subr.bf16.mxu0 %v14285_v30  ;;  %v14357_v29 = vld [vmem:[%s16861_s15 + $0x964] ss:$16 sps:$4 sm:$0xff]  }
 0x11e   : > { %10160 = vmatprep.subr.bf16.mxu1 %v14288_v31  ;;  %v14360_v30 = vld [vmem:[%s16861_s15 + $0xb64] ss:$16 sps:$4 sm:$0xff]   ;;  %v14355_v31 = vld [vmem:[%s16861_s15 + $0x960] ss:$16 sps:$4 sm:$0xff]  }
 0x11f   : > { %10070 = vmatmul.mubr.bf16.vlgmr.msra.gmra.mxu0 %v17049_v28 }
 0x120   : > { %10111 = vmatmul.mubr.bf16.vlgmr.msra.gmra.mxu1 %v17056_v32  ;;  %10120 = vmatpush1.bf16.msra.mxu0 %v14283_v33  ;;  %v14358_v33 = vld [vmem:[%s16861_s15 + $0xb60] ss:$16 sps:$4 sm:$0xff]  }
 0x121   : > { %10161 = vmatpush1.bf16.msra.mxu1 %v14286_v8  ;;  %10121 = vmatprep.subr.bf16.mxu0 %v14291_v35  ;;  %v14363_v8 = vld [vmem:[%s16861_s15 + $0x944] ss:$16 sps:$4 sm:$0xff]  }
 0x122   : > { %10162 = vmatprep.subr.bf16.mxu1 %v14294_v36  ;;  %10151 = vmatprep.mubr.bf16.mxu0 %v17078_v43  ;;  %v14366_v35 = vld [vmem:[%s16861_s15 + $0xb44] ss:$16 sps:$4 sm:$0xff]   ;;  %v1982_v36 = vcombine.high %v17061_v34, %v17061_v34  ;;  %v14367_v34 = vld [vmem:[%s16861_s15 + $0x920] ss:$16 sps:$4 sm:$0xff]  }
 0x123   : > { %10192 = vmatprep.mubr.bf16.mxu1 %v17083_v44 }
 0x124   : > { %10122 = vmatpush1.bf16.msra.mxu0 %v14289_v39  ;;  %v14364_v39 = vld [vmem:[%s16861_s15 + $0xb40] ss:$16 sps:$4 sm:$0xff]  }
 0x125   : > { %10163 = vmatpush1.bf16.msra.mxu1 %v14292_v40  ;;  %10123 = vmatprep.subr.bf16.mxu0 %v14297_v41  ;;  %v14369_v40 = vld [vmem:[%s16861_s15 + $0x924] ss:$16 sps:$4 sm:$0xff]  }
 0x126   : > { %10164 = vmatprep.subr.bf16.mxu1 %v14300_v42  ;;  %v14372_v41 = vld [vmem:[%s16861_s15 + $0xb24] ss:$16 sps:$4 sm:$0xff]   ;;  %v17137_v42 = vrot.slane %v1982_v36, %v16928_v51  ;;  %v14430_v36 = vld [vmem:[%s16861_s15 + $0xfe0] ss:$16 sps:$4 sm:$0xff]  }
 0x128   : > { %10124 = vmatpush1.bf16.msra.mxu0 %v14295_v46  ;;  %v14370_v46 = vld [vmem:[%s16861_s15 + $0xb20] ss:$16 sps:$4 sm:$0xff]  }
 0x129   : > { %10165 = vmatpush1.bf16.msra.mxu1 %v14298_v47  ;;  %10125 = vmatprep.subr.bf16.mxu0 %v14303_v48  ;;  %v14375_v47 = vld [vmem:[%s16861_s15 + $0x904] ss:$16 sps:$4 sm:$0xff]  }
 0x12a   : > { %10166 = vmatprep.subr.bf16.mxu1 %v14306_v49  ;;  %v14378_v48 = vld [vmem:[%s16861_s15 + $0xb04] ss:$16 sps:$4 sm:$0xff]   ;;  %v1998_v49 = vcombine.high %v17137_v42, %v17137_v42 }
 0x12c   : > { %10126 = vmatpush1.bf16.msra.mxu0 %v14301_v50  ;;  %v17147_v50 = vrot.slane %v17067_v37, %v16928_v51  ;;  %v14379_v37 = vld [vmem:[%s16861_s15 + $0xce0] ss:$16 sps:$4 sm:$0xff]  }
 0x12d   : > { %10167 = vmatpush1.bf16.msra.mxu1 %v14304_v52  ;;  %10127 = vmatprep.subr.bf16.mxu0 %v14309_v53  ;;  %v14373_v52 = vld [vmem:[%s16861_s15 + $0x900] ss:$16 sps:$4 sm:$0xff]  }
 0x12e   : > { %10168 = vmatprep.subr.bf16.mxu1 %v14312_v54  ;;  %v14376_v53 = vld [vmem:[%s16861_s15 + $0xb00] ss:$16 sps:$4 sm:$0xff]   ;;  %v14381_v54 = vld [vmem:[%s16861_s15 + $0xce4] ss:$16 sps:$4 sm:$0xff]  }
 0x130   : > { %10128 = vmatpush1.bf16.msra.mxu0 %v14307_v55  ;;  %v14384_v55 = vld [vmem:[%s16861_s15 + $0xee4] ss:$16 sps:$4 sm:$0xff]  }
 0x131   : > { %10169 = vmatpush1.bf16.msra.mxu1 %v14310_v56  ;;  %10129 = vmatprep.subr.bf16.mxu0 %v14315_v57  ;;  %v17154_v56 = vrot.slane %v1998_v49, %v16928_v51  ;;  %v17158_v57 = vcombine.high %v17147_v50, %v17147_v50  ;;  %v14447_v49 = vld [vmem:[%s16861_s15 + $0xd84] ss:$16 sps:$4 sm:$0xff]  }
 0x132   : > { %10170 = vmatprep.subr.bf16.mxu1 %v14318_v58  ;;  %v14382_v58 = vld [vmem:[%s16861_s15 + $0xee0] ss:$16 sps:$4 sm:$0xff]  }
 0x134   : > { %10130 = vmatpush1.bf16.msra.mxu0 %v14313_v59  ;;  %v14387_v59 = vld [vmem:[%s16861_s15 + $0xcc4] ss:$16 sps:$4 sm:$0xff]  }
 0x135   : > { %10171 = vmatpush1.bf16.msra.mxu1 %v14316_v60  ;;  %10131 = vmatprep.subr.bf16.mxu0 %v14321_v61  ;;  %v14390_v60 = vld [vmem:[%s16861_s15 + $0xec4] ss:$16 sps:$4 sm:$0xff]   ;;  %v17166_v61 = vcombine.high %v17154_v56, %v17154_v56 }
 0x136   : > { %10172 = vmatprep.subr.bf16.mxu1 %v14324_v63  ;;  %v14385_v63 = vld [vmem:[%s16861_s15 + $0xcc0] ss:$16 sps:$4 sm:$0xff]  }
 0x138   : > { %10132 = vmatpush1.bf16.msra.mxu0 %v14319_v0  ;;  %v14388_v0 = vld [vmem:[%s16861_s15 + $0xec0] ss:$16 sps:$4 sm:$0xff]  }
 0x139   : > { %10173 = vmatpush1.bf16.msra.mxu1 %v14322_v1  ;;  %10133 = vmatprep.subr.bf16.mxu0 %v14327_v3  ;;  %v14393_v1 = vld [vmem:[%s16861_s15 + $0xca4] ss:$16 sps:$4 sm:$0xff]  }
 0x13a   : > { %10174 = vmatprep.subr.bf16.mxu1 %v14330_v4  ;;  %v14396_v3 = vld [vmem:[%s16861_s15 + $0xea4] ss:$16 sps:$4 sm:$0xff]   ;;  %v14391_v4 = vld [vmem:[%s16861_s15 + $0xca0] ss:$16 sps:$4 sm:$0xff]  }
 0x13c   : > { %10134 = vmatpush1.bf16.msra.mxu0 %v14325_v5  ;;  %v14394_v5 = vld [vmem:[%s16861_s15 + $0xea0] ss:$16 sps:$4 sm:$0xff]  }
 0x13d   : > { %10175 = vmatpush1.bf16.msra.mxu1 %v14328_v6  ;;  %10135 = vmatprep.subr.bf16.mxu0 %v14333_v7  ;;  %v14399_v6 = vld [vmem:[%s16861_s15 + $0xc84] ss:$16 sps:$4 sm:$0xff]  }
 0x13e   : > { %10176 = vmatprep.subr.bf16.mxu1 %v14336_v9  ;;  %v14402_v7 = vld [vmem:[%s16861_s15 + $0xe84] ss:$16 sps:$4 sm:$0xff]   ;;  %v14397_v9 = vld [vmem:[%s16861_s15 + $0xc80] ss:$16 sps:$4 sm:$0xff]  }
 0x140   : > { %10136 = vmatpush2.bf16.msra.mxu0 %v14331_v10  ;;  %v14400_v10 = vld [vmem:[%s16861_s15 + $0xe80] ss:$16 sps:$4 sm:$0xff]  }
 0x141   : > { %10177 = vmatpush2.bf16.msra.mxu1 %v14334_v11  ;;  %10137 = vmatprep.subr.bf16.mxu0 %v14339_v12  ;;  %v14405_v11 = vld [vmem:[%s16861_s15 + $0xc64] ss:$16 sps:$4 sm:$0xff]  }
 0x142   : > { %10178 = vmatprep.subr.bf16.mxu1 %v14342_v13  ;;  %v14408_v12 = vld [vmem:[%s16861_s15 + $0xe64] ss:$16 sps:$4 sm:$0xff]   ;;  %v14403_v13 = vld [vmem:[%s16861_s15 + $0xc60] ss:$16 sps:$4 sm:$0xff]  }
 0x144   : > { %10138 = vmatpush2.bf16.msra.mxu0 %v14337_v14  ;;  %v14406_v14 = vld [vmem:[%s16861_s15 + $0xe60] ss:$16 sps:$4 sm:$0xff]  }
 0x145   : > { %10179 = vmatpush2.bf16.msra.mxu1 %v14340_v16  ;;  %10139 = vmatprep.subr.bf16.mxu0 %v14345_v17  ;;  %v14411_v16 = vld [vmem:[%s16861_s15 + $0xc44] ss:$16 sps:$4 sm:$0xff]  }
 0x146   : > { %10180 = vmatprep.subr.bf16.mxu1 %v14348_v18  ;;  %v14414_v17 = vld [vmem:[%s16861_s15 + $0xe44] ss:$16 sps:$4 sm:$0xff]   ;;  %v14409_v18 = vld [vmem:[%s16861_s15 + $0xc40] ss:$16 sps:$4 sm:$0xff]  }
 0x148   : > { %10140 = vmatpush2.bf16.msra.mxu0 %v14343_v21  ;;  %v14412_v21 = vld [vmem:[%s16861_s15 + $0xe40] ss:$16 sps:$4 sm:$0xff]  }
 0x149   : > { %10181 = vmatpush2.bf16.msra.mxu1 %v14346_v22  ;;  %10141 = vmatprep.subr.bf16.mxu0 %v14351_v23  ;;  %v14417_v22 = vld [vmem:[%s16861_s15 + $0xc24] ss:$16 sps:$4 sm:$0xff]  }
 0x14a   : > { %10182 = vmatprep.subr.bf16.mxu1 %v14354_v24  ;;  %v14420_v23 = vld [vmem:[%s16861_s15 + $0xe24] ss:$16 sps:$4 sm:$0xff]   ;;  %v14415_v24 = vld [vmem:[%s16861_s15 + $0xc20] ss:$16 sps:$4 sm:$0xff]  }
 0x14c   : > { %10142 = vmatpush2.bf16.msra.mxu0 %v14349_v26  ;;  %v14418_v26 = vld [vmem:[%s16861_s15 + $0xe20] ss:$16 sps:$4 sm:$0xff]  }
 0x14d   : > { %10183 = vmatpush2.bf16.msra.mxu1 %v14352_v27  ;;  %10143 = vmatprep.subr.bf16.mxu0 %v14357_v29  ;;  %v14423_v27 = vld [vmem:[%s16861_s15 + $0xc04] ss:$16 sps:$4 sm:$0xff]  }
 0x14e   : > { %10184 = vmatprep.subr.bf16.mxu1 %v14360_v30  ;;  %v14426_v29 = vld [vmem:[%s16861_s15 + $0xe04] ss:$16 sps:$4 sm:$0xff]   ;;  %v14421_v30 = vld [vmem:[%s16861_s15 + $0xc00] ss:$16 sps:$4 sm:$0xff]  }
 0x150   : > { %10144 = vmatpush2.bf16.msra.mxu0 %v14355_v31  ;;  %v14424_v31 = vld [vmem:[%s16861_s15 + $0xe00] ss:$16 sps:$4 sm:$0xff]  }
 0x151   : > { %10185 = vmatpush2.bf16.msra.mxu1 %v14358_v33  ;;  %10145 = vmatprep.subr.bf16.mxu0 %v14363_v8  ;;  %v14429_v33 = vld [vmem:[%s16861_s15 + $0xde4] ss:$16 sps:$4 sm:$0xff]  }
 0x152   : > { %10186 = vmatprep.subr.bf16.mxu1 %v14366_v35  ;;  %v14432_v8 = vld [vmem:[%s16861_s15 + $0xfe4] ss:$16 sps:$4 sm:$0xff]   ;;  %v14427_v35 = vld [vmem:[%s16861_s15 + $0xde0] ss:$16 sps:$4 sm:$0xff]  }
 0x154   : > { %10146 = vmatpush2.bf16.msra.mxu0 %v14361_v38  ;;  %v14435_v38 = vld [vmem:[%s16861_s15 + $0xdc4] ss:$16 sps:$4 sm:$0xff]  }
 0x155   : > { %10187 = vmatpush2.bf16.msra.mxu1 %v14364_v39  ;;  %10147 = vmatprep.subr.bf16.mxu0 %v14369_v40  ;;  %v14438_v39 = vld [vmem:[%s16861_s15 + $0xfc4] ss:$16 sps:$4 sm:$0xff]   ;;  %v14433_v40 = vld [vmem:[%s16861_s15 + $0xdc0] ss:$16 sps:$4 sm:$0xff]  }
 0x156   : > { %10188 = vmatprep.subr.bf16.mxu1 %v14372_v41  ;;  %v14436_v41 = vld [vmem:[%s16861_s15 + $0xfc0] ss:$16 sps:$4 sm:$0xff]  }
 0x158   : > { %10148 = vmatpush2.bf16.msra.mxu0 %v14367_v34  ;;  %v14441_v34 = vld [vmem:[%s16861_s15 + $0xda4] ss:$16 sps:$4 sm:$0xff]  }
 0x159   : > { %10189 = vmatpush2.bf16.msra.mxu1 %v14370_v46  ;;  %10149 = vmatprep.subr.bf16.mxu0 %v14375_v47  ;;  %v14444_v46 = vld [vmem:[%s16861_s15 + $0xfa4] ss:$16 sps:$4 sm:$0xff]   ;;  %v14439_v47 = vld [vmem:[%s16861_s15 + $0xda0] ss:$16 sps:$4 sm:$0xff]  }
 0x15a   : > { %10190 = vmatprep.subr.bf16.mxu1 %v14378_v48  ;;  %v14442_v48 = vld [vmem:[%s16861_s15 + $0xfa0] ss:$16 sps:$4 sm:$0xff]  }
 0x15c   : > { %10150 = vmatpush2.bf16.msra.mxu0 %v14373_v52  ;;  %v14450_v52 = vld [vmem:[%s16861_s15 + $0xf84] ss:$16 sps:$4 sm:$0xff]  }
 0x15d   : > { %10191 = vmatpush2.bf16.msra.mxu1 %v14376_v53  ;;  %10201 = vmatprep.subr.bf16.mxu0 %v14381_v54  ;;  %v14445_v53 = vld [vmem:[%s16861_s15 + $0xd80] ss:$16 sps:$4 sm:$0xff]  }
 0x15e   : > { %10242 = vmatprep.subr.bf16.mxu1 %v14384_v55  ;;  %v14448_v54 = vld [vmem:[%s16861_s15 + $0xf80] ss:$16 sps:$4 sm:$0xff]   ;;  %v14453_v55 = vld [vmem:[%s16861_s15 + $0xd64] ss:$16 sps:$4 sm:$0xff]  }
 0x15f   : > { %10152 = vmatmul.mubr.bf16.vlgmr.msra.gmra.mxu0 %v17147_v50 }
 0x160   : > { %10193 = vmatmul.mubr.bf16.vlgmr.msra.gmra.mxu1 %v17158_v57  ;;  %10202 = vmatpush1.bf16.msra.mxu0 %v14379_v37  ;;  %v14456_v37 = vld [vmem:[%s16861_s15 + $0xf64] ss:$16 sps:$4 sm:$0xff]  }
 0x161   : > { %10243 = vmatpush1.bf16.msra.mxu1 %v14382_v58  ;;  %10203 = vmatprep.subr.bf16.mxu0 %v14387_v59  ;;  %v14451_v58 = vld [vmem:[%s16861_s15 + $0xd60] ss:$16 sps:$4 sm:$0xff]  }
 0x162   : > { %10244 = vmatprep.subr.bf16.mxu1 %v14390_v60  ;;  %10233 = vmatprep.mubr.bf16.mxu0 %v17154_v56  ;;  %v14454_v59 = vld [vmem:[%s16861_s15 + $0xf60] ss:$16 sps:$4 sm:$0xff]   ;;  %v14459_v60 = vld [vmem:[%s16861_s15 + $0xd44] ss:$16 sps:$4 sm:$0xff]  }
 0x163   : > { %10274 = vmatprep.mubr.bf16.mxu1 %v17166_v61 }
 0x164   : > { %10204 = vmatpush1.bf16.msra.mxu0 %v14385_v63  ;;  %v14462_v63 = vld [vmem:[%s16861_s15 + $0xf44] ss:$16 sps:$4 sm:$0xff]  }
 0x165   : > { %10245 = vmatpush1.bf16.msra.mxu1 %v14388_v0  ;;  %10205 = vmatprep.subr.bf16.mxu0 %v14393_v1  ;;  %v14457_v0 = vld [vmem:[%s16861_s15 + $0xd40] ss:$16 sps:$4 sm:$0xff]  }
 0x166   : > { %10246 = vmatprep.subr.bf16.mxu1 %v14396_v3  ;;  %v17222_v1 = vld [vmem:[%s16854_s26 + $0x10] sm:$0xff] }
 0x167   : > { %v14460_v3 = vld [vmem:[%s16861_s15 + $0xf40] ss:$16 sps:$4 sm:$0xff]  }
 0x168   : > { %10206 = vmatpush1.bf16.msra.mxu0 %v14391_v4  ;;  %v14465_v4 = vld [vmem:[%s16861_s15 + $0xd24] ss:$16 sps:$4 sm:$0xff]  }
 0x169   : > { %10247 = vmatpush1.bf16.msra.mxu1 %v14394_v5  ;;  %10207 = vmatprep.subr.bf16.mxu0 %v14399_v6  ;;  %v14468_v5 = vld [vmem:[%s16861_s15 + $0xf24] ss:$16 sps:$4 sm:$0xff]   ;;  %v17229_v6 = vrot.slane %v17222_v1, %v16928_v51 }
 0x16a   : > { %10248 = vmatprep.subr.bf16.mxu1 %v14402_v7  ;;  %v14463_v7 = vld [vmem:[%s16861_s15 + $0xd20] ss:$16 sps:$4 sm:$0xff]  }
 0x16c   : > { %10208 = vmatpush1.bf16.msra.mxu0 %v14397_v9  ;;  %v14466_v9 = vld [vmem:[%s16861_s15 + $0xf20] ss:$16 sps:$4 sm:$0xff]  }
 0x16d   : > { %10249 = vmatpush1.bf16.msra.mxu1 %v14400_v10  ;;  %10209 = vmatprep.subr.bf16.mxu0 %v14405_v11  ;;  %v14471_v10 = vld [vmem:[%s16861_s15 + $0xd04] ss:$16 sps:$4 sm:$0xff]  }
 0x16e   : > { %10250 = vmatprep.subr.bf16.mxu1 %v14408_v12  ;;  %v14474_v11 = vld [vmem:[%s16861_s15 + $0xf04] ss:$16 sps:$4 sm:$0xff]   ;;  %v2046_v12 = vcombine.high %v17229_v6, %v17229_v6 }
 0x170   : > { %10210 = vmatpush1.bf16.msra.mxu0 %v14403_v13  ;;  %v14469_v13 = vld [vmem:[%s16861_s15 + $0xd00] ss:$16 sps:$4 sm:$0xff]  }
 0x171   : > { %10251 = vmatpush1.bf16.msra.mxu1 %v14406_v14  ;;  %10211 = vmatprep.subr.bf16.mxu0 %v14411_v16  ;;  %v17240_v14 = vrot.slane %v17137_v42, %v16928_v51  ;;  %v14472_v16 = vld [vmem:[%s16861_s15 + $0xf00] ss:$16 sps:$4 sm:$0xff]  }
 0x172   : > { %10252 = vmatprep.subr.bf16.mxu1 %v14414_v17  ;;  %v14478_v17 = vld [vmem:[%s16861_s15 + $0x10e4] ss:$16 sps:$4 sm:$0xff]   ;;  %v14479_v42 = vld [vmem:[%s16861_s15 + $0x12e0] ss:$16 sps:$4 sm:$0xff]  }
 0x174   : > { %10212 = vmatpush1.bf16.msra.mxu0 %v14409_v18  ;;  %v14481_v18 = vld [vmem:[%s16861_s15 + $0x12e4] ss:$16 sps:$4 sm:$0xff]  }
 0x175   : > { %10253 = vmatpush1.bf16.msra.mxu1 %v14412_v21  ;;  %10213 = vmatprep.subr.bf16.mxu0 %v14417_v22  ;;  %v17246_v21 = vrot.slane %v2046_v12, %v16928_v51  ;;  %v17250_v22 = vcombine.high %v17240_v14, %v17240_v14  ;;  %v14523_v12 = vld [vmem:[%s16861_s15 + $0x1204] ss:$16 sps:$4 sm:$0xff]  }
 0x176   : > { %10254 = vmatprep.subr.bf16.mxu1 %v14420_v23  ;;  %v14476_v23 = vld [vmem:[%s16861_s15 + $0x10e0] ss:$16 sps:$4 sm:$0xff]  }
 0x178   : > { %10214 = vmatpush1.bf16.msra.mxu0 %v14415_v24  ;;  %v14484_v24 = vld [vmem:[%s16861_s15 + $0x10c4] ss:$16 sps:$4 sm:$0xff]  }
 0x179   : > { %10255 = vmatpush1.bf16.msra.mxu1 %v14418_v26  ;;  %10215 = vmatprep.subr.bf16.mxu0 %v14423_v27  ;;  %v14487_v26 = vld [vmem:[%s16861_s15 + $0x12c4] ss:$16 sps:$4 sm:$0xff]   ;;  %v17258_v27 = vcombine.high %v17246_v21, %v17246_v21 }
 0x17a   : > { %10256 = vmatprep.subr.bf16.mxu1 %v14426_v29 }
 0x17c   : > { %10216 = vmatpush1.bf16.msra.mxu0 %v14421_v30 }
 0x17d   : > { %10257 = vmatpush1.bf16.msra.mxu1 %v14424_v31  ;;  %10217 = vmatprep.subr.bf16.mxu0 %v14429_v33  ;;  %v14482_v31 = vld [vmem:[%s16861_s15 + $0x10c0] ss:$16 sps:$4 sm:$0xff]  }
 0x17e   : > { %10258 = vmatprep.subr.bf16.mxu1 %v14432_v8  ;;  %v14485_v33 = vld [vmem:[%s16861_s15 + $0x12c0] ss:$16 sps:$4 sm:$0xff]  }
 0x180   : > { %10218 = vmatpush2.bf16.msra.mxu0 %v14427_v35 }
 0x181   : > { %10259 = vmatpush2.bf16.msra.mxu1 %v14430_v36  ;;  %10219 = vmatprep.subr.bf16.mxu0 %v14435_v38  ;;  %v14490_v38 = vld [vmem:[%s16861_s15 + $0x10a4] ss:$16 sps:$4 sm:$0xff]  }
 0x182   : > { %10260 = vmatprep.subr.bf16.mxu1 %v14438_v39  ;;  %v14493_v39 = vld [vmem:[%s16861_s15 + $0x12a4] ss:$16 sps:$4 sm:$0xff]  }
 0x184   : > { %10220 = vmatpush2.bf16.msra.mxu0 %v14433_v40 }
 0x185   : > { %10261 = vmatpush2.bf16.msra.mxu1 %v14436_v41  ;;  %10221 = vmatprep.subr.bf16.mxu0 %v14441_v34  ;;  %v14488_v41 = vld [vmem:[%s16861_s15 + $0x10a0] ss:$16 sps:$4 sm:$0xff]  }
 0x186   : > { %10262 = vmatprep.subr.bf16.mxu1 %v14444_v46  ;;  %v14491_v34 = vld [vmem:[%s16861_s15 + $0x12a0] ss:$16 sps:$4 sm:$0xff]  }
 0x188   : > { %10222 = vmatpush2.bf16.msra.mxu0 %v14439_v47 }
 0x189   : > { %10263 = vmatpush2.bf16.msra.mxu1 %v14442_v48  ;;  %10223 = vmatprep.subr.bf16.mxu0 %v14447_v49 }
 0x18a   : > { %10264 = vmatprep.subr.bf16.mxu1 %v14450_v52  ;;  %v14496_v52 = vld [vmem:[%s16861_s15 + $0x1084] ss:$16 sps:$4 sm:$0xff]  }
 0x18c   : > { %10224 = vmatpush2.bf16.msra.mxu0 %v14445_v53  ;;  %v14499_v53 = vld [vmem:[%s16861_s15 + $0x1284] ss:$16 sps:$4 sm:$0xff]  }
 0x18d   : > { %10265 = vmatpush2.bf16.msra.mxu1 %v14448_v54  ;;  %10225 = vmatprep.subr.bf16.mxu0 %v14453_v55  ;;  %v14494_v54 = vld [vmem:[%s16861_s15 + $0x1080] ss:$16 sps:$4 sm:$0xff]  }
 0x18e   : > { %10266 = vmatprep.subr.bf16.mxu1 %v14456_v37  ;;  %v14497_v55 = vld [vmem:[%s16861_s15 + $0x1280] ss:$16 sps:$4 sm:$0xff]   ;;  %v14502_v37 = vld [vmem:[%s16861_s15 + $0x1064] ss:$16 sps:$4 sm:$0xff]  }
 0x190   : > { %10226 = vmatpush2.bf16.msra.mxu0 %v14451_v58  ;;  %v14505_v58 = vld [vmem:[%s16861_s15 + $0x1264] ss:$16 sps:$4 sm:$0xff]  }
 0x191   : > { %10267 = vmatpush2.bf16.msra.mxu1 %v14454_v59  ;;  %10227 = vmatprep.subr.bf16.mxu0 %v14459_v60  ;;  %v14500_v59 = vld [vmem:[%s16861_s15 + $0x1060] ss:$16 sps:$4 sm:$0xff]  }
 0x192   : > { %10268 = vmatprep.subr.bf16.mxu1 %v14462_v63  ;;  %v14503_v60 = vld [vmem:[%s16861_s15 + $0x1260] ss:$16 sps:$4 sm:$0xff]   ;;  %v14508_v63 = vld [vmem:[%s16861_s15 + $0x1044] ss:$16 sps:$4 sm:$0xff]  }
 0x194   : > { %10228 = vmatpush2.bf16.msra.mxu0 %v14457_v0  ;;  %v14511_v0 = vld [vmem:[%s16861_s15 + $0x1244] ss:$16 sps:$4 sm:$0xff]  }
 0x195   : > { %10269 = vmatpush2.bf16.msra.mxu1 %v14460_v3  ;;  %10229 = vmatprep.subr.bf16.mxu0 %v14465_v4  ;;  %v14506_v3 = vld [vmem:[%s16861_s15 + $0x1040] ss:$16 sps:$4 sm:$0xff]  }
 0x196   : > { %10270 = vmatprep.subr.bf16.mxu1 %v14468_v5  ;;  %v14509_v4 = vld [vmem:[%s16861_s15 + $0x1240] ss:$16 sps:$4 sm:$0xff]   ;;  %v14514_v5 = vld [vmem:[%s16861_s15 + $0x1024] ss:$16 sps:$4 sm:$0xff]  }
 0x198   : > { %10230 = vmatpush2.bf16.msra.mxu0 %v14463_v7  ;;  %v14517_v7 = vld [vmem:[%s16861_s15 + $0x1224] ss:$16 sps:$4 sm:$0xff]  }
 0x199   : > { %10271 = vmatpush2.bf16.msra.mxu1 %v14466_v9  ;;  %10231 = vmatprep.subr.bf16.mxu0 %v14471_v10  ;;  %v14512_v9 = vld [vmem:[%s16861_s15 + $0x1020] ss:$16 sps:$4 sm:$0xff]  }
 0x19a   : > { %10272 = vmatprep.subr.bf16.mxu1 %v14474_v11  ;;  %v14515_v10 = vld [vmem:[%s16861_s15 + $0x1220] ss:$16 sps:$4 sm:$0xff]   ;;  %v14520_v11 = vld [vmem:[%s16861_s15 + $0x1004] ss:$16 sps:$4 sm:$0xff]  }
 0x19c   : > { %10232 = vmatpush2.bf16.msra.mxu0 %v14469_v13  ;;  %v14518_v13 = vld [vmem:[%s16861_s15 + $0x1000] ss:$16 sps:$4 sm:$0xff]  }
 0x19d   : > { %10273 = vmatpush2.bf16.msra.mxu1 %v14472_v16  ;;  %10283 = vmatprep.subr.bf16.mxu0 %v14478_v17  ;;  %v14521_v16 = vld [vmem:[%s16861_s15 + $0x1200] ss:$16 sps:$4 sm:$0xff]   ;;  %v14526_v17 = vld [vmem:[%s16861_s15 + $0x11e4] ss:$16 sps:$4 sm:$0xff]  }
 0x19e   : > { %10324 = vmatprep.subr.bf16.mxu1 %v14481_v18  ;;  %v14529_v18 = vld [vmem:[%s16861_s15 + $0x13e4] ss:$16 sps:$4 sm:$0xff]  }
 0x19f   : > { %v9989_v29 = vpop.f32.mrf.mxu0  ;;  %10234 = vmatmul.mubr.bf16.vlgmr.msra.gmra.mxu0 %v17240_v14 }
 0x1a0   : > { %v10030_v30 = vpop.f32.mrf.mxu1  ;;  %10275 = vmatmul.mubr.bf16.vlgmr.msra.gmra.mxu1 %v17250_v22  ;;  %10284 = vmatpush1.bf16.msra.mxu0 %v14476_v23  ;;  %v14524_v23 = vld [vmem:[%s16861_s15 + $0x11e0] ss:$16 sps:$4 sm:$0xff]  }
 0x1a1   : > { %v17264_v8 = vadd.f32 %v10030_v30, %v9989_v29  ;;  %10325 = vmatpush1.bf16.msra.mxu1 %v14479_v42  ;;  %v9991_v35 = vpop.f32.mrf.mxu0  ;;  %10285 = vmatprep.subr.bf16.mxu0 %v14484_v24  ;;  %v14527_v42 = vld [vmem:[%s16861_s15 + $0x13e0] ss:$16 sps:$4 sm:$0xff]   ;;  %v14532_v24 = vld [vmem:[%s16861_s15 + $0x11c4] ss:$16 sps:$4 sm:$0xff]  }
 0x1a2   : > { %v10032_v36 = vpop.f32.mrf.mxu1  ;;  %10326 = vmatprep.subr.bf16.mxu1 %v14487_v26  ;;  %10315 = vmatprep.mubr.bf16.mxu0 %v17246_v21  ;;  %v14535_v26 = vld [vmem:[%s16861_s15 + $0x13c4] ss:$16 sps:$4 sm:$0xff]   ;;  %v14530_v29 = vld [vmem:[%s16861_s15 + $0x11c0] ss:$16 sps:$4 sm:$0xff]  }
 0x1a3   : > { %v17268_v40 = vadd.f32 %v10032_v36, %v9991_v35  ;;  %10356 = vmatprep.mubr.bf16.mxu1 %v17258_v27  ;;  %v9993_v46 = vpop.f32.mrf.mxu0  ;;  %v14533_v30 = vld [vmem:[%s16861_s15 + $0x13c0] ss:$16 sps:$4 sm:$0xff]  }
 0x1a4   : > { %v10034_v47 = vpop.f32.mrf.mxu1  ;;  %10286 = vmatpush1.bf16.msra.mxu0 %v14482_v31  ;;  %v14538_v31 = vld [vmem:[%s16861_s15 + $0x11a4] ss:$16 sps:$4 sm:$0xff]   ;;  %v14536_v35 = vld [vmem:[%s16861_s15 + $0x11a0] ss:$16 sps:$4 sm:$0xff]  }
 0x1a5   : > { %10327 = vmatpush1.bf16.msra.mxu1 %v14485_v33  ;;  %v9994_v48 = vpop.f32.mrf.mxu0  ;;  %10287 = vmatprep.subr.bf16.mxu0 %v14490_v38  ;;  %v14541_v33 = vld [vmem:[%s16861_s15 + $0x13a4] ss:$16 sps:$4 sm:$0xff]   ;;  %v14539_v36 = vld [vmem:[%s16861_s15 + $0x13a0] ss:$16 sps:$4 sm:$0xff]  }
 0x1a6   : > { %v10035_v49 = vpop.f32.mrf.mxu1  ;;  %10328 = vmatprep.subr.bf16.mxu1 %v14493_v39  ;;  %v14544_v38 = vld [vmem:[%s16861_s15 + $0x1184] ss:$16 sps:$4 sm:$0xff]   ;;  %v14548_v48 = vld [vmem:[%s16861_s15 + $0x1160] ss:$16 sps:$4 sm:$0xff]  }
 0x1a7   : > { %v14547_v39 = vld [vmem:[%s16861_s15 + $0x1384] ss:$16 sps:$4 sm:$0xff]   ;;  %v14551_v49 = vld [vmem:[%s16861_s15 + $0x1360] ss:$16 sps:$4 sm:$0xff]  }
 0x1a8   : > { %10288 = vmatpush1.bf16.msra.mxu0 %v14488_v41  ;;  %v14542_v41 = vld [vmem:[%s16861_s15 + $0x1180] ss:$16 sps:$4 sm:$0xff]   ;;  %v14550_v46 = vld [vmem:[%s16861_s15 + $0x1164] ss:$16 sps:$4 sm:$0xff]  }
 0x1a9   : > { %10329 = vmatpush1.bf16.msra.mxu1 %v14491_v34  ;;  %10289 = vmatprep.subr.bf16.mxu0 %v14496_v52  ;;  %v14545_v34 = vld [vmem:[%s16861_s15 + $0x1380] ss:$16 sps:$4 sm:$0xff]   ;;  %v14553_v47 = vld [vmem:[%s16861_s15 + $0x1364] ss:$16 sps:$4 sm:$0xff]  }
 0x1aa   : > { %10330 = vmatprep.subr.bf16.mxu1 %v14499_v53  ;;  %v14556_v52 = vld [vmem:[%s16861_s15 + $0x1144] ss:$16 sps:$4 sm:$0xff]  }
 0x1ab   : > { %v14559_v53 = vld [vmem:[%s16861_s15 + $0x1344] ss:$16 sps:$4 sm:$0xff]  }
 0x1ac   : > { %10290 = vmatpush1.bf16.msra.mxu0 %v14494_v54  ;;  %v2031_v54 = vcombine.high %v17222_v1, %v17222_v1  ;;  %v14560_v1 = vld [vmem:[%s16861_s15 + $0x1120] ss:$16 sps:$4 sm:$0xff]  }
 0x1ad   : > { %10331 = vmatpush1.bf16.msra.mxu1 %v14497_v55  ;;  %10291 = vmatprep.subr.bf16.mxu0 %v14502_v37  ;;  %v14554_v55 = vld [vmem:[%s16861_s15 + $0x1140] ss:$16 sps:$4 sm:$0xff]  }
 0x1ae   : > { %10332 = vmatprep.subr.bf16.mxu1 %v14505_v58  ;;  %v14557_v37 = vld [vmem:[%s16861_s15 + $0x1340] ss:$16 sps:$4 sm:$0xff]   ;;  %v14562_v58 = vld [vmem:[%s16861_s15 + $0x1124] ss:$16 sps:$4 sm:$0xff]  }
 0x1b0   : > { %10292 = vmatpush1.bf16.msra.mxu0 %v14500_v59  ;;  %v14565_v59 = vld [vmem:[%s16861_s15 + $0x1324] ss:$16 sps:$4 sm:$0xff]  }
 0x1b1   : > { %10333 = vmatpush1.bf16.msra.mxu1 %v14503_v60  ;;  %10293 = vmatprep.subr.bf16.mxu0 %v14508_v63  ;;  %v17323_v60 = vrot.slane %v2031_v54, %v16928_v51  ;;  %v14563_v63 = vld [vmem:[%s16861_s15 + $0x1320] ss:$16 sps:$4 sm:$0xff]  }
 0x1b2   : > { %10334 = vmatprep.subr.bf16.mxu1 %v14511_v0  ;;  %v14568_v0 = vld [vmem:[%s16861_s15 + $0x1104] ss:$16 sps:$4 sm:$0xff]   ;;  %v14593_v54 = vld [vmem:[%s16861_s15 + $0x1680] ss:$16 sps:$4 sm:$0xff]  }
 0x1b4   : > { %10294 = vmatpush1.bf16.msra.mxu0 %v14506_v3  ;;  %v14571_v3 = vld [vmem:[%s16861_s15 + $0x1304] ss:$16 sps:$4 sm:$0xff]  }
 0x1b5   : > { %10335 = vmatpush1.bf16.msra.mxu1 %v14509_v4  ;;  %10295 = vmatprep.subr.bf16.mxu0 %v14514_v5  ;;  %v2047_v4 = vcombine.high %v17323_v60, %v17323_v60  ;;  %v17333_v5 = vrot.slane %v17229_v6, %v16928_v51 }
 0x1b6   : > { %10336 = vmatprep.subr.bf16.mxu1 %v14517_v7  ;;  %v14566_v7 = vld [vmem:[%s16861_s15 + $0x1100] ss:$16 sps:$4 sm:$0xff]  }
 0x1b7   : > { %v17346_v6 = vcombine.high %v17333_v5, %v17333_v5 }
 0x1b8   : > { %10296 = vmatpush1.bf16.msra.mxu0 %v14512_v9  ;;  %v14569_v9 = vld [vmem:[%s16861_s15 + $0x1300] ss:$16 sps:$4 sm:$0xff]  }
 0x1b9   : > { %10337 = vmatpush1.bf16.msra.mxu1 %v14515_v10  ;;  %10297 = vmatprep.subr.bf16.mxu0 %v14520_v11  ;;  %v14574_v10 = vld [vmem:[%s16861_s15 + $0x14e4] ss:$16 sps:$4 sm:$0xff]  }
 0x1ba   : > { %10338 = vmatprep.subr.bf16.mxu1 %v14523_v12  ;;  %v14577_v11 = vld [vmem:[%s16861_s15 + $0x16e4] ss:$16 sps:$4 sm:$0xff]   ;;  %v14572_v12 = vld [vmem:[%s16861_s15 + $0x14e0] ss:$16 sps:$4 sm:$0xff]  }
 0x1bc   : > { %10298 = vmatpush1.bf16.msra.mxu0 %v14518_v13  ;;  %v14575_v13 = vld [vmem:[%s16861_s15 + $0x16e0] ss:$16 sps:$4 sm:$0xff]  }
 0x1bd   : > { %10339 = vmatpush1.bf16.msra.mxu1 %v14521_v16  ;;  %10299 = vmatprep.subr.bf16.mxu0 %v14526_v17  ;;  %v17342_v16 = vrot.slane %v2047_v4, %v16928_v51  ;;  %v14580_v17 = vld [vmem:[%s16861_s15 + $0x14c4] ss:$16 sps:$4 sm:$0xff]  }
 0x1be   : > { %10340 = vmatprep.subr.bf16.mxu1 %v14529_v18  ;;  %v14583_v18 = vld [vmem:[%s16861_s15 + $0x16c4] ss:$16 sps:$4 sm:$0xff]  }
 0x1bf   : > { %v14610_v4 = vld [vmem:[%s16861_s15 + $0x1424] ss:$16 sps:$4 sm:$0xff]  }
 0x1c0   : > { %10300 = vmatpush2.bf16.msra.mxu0 %v14524_v23  ;;  %v14578_v23 = vld [vmem:[%s16861_s15 + $0x14c0] ss:$16 sps:$4 sm:$0xff]  }
 0x1c1   : > { %10341 = vmatpush2.bf16.msra.mxu1 %v14527_v42  ;;  %10301 = vmatprep.subr.bf16.mxu0 %v14532_v24  ;;  %v14581_v42 = vld [vmem:[%s16861_s15 + $0x16c0] ss:$16 sps:$4 sm:$0xff]   ;;  %v17354_v24 = vcombine.high %v17342_v16, %v17342_v16 }
 0x1c2   : > { %10342 = vmatprep.subr.bf16.mxu1 %v14535_v26 }
 0x1c4   : > { %10302 = vmatpush2.bf16.msra.mxu0 %v14530_v29 }
 0x1c5   : > { %10343 = vmatpush2.bf16.msra.mxu1 %v14533_v30  ;;  %10303 = vmatprep.subr.bf16.mxu0 %v14538_v31 }
 0x1c6   : > { %10344 = vmatprep.subr.bf16.mxu1 %v14541_v33 }
 0x1c8   : > { %10304 = vmatpush2.bf16.msra.mxu0 %v14536_v35  ;;  %v14586_v35 = vld [vmem:[%s16861_s15 + $0x14a4] ss:$16 sps:$4 sm:$0xff]  }
 0x1c9   : > { %10345 = vmatpush2.bf16.msra.mxu1 %v14539_v36  ;;  %10305 = vmatprep.subr.bf16.mxu0 %v14544_v38  ;;  %v14589_v36 = vld [vmem:[%s16861_s15 + $0x16a4] ss:$16 sps:$4 sm:$0xff]  }
 0x1ca   : > { %10346 = vmatprep.subr.bf16.mxu1 %v14547_v39 }
 0x1cc   : > { %10306 = vmatpush2.bf16.msra.mxu0 %v14542_v41  ;;  %v14584_v41 = vld [vmem:[%s16861_s15 + $0x14a0] ss:$16 sps:$4 sm:$0xff]  }
 0x1cd   : > { %10347 = vmatpush2.bf16.msra.mxu1 %v14545_v34  ;;  %10307 = vmatprep.subr.bf16.mxu0 %v14550_v46  ;;  %v14587_v34 = vld [vmem:[%s16861_s15 + $0x16a0] ss:$16 sps:$4 sm:$0xff]  }
 0x1ce   : > { %10348 = vmatprep.subr.bf16.mxu1 %v14553_v47 }
 0x1d0   : > { %10308 = vmatpush2.bf16.msra.mxu0 %v14548_v48 }
 0x1d1   : > { %10349 = vmatpush2.bf16.msra.mxu1 %v14551_v49  ;;  %10309 = vmatprep.subr.bf16.mxu0 %v14556_v52  ;;  %v14595_v52 = vld [vmem:[%s16861_s15 + $0x1684] ss:$16 sps:$4 sm:$0xff]  }
 0x1d2   : > { %10350 = vmatprep.subr.bf16.mxu1 %v14559_v53  ;;  %v14590_v53 = vld [vmem:[%s16861_s15 + $0x1480] ss:$16 sps:$4 sm:$0xff]  }
 0x1d4   : > { %10310 = vmatpush2.bf16.msra.mxu0 %v14554_v55  ;;  %v14598_v55 = vld [vmem:[%s16861_s15 + $0x1464] ss:$16 sps:$4 sm:$0xff]  }
 0x1d5   : > { %10351 = vmatpush2.bf16.msra.mxu1 %v14557_v37  ;;  %10311 = vmatprep.subr.bf16.mxu0 %v14562_v58  ;;  %v14601_v37 = vld [vmem:[%s16861_s15 + $0x1664] ss:$16 sps:$4 sm:$0xff]   ;;  %v14596_v58 = vld [vmem:[%s16861_s15 + $0x1460] ss:$16 sps:$4 sm:$0xff]  }
 0x1d6   : > { %10352 = vmatprep.subr.bf16.mxu1 %v14565_v59  ;;  %v14599_v59 = vld [vmem:[%s16861_s15 + $0x1660] ss:$16 sps:$4 sm:$0xff]  }
 0x1d8   : > { %10312 = vmatpush2.bf16.msra.mxu0 %v14560_v1  ;;  %v14604_v1 = vld [vmem:[%s16861_s15 + $0x1444] ss:$16 sps:$4 sm:$0xff]  }
 0x1d9   : > { %10353 = vmatpush2.bf16.msra.mxu1 %v14563_v63  ;;  %10313 = vmatprep.subr.bf16.mxu0 %v14568_v0  ;;  %v14607_v63 = vld [vmem:[%s16861_s15 + $0x1644] ss:$16 sps:$4 sm:$0xff]   ;;  %v14602_v0 = vld [vmem:[%s16861_s15 + $0x1440] ss:$16 sps:$4 sm:$0xff]  }
 0x1da   : > { %10354 = vmatprep.subr.bf16.mxu1 %v14571_v3  ;;  %v14605_v3 = vld [vmem:[%s16861_s15 + $0x1640] ss:$16 sps:$4 sm:$0xff]  }
 0x1dc   : > { %10314 = vmatpush2.bf16.msra.mxu0 %v14566_v7  ;;  %v14613_v7 = vld [vmem:[%s16861_s15 + $0x1624] ss:$16 sps:$4 sm:$0xff]  }
 0x1dd   : > { %10355 = vmatpush2.bf16.msra.mxu1 %v14569_v9  ;;  %10365 = vmatprep.subr.bf16.mxu0 %v14574_v10  ;;  %v14608_v9 = vld [vmem:[%s16861_s15 + $0x1420] ss:$16 sps:$4 sm:$0xff]  }
 0x1de   : > { %10406 = vmatprep.subr.bf16.mxu1 %v14577_v11  ;;  %v14611_v10 = vld [vmem:[%s16861_s15 + $0x1620] ss:$16 sps:$4 sm:$0xff]   ;;  %v14616_v11 = vld [vmem:[%s16861_s15 + $0x1404] ss:$16 sps:$4 sm:$0xff]  }
 0x1df   : > { %v10071_v26 = vpop.f32.mrf.mxu0  ;;  %10316 = vmatmul.mubr.bf16.vlgmr.msra.gmra.mxu0 %v17333_v5 }
 0x1e0   : > { %v10112_v29 = vpop.f32.mrf.mxu1  ;;  %10357 = vmatmul.mubr.bf16.vlgmr.msra.gmra.mxu1 %v17346_v6  ;;  %v10072_v30 = vadd.f32 %v10071_v26, %v17264_v8  ;;  %10366 = vmatpush1.bf16.msra.mxu0 %v14572_v12  ;;  %v14619_v12 = vld [vmem:[%s16861_s15 + $0x1604] ss:$16 sps:$4 sm:$0xff]   ;;  %v14623_v26 = vld [vmem:[%s16861_s15 + $0x17e0] ss:$16 sps:$4 sm:$0xff]  }
 0x1e1   : > { %10407 = vmatpush1.bf16.msra.mxu1 %v14575_v13  ;;  %v10073_v31 = vpop.f32.mrf.mxu0  ;;  %10367 = vmatprep.subr.bf16.mxu0 %v14580_v17  ;;  %v14614_v13 = vld [vmem:[%s16861_s15 + $0x1400] ss:$16 sps:$4 sm:$0xff]  }
 0x1e2   : > { %v10114_v33 = vpop.f32.mrf.mxu1  ;;  %10408 = vmatprep.subr.bf16.mxu1 %v14583_v18  ;;  %v17361_v38 = vadd.f32 %v10112_v29, %v10072_v30  ;;  %v10074_v39 = vadd.f32 %v10073_v31, %v17268_v40  ;;  %10397 = vmatprep.mubr.bf16.mxu0 %v17342_v16  ;;  %v14592_v40 = vld [vmem:[%s16861_s15 + $0x1484] ss:$16 sps:$4 sm:$0xff]   ;;  %v14617_v17 = vld [vmem:[%s16861_s15 + $0x1600] ss:$16 sps:$4 sm:$0xff]  }
 0x1e3   : > { %10438 = vmatprep.mubr.bf16.mxu1 %v17354_v24  ;;  %v10075_v8 = vpop.f32.mrf.mxu0  ;;  %v14622_v18 = vld [vmem:[%s16861_s15 + $0x15e4] ss:$16 sps:$4 sm:$0xff]   ;;  %v14626_v31 = vld [vmem:[%s16861_s15 + $0x15c0] ss:$16 sps:$4 sm:$0xff]  }
 0x1e4   : > { %v10116_v46 = vpop.f32.mrf.mxu1  ;;  %v17368_v47 = vadd.f32 %v10114_v33, %v10074_v39  ;;  %10368 = vmatpush1.bf16.msra.mxu0 %v14578_v23  ;;  %v14625_v23 = vld [vmem:[%s16861_s15 + $0x17e4] ss:$16 sps:$4 sm:$0xff]   ;;  %v14629_v33 = vld [vmem:[%s16861_s15 + $0x17c0] ss:$16 sps:$4 sm:$0xff]  }
 0x1e5   : > { %10409 = vmatpush1.bf16.msra.mxu1 %v14581_v42  ;;  %v10076_v48 = vpop.f32.mrf.mxu0  ;;  %10369 = vmatprep.subr.bf16.mxu0 %v14586_v35  ;;  %v14620_v42 = vld [vmem:[%s16861_s15 + $0x15e0] ss:$16 sps:$4 sm:$0xff]   ;;  %v14628_v29 = vld [vmem:[%s16861_s15 + $0x15c4] ss:$16 sps:$4 sm:$0xff]  }
 0x1e6   : > { %v10117_v49 = vpop.f32.mrf.mxu1  ;;  %10410 = vmatprep.subr.bf16.mxu1 %v14589_v36  ;;  %v14631_v30 = vld [vmem:[%s16861_s15 + $0x17c4] ss:$16 sps:$4 sm:$0xff]   ;;  %v14632_v39 = vld [vmem:[%s16861_s15 + $0x15a0] ss:$16 sps:$4 sm:$0xff]  }
 0x1e7   : > { %v14634_v35 = vld [vmem:[%s16861_s15 + $0x15a4] ss:$16 sps:$4 sm:$0xff]   ;;  %v14638_v46 = vld [vmem:[%s16861_s15 + $0x1580] ss:$16 sps:$4 sm:$0xff]  }
 0x1e8   : > { %10370 = vmatpush1.bf16.msra.mxu0 %v14584_v41  ;;  %v14637_v36 = vld [vmem:[%s16861_s15 + $0x17a4] ss:$16 sps:$4 sm:$0xff]   ;;  %v14635_v41 = vld [vmem:[%s16861_s15 + $0x17a0] ss:$16 sps:$4 sm:$0xff]  }
 0x1e9   : > { %10411 = vmatpush1.bf16.msra.mxu1 %v14587_v34  ;;  %10371 = vmatprep.subr.bf16.mxu0 %v14592_v40  ;;  %v14640_v34 = vld [vmem:[%s16861_s15 + $0x1584] ss:$16 sps:$4 sm:$0xff]   ;;  %v14641_v48 = vld [vmem:[%s16861_s15 + $0x1780] ss:$16 sps:$4 sm:$0xff]  }
 0x1ea   : > { %10412 = vmatprep.subr.bf16.mxu1 %v14595_v52  ;;  %v14643_v8 = vld [vmem:[%s16861_s15 + $0x1784] ss:$16 sps:$4 sm:$0xff]   ;;  %v14644_v52 = vld [vmem:[%s16861_s15 + $0x1560] ss:$16 sps:$4 sm:$0xff]  }
 0x1eb   : > { %v14646_v49 = vld [vmem:[%s16861_s15 + $0x1564] ss:$16 sps:$4 sm:$0xff]  }
 0x1ec   : > { %10372 = vmatpush1.bf16.msra.mxu0 %v14590_v53  ;;  %v14649_v40 = vld [vmem:[%s16861_s15 + $0x1764] ss:$16 sps:$4 sm:$0xff]   ;;  %v14647_v53 = vld [vmem:[%s16861_s15 + $0x1760] ss:$16 sps:$4 sm:$0xff]  }
 0x1ed   : > { %10413 = vmatpush1.bf16.msra.mxu1 %v14593_v54  ;;  %10373 = vmatprep.subr.bf16.mxu0 %v14598_v55  ;;  %v14652_v54 = vld [vmem:[%s16861_s15 + $0x1544] ss:$16 sps:$4 sm:$0xff]  }
 0x1ee   : > { %10414 = vmatprep.subr.bf16.mxu1 %v14601_v37  ;;  %v14655_v55 = vld [vmem:[%s16861_s15 + $0x1744] ss:$16 sps:$4 sm:$0xff]   ;;  %v17413_v37 = vld [vmem:[%s16854_s26 + $0x18] sm:$0xff] }
 0x1f0   : > { %10374 = vmatpush1.bf16.msra.mxu0 %v14596_v58  ;;  %v14650_v58 = vld [vmem:[%s16861_s15 + $0x1540] ss:$16 sps:$4 sm:$0xff]  }
 0x1f1   : > { %10415 = vmatpush1.bf16.msra.mxu1 %v14599_v59  ;;  %10375 = vmatprep.subr.bf16.mxu0 %v14604_v1  ;;  %v14653_v59 = vld [vmem:[%s16861_s15 + $0x1740] ss:$16 sps:$4 sm:$0xff]   ;;  %v14658_v1 = vld [vmem:[%s16861_s15 + $0x1524] ss:$16 sps:$4 sm:$0xff]  }
 0x1f2   : > { %10416 = vmatprep.subr.bf16.mxu1 %v14607_v63  ;;  %v14661_v63 = vld [vmem:[%s16861_s15 + $0x1724] ss:$16 sps:$4 sm:$0xff]  }
 0x1f4   : > { %10376 = vmatpush1.bf16.msra.mxu0 %v14602_v0  ;;  %v17421_v0 = vrot.slane %v17413_v37, %v16928_v51 }
 0x1f5   : > { %10417 = vmatpush1.bf16.msra.mxu1 %v14605_v3  ;;  %10377 = vmatprep.subr.bf16.mxu0 %v14610_v4  ;;  %v14656_v3 = vld [vmem:[%s16861_s15 + $0x1520] ss:$16 sps:$4 sm:$0xff]  }
 0x1f6   : > { %10418 = vmatprep.subr.bf16.mxu1 %v14613_v7  ;;  %v14659_v4 = vld [vmem:[%s16861_s15 + $0x1720] ss:$16 sps:$4 sm:$0xff]   ;;  %v14664_v7 = vld [vmem:[%s16861_s15 + $0x1504] ss:$16 sps:$4 sm:$0xff]  }
 0x1f8   : > { %10378 = vmatpush1.bf16.msra.mxu0 %v14608_v9  ;;  %v14667_v9 = vld [vmem:[%s16861_s15 + $0x1704] ss:$16 sps:$4 sm:$0xff]  }
 0x1f9   : > { %10419 = vmatpush1.bf16.msra.mxu1 %v14611_v10  ;;  %10379 = vmatprep.subr.bf16.mxu0 %v14616_v11  ;;  %v2095_v10 = vcombine.high %v17421_v0, %v17421_v0  ;;  %v17431_v11 = vrot.slane %v17323_v60, %v16928_v51 }
 0x1fa   : > { %10420 = vmatprep.subr.bf16.mxu1 %v14619_v12  ;;  %v14662_v12 = vld [vmem:[%s16861_s15 + $0x1500] ss:$16 sps:$4 sm:$0xff]  }
 0x1fb   : > { %v17444_v60 = vcombine.high %v17431_v11, %v17431_v11 }
 0x1fc   : > { %10380 = vmatpush1.bf16.msra.mxu0 %v14614_v13  ;;  %v14665_v13 = vld [vmem:[%s16861_s15 + $0x1700] ss:$16 sps:$4 sm:$0xff]  }
 0x1fd   : > { %10421 = vmatpush1.bf16.msra.mxu1 %v14617_v17  ;;  %10381 = vmatprep.subr.bf16.mxu0 %v14622_v18  ;;  %v14671_v17 = vld [vmem:[%s16861_s15 + $0x18e4] ss:$16 sps:$4 sm:$0xff]  }
 0x1fe   : > { %10422 = vmatprep.subr.bf16.mxu1 %v14625_v23  ;;  %v14674_v18 = vld [vmem:[%s16861_s15 + $0x1ae4] ss:$16 sps:$4 sm:$0xff]   ;;  %v14669_v23 = vld [vmem:[%s16861_s15 + $0x18e0] ss:$16 sps:$4 sm:$0xff]  }
 0x200   : > { %10382 = vmatpush2.bf16.msra.mxu0 %v14620_v42  ;;  %v14672_v42 = vld [vmem:[%s16861_s15 + $0x1ae0] ss:$16 sps:$4 sm:$0xff]  }
 0x201   : > { %10423 = vmatpush2.bf16.msra.mxu1 %v14623_v26  ;;  %10383 = vmatprep.subr.bf16.mxu0 %v14628_v29  ;;  %v17440_v26 = vrot.slane %v2095_v10, %v16928_v51  ;;  %v14677_v29 = vld [vmem:[%s16861_s15 + $0x18c4] ss:$16 sps:$4 sm:$0xff]   ;;  %v14696_v10 = vld [vmem:[%s16861_s15 + $0x1a60] ss:$16 sps:$4 sm:$0xff]  }
 0x202   : > { %10424 = vmatprep.subr.bf16.mxu1 %v14631_v30  ;;  %v14680_v30 = vld [vmem:[%s16861_s15 + $0x1ac4] ss:$16 sps:$4 sm:$0xff]  }
 0x204   : > { %10384 = vmatpush2.bf16.msra.mxu0 %v14626_v31  ;;  %v14675_v31 = vld [vmem:[%s16861_s15 + $0x18c0] ss:$16 sps:$4 sm:$0xff]  }
 0x205   : > { %10425 = vmatpush2.bf16.msra.mxu1 %v14629_v33  ;;  %10385 = vmatprep.subr.bf16.mxu0 %v14634_v35  ;;  %v14678_v33 = vld [vmem:[%s16861_s15 + $0x1ac0] ss:$16 sps:$4 sm:$0xff]   ;;  %v17452_v35 = vcombine.high %v17440_v26, %v17440_v26 }
 0x206   : > { %10426 = vmatprep.subr.bf16.mxu1 %v14637_v36 }
 0x208   : > { %10386 = vmatpush2.bf16.msra.mxu0 %v14632_v39 }
 0x209   : > { %10427 = vmatpush2.bf16.msra.mxu1 %v14635_v41  ;;  %10387 = vmatprep.subr.bf16.mxu0 %v14640_v34 }
 0x20a   : > { %10428 = vmatprep.subr.bf16.mxu1 %v14643_v8 }
 0x20c   : > { %10388 = vmatpush2.bf16.msra.mxu0 %v14638_v46  ;;  %v14683_v46 = vld [vmem:[%s16861_s15 + $0x18a4] ss:$16 sps:$4 sm:$0xff]  }
 0x20d   : > { %10429 = vmatpush2.bf16.msra.mxu1 %v14641_v48  ;;  %10389 = vmatprep.subr.bf16.mxu0 %v14646_v49  ;;  %v14686_v48 = vld [vmem:[%s16861_s15 + $0x1aa4] ss:$16 sps:$4 sm:$0xff]  }
 0x20e   : > { %10430 = vmatprep.subr.bf16.mxu1 %v14649_v40 }
 0x210   : > { %10390 = vmatpush2.bf16.msra.mxu0 %v14644_v52  ;;  %v14681_v52 = vld [vmem:[%s16861_s15 + $0x18a0] ss:$16 sps:$4 sm:$0xff]  }
 0x211   : > { %10431 = vmatpush2.bf16.msra.mxu1 %v14647_v53  ;;  %10391 = vmatprep.subr.bf16.mxu0 %v14652_v54  ;;  %v14684_v53 = vld [vmem:[%s16861_s15 + $0x1aa0] ss:$16 sps:$4 sm:$0xff]  }
 0x212   : > { %10432 = vmatprep.subr.bf16.mxu1 %v14655_v55 }
 0x214   : > { %10392 = vmatpush2.bf16.msra.mxu0 %v14650_v58 }
 0x215   : > { %10433 = vmatpush2.bf16.msra.mxu1 %v14653_v59  ;;  %10393 = vmatprep.subr.bf16.mxu0 %v14658_v1  ;;  %v14692_v1 = vld [vmem:[%s16861_s15 + $0x1a84] ss:$16 sps:$4 sm:$0xff]  }
 0x216   : > { %10434 = vmatprep.subr.bf16.mxu1 %v14661_v63  ;;  %v14687_v63 = vld [vmem:[%s16861_s15 + $0x1880] ss:$16 sps:$4 sm:$0xff]  }
 0x218   : > { %10394 = vmatpush2.bf16.msra.mxu0 %v14656_v3  ;;  %v14690_v3 = vld [vmem:[%s16861_s15 + $0x1a80] ss:$16 sps:$4 sm:$0xff]  }
 0x219   : > { %10435 = vmatpush2.bf16.msra.mxu1 %v14659_v4  ;;  %10395 = vmatprep.subr.bf16.mxu0 %v14664_v7  ;;  %v14695_v4 = vld [vmem:[%s16861_s15 + $0x1864] ss:$16 sps:$4 sm:$0xff]  }
 0x21a   : > { %10436 = vmatprep.subr.bf16.mxu1 %v14667_v9  ;;  %v14698_v7 = vld [vmem:[%s16861_s15 + $0x1a64] ss:$16 sps:$4 sm:$0xff]   ;;  %v14693_v9 = vld [vmem:[%s16861_s15 + $0x1860] ss:$16 sps:$4 sm:$0xff]  }
 0x21c   : > { %10396 = vmatpush2.bf16.msra.mxu0 %v14662_v12  ;;  %v14701_v12 = vld [vmem:[%s16861_s15 + $0x1844] ss:$16 sps:$4 sm:$0xff]  }
 0x21d   : > { %10437 = vmatpush2.bf16.msra.mxu1 %v14665_v13  ;;  %10447 = vmatprep.subr.bf16.mxu0 %v14671_v17  ;;  %v14704_v13 = vld [vmem:[%s16861_s15 + $0x1a44] ss:$16 sps:$4 sm:$0xff]   ;;  %v14699_v17 = vld [vmem:[%s16861_s15 + $0x1840] ss:$16 sps:$4 sm:$0xff]  }
 0x21e   : > { %10488 = vmatprep.subr.bf16.mxu1 %v14674_v18  ;;  %v14702_v18 = vld [vmem:[%s16861_s15 + $0x1a40] ss:$16 sps:$4 sm:$0xff]  }
 0x21f   : > { %v10153_v36 = vpop.f32.mrf.mxu0  ;;  %10398 = vmatmul.mubr.bf16.vlgmr.msra.gmra.mxu0 %v17431_v11 }
 0x220   : > { %v10194_v39 = vpop.f32.mrf.mxu1  ;;  %10439 = vmatmul.mubr.bf16.vlgmr.msra.gmra.mxu1 %v17444_v60  ;;  %v10154_v41 = vadd.f32 %v10153_v36, %v17361_v38  ;;  %10448 = vmatpush1.bf16.msra.mxu0 %v14669_v23  ;;  %v14707_v23 = vld [vmem:[%s16861_s15 + $0x1824] ss:$16 sps:$4 sm:$0xff]   ;;  %v14711_v36 = vld [vmem:[%s16861_s15 + $0x1800] ss:$16 sps:$4 sm:$0xff]  }
 0x221   : > { %10489 = vmatpush1.bf16.msra.mxu1 %v14672_v42  ;;  %v10155_v34 = vpop.f32.mrf.mxu0  ;;  %10449 = vmatprep.subr.bf16.mxu0 %v14677_v29  ;;  %v14710_v42 = vld [vmem:[%s16861_s15 + $0x1a24] ss:$16 sps:$4 sm:$0xff]   ;;  %v14705_v29 = vld [vmem:[%s16861_s15 + $0x1820] ss:$16 sps:$4 sm:$0xff]  }
 0x222   : > { %v10196_v8 = vpop.f32.mrf.mxu1  ;;  %10490 = vmatprep.subr.bf16.mxu1 %v14680_v30  ;;  %v17459_v49 = vadd.f32 %v10194_v39, %v10154_v41  ;;  %v10156_v40 = vadd.f32 %v10155_v34, %v17368_v47  ;;  %10479 = vmatprep.mubr.bf16.mxu0 %v17440_v26  ;;  %v14689_v47 = vld [vmem:[%s16861_s15 + $0x1884] ss:$16 sps:$4 sm:$0xff]   ;;  %v14708_v30 = vld [vmem:[%s16861_s15 + $0x1a20] ss:$16 sps:$4 sm:$0xff]  }
 0x223   : > { %10520 = vmatprep.mubr.bf16.mxu1 %v17452_v35  ;;  %v10157_v38 = vpop.f32.mrf.mxu0  ;;  %v14714_v39 = vld [vmem:[%s16861_s15 + $0x1a00] ss:$16 sps:$4 sm:$0xff]   ;;  %v14719_v41 = vld [vmem:[%s16861_s15 + $0x19e4] ss:$16 sps:$4 sm:$0xff]  }
 0x224   : > { %v10198_v54 = vpop.f32.mrf.mxu1  ;;  %v17466_v55 = vadd.f32 %v10196_v8, %v10156_v40  ;;  %10450 = vmatpush1.bf16.msra.mxu0 %v14675_v31  ;;  %v14713_v31 = vld [vmem:[%s16861_s15 + $0x1804] ss:$16 sps:$4 sm:$0xff]   ;;  %v14717_v8 = vld [vmem:[%s16861_s15 + $0x19e0] ss:$16 sps:$4 sm:$0xff]  }
 0x225   : > { %10491 = vmatpush1.bf16.msra.mxu1 %v14678_v33  ;;  %v10158_v58 = vpop.f32.mrf.mxu0  ;;  %10451 = vmatprep.subr.bf16.mxu0 %v14683_v46  ;;  %v14716_v33 = vld [vmem:[%s16861_s15 + $0x1a04] ss:$16 sps:$4 sm:$0xff]   ;;  %v14720_v46 = vld [vmem:[%s16861_s15 + $0x1be0] ss:$16 sps:$4 sm:$0xff]  }
 0x226   : > { %v10199_v59 = vpop.f32.mrf.mxu1  ;;  %10492 = vmatprep.subr.bf16.mxu1 %v14686_v48  ;;  %v14722_v34 = vld [vmem:[%s16861_s15 + $0x1be4] ss:$16 sps:$4 sm:$0xff]   ;;  %v14729_v58 = vld [vmem:[%s16861_s15 + $0x19a0] ss:$16 sps:$4 sm:$0xff]  }
 0x227   : > { %v14725_v48 = vld [vmem:[%s16861_s15 + $0x19c4] ss:$16 sps:$4 sm:$0xff]   ;;  %v14732_v59 = vld [vmem:[%s16861_s15 + $0x1ba0] ss:$16 sps:$4 sm:$0xff]  }
 0x228   : > { %10452 = vmatpush1.bf16.msra.mxu0 %v14681_v52  ;;  %v14728_v40 = vld [vmem:[%s16861_s15 + $0x1bc4] ss:$16 sps:$4 sm:$0xff]   ;;  %v14723_v52 = vld [vmem:[%s16861_s15 + $0x19c0] ss:$16 sps:$4 sm:$0xff]  }
 0x229   : > { %10493 = vmatpush1.bf16.msra.mxu1 %v14684_v53  ;;  %10453 = vmatprep.subr.bf16.mxu0 %v14689_v47  ;;  %v14726_v53 = vld [vmem:[%s16861_s15 + $0x1bc0] ss:$16 sps:$4 sm:$0xff]   ;;  %v14731_v38 = vld [vmem:[%s16861_s15 + $0x19a4] ss:$16 sps:$4 sm:$0xff]  }
 0x22a   : > { %10494 = vmatprep.subr.bf16.mxu1 %v14692_v1  ;;  %v14734_v54 = vld [vmem:[%s16861_s15 + $0x1ba4] ss:$16 sps:$4 sm:$0xff]  }
 0x22b   : > { %v14737_v47 = vld [vmem:[%s16861_s15 + $0x1984] ss:$16 sps:$4 sm:$0xff]  }
 0x22c   : > { %10454 = vmatpush1.bf16.msra.mxu0 %v14687_v63  ;;  %v14740_v1 = vld [vmem:[%s16861_s15 + $0x1b84] ss:$16 sps:$4 sm:$0xff]   ;;  %v14735_v63 = vld [vmem:[%s16861_s15 + $0x1980] ss:$16 sps:$4 sm:$0xff]  }
 0x22d   : > { %10495 = vmatpush1.bf16.msra.mxu1 %v14690_v3  ;;  %10455 = vmatprep.subr.bf16.mxu0 %v14695_v4  ;;  %v14738_v3 = vld [vmem:[%s16861_s15 + $0x1b80] ss:$16 sps:$4 sm:$0xff]   ;;  %v14743_v4 = vld [vmem:[%s16861_s15 + $0x1964] ss:$16 sps:$4 sm:$0xff]  }
 0x22e   : > { %10496 = vmatprep.subr.bf16.mxu1 %v14698_v7  ;;  %v14746_v7 = vld [vmem:[%s16861_s15 + $0x1b64] ss:$16 sps:$4 sm:$0xff]  }
 0x230   : > { %10456 = vmatpush1.bf16.msra.mxu0 %v14693_v9  ;;  %v14741_v9 = vld [vmem:[%s16861_s15 + $0x1960] ss:$16 sps:$4 sm:$0xff]  }
 0x231   : > { %10497 = vmatpush1.bf16.msra.mxu1 %v14696_v10  ;;  %10457 = vmatprep.subr.bf16.mxu0 %v14701_v12  ;;  %v14744_v10 = vld [vmem:[%s16861_s15 + $0x1b60] ss:$16 sps:$4 sm:$0xff]   ;;  %v14749_v12 = vld [vmem:[%s16861_s15 + $0x1944] ss:$16 sps:$4 sm:$0xff]  }
 0x232   : > { %10498 = vmatprep.subr.bf16.mxu1 %v14704_v13  ;;  %v14752_v13 = vld [vmem:[%s16861_s15 + $0x1b44] ss:$16 sps:$4 sm:$0xff]  }
 0x234   : > { %10458 = vmatpush1.bf16.msra.mxu0 %v14699_v17  ;;  %v2080_v17 = vcombine.high %v17413_v37, %v17413_v37  ;;  %v14753_v37 = vld [vmem:[%s16861_s15 + $0x1920] ss:$16 sps:$4 sm:$0xff]  }
 0x235   : > { %10499 = vmatpush1.bf16.msra.mxu1 %v14702_v18  ;;  %10459 = vmatprep.subr.bf16.mxu0 %v14707_v23  ;;  %v14747_v18 = vld [vmem:[%s16861_s15 + $0x1940] ss:$16 sps:$4 sm:$0xff]  }
 0x236   : > { %10500 = vmatprep.subr.bf16.mxu1 %v14710_v42  ;;  %v14750_v23 = vld [vmem:[%s16861_s15 + $0x1b40] ss:$16 sps:$4 sm:$0xff]   ;;  %v14755_v42 = vld [vmem:[%s16861_s15 + $0x1924] ss:$16 sps:$4 sm:$0xff]  }
 0x238   : > { %10460 = vmatpush1.bf16.msra.mxu0 %v14705_v29  ;;  %v14758_v29 = vld [vmem:[%s16861_s15 + $0x1b24] ss:$16 sps:$4 sm:$0xff]  }
 0x239   : > { %10501 = vmatpush1.bf16.msra.mxu1 %v14708_v30  ;;  %10461 = vmatprep.subr.bf16.mxu0 %v14713_v31  ;;  %v17517_v30 = vrot.slane %v2080_v17, %v16928_v51  ;;  %v14756_v31 = vld [vmem:[%s16861_s15 + $0x1b20] ss:$16 sps:$4 sm:$0xff]  }
 0x23a   : > { %10502 = vmatprep.subr.bf16.mxu1 %v14716_v33  ;;  %v14761_v33 = vld [vmem:[%s16861_s15 + $0x1904] ss:$16 sps:$4 sm:$0xff]   ;;  %v14777_v17 = vld [vmem:[%s16861_s15 + $0x1ca0] ss:$16 sps:$4 sm:$0xff]  }
 0x23c   : > { %10462 = vmatpush1.bf16.msra.mxu0 %v14711_v36  ;;  %v14764_v36 = vld [vmem:[%s16861_s15 + $0x1b04] ss:$16 sps:$4 sm:$0xff]  }
 0x23d   : > { %10503 = vmatpush1.bf16.msra.mxu1 %v14714_v39  ;;  %10463 = vmatprep.subr.bf16.mxu0 %v14719_v41  ;;  %v2096_v39 = vcombine.high %v17517_v30, %v17517_v30  ;;  %v17527_v41 = vrot.slane %v17421_v0, %v16928_v51 }
 0x23e   : > { %10504 = vmatprep.subr.bf16.mxu1 %v14722_v34  ;;  %v14759_v34 = vld [vmem:[%s16861_s15 + $0x1900] ss:$16 sps:$4 sm:$0xff]  }
 0x23f   : > { %v17540_v0 = vcombine.high %v17527_v41, %v17527_v41 }
 0x240   : > { %10464 = vmatpush2.bf16.msra.mxu0 %v14717_v8  ;;  %v14762_v8 = vld [vmem:[%s16861_s15 + $0x1b00] ss:$16 sps:$4 sm:$0xff]  }
 0x241   : > { %10505 = vmatpush2.bf16.msra.mxu1 %v14720_v46  ;;  %10465 = vmatprep.subr.bf16.mxu0 %v14725_v48  ;;  %v14767_v46 = vld [vmem:[%s16861_s15 + $0x1ce4] ss:$16 sps:$4 sm:$0xff]  }
 0x242   : > { %10506 = vmatprep.subr.bf16.mxu1 %v14728_v40  ;;  %v14770_v48 = vld [vmem:[%s16861_s15 + $0x1ee4] ss:$16 sps:$4 sm:$0xff]   ;;  %v14765_v40 = vld [vmem:[%s16861_s15 + $0x1ce0] ss:$16 sps:$4 sm:$0xff]  }
 0x244   : > { %10466 = vmatpush2.bf16.msra.mxu0 %v14723_v52  ;;  %v14768_v52 = vld [vmem:[%s16861_s15 + $0x1ee0] ss:$16 sps:$4 sm:$0xff]  }
 0x245   : > { %10507 = vmatpush2.bf16.msra.mxu1 %v14726_v53  ;;  %10467 = vmatprep.subr.bf16.mxu0 %v14731_v38  ;;  %v17536_v53 = vrot.slane %v2096_v39, %v16928_v51  ;;  %v14773_v38 = vld [vmem:[%s16861_s15 + $0x1cc4] ss:$16 sps:$4 sm:$0xff]  }
 0x246   : > { %10508 = vmatprep.subr.bf16.mxu1 %v14734_v54  ;;  %v14776_v54 = vld [vmem:[%s16861_s15 + $0x1ec4] ss:$16 sps:$4 sm:$0xff]  }
 0x247   : > { %v14791_v39 = vld [vmem:[%s16861_s15 + $0x1c64] ss:$16 sps:$4 sm:$0xff]  }
 0x248   : > { %10468 = vmatpush2.bf16.msra.mxu0 %v14729_v58  ;;  %v14771_v58 = vld [vmem:[%s16861_s15 + $0x1cc0] ss:$16 sps:$4 sm:$0xff]  }
 0x249   : > { %10509 = vmatpush2.bf16.msra.mxu1 %v14732_v59  ;;  %10469 = vmatprep.subr.bf16.mxu0 %v14737_v47  ;;  %v14774_v59 = vld [vmem:[%s16861_s15 + $0x1ec0] ss:$16 sps:$4 sm:$0xff]   ;;  %v17548_v47 = vcombine.high %v17536_v53, %v17536_v53 }
 0x24a   : > { %10510 = vmatprep.subr.bf16.mxu1 %v14740_v1 }
 0x24c   : > { %10470 = vmatpush2.bf16.msra.mxu0 %v14735_v63 }
 0x24d   : > { %10511 = vmatpush2.bf16.msra.mxu1 %v14738_v3  ;;  %10471 = vmatprep.subr.bf16.mxu0 %v14743_v4 }
 0x24e   : > { %10512 = vmatprep.subr.bf16.mxu1 %v14746_v7 }
 0x250   : > { %10472 = vmatpush2.bf16.msra.mxu0 %v14741_v9  ;;  %v14779_v9 = vld [vmem:[%s16861_s15 + $0x1ca4] ss:$16 sps:$4 sm:$0xff]  }
 0x251   : > { %10513 = vmatpush2.bf16.msra.mxu1 %v14744_v10  ;;  %10473 = vmatprep.subr.bf16.mxu0 %v14749_v12  ;;  %v14782_v10 = vld [vmem:[%s16861_s15 + $0x1ea4] ss:$16 sps:$4 sm:$0xff]  }
 0x252   : > { %10514 = vmatprep.subr.bf16.mxu1 %v14752_v13 }
 0x254   : > { %10474 = vmatpush2.bf16.msra.mxu0 %v14747_v18  ;;  %v14780_v18 = vld [vmem:[%s16861_s15 + $0x1ea0] ss:$16 sps:$4 sm:$0xff]  }
 0x255   : > { %10515 = vmatpush2.bf16.msra.mxu1 %v14750_v23  ;;  %10475 = vmatprep.subr.bf16.mxu0 %v14755_v42 }
 0x256   : > { %10516 = vmatprep.subr.bf16.mxu1 %v14758_v29 }
 0x258   : > { %10476 = vmatpush2.bf16.msra.mxu0 %v14753_v37 }
 0x259   : > { %10517 = vmatpush2.bf16.msra.mxu1 %v14756_v31  ;;  %10477 = vmatprep.subr.bf16.mxu0 %v14761_v33  ;;  %v14788_v31 = vld [vmem:[%s16861_s15 + $0x1e84] ss:$16 sps:$4 sm:$0xff]   ;;  %v14783_v33 = vld [vmem:[%s16861_s15 + $0x1c80] ss:$16 sps:$4 sm:$0xff]  }
 0x25a   : > { %10518 = vmatprep.subr.bf16.mxu1 %v14764_v36  ;;  %v14786_v36 = vld [vmem:[%s16861_s15 + $0x1e80] ss:$16 sps:$4 sm:$0xff]  }
 0x25c   : > { %10478 = vmatpush2.bf16.msra.mxu0 %v14759_v34  ;;  %v14794_v34 = vld [vmem:[%s16861_s15 + $0x1e64] ss:$16 sps:$4 sm:$0xff]  }
 0x25d   : > { %10519 = vmatpush2.bf16.msra.mxu1 %v14762_v8  ;;  %10529 = vmatprep.subr.bf16.mxu0 %v14767_v46  ;;  %v14789_v8 = vld [vmem:[%s16861_s15 + $0x1c60] ss:$16 sps:$4 sm:$0xff]  }
 0x25e   : > { %10570 = vmatprep.subr.bf16.mxu1 %v14770_v48  ;;  %v14792_v46 = vld [vmem:[%s16861_s15 + $0x1e60] ss:$16 sps:$4 sm:$0xff]   ;;  %v14797_v48 = vld [vmem:[%s16861_s15 + $0x1c44] ss:$16 sps:$4 sm:$0xff]  }
 0x25f   : > { %v10235_v1 = vpop.f32.mrf.mxu0  ;;  %10480 = vmatmul.mubr.bf16.vlgmr.msra.gmra.mxu0 %v17527_v41 }
 0x260   : > { %v10276_v63 = vpop.f32.mrf.mxu1  ;;  %10521 = vmatmul.mubr.bf16.vlgmr.msra.gmra.mxu1 %v17540_v0  ;;  %v10236_v3 = vadd.f32 %v10235_v1, %v17459_v49  ;;  %10530 = vmatpush1.bf16.msra.mxu0 %v14765_v40  ;;  %v14800_v40 = vld [vmem:[%s16861_s15 + $0x1e44] ss:$16 sps:$4 sm:$0xff]   ;;  %v14804_v1 = vld [vmem:[%s16861_s15 + $0x1e20] ss:$16 sps:$4 sm:$0xff]  }
 0x261   : > { %10571 = vmatpush1.bf16.msra.mxu1 %v14768_v52  ;;  %v10237_v4 = vpop.f32.mrf.mxu0  ;;  %10531 = vmatprep.subr.bf16.mxu0 %v14773_v38  ;;  %v14795_v52 = vld [vmem:[%s16861_s15 + $0x1c40] ss:$16 sps:$4 sm:$0xff]  }
 0x262   : > { %v10278_v7 = vpop.f32.mrf.mxu1  ;;  %10572 = vmatprep.subr.bf16.mxu1 %v14776_v54  ;;  %v17555_v12 = vadd.f32 %v10276_v63, %v10236_v3  ;;  %v10238_v13 = vadd.f32 %v10237_v4, %v17466_v55  ;;  %10561 = vmatprep.mubr.bf16.mxu0 %v17536_v53  ;;  %v14785_v55 = vld [vmem:[%s16861_s15 + $0x1c84] ss:$16 sps:$4 sm:$0xff]   ;;  %v14798_v38 = vld [vmem:[%s16861_s15 + $0x1e40] ss:$16 sps:$4 sm:$0xff]  }
 0x263   : > { %10602 = vmatprep.mubr.bf16.mxu1 %v17548_v47  ;;  %v10239_v49 = vpop.f32.mrf.mxu0  ;;  %v14803_v54 = vld [vmem:[%s16861_s15 + $0x1c24] ss:$16 sps:$4 sm:$0xff]   ;;  %v14807_v4 = vld [vmem:[%s16861_s15 + $0x1c00] ss:$16 sps:$4 sm:$0xff]  }
 0x264   : > { %v10280_v23 = vpop.f32.mrf.mxu1  ;;  %v17562_v42 = vadd.f32 %v10278_v7, %v10238_v13  ;;  %10532 = vmatpush1.bf16.msra.mxu0 %v14771_v58  ;;  %v14806_v58 = vld [vmem:[%s16861_s15 + $0x1e24] ss:$16 sps:$4 sm:$0xff]   ;;  %v14810_v7 = vld [vmem:[%s16861_s15 + $0x1e00] ss:$16 sps:$4 sm:$0xff]  }
 0x265   : > { %10573 = vmatpush1.bf16.msra.mxu1 %v14774_v59  ;;  %v10240_v29 = vpop.f32.mrf.mxu0  ;;  %10533 = vmatprep.subr.bf16.mxu0 %v14779_v9  ;;  %v14801_v59 = vld [vmem:[%s16861_s15 + $0x1c20] ss:$16 sps:$4 sm:$0xff]   ;;  %v14809_v63 = vld [vmem:[%s16861_s15 + $0x1c04] ss:$16 sps:$4 sm:$0xff]  }
 0x266   : > { %v10281_v37 = vpop.f32.mrf.mxu1  ;;  %10574 = vmatprep.subr.bf16.mxu1 %v14782_v10  ;;  %v14812_v3 = vld [vmem:[%s16861_s15 + $0x1e04] ss:$16 sps:$4 sm:$0xff]   ;;  %v14813_v13 = vld [vmem:[%s16861_s15 + $0x1de0] ss:$16 sps:$4 sm:$0xff]  }
 0x267   : > { %v14815_v9 = vld [vmem:[%s16861_s15 + $0x1de4] ss:$16 sps:$4 sm:$0xff]   ;;  %v14819_v23 = vld [vmem:[%s16861_s15 + $0x1dc0] ss:$16 sps:$4 sm:$0xff]  }
 0x268   : > { %10534 = vmatpush1.bf16.msra.mxu0 %v14777_v17  ;;  %v14818_v10 = vld [vmem:[%s16861_s15 + $0x1fe4] ss:$16 sps:$4 sm:$0xff]   ;;  %v14816_v17 = vld [vmem:[%s16861_s15 + $0x1fe0] ss:$16 sps:$4 sm:$0xff]  }
 0x269   : > { %10575 = vmatpush1.bf16.msra.mxu1 %v14780_v18  ;;  %10535 = vmatprep.subr.bf16.mxu0 %v14785_v55  ;;  %v14821_v18 = vld [vmem:[%s16861_s15 + $0x1dc4] ss:$16 sps:$4 sm:$0xff]   ;;  %v14822_v29 = vld [vmem:[%s16861_s15 + $0x1fc0] ss:$16 sps:$4 sm:$0xff]  }
 0x26a   : > { %10576 = vmatprep.subr.bf16.mxu1 %v14788_v31  ;;  %v14824_v49 = vld [vmem:[%s16861_s15 + $0x1fc4] ss:$16 sps:$4 sm:$0xff]   ;;  %v14825_v31 = vld [vmem:[%s16861_s15 + $0x1da0] ss:$16 sps:$4 sm:$0xff]  }
 0x26b   : > { %v14827_v37 = vld [vmem:[%s16861_s15 + $0x1da4] ss:$16 sps:$4 sm:$0xff]  }
 0x26c   : > { %10536 = vmatpush1.bf16.msra.mxu0 %v14783_v33  ;;  %v14830_v55 = vld [vmem:[%s16861_s15 + $0x1fa4] ss:$16 sps:$4 sm:$0xff]   ;;  %v14828_v33 = vld [vmem:[%s16861_s15 + $0x1fa0] ss:$16 sps:$4 sm:$0xff]  }
 0x26d   : > { %10577 = vmatpush1.bf16.msra.mxu1 %v14786_v36  ;;  %10537 = vmatprep.subr.bf16.mxu0 %v14791_v39  ;;  %v14833_v36 = vld [vmem:[%s16861_s15 + $0x1d84] ss:$16 sps:$4 sm:$0xff]  }
 0x26e   : > { %10578 = vmatprep.subr.bf16.mxu1 %v14794_v34  ;;  %v14836_v39 = vld [vmem:[%s16861_s15 + $0x1f84] ss:$16 sps:$4 sm:$0xff]   ;;  %v14831_v34 = vld [vmem:[%s16861_s15 + $0x1d80] ss:$16 sps:$4 sm:$0xff]  }
 0x270   : > { %10538 = vmatpush1.bf16.msra.mxu0 %v14789_v8  ;;  %v14834_v8 = vld [vmem:[%s16861_s15 + $0x1f80] ss:$16 sps:$4 sm:$0xff]  }
 0x271   : > { %10579 = vmatpush1.bf16.msra.mxu1 %v14792_v46  ;;  %10539 = vmatprep.subr.bf16.mxu0 %v14797_v48  ;;  %v14839_v46 = vld [vmem:[%s16861_s15 + $0x1d64] ss:$16 sps:$4 sm:$0xff]  }
 0x272   : > { %10580 = vmatprep.subr.bf16.mxu1 %v14800_v40  ;;  %v14842_v48 = vld [vmem:[%s16861_s15 + $0x1f64] ss:$16 sps:$4 sm:$0xff]   ;;  %v14837_v40 = vld [vmem:[%s16861_s15 + $0x1d60] ss:$16 sps:$4 sm:$0xff]  }
 0x274   : > { %10540 = vmatpush1.bf16.msra.mxu0 %v14795_v52  ;;  %v14840_v52 = vld [vmem:[%s16861_s15 + $0x1f60] ss:$16 sps:$4 sm:$0xff]  }
 0x275   : > { %10581 = vmatpush1.bf16.msra.mxu1 %v14798_v38  ;;  %10541 = vmatprep.subr.bf16.mxu0 %v14803_v54  ;;  %v14845_v38 = vld [vmem:[%s16861_s15 + $0x1d44] ss:$16 sps:$4 sm:$0xff]  }
 0x276   : > { %10582 = vmatprep.subr.bf16.mxu1 %v14806_v58  ;;  %v14848_v54 = vld [vmem:[%s16861_s15 + $0x1f44] ss:$16 sps:$4 sm:$0xff]  }
 0x277   : > { %v17607_v58 = vld [vmem:[%s16854_s26 + $0x20] sm:$0xff] }
 0x278   : > { %10542 = vmatpush1.bf16.msra.mxu0 %v14801_v59  ;;  %v14843_v59 = vld [vmem:[%s16861_s15 + $0x1d40] ss:$16 sps:$4 sm:$0xff]  }
 0x279   : > { %10583 = vmatpush1.bf16.msra.mxu1 %v14804_v1  ;;  %10543 = vmatprep.subr.bf16.mxu0 %v14809_v63  ;;  %v14846_v1 = vld [vmem:[%s16861_s15 + $0x1f40] ss:$16 sps:$4 sm:$0xff]   ;;  %v14851_v63 = vld [vmem:[%s16861_s15 + $0x1d24] ss:$16 sps:$4 sm:$0xff]  }
 0x27a   : > { %10584 = vmatprep.subr.bf16.mxu1 %v14812_v3  ;;  %v14854_v3 = vld [vmem:[%s16861_s15 + $0x1f24] ss:$16 sps:$4 sm:$0xff]  }
 0x27c   : > { %10544 = vmatpush1.bf16.msra.mxu0 %v14807_v4  ;;  %v17615_v4 = vrot.slane %v17607_v58, %v16928_v51 }
 0x27d   : > { %10585 = vmatpush1.bf16.msra.mxu1 %v14810_v7  ;;  %10545 = vmatprep.subr.bf16.mxu0 %v14815_v9  ;;  %v14849_v7 = vld [vmem:[%s16861_s15 + $0x1d20] ss:$16 sps:$4 sm:$0xff]  }
 0x27e   : > { %10586 = vmatprep.subr.bf16.mxu1 %v14818_v10  ;;  %v14852_v9 = vld [vmem:[%s16861_s15 + $0x1f20] ss:$16 sps:$4 sm:$0xff]   ;;  %v14857_v10 = vld [vmem:[%s16861_s15 + $0x1d04] ss:$16 sps:$4 sm:$0xff]  }
 0x280   : > { %10546 = vmatpush2.bf16.msra.mxu0 %v14813_v13  ;;  %v14860_v13 = vld [vmem:[%s16861_s15 + $0x1f04] ss:$16 sps:$4 sm:$0xff]  }
 0x281   : > { %10587 = vmatpush2.bf16.msra.mxu1 %v14816_v17  ;;  %10547 = vmatprep.subr.bf16.mxu0 %v14821_v18  ;;  %v2144_v17 = vcombine.high %v17615_v4, %v17615_v4  ;;  %v17625_v18 = vrot.slane %v17517_v30, %v16928_v51 }
 0x282   : > { %10588 = vmatprep.subr.bf16.mxu1 %v14824_v49  ;;  %v14855_v49 = vld [vmem:[%s16861_s15 + $0x1d00] ss:$16 sps:$4 sm:$0xff]  }
 0x283   : > { %v17638_v30 = vcombine.high %v17625_v18, %v17625_v18 }
 0x284   : > { %10548 = vmatpush2.bf16.msra.mxu0 %v14819_v23  ;;  %v14858_v23 = vld [vmem:[%s16861_s15 + $0x1f00] ss:$16 sps:$4 sm:$0xff]  }
 0x285   : > { %10589 = vmatpush2.bf16.msra.mxu1 %v14822_v29  ;;  %10549 = vmatprep.subr.bf16.mxu0 %v14827_v37  ;;  %v14864_v29 = vld [vmem:[%s16861_s15 + $0x20e4] ss:$16 sps:$4 sm:$0xff]  }
 0x286   : > { %10590 = vmatprep.subr.bf16.mxu1 %v14830_v55  ;;  %v14867_v37 = vld [vmem:[%s16861_s15 + $0x22e4] ss:$16 sps:$4 sm:$0xff]   ;;  %v14862_v55 = vld [vmem:[%s16861_s15 + $0x20e0] ss:$16 sps:$4 sm:$0xff]  }
 0x288   : > { %10550 = vmatpush2.bf16.msra.mxu0 %v14825_v31  ;;  %v14865_v31 = vld [vmem:[%s16861_s15 + $0x22e0] ss:$16 sps:$4 sm:$0xff]  }
 0x289   : > { %10591 = vmatpush2.bf16.msra.mxu1 %v14828_v33  ;;  %10551 = vmatprep.subr.bf16.mxu0 %v14833_v36  ;;  %v17634_v33 = vrot.slane %v2144_v17, %v16928_v51  ;;  %v14870_v36 = vld [vmem:[%s16861_s15 + $0x20c4] ss:$16 sps:$4 sm:$0xff]  }
 0x28a   : > { %10592 = vmatprep.subr.bf16.mxu1 %v14836_v39  ;;  %v14873_v39 = vld [vmem:[%s16861_s15 + $0x22c4] ss:$16 sps:$4 sm:$0xff]  }
 0x28c   : > { %10552 = vmatpush2.bf16.msra.mxu0 %v14831_v34  ;;  %v14868_v34 = vld [vmem:[%s16861_s15 + $0x20c0] ss:$16 sps:$4 sm:$0xff]  }
 0x28d   : > { %10593 = vmatpush2.bf16.msra.mxu1 %v14834_v8  ;;  %10553 = vmatprep.subr.bf16.mxu0 %v14839_v46  ;;  %v14871_v8 = vld [vmem:[%s16861_s15 + $0x22c0] ss:$16 sps:$4 sm:$0xff]   ;;  %v17646_v46 = vcombine.high %v17634_v33, %v17634_v33 }
 0x28e   : > { %10594 = vmatprep.subr.bf16.mxu1 %v14842_v48 }
 0x290   : > { %10554 = vmatpush2.bf16.msra.mxu0 %v14837_v40 }
 0x291   : > { %10595 = vmatpush2.bf16.msra.mxu1 %v14840_v52  ;;  %10555 = vmatprep.subr.bf16.mxu0 %v14845_v38 }
 0x292   : > { %10596 = vmatprep.subr.bf16.mxu1 %v14848_v54 }
 0x294   : > { %10556 = vmatpush2.bf16.msra.mxu0 %v14843_v59  ;;  %v14876_v59 = vld [vmem:[%s16861_s15 + $0x20a4] ss:$16 sps:$4 sm:$0xff]  }
 0x295   : > { %10597 = vmatpush2.bf16.msra.mxu1 %v14846_v1  ;;  %10557 = vmatprep.subr.bf16.mxu0 %v14851_v63  ;;  %v14879_v1 = vld [vmem:[%s16861_s15 + $0x22a4] ss:$16 sps:$4 sm:$0xff]  }
 0x296   : > { %10598 = vmatprep.subr.bf16.mxu1 %v14854_v3 }
 0x298   : > { %10558 = vmatpush2.bf16.msra.mxu0 %v14849_v7  ;;  %v14874_v7 = vld [vmem:[%s16861_s15 + $0x20a0] ss:$16 sps:$4 sm:$0xff]  }
 0x299   : > { %10599 = vmatpush2.bf16.msra.mxu1 %v14852_v9  ;;  %10559 = vmatprep.subr.bf16.mxu0 %v14857_v10  ;;  %v14877_v9 = vld [vmem:[%s16861_s15 + $0x22a0] ss:$16 sps:$4 sm:$0xff]  }
 0x29a   : > { %10600 = vmatprep.subr.bf16.mxu1 %v14860_v13 }
 0x29c   : > { %10560 = vmatpush2.bf16.msra.mxu0 %v14855_v49 }
 0x29d   : > { %10601 = vmatpush2.bf16.msra.mxu1 %v14858_v23  ;;  %10611 = vmatprep.subr.bf16.mxu0 %v14864_v29  ;;  %v14885_v23 = vld [vmem:[%s16861_s15 + $0x2284] ss:$16 sps:$4 sm:$0xff]   ;;  %v14880_v29 = vld [vmem:[%s16861_s15 + $0x2080] ss:$16 sps:$4 sm:$0xff]  }
 0x29e   : > { %10652 = vmatprep.subr.bf16.mxu1 %v14867_v37  ;;  %v14883_v37 = vld [vmem:[%s16861_s15 + $0x2280] ss:$16 sps:$4 sm:$0xff]  }
 0x29f   : > { %v10317_v48 = vpop.f32.mrf.mxu0  ;;  %10562 = vmatmul.mubr.bf16.vlgmr.msra.gmra.mxu0 %v17625_v18 }
 0x2a0   : > { %v10358_v40 = vpop.f32.mrf.mxu1  ;;  %10603 = vmatmul.mubr.bf16.vlgmr.msra.gmra.mxu1 %v17638_v30  ;;  %v10318_v52 = vadd.f32 %v10317_v48, %v17555_v12  ;;  %10612 = vmatpush1.bf16.msra.mxu0 %v14862_v55  ;;  %v14888_v55 = vld [vmem:[%s16861_s15 + $0x2064] ss:$16 sps:$4 sm:$0xff]   ;;  %v14892_v48 = vld [vmem:[%s16861_s15 + $0x2040] ss:$16 sps:$4 sm:$0xff]  }
 0x2a1   : > { %10653 = vmatpush1.bf16.msra.mxu1 %v14865_v31  ;;  %v10319_v38 = vpop.f32.mrf.mxu0  ;;  %10613 = vmatprep.subr.bf16.mxu0 %v14870_v36  ;;  %v14891_v31 = vld [vmem:[%s16861_s15 + $0x2264] ss:$16 sps:$4 sm:$0xff]   ;;  %v14886_v36 = vld [vmem:[%s16861_s15 + $0x2060] ss:$16 sps:$4 sm:$0xff]  }
 0x2a2   : > { %v10360_v54 = vpop.f32.mrf.mxu1  ;;  %10654 = vmatprep.subr.bf16.mxu1 %v14873_v39  ;;  %v17653_v63 = vadd.f32 %v10358_v40, %v10318_v52  ;;  %v10320_v3 = vadd.f32 %v10319_v38, %v17562_v42  ;;  %10643 = vmatprep.mubr.bf16.mxu0 %v17634_v33  ;;  %v14882_v42 = vld [vmem:[%s16861_s15 + $0x2084] ss:$16 sps:$4 sm:$0xff]   ;;  %v14889_v39 = vld [vmem:[%s16861_s15 + $0x2260] ss:$16 sps:$4 sm:$0xff]  }
 0x2a3   : > { %10684 = vmatprep.mubr.bf16.mxu1 %v17646_v46  ;;  %v10321_v12 = vpop.f32.mrf.mxu0  ;;  %v14895_v40 = vld [vmem:[%s16861_s15 + $0x2240] ss:$16 sps:$4 sm:$0xff]   ;;  %v14900_v52 = vld [vmem:[%s16861_s15 + $0x2024] ss:$16 sps:$4 sm:$0xff]  }
 0x2a4   : > { %v10362_v10 = vpop.f32.mrf.mxu1  ;;  %v17660_v13 = vadd.f32 %v10360_v54, %v10320_v3  ;;  %10614 = vmatpush1.bf16.msra.mxu0 %v14868_v34  ;;  %v14894_v34 = vld [vmem:[%s16861_s15 + $0x2044] ss:$16 sps:$4 sm:$0xff]   ;;  %v14898_v54 = vld [vmem:[%s16861_s15 + $0x2020] ss:$16 sps:$4 sm:$0xff]  }
 0x2a5   : > { %10655 = vmatpush1.bf16.msra.mxu1 %v14871_v8  ;;  %v10322_v17 = vpop.f32.mrf.mxu0  ;;  %10615 = vmatprep.subr.bf16.mxu0 %v14876_v59  ;;  %v14897_v8 = vld [vmem:[%s16861_s15 + $0x2244] ss:$16 sps:$4 sm:$0xff]   ;;  %v14901_v59 = vld [vmem:[%s16861_s15 + $0x2220] ss:$16 sps:$4 sm:$0xff]  }
 0x2a6   : > { %v10363_v49 = vpop.f32.mrf.mxu1  ;;  %10656 = vmatprep.subr.bf16.mxu1 %v14879_v1  ;;  %v14903_v38 = vld [vmem:[%s16861_s15 + $0x2224] ss:$16 sps:$4 sm:$0xff]   ;;  %v14910_v17 = vld [vmem:[%s16861_s15 + $0x21e0] ss:$16 sps:$4 sm:$0xff]  }
 0x2a7   : > { %v14906_v1 = vld [vmem:[%s16861_s15 + $0x2004] ss:$16 sps:$4 sm:$0xff]   ;;  %v14913_v49 = vld [vmem:[%s16861_s15 + $0x23e0] ss:$16 sps:$4 sm:$0xff]  }
 0x2a8   : > { %10616 = vmatpush1.bf16.msra.mxu0 %v14874_v7  ;;  %v14909_v3 = vld [vmem:[%s16861_s15 + $0x2204] ss:$16 sps:$4 sm:$0xff]   ;;  %v14904_v7 = vld [vmem:[%s16861_s15 + $0x2000] ss:$16 sps:$4 sm:$0xff]  }
 0x2a9   : > { %10657 = vmatpush1.bf16.msra.mxu1 %v14877_v9  ;;  %10617 = vmatprep.subr.bf16.mxu0 %v14882_v42  ;;  %v14907_v9 = vld [vmem:[%s16861_s15 + $0x2200] ss:$16 sps:$4 sm:$0xff]   ;;  %v14912_v12 = vld [vmem:[%s16861_s15 + $0x21e4] ss:$16 sps:$4 sm:$0xff]  }
 0x2aa   : > { %10658 = vmatprep.subr.bf16.mxu1 %v14885_v23  ;;  %v14915_v10 = vld [vmem:[%s16861_s15 + $0x23e4] ss:$16 sps:$4 sm:$0xff]  }
 0x2ab   : > { %v14918_v42 = vld [vmem:[%s16861_s15 + $0x21c4] ss:$16 sps:$4 sm:$0xff]  }
 0x2ac   : > { %10618 = vmatpush1.bf16.msra.mxu0 %v14880_v29  ;;  %v14921_v23 = vld [vmem:[%s16861_s15 + $0x23c4] ss:$16 sps:$4 sm:$0xff]   ;;  %v14916_v29 = vld [vmem:[%s16861_s15 + $0x21c0] ss:$16 sps:$4 sm:$0xff]  }
 0x2ad   : > { %10659 = vmatpush1.bf16.msra.mxu1 %v14883_v37  ;;  %10619 = vmatprep.subr.bf16.mxu0 %v14888_v55  ;;  %v14919_v37 = vld [vmem:[%s16861_s15 + $0x23c0] ss:$16 sps:$4 sm:$0xff]   ;;  %v14924_v55 = vld [vmem:[%s16861_s15 + $0x21a4] ss:$16 sps:$4 sm:$0xff]  }
 0x2ae   : > { %10660 = vmatprep.subr.bf16.mxu1 %v14891_v31  ;;  %v14927_v31 = vld [vmem:[%s16861_s15 + $0x23a4] ss:$16 sps:$4 sm:$0xff]  }
 0x2b0   : > { %10620 = vmatpush1.bf16.msra.mxu0 %v14886_v36  ;;  %v14922_v36 = vld [vmem:[%s16861_s15 + $0x21a0] ss:$16 sps:$4 sm:$0xff]  }
 0x2b1   : > { %10661 = vmatpush1.bf16.msra.mxu1 %v14889_v39  ;;  %10621 = vmatprep.subr.bf16.mxu0 %v14894_v34  ;;  %v14925_v39 = vld [vmem:[%s16861_s15 + $0x23a0] ss:$16 sps:$4 sm:$0xff]   ;;  %v14930_v34 = vld [vmem:[%s16861_s15 + $0x2184] ss:$16 sps:$4 sm:$0xff]  }
 0x2b2   : > { %10662 = vmatprep.subr.bf16.mxu1 %v14897_v8  ;;  %v14933_v8 = vld [vmem:[%s16861_s15 + $0x2384] ss:$16 sps:$4 sm:$0xff]  }
 0x2b4   : > { %10622 = vmatpush1.bf16.msra.mxu0 %v14892_v48  ;;  %v14928_v48 = vld [vmem:[%s16861_s15 + $0x2180] ss:$16 sps:$4 sm:$0xff]  }
 0x2b5   : > { %10663 = vmatpush1.bf16.msra.mxu1 %v14895_v40  ;;  %10623 = vmatprep.subr.bf16.mxu0 %v14900_v52  ;;  %v14931_v40 = vld [vmem:[%s16861_s15 + $0x2380] ss:$16 sps:$4 sm:$0xff]   ;;  %v14936_v52 = vld [vmem:[%s16861_s15 + $0x2164] ss:$16 sps:$4 sm:$0xff]  }
 0x2b6   : > { %10664 = vmatprep.subr.bf16.mxu1 %v14903_v38  ;;  %v14939_v38 = vld [vmem:[%s16861_s15 + $0x2364] ss:$16 sps:$4 sm:$0xff]  }
 0x2b8   : > { %10624 = vmatpush1.bf16.msra.mxu0 %v14898_v54  ;;  %v14934_v54 = vld [vmem:[%s16861_s15 + $0x2160] ss:$16 sps:$4 sm:$0xff]  }
 0x2b9   : > { %10665 = vmatpush1.bf16.msra.mxu1 %v14901_v59  ;;  %10625 = vmatprep.subr.bf16.mxu0 %v14906_v1  ;;  %v14937_v59 = vld [vmem:[%s16861_s15 + $0x2360] ss:$16 sps:$4 sm:$0xff]   ;;  %v14942_v1 = vld [vmem:[%s16861_s15 + $0x2144] ss:$16 sps:$4 sm:$0xff]  }
 0x2ba   : > { %10666 = vmatprep.subr.bf16.mxu1 %v14909_v3  ;;  %v14945_v3 = vld [vmem:[%s16861_s15 + $0x2344] ss:$16 sps:$4 sm:$0xff]  }
 0x2bc   : > { %10626 = vmatpush1.bf16.msra.mxu0 %v14904_v7  ;;  %v2129_v7 = vcombine.high %v17607_v58, %v17607_v58  ;;  %v14946_v58 = vld [vmem:[%s16861_s15 + $0x2120] ss:$16 sps:$4 sm:$0xff]  }
 0x2bd   : > { %10667 = vmatpush1.bf16.msra.mxu1 %v14907_v9  ;;  %10627 = vmatprep.subr.bf16.mxu0 %v14912_v12  ;;  %v14940_v9 = vld [vmem:[%s16861_s15 + $0x2140] ss:$16 sps:$4 sm:$0xff]  }
 0x2be   : > { %10668 = vmatprep.subr.bf16.mxu1 %v14915_v10  ;;  %v14943_v12 = vld [vmem:[%s16861_s15 + $0x2340] ss:$16 sps:$4 sm:$0xff]   ;;  %v14948_v10 = vld [vmem:[%s16861_s15 + $0x2124] ss:$16 sps:$4 sm:$0xff]  }
 0x2c0   : > { %10628 = vmatpush2.bf16.msra.mxu0 %v14910_v17  ;;  %v14951_v17 = vld [vmem:[%s16861_s15 + $0x2324] ss:$16 sps:$4 sm:$0xff]  }
 0x2c1   : > { %10669 = vmatpush2.bf16.msra.mxu1 %v14913_v49  ;;  %10629 = vmatprep.subr.bf16.mxu0 %v14918_v42  ;;  %v17711_v49 = vrot.slane %v2129_v7, %v16928_v51  ;;  %v14949_v42 = vld [vmem:[%s16861_s15 + $0x2320] ss:$16 sps:$4 sm:$0xff]  }
 0x2c2   : > { %10670 = vmatprep.subr.bf16.mxu1 %v14921_v23  ;;  %v14954_v23 = vld [vmem:[%s16861_s15 + $0x2104] ss:$16 sps:$4 sm:$0xff]  }
 0x2c4   : > { %10630 = vmatpush2.bf16.msra.mxu0 %v14916_v29  ;;  %v14957_v29 = vld [vmem:[%s16861_s15 + $0x2304] ss:$16 sps:$4 sm:$0xff]  }
 0x2c5   : > { %10671 = vmatpush2.bf16.msra.mxu1 %v14919_v37  ;;  %10631 = vmatprep.subr.bf16.mxu0 %v14924_v55  ;;  %v2145_v37 = vcombine.high %v17711_v49, %v17711_v49  ;;  %v17721_v55 = vrot.slane %v17615_v4, %v16928_v51 }
 0x2c6   : > { %10672 = vmatprep.subr.bf16.mxu1 %v14927_v31  ;;  %v14952_v31 = vld [vmem:[%s16861_s15 + $0x2100] ss:$16 sps:$4 sm:$0xff]  }
 0x2c7   : > { %v17734_v4 = vcombine.high %v17721_v55, %v17721_v55 }
 0x2c8   : > { %10632 = vmatpush2.bf16.msra.mxu0 %v14922_v36  ;;  %v14955_v36 = vld [vmem:[%s16861_s15 + $0x2300] ss:$16 sps:$4 sm:$0xff]  }
 0x2c9   : > { %10673 = vmatpush2.bf16.msra.mxu1 %v14925_v39  ;;  %10633 = vmatprep.subr.bf16.mxu0 %v14930_v34  ;;  %v14960_v39 = vld [vmem:[%s16861_s15 + $0x24e4] ss:$16 sps:$4 sm:$0xff]  }
 0x2ca   : > { %10674 = vmatprep.subr.bf16.mxu1 %v14933_v8  ;;  %v14963_v34 = vld [vmem:[%s16861_s15 + $0x26e4] ss:$16 sps:$4 sm:$0xff]   ;;  %v14958_v8 = vld [vmem:[%s16861_s15 + $0x24e0] ss:$16 sps:$4 sm:$0xff]  }
 0x2cc   : > { %10634 = vmatpush2.bf16.msra.mxu0 %v14928_v48  ;;  %v14961_v48 = vld [vmem:[%s16861_s15 + $0x26e0] ss:$16 sps:$4 sm:$0xff]  }
 0x2cd   : > { %10675 = vmatpush2.bf16.msra.mxu1 %v14931_v40  ;;  %10635 = vmatprep.subr.bf16.mxu0 %v14936_v52  ;;  %v17730_v40 = vrot.slane %v2145_v37, %v16928_v51  ;;  %v14966_v52 = vld [vmem:[%s16861_s15 + $0x24c4] ss:$16 sps:$4 sm:$0xff]   ;;  %v14973_v37 = vld [vmem:[%s16861_s15 + $0x26a0] ss:$16 sps:$4 sm:$0xff]  }
 0x2ce   : > { %10676 = vmatprep.subr.bf16.mxu1 %v14939_v38  ;;  %v14969_v38 = vld [vmem:[%s16861_s15 + $0x26c4] ss:$16 sps:$4 sm:$0xff]  }
 0x2d0   : > { %10636 = vmatpush2.bf16.msra.mxu0 %v14934_v54  ;;  %v14964_v54 = vld [vmem:[%s16861_s15 + $0x24c0] ss:$16 sps:$4 sm:$0xff]  }
 0x2d1   : > { %10677 = vmatpush2.bf16.msra.mxu1 %v14937_v59  ;;  %10637 = vmatprep.subr.bf16.mxu0 %v14942_v1  ;;  %v14967_v59 = vld [vmem:[%s16861_s15 + $0x26c0] ss:$16 sps:$4 sm:$0xff]   ;;  %v17742_v1 = vcombine.high %v17730_v40, %v17730_v40 }
 0x2d2   : > { %10678 = vmatprep.subr.bf16.mxu1 %v14945_v3 }
 0x2d4   : > { %10638 = vmatpush2.bf16.msra.mxu0 %v14940_v9 }
 0x2d5   : > { %10679 = vmatpush2.bf16.msra.mxu1 %v14943_v12  ;;  %10639 = vmatprep.subr.bf16.mxu0 %v14948_v10 }
 0x2d6   : > { %10680 = vmatprep.subr.bf16.mxu1 %v14951_v17  ;;  %v14972_v17 = vld [vmem:[%s16861_s15 + $0x24a4] ss:$16 sps:$4 sm:$0xff]  }
 0x2d8   : > { %10640 = vmatpush2.bf16.msra.mxu0 %v14946_v58  ;;  %v14975_v58 = vld [vmem:[%s16861_s15 + $0x26a4] ss:$16 sps:$4 sm:$0xff]  }
 0x2d9   : > { %10681 = vmatpush2.bf16.msra.mxu1 %v14949_v42  ;;  %10641 = vmatprep.subr.bf16.mxu0 %v14954_v23 }
 0x2da   : > { %10682 = vmatprep.subr.bf16.mxu1 %v14957_v29  ;;  %v14970_v29 = vld [vmem:[%s16861_s15 + $0x24a0] ss:$16 sps:$4 sm:$0xff]  }
 0x2dc   : > { %10642 = vmatpush2.bf16.msra.mxu0 %v14952_v31 }
 0x2dd   : > { %10683 = vmatpush2.bf16.msra.mxu1 %v14955_v36  ;;  %10693 = vmatprep.subr.bf16.mxu0 %v14960_v39 }
 0x2de   : > { %10734 = vmatprep.subr.bf16.mxu1 %v14963_v34 }
 0x2df   : > { %v10399_v3 = vpop.f32.mrf.mxu0  ;;  %10644 = vmatmul.mubr.bf16.vlgmr.msra.gmra.mxu0 %v17721_v55 }
 0x2e0   : > { %v10440_v7 = vpop.f32.mrf.mxu1  ;;  %10685 = vmatmul.mubr.bf16.vlgmr.msra.gmra.mxu1 %v17734_v4  ;;  %v10400_v9 = vadd.f32 %v10399_v3, %v17653_v63  ;;  %10694 = vmatpush1.bf16.msra.mxu0 %v14958_v8  ;;  %v14981_v8 = vld [vmem:[%s16861_s15 + $0x2684] ss:$16 sps:$4 sm:$0xff]   ;;  %v14985_v3 = vld [vmem:[%s16861_s15 + $0x2660] ss:$16 sps:$4 sm:$0xff]  }
 0x2e1   : > { %10735 = vmatpush1.bf16.msra.mxu1 %v14961_v48  ;;  %v10401_v12 = vpop.f32.mrf.mxu0  ;;  %10695 = vmatprep.subr.bf16.mxu0 %v14966_v52  ;;  %v14976_v48 = vld [vmem:[%s16861_s15 + $0x2480] ss:$16 sps:$4 sm:$0xff]  }
 0x2e2   : > { %v10442_v10 = vpop.f32.mrf.mxu1  ;;  %10736 = vmatprep.subr.bf16.mxu1 %v14969_v38  ;;  %v17749_v42 = vadd.f32 %v10440_v7, %v10400_v9  ;;  %v10402_v23 = vadd.f32 %v10401_v12, %v17660_v13  ;;  %10725 = vmatprep.mubr.bf16.mxu0 %v17730_v40  ;;  %v14978_v13 = vld [vmem:[%s16861_s15 + $0x2484] ss:$16 sps:$4 sm:$0xff]   ;;  %v14979_v52 = vld [vmem:[%s16861_s15 + $0x2680] ss:$16 sps:$4 sm:$0xff]  }
 0x2e3   : > { %10766 = vmatprep.mubr.bf16.mxu1 %v17742_v1  ;;  %v10403_v63 = vpop.f32.mrf.mxu0  ;;  %v14984_v38 = vld [vmem:[%s16861_s15 + $0x2464] ss:$16 sps:$4 sm:$0xff]   ;;  %v14988_v12 = vld [vmem:[%s16861_s15 + $0x2440] ss:$16 sps:$4 sm:$0xff]  }
 0x2e4   : > { %v10444_v31 = vpop.f32.mrf.mxu1  ;;  %v17756_v36 = vadd.f32 %v10442_v10, %v10402_v23  ;;  %10696 = vmatpush1.bf16.msra.mxu0 %v14964_v54  ;;  %v14987_v54 = vld [vmem:[%s16861_s15 + $0x2664] ss:$16 sps:$4 sm:$0xff]   ;;  %v14991_v10 = vld [vmem:[%s16861_s15 + $0x2640] ss:$16 sps:$4 sm:$0xff]  }
 0x2e5   : > { %10737 = vmatpush1.bf16.msra.mxu1 %v14967_v59  ;;  %v10404_v39 = vpop.f32.mrf.mxu0  ;;  %10697 = vmatprep.subr.bf16.mxu0 %v14972_v17  ;;  %v14982_v59 = vld [vmem:[%s16861_s15 + $0x2460] ss:$16 sps:$4 sm:$0xff]   ;;  %v14990_v7 = vld [vmem:[%s16861_s15 + $0x2444] ss:$16 sps:$4 sm:$0xff]  }
 0x2e6   : > { %v10445_v34 = vpop.f32.mrf.mxu1  ;;  %10738 = vmatprep.subr.bf16.mxu1 %v14975_v58  ;;  %v14993_v9 = vld [vmem:[%s16861_s15 + $0x2644] ss:$16 sps:$4 sm:$0xff]   ;;  %v14994_v23 = vld [vmem:[%s16861_s15 + $0x2420] ss:$16 sps:$4 sm:$0xff]  }
 0x2e7   : > { %v14996_v17 = vld [vmem:[%s16861_s15 + $0x2424] ss:$16 sps:$4 sm:$0xff]   ;;  %v15000_v31 = vld [vmem:[%s16861_s15 + $0x2400] ss:$16 sps:$4 sm:$0xff]  }
 0x2e8   : > { %10698 = vmatpush1.bf16.msra.mxu0 %v14970_v29  ;;  %v14999_v58 = vld [vmem:[%s16861_s15 + $0x2624] ss:$16 sps:$4 sm:$0xff]   ;;  %v14997_v29 = vld [vmem:[%s16861_s15 + $0x2620] ss:$16 sps:$4 sm:$0xff]  }
 0x2e9   : > { %10739 = vmatpush1.bf16.msra.mxu1 %v14973_v37  ;;  %10699 = vmatprep.subr.bf16.mxu0 %v14978_v13  ;;  %v15002_v37 = vld [vmem:[%s16861_s15 + $0x2404] ss:$16 sps:$4 sm:$0xff]   ;;  %v15003_v39 = vld [vmem:[%s16861_s15 + $0x2600] ss:$16 sps:$4 sm:$0xff]  }
 0x2ea   : > { %10740 = vmatprep.subr.bf16.mxu1 %v14981_v8  ;;  %v15005_v63 = vld [vmem:[%s16861_s15 + $0x2604] ss:$16 sps:$4 sm:$0xff]   ;;  %v15006_v8 = vld [vmem:[%s16861_s15 + $0x25e0] ss:$16 sps:$4 sm:$0xff]  }
 0x2eb   : > { %v15008_v34 = vld [vmem:[%s16861_s15 + $0x25e4] ss:$16 sps:$4 sm:$0xff]  }
 0x2ec   : > { %10700 = vmatpush1.bf16.msra.mxu0 %v14976_v48  ;;  %v15011_v13 = vld [vmem:[%s16861_s15 + $0x27e4] ss:$16 sps:$4 sm:$0xff]   ;;  %v15009_v48 = vld [vmem:[%s16861_s15 + $0x27e0] ss:$16 sps:$4 sm:$0xff]  }
 0x2ed   : > { %10741 = vmatpush1.bf16.msra.mxu1 %v14979_v52  ;;  %10701 = vmatprep.subr.bf16.mxu0 %v14984_v38  ;;  %v15014_v52 = vld [vmem:[%s16861_s15 + $0x25c4] ss:$16 sps:$4 sm:$0xff]  }
 0x2ee   : > { %10742 = vmatprep.subr.bf16.mxu1 %v14987_v54  ;;  %v15017_v38 = vld [vmem:[%s16861_s15 + $0x27c4] ss:$16 sps:$4 sm:$0xff]   ;;  %v15012_v54 = vld [vmem:[%s16861_s15 + $0x25c0] ss:$16 sps:$4 sm:$0xff]  }
 0x2f0   : > { %10702 = vmatpush1.bf16.msra.mxu0 %v14982_v59  ;;  %v15015_v59 = vld [vmem:[%s16861_s15 + $0x27c0] ss:$16 sps:$4 sm:$0xff]  }
 0x2f1   : > { %10743 = vmatpush1.bf16.msra.mxu1 %v14985_v3  ;;  %10703 = vmatprep.subr.bf16.mxu0 %v14990_v7  ;;  %v15020_v3 = vld [vmem:[%s16861_s15 + $0x25a4] ss:$16 sps:$4 sm:$0xff]  }
 0x2f2   : > { %10744 = vmatprep.subr.bf16.mxu1 %v14993_v9  ;;  %v15023_v7 = vld [vmem:[%s16861_s15 + $0x27a4] ss:$16 sps:$4 sm:$0xff]   ;;  %v15018_v9 = vld [vmem:[%s16861_s15 + $0x25a0] ss:$16 sps:$4 sm:$0xff]  }
 0x2f4   : > { %10704 = vmatpush1.bf16.msra.mxu0 %v14988_v12  ;;  %v15021_v12 = vld [vmem:[%s16861_s15 + $0x27a0] ss:$16 sps:$4 sm:$0xff]  }
 0x2f5   : > { %10745 = vmatpush1.bf16.msra.mxu1 %v14991_v10  ;;  %10705 = vmatprep.subr.bf16.mxu0 %v14996_v17  ;;  %v15026_v10 = vld [vmem:[%s16861_s15 + $0x2584] ss:$16 sps:$4 sm:$0xff]  }
 0x2f6   : > { %10746 = vmatprep.subr.bf16.mxu1 %v14999_v58  ;;  %v15029_v17 = vld [vmem:[%s16861_s15 + $0x2784] ss:$16 sps:$4 sm:$0xff]   ;;  %v15024_v58 = vld [vmem:[%s16861_s15 + $0x2580] ss:$16 sps:$4 sm:$0xff]  }
 0x2f8   : > { %10706 = vmatpush1.bf16.msra.mxu0 %v14994_v23  ;;  %v15027_v23 = vld [vmem:[%s16861_s15 + $0x2780] ss:$16 sps:$4 sm:$0xff]  }
 0x2f9   : > { %10747 = vmatpush1.bf16.msra.mxu1 %v14997_v29  ;;  %10707 = vmatprep.subr.bf16.mxu0 %v15002_v37  ;;  %v15032_v29 = vld [vmem:[%s16861_s15 + $0x2564] ss:$16 sps:$4 sm:$0xff]  }
 0x2fa   : > { %10748 = vmatprep.subr.bf16.mxu1 %v15005_v63  ;;  %v15035_v37 = vld [vmem:[%s16861_s15 + $0x2764] ss:$16 sps:$4 sm:$0xff]   ;;  %v15030_v63 = vld [vmem:[%s16861_s15 + $0x2560] ss:$16 sps:$4 sm:$0xff]  }
 0x2fc   : > { %10708 = vmatpush1.bf16.msra.mxu0 %v15000_v31  ;;  %v15033_v31 = vld [vmem:[%s16861_s15 + $0x2760] ss:$16 sps:$4 sm:$0xff]  }
 0x2fd   : > { %10749 = vmatpush1.bf16.msra.mxu1 %v15003_v39  ;;  %10709 = vmatprep.subr.bf16.mxu0 %v15008_v34  ;;  %v15038_v39 = vld [vmem:[%s16861_s15 + $0x2544] ss:$16 sps:$4 sm:$0xff]  }
 0x2fe   : > { %10750 = vmatprep.subr.bf16.mxu1 %v15011_v13  ;;  %v15041_v34 = vld [vmem:[%s16861_s15 + $0x2744] ss:$16 sps:$4 sm:$0xff]   ;;  %v17801_v13 = vld [vmem:[%s16854_s26 + $0x28] sm:$0xff] }
 0x300   : > { %10710 = vmatpush2.bf16.msra.mxu0 %v15006_v8  ;;  %v15036_v8 = vld [vmem:[%s16861_s15 + $0x2540] ss:$16 sps:$4 sm:$0xff]  }
 0x301   : > { %10751 = vmatpush2.bf16.msra.mxu1 %v15009_v48  ;;  %10711 = vmatprep.subr.bf16.mxu0 %v15014_v52  ;;  %v15039_v48 = vld [vmem:[%s16861_s15 + $0x2740] ss:$16 sps:$4 sm:$0xff]   ;;  %v15044_v52 = vld [vmem:[%s16861_s15 + $0x2524] ss:$16 sps:$4 sm:$0xff]  }
 0x302   : > { %10752 = vmatprep.subr.bf16.mxu1 %v15017_v38  ;;  %v15047_v38 = vld [vmem:[%s16861_s15 + $0x2724] ss:$16 sps:$4 sm:$0xff]  }
 0x304   : > { %10712 = vmatpush2.bf16.msra.mxu0 %v15012_v54  ;;  %v17809_v54 = vrot.slane %v17801_v13, %v16928_v51 }
 0x305   : > { %10753 = vmatpush2.bf16.msra.mxu1 %v15015_v59  ;;  %10713 = vmatprep.subr.bf16.mxu0 %v15020_v3  ;;  %v15042_v59 = vld [vmem:[%s16861_s15 + $0x2520] ss:$16 sps:$4 sm:$0xff]  }
 0x306   : > { %10754 = vmatprep.subr.bf16.mxu1 %v15023_v7  ;;  %v15045_v3 = vld [vmem:[%s16861_s15 + $0x2720] ss:$16 sps:$4 sm:$0xff]   ;;  %v15050_v7 = vld [vmem:[%s16861_s15 + $0x2504] ss:$16 sps:$4 sm:$0xff]  }
 0x308   : > { %10714 = vmatpush2.bf16.msra.mxu0 %v15018_v9  ;;  %v15053_v9 = vld [vmem:[%s16861_s15 + $0x2704] ss:$16 sps:$4 sm:$0xff]  }
 0x309   : > { %10755 = vmatpush2.bf16.msra.mxu1 %v15021_v12  ;;  %10715 = vmatprep.subr.bf16.mxu0 %v15026_v10  ;;  %v2193_v12 = vcombine.high %v17809_v54, %v17809_v54  ;;  %v17819_v10 = vrot.slane %v17711_v49, %v16928_v51 }
 0x30a   : > { %10756 = vmatprep.subr.bf16.mxu1 %v15029_v17  ;;  %v15048_v17 = vld [vmem:[%s16861_s15 + $0x2500] ss:$16 sps:$4 sm:$0xff]  }
 0x30b   : > { %v17832_v49 = vcombine.high %v17819_v10, %v17819_v10 }
 0x30c   : > { %10716 = vmatpush2.bf16.msra.mxu0 %v15024_v58  ;;  %v15051_v58 = vld [vmem:[%s16861_s15 + $0x2700] ss:$16 sps:$4 sm:$0xff]  }
 0x30d   : > { %10757 = vmatpush2.bf16.msra.mxu1 %v15027_v23  ;;  %10717 = vmatprep.subr.bf16.mxu0 %v15032_v29  ;;  %v15057_v23 = vld [vmem:[%s16861_s15 + $0x28e4] ss:$16 sps:$4 sm:$0xff]  }
 0x30e   : > { %10758 = vmatprep.subr.bf16.mxu1 %v15035_v37  ;;  %v15060_v29 = vld [vmem:[%s16861_s15 + $0x2ae4] ss:$16 sps:$4 sm:$0xff]   ;;  %v15055_v37 = vld [vmem:[%s16861_s15 + $0x28e0] ss:$16 sps:$4 sm:$0xff]  }
 0x310   : > { %10718 = vmatpush2.bf16.msra.mxu0 %v15030_v63  ;;  %v15058_v63 = vld [vmem:[%s16861_s15 + $0x2ae0] ss:$16 sps:$4 sm:$0xff]  }
 0x311   : > { %10759 = vmatpush2.bf16.msra.mxu1 %v15033_v31  ;;  %10719 = vmatprep.subr.bf16.mxu0 %v15038_v39  ;;  %v17828_v31 = vrot.slane %v2193_v12, %v16928_v51  ;;  %v15063_v39 = vld [vmem:[%s16861_s15 + $0x28c4] ss:$16 sps:$4 sm:$0xff]  }
 0x312   : > { %10760 = vmatprep.subr.bf16.mxu1 %v15041_v34  ;;  %v15066_v34 = vld [vmem:[%s16861_s15 + $0x2ac4] ss:$16 sps:$4 sm:$0xff]  }
 0x313   : > { %18979 = vst [vmem:[#allocation20_spill] sm:$0xff] %v17828_v31  ;;  %v15069_v12 = vld [vmem:[%s16861_s15 + $0x28a4] ss:$16 sps:$4 sm:$0xff]  }
 0x314   : > { %10720 = vmatpush2.bf16.msra.mxu0 %v15036_v8  ;;  %v15061_v8 = vld [vmem:[%s16861_s15 + $0x28c0] ss:$16 sps:$4 sm:$0xff]  }
 0x315   : > { %10761 = vmatpush2.bf16.msra.mxu1 %v15039_v48  ;;  %10721 = vmatprep.subr.bf16.mxu0 %v15044_v52  ;;  %v15064_v48 = vld [vmem:[%s16861_s15 + $0x2ac0] ss:$16 sps:$4 sm:$0xff]   ;;  %v17840_v52 = vcombine.high %v17828_v31, %v17828_v31 }
 0x316   : > { %10762 = vmatprep.subr.bf16.mxu1 %v15047_v38 }
 0x317   : > { %18980 = vst [vmem:[#allocation21_spill] sm:$0xff] %v17840_v52 }
 0x318   : > { %10722 = vmatpush2.bf16.msra.mxu0 %v15042_v59 }
 0x319   : > { %10763 = vmatpush2.bf16.msra.mxu1 %v15045_v3  ;;  %10723 = vmatprep.subr.bf16.mxu0 %v15050_v7 }
 0x31a   : > { %10764 = vmatprep.subr.bf16.mxu1 %v15053_v9 }
 0x31c   : > { %10724 = vmatpush2.bf16.msra.mxu0 %v15048_v17  ;;  %v15072_v17 = vld [vmem:[%s16861_s15 + $0x2aa4] ss:$16 sps:$4 sm:$0xff]  }
 0x31d   : > { %10765 = vmatpush2.bf16.msra.mxu1 %v15051_v58  ;;  %10775 = vmatprep.subr.bf16.mxu0 %v15057_v23 }
 0x31e   : > { %10816 = vmatprep.subr.bf16.mxu1 %v15060_v29  ;;  %v15067_v29 = vld [vmem:[%s16861_s15 + $0x28a0] ss:$16 sps:$4 sm:$0xff]  }
 0x31f   : > { %v10481_v38 = vpop.f32.mrf.mxu0  ;;  %10726 = vmatmul.mubr.bf16.vlgmr.msra.gmra.mxu0 %v17819_v10 }
 0x320   : > { %v10522_v59 = vpop.f32.mrf.mxu1  ;;  %10767 = vmatmul.mubr.bf16.vlgmr.msra.gmra.mxu1 %v17832_v49  ;;  %v10482_v3 = vadd.f32 %v10481_v38, %v17749_v42  ;;  %10776 = vmatpush1.bf16.msra.mxu0 %v15055_v37  ;;  %v15078_v38 = vld [vmem:[%s16861_s15 + $0x2a84] ss:$16 sps:$4 sm:$0xff]  }
 0x321   : > { %10817 = vmatpush1.bf16.msra.mxu1 %v15058_v63  ;;  %v10483_v7 = vpop.f32.mrf.mxu0  ;;  %10777 = vmatprep.subr.bf16.mxu0 %v15063_v39 }
 0x322   : > { %v10524_v9 = vpop.f32.mrf.mxu1  ;;  %10818 = vmatprep.subr.bf16.mxu1 %v15066_v34  ;;  %v17847_v58 = vadd.f32 %v10522_v59, %v10482_v3  ;;  %v10484_v23 = vadd.f32 %v10483_v7, %v17756_v36  ;;  %10807 = vmatprep.mubr.bf16.mxu0 %v17828_v31  ;;  %v15075_v36 = vld [vmem:[%s16861_s15 + $0x2884] ss:$16 sps:$4 sm:$0xff]   ;;  %v15073_v59 = vld [vmem:[%s16861_s15 + $0x2880] ss:$16 sps:$4 sm:$0xff]  }
 0x323   : > { %10848 = vmatprep.mubr.bf16.mxu1 %v17840_v52  ;;  %v10485_v42 = vpop.f32.mrf.mxu0  ;;  %v15076_v3 = vld [vmem:[%s16861_s15 + $0x2a80] ss:$16 sps:$4 sm:$0xff]  }
 0x324   : > { %v10526_v37 = vpop.f32.mrf.mxu1  ;;  %v17854_v63 = vadd.f32 %v10524_v9, %v10484_v23  ;;  %10778 = vmatpush1.bf16.msra.mxu0 %v15061_v8  ;;  %v15081_v8 = vld [vmem:[%s16861_s15 + $0x2864] ss:$16 sps:$4 sm:$0xff]   ;;  %v15079_v7 = vld [vmem:[%s16861_s15 + $0x2860] ss:$16 sps:$4 sm:$0xff]  }
 0x325   : > { %10819 = vmatpush1.bf16.msra.mxu1 %v15064_v48  ;;  %v10486_v39 = vpop.f32.mrf.mxu0  ;;  %10779 = vmatprep.subr.bf16.mxu0 %v15069_v12  ;;  %v15084_v48 = vld [vmem:[%s16861_s15 + $0x2a64] ss:$16 sps:$4 sm:$0xff]   ;;  %v15082_v9 = vld [vmem:[%s16861_s15 + $0x2a60] ss:$16 sps:$4 sm:$0xff]  }
 0x326   : > { %v10527_v34 = vpop.f32.mrf.mxu1  ;;  %10820 = vmatprep.subr.bf16.mxu1 %v15072_v17  ;;  %v15087_v12 = vld [vmem:[%s16861_s15 + $0x2844] ss:$16 sps:$4 sm:$0xff]   ;;  %v15085_v17 = vld [vmem:[%s16861_s15 + $0x2840] ss:$16 sps:$4 sm:$0xff]  }
 0x327   : > { %v15088_v23 = vld [vmem:[%s16861_s15 + $0x2a40] ss:$16 sps:$4 sm:$0xff]   ;;  %v15096_v42 = vld [vmem:[%s16861_s15 + $0x2a24] ss:$16 sps:$4 sm:$0xff]  }
 0x328   : > { %10780 = vmatpush1.bf16.msra.mxu0 %v15067_v29  ;;  %v15093_v29 = vld [vmem:[%s16861_s15 + $0x2824] ss:$16 sps:$4 sm:$0xff]   ;;  %v15091_v37 = vld [vmem:[%s16861_s15 + $0x2820] ss:$16 sps:$4 sm:$0xff]  }
 0x329   : > { %10821 = vmatpush1.bf16.msra.mxu1 %v15070_v45  ;;  %10781 = vmatprep.subr.bf16.mxu0 %v15075_v36  ;;  %v15090_v45 = vld [vmem:[%s16861_s15 + $0x2a44] ss:$16 sps:$4 sm:$0xff]   ;;  %v15094_v39 = vld [vmem:[%s16861_s15 + $0x2a20] ss:$16 sps:$4 sm:$0xff]  }
 0x32a   : > { %10822 = vmatprep.subr.bf16.mxu1 %v15078_v38  ;;  %v15099_v34 = vld [vmem:[%s16861_s15 + $0x2804] ss:$16 sps:$4 sm:$0xff]   ;;  %v15097_v38 = vld [vmem:[%s16861_s15 + $0x2800] ss:$16 sps:$4 sm:$0xff]  }
 0x32b   : > { %v15102_v36 = vld [vmem:[%s16861_s15 + $0x2a04] ss:$16 sps:$4 sm:$0xff]   ;;  %v15163_v31 = vld [vmem:[%s16861_s15 + $0x2ca0] ss:$16 sps:$4 sm:$0xff]  }
 0x32c   : > { %10782 = vmatpush1.bf16.msra.mxu0 %v15073_v59  ;;  %v15100_v59 = vld [vmem:[%s16861_s15 + $0x2a00] ss:$16 sps:$4 sm:$0xff]  }
 0x32d   : > { %10823 = vmatpush1.bf16.msra.mxu1 %v15076_v3  ;;  %10783 = vmatprep.subr.bf16.mxu0 %v15081_v8  ;;  %v15105_v3 = vld [vmem:[%s16861_s15 + $0x29e4] ss:$16 sps:$4 sm:$0xff]  }
 0x32e   : > { %10824 = vmatprep.subr.bf16.mxu1 %v15084_v48  ;;  %v15108_v8 = vld [vmem:[%s16861_s15 + $0x2be4] ss:$16 sps:$4 sm:$0xff]   ;;  %v15103_v48 = vld [vmem:[%s16861_s15 + $0x29e0] ss:$16 sps:$4 sm:$0xff]  }
 0x330   : > { %10784 = vmatpush1.bf16.msra.mxu0 %v15079_v7  ;;  %v15106_v7 = vld [vmem:[%s16861_s15 + $0x2be0] ss:$16 sps:$4 sm:$0xff]  }
 0x331   : > { %10825 = vmatpush1.bf16.msra.mxu1 %v15082_v9  ;;  %10785 = vmatprep.subr.bf16.mxu0 %v15087_v12  ;;  %v15111_v9 = vld [vmem:[%s16861_s15 + $0x29c4] ss:$16 sps:$4 sm:$0xff]  }
 0x332   : > { %10826 = vmatprep.subr.bf16.mxu1 %v15090_v45  ;;  %v15114_v12 = vld [vmem:[%s16861_s15 + $0x2bc4] ss:$16 sps:$4 sm:$0xff]   ;;  %v15109_v45 = vld [vmem:[%s16861_s15 + $0x29c0] ss:$16 sps:$4 sm:$0xff]  }
 0x334   : > { %10786 = vmatpush1.bf16.msra.mxu0 %v15085_v17  ;;  %v15112_v17 = vld [vmem:[%s16861_s15 + $0x2bc0] ss:$16 sps:$4 sm:$0xff]  }
 0x335   : > { %10827 = vmatpush1.bf16.msra.mxu1 %v15088_v23  ;;  %10787 = vmatprep.subr.bf16.mxu0 %v15093_v29  ;;  %v15117_v23 = vld [vmem:[%s16861_s15 + $0x29a4] ss:$16 sps:$4 sm:$0xff]  }
 0x336   : > { %10828 = vmatprep.subr.bf16.mxu1 %v15096_v42  ;;  %v15120_v29 = vld [vmem:[%s16861_s15 + $0x2ba4] ss:$16 sps:$4 sm:$0xff]   ;;  %v15115_v42 = vld [vmem:[%s16861_s15 + $0x29a0] ss:$16 sps:$4 sm:$0xff]  }
 0x338   : > { %10788 = vmatpush1.bf16.msra.mxu0 %v15091_v37  ;;  %v15118_v37 = vld [vmem:[%s16861_s15 + $0x2ba0] ss:$16 sps:$4 sm:$0xff]  }
 0x339   : > { %10829 = vmatpush1.bf16.msra.mxu1 %v15094_v39  ;;  %10789 = vmatprep.subr.bf16.mxu0 %v15099_v34  ;;  %v15123_v39 = vld [vmem:[%s16861_s15 + $0x2984] ss:$16 sps:$4 sm:$0xff]  }
 0x33a   : > { %10830 = vmatprep.subr.bf16.mxu1 %v15102_v36  ;;  %v15126_v34 = vld [vmem:[%s16861_s15 + $0x2b84] ss:$16 sps:$4 sm:$0xff]   ;;  %v15121_v36 = vld [vmem:[%s16861_s15 + $0x2980] ss:$16 sps:$4 sm:$0xff]  }
 0x33c   : > { %10790 = vmatpush1.bf16.msra.mxu0 %v15097_v38  ;;  %v15124_v38 = vld [vmem:[%s16861_s15 + $0x2b80] ss:$16 sps:$4 sm:$0xff]  }
 0x33d   : > { %10831 = vmatpush1.bf16.msra.mxu1 %v15100_v59  ;;  %10791 = vmatprep.subr.bf16.mxu0 %v15105_v3  ;;  %v15129_v59 = vld [vmem:[%s16861_s15 + $0x2964] ss:$16 sps:$4 sm:$0xff]  }
 0x33e   : > { %10832 = vmatprep.subr.bf16.mxu1 %v15108_v8  ;;  %v15132_v3 = vld [vmem:[%s16861_s15 + $0x2b64] ss:$16 sps:$4 sm:$0xff]   ;;  %v15127_v8 = vld [vmem:[%s16861_s15 + $0x2960] ss:$16 sps:$4 sm:$0xff]  }
 0x340   : > { %10792 = vmatpush2.bf16.msra.mxu0 %v15103_v48  ;;  %v15130_v48 = vld [vmem:[%s16861_s15 + $0x2b60] ss:$16 sps:$4 sm:$0xff]  }
 0x341   : > { %10833 = vmatpush2.bf16.msra.mxu1 %v15106_v7  ;;  %10793 = vmatprep.subr.bf16.mxu0 %v15111_v9  ;;  %v15135_v7 = vld [vmem:[%s16861_s15 + $0x2944] ss:$16 sps:$4 sm:$0xff]  }
 0x342   : > { %10834 = vmatprep.subr.bf16.mxu1 %v15114_v12  ;;  %v15138_v9 = vld [vmem:[%s16861_s15 + $0x2b44] ss:$16 sps:$4 sm:$0xff]   ;;  %v2178_v12 = vcombine.high %v17801_v13, %v17801_v13  ;;  %v15139_v13 = vld [vmem:[%s16861_s15 + $0x2920] ss:$16 sps:$4 sm:$0xff]  }
 0x344   : > { %10794 = vmatpush2.bf16.msra.mxu0 %v15109_v45  ;;  %v15133_v45 = vld [vmem:[%s16861_s15 + $0x2940] ss:$16 sps:$4 sm:$0xff]  }
 0x345   : > { %10835 = vmatpush2.bf16.msra.mxu1 %v15112_v17  ;;  %10795 = vmatprep.subr.bf16.mxu0 %v15117_v23  ;;  %v15136_v17 = vld [vmem:[%s16861_s15 + $0x2b40] ss:$16 sps:$4 sm:$0xff]   ;;  %v15141_v23 = vld [vmem:[%s16861_s15 + $0x2924] ss:$16 sps:$4 sm:$0xff]  }
 0x346   : > { %10836 = vmatprep.subr.bf16.mxu1 %v15120_v29  ;;  %v15144_v29 = vld [vmem:[%s16861_s15 + $0x2b24] ss:$16 sps:$4 sm:$0xff]  }
 0x348   : > { %10796 = vmatpush2.bf16.msra.mxu0 %v15115_v42  ;;  %v17905_v42 = vrot.slane %v2178_v12, %v16928_v51 }
 0x349   : > { %10837 = vmatpush2.bf16.msra.mxu1 %v15118_v37  ;;  %10797 = vmatprep.subr.bf16.mxu0 %v15123_v39  ;;  %v15142_v37 = vld [vmem:[%s16861_s15 + $0x2b20] ss:$16 sps:$4 sm:$0xff]   ;;  %v15147_v39 = vld [vmem:[%s16861_s15 + $0x2904] ss:$16 sps:$4 sm:$0xff]  }
 0x34a   : > { %10838 = vmatprep.subr.bf16.mxu1 %v15126_v34  ;;  %v15150_v34 = vld [vmem:[%s16861_s15 + $0x2b04] ss:$16 sps:$4 sm:$0xff]  }
 0x34c   : > { %10798 = vmatpush2.bf16.msra.mxu0 %v15121_v36  ;;  %v2194_v36 = vcombine.high %v17905_v42, %v17905_v42 }
 0x34d   : > { %10839 = vmatpush2.bf16.msra.mxu1 %v15124_v38  ;;  %10799 = vmatprep.subr.bf16.mxu0 %v15129_v59  ;;  %v17915_v38 = vrot.slane %v17809_v54, %v16928_v51  ;;  %v15145_v59 = vld [vmem:[%s16861_s15 + $0x2900] ss:$16 sps:$4 sm:$0xff]  }
 0x34e   : > { %10840 = vmatprep.subr.bf16.mxu1 %v15132_v3  ;;  %v15148_v3 = vld [vmem:[%s16861_s15 + $0x2b00] ss:$16 sps:$4 sm:$0xff]   ;;  %v17924_v12 = vrot.slane %v2194_v36, %v16928_v51 }
 0x34f   : > { %18981 = vst [vmem:[#allocation22_spill] sm:$0xff] %v17915_v38  ;;  %v17928_v54 = vcombine.high %v17915_v38, %v17915_v38 }
 0x350   : > { %10800 = vmatpush2.bf16.msra.mxu0 %v15127_v8  ;;  %v15153_v8 = vld [vmem:[%s16861_s15 + $0x2ce4] ss:$16 sps:$4 sm:$0xff]  }
 0x351   : > { %10841 = vmatpush2.bf16.msra.mxu1 %v15130_v48  ;;  %10801 = vmatprep.subr.bf16.mxu0 %v15135_v7  ;;  %v15156_v48 = vld [vmem:[%s16861_s15 + $0x2ee4] ss:$16 sps:$4 sm:$0xff]   ;;  %v15151_v7 = vld [vmem:[%s16861_s15 + $0x2ce0] ss:$16 sps:$4 sm:$0xff]  }
 0x352   : > { %10842 = vmatprep.subr.bf16.mxu1 %v15138_v9  ;;  %v15154_v9 = vld [vmem:[%s16861_s15 + $0x2ee0] ss:$16 sps:$4 sm:$0xff]  }
 0x354   : > { %10802 = vmatpush2.bf16.msra.mxu0 %v15133_v45  ;;  %v15159_v45 = vld [vmem:[%s16861_s15 + $0x2cc4] ss:$16 sps:$4 sm:$0xff]  }
 0x355   : > { %10843 = vmatpush2.bf16.msra.mxu1 %v15136_v17  ;;  %10803 = vmatprep.subr.bf16.mxu0 %v15141_v23  ;;  %v15162_v17 = vld [vmem:[%s16861_s15 + $0x2ec4] ss:$16 sps:$4 sm:$0xff]   ;;  %v15157_v23 = vld [vmem:[%s16861_s15 + $0x2cc0] ss:$16 sps:$4 sm:$0xff]  }
 0x356   : > { %10844 = vmatprep.subr.bf16.mxu1 %v15144_v29  ;;  %v15160_v29 = vld [vmem:[%s16861_s15 + $0x2ec0] ss:$16 sps:$4 sm:$0xff]  }
 0x358   : > { %10804 = vmatpush2.bf16.msra.mxu0 %v15139_v13  ;;  %v17936_v13 = vcombine.high %v17924_v12, %v17924_v12 }
 0x359   : > { %10845 = vmatpush2.bf16.msra.mxu1 %v15142_v37  ;;  %10805 = vmatprep.subr.bf16.mxu0 %v15147_v39 }
 0x35a   : > { %10846 = vmatprep.subr.bf16.mxu1 %v15150_v34 }
 0x35c   : > { %10806 = vmatpush2.bf16.msra.mxu0 %v15145_v59 }
 0x35d   : > { %10847 = vmatpush2.bf16.msra.mxu1 %v15148_v3  ;;  %10857 = vmatprep.subr.bf16.mxu0 %v15153_v8  ;;  %v15165_v3 = vld [vmem:[%s16861_s15 + $0x2ca4] ss:$16 sps:$4 sm:$0xff]  }
 0x35e   : > { %10898 = vmatprep.subr.bf16.mxu1 %v15156_v48  ;;  %v15168_v8 = vld [vmem:[%s16861_s15 + $0x2ea4] ss:$16 sps:$4 sm:$0xff]  }
 0x35f   : > { %v10563_v37 = vpop.f32.mrf.mxu0  ;;  %10808 = vmatmul.mubr.bf16.vlgmr.msra.gmra.mxu0 %v17915_v38  ;;  %v15166_v38 = vld [vmem:[%s16861_s15 + $0x2ea0] ss:$16 sps:$4 sm:$0xff]  }
 0x360   : > { %v10604_v39 = vpop.f32.mrf.mxu1  ;;  %10849 = vmatmul.mubr.bf16.vlgmr.msra.gmra.mxu1 %v17928_v54  ;;  %v10564_v34 = vadd.f32 %v10563_v37, %v17847_v58  ;;  %10858 = vmatpush1.bf16.msra.mxu0 %v15151_v7  ;;  %v15174_v37 = vld [vmem:[%s16861_s15 + $0x2e84] ss:$16 sps:$4 sm:$0xff]  }
 0x361   : > { %10899 = vmatpush1.bf16.msra.mxu1 %v15154_v9  ;;  %v10565_v36 = vpop.f32.mrf.mxu0  ;;  %10859 = vmatprep.subr.bf16.mxu0 %v15159_v45 }
 0x362   : > { %v10606_v59 = vpop.f32.mrf.mxu1  ;;  %10900 = vmatprep.subr.bf16.mxu1 %v15162_v17  ;;  %v17943_v48 = vadd.f32 %v10604_v39, %v10564_v34  ;;  %v10566_v52 = vadd.f32 %v10565_v36, %v17854_v63  ;;  %10889 = vmatprep.mubr.bf16.mxu0 %v17924_v12  ;;  %v15171_v63 = vld [vmem:[%s16861_s15 + $0x2c84] ss:$16 sps:$4 sm:$0xff]   ;;  %v15169_v39 = vld [vmem:[%s16861_s15 + $0x2c80] ss:$16 sps:$4 sm:$0xff]  }
 0x363   : > { %10930 = vmatprep.mubr.bf16.mxu1 %v17936_v13  ;;  %v10567_v58 = vpop.f32.mrf.mxu0  ;;  %v15172_v34 = vld [vmem:[%s16861_s15 + $0x2e80] ss:$16 sps:$4 sm:$0xff]  }
 0x364   : > { %v10608_v7 = vpop.f32.mrf.mxu1  ;;  %v17950_v9 = vadd.f32 %v10606_v59, %v10566_v52  ;;  %10860 = vmatpush1.bf16.msra.mxu0 %v15157_v23  ;;  %v15177_v52 = vld [vmem:[%s16861_s15 + $0x2c64] ss:$16 sps:$4 sm:$0xff]   ;;  %v15178_v36 = vld [vmem:[%s16861_s15 + $0x2e60] ss:$16 sps:$4 sm:$0xff]  }
 0x365   : > { %10901 = vmatpush1.bf16.msra.mxu1 %v15160_v29  ;;  %v10568_v45 = vpop.f32.mrf.mxu0  ;;  %10861 = vmatprep.subr.bf16.mxu0 %v15165_v3  ;;  %v15180_v23 = vld [vmem:[%s16861_s15 + $0x2e64] ss:$16 sps:$4 sm:$0xff]   ;;  %v15175_v29 = vld [vmem:[%s16861_s15 + $0x2c60] ss:$16 sps:$4 sm:$0xff]  }
 0x366   : > { %v10609_v17 = vpop.f32.mrf.mxu1  ;;  %10902 = vmatprep.subr.bf16.mxu1 %v15168_v8  ;;  %v15181_v59 = vld [vmem:[%s16861_s15 + $0x2c40] ss:$16 sps:$4 sm:$0xff]   ;;  %v15189_v8 = vld [vmem:[%s16861_s15 + $0x2c24] ss:$16 sps:$4 sm:$0xff]  }
 0x367   : > { %v15184_v3 = vld [vmem:[%s16861_s15 + $0x2e40] ss:$16 sps:$4 sm:$0xff]   ;;  %v15192_v58 = vld [vmem:[%s16861_s15 + $0x2e24] ss:$16 sps:$4 sm:$0xff]  }
 0x368   : > { %10862 = vmatpush1.bf16.msra.mxu0 %v15163_v31  ;;  %v15183_v31 = vld [vmem:[%s16861_s15 + $0x2c44] ss:$16 sps:$4 sm:$0xff]   ;;  %v15187_v7 = vld [vmem:[%s16861_s15 + $0x2c20] ss:$16 sps:$4 sm:$0xff]  }
 0x369   : > { %10903 = vmatpush1.bf16.msra.mxu1 %v15166_v38  ;;  %10863 = vmatprep.subr.bf16.mxu0 %v15171_v63  ;;  %v15186_v38 = vld [vmem:[%s16861_s15 + $0x2e44] ss:$16 sps:$4 sm:$0xff]   ;;  %v15190_v45 = vld [vmem:[%s16861_s15 + $0x2e20] ss:$16 sps:$4 sm:$0xff]  }
 0x36a   : > { %10904 = vmatprep.subr.bf16.mxu1 %v15174_v37  ;;  %v15195_v17 = vld [vmem:[%s16861_s15 + $0x2c04] ss:$16 sps:$4 sm:$0xff]   ;;  %v15193_v37 = vld [vmem:[%s16861_s15 + $0x2c00] ss:$16 sps:$4 sm:$0xff]  }
 0x36b   : > { %v15198_v63 = vld [vmem:[%s16861_s15 + $0x2e04] ss:$16 sps:$4 sm:$0xff]  }
 0x36c   : > { %10864 = vmatpush1.bf16.msra.mxu0 %v15169_v39  ;;  %v15196_v39 = vld [vmem:[%s16861_s15 + $0x2e00] ss:$16 sps:$4 sm:$0xff]  }
 0x36d   : > { %10905 = vmatpush1.bf16.msra.mxu1 %v15172_v34  ;;  %10865 = vmatprep.subr.bf16.mxu0 %v15177_v52  ;;  %v15201_v34 = vld [vmem:[%s16861_s15 + $0x2de4] ss:$16 sps:$4 sm:$0xff]  }
 0x36e   : > { %10906 = vmatprep.subr.bf16.mxu1 %v15180_v23  ;;  %v15204_v52 = vld [vmem:[%s16861_s15 + $0x2fe4] ss:$16 sps:$4 sm:$0xff]   ;;  %v15199_v23 = vld [vmem:[%s16861_s15 + $0x2de0] ss:$16 sps:$4 sm:$0xff]  }
 0x370   : > { %10866 = vmatpush1.bf16.msra.mxu0 %v15175_v29  ;;  %v15202_v29 = vld [vmem:[%s16861_s15 + $0x2fe0] ss:$16 sps:$4 sm:$0xff]  }
 0x371   : > { %10907 = vmatpush1.bf16.msra.mxu1 %v15178_v36  ;;  %10867 = vmatprep.subr.bf16.mxu0 %v15183_v31  ;;  %v15207_v36 = vld [vmem:[%s16861_s15 + $0x2dc4] ss:$16 sps:$4 sm:$0xff]  }
 0x372   : > { %10908 = vmatprep.subr.bf16.mxu1 %v15186_v38  ;;  %v15210_v31 = vld [vmem:[%s16861_s15 + $0x2fc4] ss:$16 sps:$4 sm:$0xff]   ;;  %v15205_v38 = vld [vmem:[%s16861_s15 + $0x2dc0] ss:$16 sps:$4 sm:$0xff]  }
 0x374   : > { %10868 = vmatpush1.bf16.msra.mxu0 %v15181_v59  ;;  %v15208_v59 = vld [vmem:[%s16861_s15 + $0x2fc0] ss:$16 sps:$4 sm:$0xff]  }
 0x375   : > { %10909 = vmatpush1.bf16.msra.mxu1 %v15184_v3  ;;  %10869 = vmatprep.subr.bf16.mxu0 %v15189_v8  ;;  %v15213_v3 = vld [vmem:[%s16861_s15 + $0x2da4] ss:$16 sps:$4 sm:$0xff]  }
 0x376   : > { %10910 = vmatprep.subr.bf16.mxu1 %v15192_v58  ;;  %v15216_v8 = vld [vmem:[%s16861_s15 + $0x2fa4] ss:$16 sps:$4 sm:$0xff]   ;;  %v15211_v58 = vld [vmem:[%s16861_s15 + $0x2da0] ss:$16 sps:$4 sm:$0xff]  }
 0x378   : > { %10870 = vmatpush1.bf16.msra.mxu0 %v15187_v7  ;;  %v15214_v7 = vld [vmem:[%s16861_s15 + $0x2fa0] ss:$16 sps:$4 sm:$0xff]  }
 0x379   : > { %10911 = vmatpush1.bf16.msra.mxu1 %v15190_v45  ;;  %10871 = vmatprep.subr.bf16.mxu0 %v15195_v17  ;;  %v15219_v45 = vld [vmem:[%s16861_s15 + $0x2d84] ss:$16 sps:$4 sm:$0xff]  }
 0x37a   : > { %10912 = vmatprep.subr.bf16.mxu1 %v15198_v63  ;;  %v15222_v17 = vld [vmem:[%s16861_s15 + $0x2f84] ss:$16 sps:$4 sm:$0xff]   ;;  %v15217_v63 = vld [vmem:[%s16861_s15 + $0x2d80] ss:$16 sps:$4 sm:$0xff]  }
 0x37c   : > { %10872 = vmatpush1.bf16.msra.mxu0 %v15193_v37  ;;  %v15220_v37 = vld [vmem:[%s16861_s15 + $0x2f80] ss:$16 sps:$4 sm:$0xff]  }
 0x37d   : > { %10913 = vmatpush1.bf16.msra.mxu1 %v15196_v39  ;;  %10873 = vmatprep.subr.bf16.mxu0 %v15201_v34  ;;  %v15225_v39 = vld [vmem:[%s16861_s15 + $0x2d64] ss:$16 sps:$4 sm:$0xff]  }
 0x37e   : > { %10914 = vmatprep.subr.bf16.mxu1 %v15204_v52  ;;  %v15228_v34 = vld [vmem:[%s16861_s15 + $0x2f64] ss:$16 sps:$4 sm:$0xff]   ;;  %v15223_v52 = vld [vmem:[%s16861_s15 + $0x2d60] ss:$16 sps:$4 sm:$0xff]  }
 0x380   : > { %10874 = vmatpush2.bf16.msra.mxu0 %v15199_v23  ;;  %v15226_v23 = vld [vmem:[%s16861_s15 + $0x2f60] ss:$16 sps:$4 sm:$0xff]  }
 0x381   : > { %10915 = vmatpush2.bf16.msra.mxu1 %v15202_v29  ;;  %10875 = vmatprep.subr.bf16.mxu0 %v15207_v36  ;;  %v15231_v29 = vld [vmem:[%s16861_s15 + $0x2d44] ss:$16 sps:$4 sm:$0xff]  }
 0x382   : > { %10916 = vmatprep.subr.bf16.mxu1 %v15210_v31  ;;  %v15234_v36 = vld [vmem:[%s16861_s15 + $0x2f44] ss:$16 sps:$4 sm:$0xff]   ;;  %v15229_v31 = vld [vmem:[%s16861_s15 + $0x2d40] ss:$16 sps:$4 sm:$0xff]  }
 0x384   : > { %10876 = vmatpush2.bf16.msra.mxu0 %v15205_v38  ;;  %v15232_v38 = vld [vmem:[%s16861_s15 + $0x2f40] ss:$16 sps:$4 sm:$0xff]  }
 0x385   : > { %10917 = vmatpush2.bf16.msra.mxu1 %v15208_v59  ;;  %10877 = vmatprep.subr.bf16.mxu0 %v15213_v3  ;;  %v15237_v59 = vld [vmem:[%s16861_s15 + $0x2d24] ss:$16 sps:$4 sm:$0xff]  }
 0x386   : > { %10918 = vmatprep.subr.bf16.mxu1 %v15216_v8  ;;  %v15240_v3 = vld [vmem:[%s16861_s15 + $0x2f24] ss:$16 sps:$4 sm:$0xff]   ;;  %v15235_v8 = vld [vmem:[%s16861_s15 + $0x2d20] ss:$16 sps:$4 sm:$0xff]  }
 0x388   : > { %10878 = vmatpush2.bf16.msra.mxu0 %v15211_v58  ;;  %v15238_v58 = vld [vmem:[%s16861_s15 + $0x2f20] ss:$16 sps:$4 sm:$0xff]  }
 0x389   : > { %10919 = vmatpush2.bf16.msra.mxu1 %v15214_v7  ;;  %10879 = vmatprep.subr.bf16.mxu0 %v15219_v45  ;;  %v15243_v7 = vld [vmem:[%s16861_s15 + $0x2d04] ss:$16 sps:$4 sm:$0xff]  }
 0x38a   : > { %10920 = vmatprep.subr.bf16.mxu1 %v15222_v17  ;;  %v15246_v45 = vld [vmem:[%s16861_s15 + $0x2f04] ss:$16 sps:$4 sm:$0xff]   ;;  %v18004_v17 = vrot.slane %v17905_v42, %v16928_v51  ;;  %v15256_v51 = vld [vmem:[%s16861_s15 + $0xcc] ss:$16 sps:$4 sm:$0xff]  }
 0x38b   : > { %v15259_v42 = vld [vmem:[%s16861_s15 + $0x2cc] ss:$16 sps:$4 sm:$0xff]  }
 0x38c   : > { %10880 = vmatpush2.bf16.msra.mxu0 %v15217_v63  ;;  %v15241_v63 = vld [vmem:[%s16861_s15 + $0x2d00] ss:$16 sps:$4 sm:$0xff]  }
 0x38d   : > { %10921 = vmatpush2.bf16.msra.mxu1 %v15220_v37  ;;  %10881 = vmatprep.subr.bf16.mxu0 %v15225_v39  ;;  %v15244_v37 = vld [vmem:[%s16861_s15 + $0x2f00] ss:$16 sps:$4 sm:$0xff]   ;;  %v15250_v39 = vld [vmem:[%s16861_s15 + $0xec] ss:$16 sps:$4 sm:$0xff]  }
 0x38e   : > { %10922 = vmatprep.subr.bf16.mxu1 %v15228_v34  ;;  %v15253_v34 = vld [vmem:[%s16861_s15 + $0x2ec] ss:$16 sps:$4 sm:$0xff]  }
 0x390   : > { %10882 = vmatpush2.bf16.msra.mxu0 %v15223_v52  ;;  %v15248_v52 = vld [vmem:[%s16861_s15 + $0xe8] ss:$16 sps:$4 sm:$0xff]  }
 0x391   : > { %10923 = vmatpush2.bf16.msra.mxu1 %v15226_v23  ;;  %10883 = vmatprep.subr.bf16.mxu0 %v15231_v29  ;;  %v15251_v23 = vld [vmem:[%s16861_s15 + $0x2e8] ss:$16 sps:$4 sm:$0xff]   ;;  %v18014_v29 = vcombine.high %v18004_v17, %v18004_v17 }
 0x392   : > { %10924 = vmatprep.subr.bf16.mxu1 %v15234_v36  ;;  %v15254_v36 = vld [vmem:[%s16861_s15 + $0xc8] ss:$16 sps:$4 sm:$0xff]  }
 0x394   : > { %10884 = vmatpush2.bf16.msra.mxu0 %v15229_v31  ;;  %v15257_v31 = vld [vmem:[%s16861_s15 + $0x2c8] ss:$16 sps:$4 sm:$0xff]  }
 0x395   : > { %10925 = vmatpush2.bf16.msra.mxu1 %v15232_v38  ;;  %10885 = vmatprep.subr.bf16.mxu0 %v15237_v59 }
 0x396   : > { %10926 = vmatprep.subr.bf16.mxu1 %v15240_v3 }
 0x398   : > { %10886 = vmatpush2.bf16.msra.mxu0 %v15235_v8 }
 0x399   : > { %10927 = vmatpush2.bf16.msra.mxu1 %v15238_v58  ;;  %10887 = vmatprep.subr.bf16.mxu0 %v15243_v7  ;;  %v15262_v7 = vld [vmem:[%s16861_s15 + $0xac] ss:$16 sps:$4 sm:$0xff]  }
 0x39a   : > { %10928 = vmatprep.subr.bf16.mxu1 %v15246_v45  ;;  %v15265_v45 = vld [vmem:[%s16861_s15 + $0x2ac] ss:$16 sps:$4 sm:$0xff]  }
 0x39c   : > { %10888 = vmatpush2.bf16.msra.mxu0 %v15241_v63 }
 0x39d   : > { %10929 = vmatpush2.bf16.msra.mxu1 %v15244_v37  ;;  %10939 = vmatprep.subr.bf16.mxu0 %v15250_v39  ;;  %v15260_v39 = vld [vmem:[%s16861_s15 + $0xa8] ss:$16 sps:$4 sm:$0xff]  }
 0x39e   : > { %10980 = vmatprep.subr.bf16.mxu1 %v15253_v34  ;;  %v15263_v34 = vld [vmem:[%s16861_s15 + $0x2a8] ss:$16 sps:$4 sm:$0xff]  }
 0x39f   : > { %v10645_v38 = vpop.f32.mrf.mxu0  ;;  %10890 = vmatmul.mubr.bf16.vlgmr.msra.gmra.mxu0 %v18004_v17 }
 0x3a0   : > { %v10686_v59 = vpop.f32.mrf.mxu1  ;;  %10931 = vmatmul.mubr.bf16.vlgmr.msra.gmra.mxu1 %v18014_v29  ;;  %v10646_v3 = vadd.f32 %v10645_v38, %v17943_v48  ;;  %10940 = vmatpush1.bf16.msra.mxu0 %v15248_v52  ;;  %v15269_v38 = vld [vmem:[%s16861_s15 + $0x288] ss:$16 sps:$4 sm:$0xff]  }
 0x3a1   : > { %10981 = vmatpush1.bf16.msra.mxu1 %v15251_v23  ;;  %v10647_v8 = vpop.f32.mrf.mxu0  ;;  %10941 = vmatprep.subr.bf16.mxu0 %v15256_v51 }
 0x3a2   : > { %v10688_v58 = vpop.f32.mrf.mxu1  ;;  %10982 = vmatprep.subr.bf16.mxu1 %v15259_v42  ;;  %v18025_v63 = vadd.f32 %v10686_v59, %v10646_v3  ;;  %v10648_v37 = vadd.f32 %v10647_v8, %v17950_v9  ;;  %10971 = vmatprep.mubr.bf16.mxu0 %v16940_v62  ;;  %v15268_v9 = vld [vmem:[%s16861_s15 + $0x8c] ss:$16 sps:$4 sm:$0xff]   ;;  %v15272_v59 = vld [vmem:[%s16861_s15 + $0x68] ss:$16 sps:$4 sm:$0xff]  }
 0x3a3   : > { %11012 = vmatprep.mubr.bf16.mxu1 %v16947_v2  ;;  %v10649_v48 = vpop.f32.mrf.mxu0  ;;  %v15271_v62 = vld [vmem:[%s16861_s15 + $0x28c] ss:$16 sps:$4 sm:$0xff]   ;;  %v15266_v2 = vld [vmem:[%s16861_s15 + $0x88] ss:$16 sps:$4 sm:$0xff]  }
 0x3a4   : > { %v10690_v52 = vpop.f32.mrf.mxu1  ;;  %v18032_v23 = vadd.f32 %v10688_v58, %v10648_v37  ;;  %10942 = vmatpush1.bf16.msra.mxu0 %v15254_v36  ;;  %v15274_v36 = vld [vmem:[%s16861_s15 + $0x6c] ss:$16 sps:$4 sm:$0xff]   ;;  %v15275_v3 = vld [vmem:[%s16861_s15 + $0x268] ss:$16 sps:$4 sm:$0xff]  }
 0x3a5   : > { %10983 = vmatpush1.bf16.msra.mxu1 %v15257_v31  ;;  %v10650_v51 = vpop.f32.mrf.mxu0  ;;  %10943 = vmatprep.subr.bf16.mxu0 %v15262_v7  ;;  %v15277_v31 = vld [vmem:[%s16861_s15 + $0x26c] ss:$16 sps:$4 sm:$0xff]   ;;  %v15278_v7 = vld [vmem:[%s16861_s15 + $0x48] ss:$16 sps:$4 sm:$0xff]  }
 0x3a6   : > { %v10691_v42 = vpop.f32.mrf.mxu1  ;;  %10984 = vmatprep.subr.bf16.mxu1 %v15265_v45  ;;  %v15280_v8 = vld [vmem:[%s16861_s15 + $0x4c] ss:$16 sps:$4 sm:$0xff]   ;;  %v15281_v45 = vld [vmem:[%s16861_s15 + $0x248] ss:$16 sps:$4 sm:$0xff]  }
 0x3a7   : > { %v15283_v58 = vld [vmem:[%s16861_s15 + $0x24c] ss:$16 sps:$4 sm:$0xff]   ;;  %v15287_v48 = vld [vmem:[%s16861_s15 + $0x228] ss:$16 sps:$4 sm:$0xff]  }
 0x3a8   : > { %10944 = vmatpush1.bf16.msra.mxu0 %v15260_v39  ;;  %v15286_v37 = vld [vmem:[%s16861_s15 + $0x2c] ss:$16 sps:$4 sm:$0xff]   ;;  %v15290_v42 = vld [vmem:[%s16861_s15 + $0x8] ss:$16 sps:$4 sm:$0xff]  }
 0x3a9   : > { %10985 = vmatpush1.bf16.msra.mxu1 %v15263_v34  ;;  %10945 = vmatprep.subr.bf16.mxu0 %v15268_v9  ;;  %v15289_v39 = vld [vmem:[%s16861_s15 + $0x22c] ss:$16 sps:$4 sm:$0xff]   ;;  %v15284_v34 = vld [vmem:[%s16861_s15 + $0x28] ss:$16 sps:$4 sm:$0xff]  }
 0x3aa   : > { %10986 = vmatprep.subr.bf16.mxu1 %v15271_v62  ;;  %v15292_v52 = vld [vmem:[%s16861_s15 + $0xc] ss:$16 sps:$4 sm:$0xff]   ;;  %v15293_v9 = vld [vmem:[%s16861_s15 + $0x208] ss:$16 sps:$4 sm:$0xff]  }
 0x3ab   : > { %v15295_v51 = vld [vmem:[%s16861_s15 + $0x20c] ss:$16 sps:$4 sm:$0xff]  }
 0x3ac   : > { %10946 = vmatpush1.bf16.msra.mxu0 %v15266_v2  ;;  %v15298_v62 = vld [vmem:[%s16861_s15 + $0x1ec] ss:$16 sps:$4 sm:$0xff]  }
 0x3ad   : > { %10987 = vmatpush1.bf16.msra.mxu1 %v15269_v38  ;;  %10947 = vmatprep.subr.bf16.mxu0 %v15274_v36  ;;  %v15301_v2 = vld [vmem:[%s16861_s15 + $0x3ec] ss:$16 sps:$4 sm:$0xff]   ;;  %v15296_v38 = vld [vmem:[%s16861_s15 + $0x1e8] ss:$16 sps:$4 sm:$0xff]  }
 0x3ae   : > { %10988 = vmatprep.subr.bf16.mxu1 %v15277_v31  ;;  %v15299_v36 = vld [vmem:[%s16861_s15 + $0x3e8] ss:$16 sps:$4 sm:$0xff]   ;;  %v15304_v31 = vld [vmem:[%s16861_s15 + $0x1cc] ss:$16 sps:$4 sm:$0xff]  }
 0x3b0   : > { %10948 = vmatpush1.bf16.msra.mxu0 %v15272_v59  ;;  %v15307_v59 = vld [vmem:[%s16861_s15 + $0x3cc] ss:$16 sps:$4 sm:$0xff]  }
 0x3b1   : > { %10989 = vmatpush1.bf16.msra.mxu1 %v15275_v3  ;;  %10949 = vmatprep.subr.bf16.mxu0 %v15280_v8  ;;  %v15302_v3 = vld [vmem:[%s16861_s15 + $0x1c8] ss:$16 sps:$4 sm:$0xff]  }
 0x3b2   : > { %10990 = vmatprep.subr.bf16.mxu1 %v15283_v58  ;;  %v15305_v8 = vld [vmem:[%s16861_s15 + $0x3c8] ss:$16 sps:$4 sm:$0xff]   ;;  %v15310_v58 = vld [vmem:[%s16861_s15 + $0x1ac] ss:$16 sps:$4 sm:$0xff]  }
 0x3b4   : > { %10950 = vmatpush1.bf16.msra.mxu0 %v15278_v7  ;;  %v15313_v7 = vld [vmem:[%s16861_s15 + $0x3ac] ss:$16 sps:$4 sm:$0xff]  }
 0x3b5   : > { %10991 = vmatpush1.bf16.msra.mxu1 %v15281_v45  ;;  %10951 = vmatprep.subr.bf16.mxu0 %v15286_v37  ;;  %v15308_v45 = vld [vmem:[%s16861_s15 + $0x1a8] ss:$16 sps:$4 sm:$0xff]  }
 0x3b6   : > { %10992 = vmatprep.subr.bf16.mxu1 %v15289_v39  ;;  %v15311_v37 = vld [vmem:[%s16861_s15 + $0x3a8] ss:$16 sps:$4 sm:$0xff]   ;;  %v15316_v39 = vld [vmem:[%s16861_s15 + $0x18c] ss:$16 sps:$4 sm:$0xff]  }
 0x3b8   : > { %10952 = vmatpush1.bf16.msra.mxu0 %v15284_v34  ;;  %v15319_v34 = vld [vmem:[%s16861_s15 + $0x38c] ss:$16 sps:$4 sm:$0xff]  }
 0x3b9   : > { %10993 = vmatpush1.bf16.msra.mxu1 %v15287_v48  ;;  %10953 = vmatprep.subr.bf16.mxu0 %v15292_v52  ;;  %v15314_v48 = vld [vmem:[%s16861_s15 + $0x188] ss:$16 sps:$4 sm:$0xff]  }
 0x3ba   : > { %10994 = vmatprep.subr.bf16.mxu1 %v15295_v51  ;;  %v15317_v52 = vld [vmem:[%s16861_s15 + $0x388] ss:$16 sps:$4 sm:$0xff]   ;;  %v15322_v51 = vld [vmem:[%s16861_s15 + $0x16c] ss:$16 sps:$4 sm:$0xff]  }
 0x3bc   : > { %10954 = vmatpush1.bf16.msra.mxu0 %v15290_v42  ;;  %v15325_v42 = vld [vmem:[%s16861_s15 + $0x36c] ss:$16 sps:$4 sm:$0xff]  }
 0x3bd   : > { %10995 = vmatpush1.bf16.msra.mxu1 %v15293_v9  ;;  %10955 = vmatprep.subr.bf16.mxu0 %v15298_v62  ;;  %v15320_v9 = vld [vmem:[%s16861_s15 + $0x168] ss:$16 sps:$4 sm:$0xff]  }
 0x3be   : > { %10996 = vmatprep.subr.bf16.mxu1 %v15301_v2  ;;  %v15323_v62 = vld [vmem:[%s16861_s15 + $0x368] ss:$16 sps:$4 sm:$0xff]   ;;  %v15328_v2 = vld [vmem:[%s16861_s15 + $0x14c] ss:$16 sps:$4 sm:$0xff]  }
 0x3c0   : > { %10956 = vmatpush2.bf16.msra.mxu0 %v15296_v38  ;;  %v15331_v38 = vld [vmem:[%s16861_s15 + $0x34c] ss:$16 sps:$4 sm:$0xff]  }
 0x3c1   : > { %10997 = vmatpush2.bf16.msra.mxu1 %v15299_v36  ;;  %10957 = vmatprep.subr.bf16.mxu0 %v15304_v31  ;;  %v15326_v36 = vld [vmem:[%s16861_s15 + $0x148] ss:$16 sps:$4 sm:$0xff]  }
 0x3c2   : > { %10998 = vmatprep.subr.bf16.mxu1 %v15307_v59  ;;  %v15329_v31 = vld [vmem:[%s16861_s15 + $0x348] ss:$16 sps:$4 sm:$0xff]   ;;  %v15334_v59 = vld [vmem:[%s16861_s15 + $0x12c] ss:$16 sps:$4 sm:$0xff]  }
 0x3c4   : > { %10958 = vmatpush2.bf16.msra.mxu0 %v15302_v3  ;;  %v15337_v3 = vld [vmem:[%s16861_s15 + $0x32c] ss:$16 sps:$4 sm:$0xff]  }
 0x3c5   : > { %10999 = vmatpush2.bf16.msra.mxu1 %v15305_v8  ;;  %10959 = vmatprep.subr.bf16.mxu0 %v15310_v58  ;;  %v15332_v8 = vld [vmem:[%s16861_s15 + $0x128] ss:$16 sps:$4 sm:$0xff]  }
 0x3c6   : > { %11000 = vmatprep.subr.bf16.mxu1 %v15313_v7  ;;  %v15335_v58 = vld [vmem:[%s16861_s15 + $0x328] ss:$16 sps:$4 sm:$0xff]   ;;  %v15340_v7 = vld [vmem:[%s16861_s15 + $0x10c] ss:$16 sps:$4 sm:$0xff]  }
 0x3c8   : > { %10960 = vmatpush2.bf16.msra.mxu0 %v15308_v45  ;;  %v15343_v45 = vld [vmem:[%s16861_s15 + $0x30c] ss:$16 sps:$4 sm:$0xff]  }
 0x3c9   : > { %11001 = vmatpush2.bf16.msra.mxu1 %v15311_v37  ;;  %10961 = vmatprep.subr.bf16.mxu0 %v15316_v39  ;;  %v15338_v37 = vld [vmem:[%s16861_s15 + $0x108] ss:$16 sps:$4 sm:$0xff]  }
 0x3ca   : > { %11002 = vmatprep.subr.bf16.mxu1 %v15319_v34  ;;  %v15341_v39 = vld [vmem:[%s16861_s15 + $0x308] ss:$16 sps:$4 sm:$0xff]   ;;  %v15346_v34 = vld [vmem:[%s16861_s15 + $0x4ec] ss:$16 sps:$4 sm:$0xff]  }
 0x3cc   : > { %10962 = vmatpush2.bf16.msra.mxu0 %v15314_v48  ;;  %v15349_v48 = vld [vmem:[%s16861_s15 + $0x6ec] ss:$16 sps:$4 sm:$0xff]  }
 0x3cd   : > { %11003 = vmatpush2.bf16.msra.mxu1 %v15317_v52  ;;  %10963 = vmatprep.subr.bf16.mxu0 %v15322_v51  ;;  %v15344_v52 = vld [vmem:[%s16861_s15 + $0x4e8] ss:$16 sps:$4 sm:$0xff]  }
 0x3ce   : > { %11004 = vmatprep.subr.bf16.mxu1 %v15325_v42  ;;  %v15347_v51 = vld [vmem:[%s16861_s15 + $0x6e8] ss:$16 sps:$4 sm:$0xff]   ;;  %v15352_v42 = vld [vmem:[%s16861_s15 + $0x4cc] ss:$16 sps:$4 sm:$0xff]  }
 0x3d0   : > { %10964 = vmatpush2.bf16.msra.mxu0 %v15320_v9  ;;  %v15355_v9 = vld [vmem:[%s16861_s15 + $0x6cc] ss:$16 sps:$4 sm:$0xff]  }
 0x3d1   : > { %11005 = vmatpush2.bf16.msra.mxu1 %v15323_v62  ;;  %10965 = vmatprep.subr.bf16.mxu0 %v15328_v2 }
 0x3d2   : > { %11006 = vmatprep.subr.bf16.mxu1 %v15331_v38 }
 0x3d4   : > { %10966 = vmatpush2.bf16.msra.mxu0 %v15326_v36  ;;  %v15350_v36 = vld [vmem:[%s16861_s15 + $0x4c8] ss:$16 sps:$4 sm:$0xff]  }
 0x3d5   : > { %11007 = vmatpush2.bf16.msra.mxu1 %v15329_v31  ;;  %10967 = vmatprep.subr.bf16.mxu0 %v15334_v59  ;;  %v15353_v31 = vld [vmem:[%s16861_s15 + $0x6c8] ss:$16 sps:$4 sm:$0xff]  }
 0x3d6   : > { %11008 = vmatprep.subr.bf16.mxu1 %v15337_v3 }
 0x3d8   : > { %10968 = vmatpush2.bf16.msra.mxu0 %v15332_v8  ;;  %v15358_v8 = vld [vmem:[%s16861_s15 + $0x4ac] ss:$16 sps:$4 sm:$0xff]  }
 0x3d9   : > { %11009 = vmatpush2.bf16.msra.mxu1 %v15335_v58  ;;  %10969 = vmatprep.subr.bf16.mxu0 %v15340_v7  ;;  %v15361_v58 = vld [vmem:[%s16861_s15 + $0x6ac] ss:$16 sps:$4 sm:$0xff]  }
 0x3da   : > { %11010 = vmatprep.subr.bf16.mxu1 %v15343_v45 }
 0x3dc   : > { %10970 = vmatpush2.bf16.msra.mxu0 %v15338_v37  ;;  %v15356_v37 = vld [vmem:[%s16861_s15 + $0x4a8] ss:$16 sps:$4 sm:$0xff]  }
 0x3dd   : > { %11011 = vmatpush2.bf16.msra.mxu1 %v15341_v39  ;;  %11021 = vmatprep.subr.bf16.mxu0 %v15346_v34  ;;  %v15359_v39 = vld [vmem:[%s16861_s15 + $0x6a8] ss:$16 sps:$4 sm:$0xff]  }
 0x3de   : > { %11062 = vmatprep.subr.bf16.mxu1 %v15349_v48 }
 0x3df   : > { %v10727_v62 = vpop.f32.mrf.mxu0  ;;  %10972 = vmatmul.mubr.bf16.vlgmr.msra.gmra.mxu0 %v16966_v15 }
 0x3e0   : > { %v10768_v2 = vpop.f32.mrf.mxu1  ;;  %11013 = vmatmul.mubr.bf16.vlgmr.msra.gmra.mxu1 %v16976_v20  ;;  %v10728_v38 = vadd.f32 %v10727_v62, %v18025_v63  ;;  %11022 = vmatpush1.bf16.msra.mxu0 %v15344_v52  ;;  %v15365_v52 = vld [vmem:[%s16861_s15 + $0x688] ss:$16 sps:$4 sm:$0xff]  }
 0x3e1   : > { %11063 = vmatpush1.bf16.msra.mxu1 %v15347_v51  ;;  %v10729_v59 = vpop.f32.mrf.mxu0  ;;  %11023 = vmatprep.subr.bf16.mxu0 %v15352_v42  ;;  %v15370_v51 = vld [vmem:[%s16861_s15 + $0x46c] ss:$16 sps:$4 sm:$0xff]   ;;  %v15371_v62 = vld [vmem:[%s16861_s15 + $0x668] ss:$16 sps:$4 sm:$0xff]  }
 0x3e2   : > { %v10770_v3 = vpop.f32.mrf.mxu1  ;;  %11064 = vmatprep.subr.bf16.mxu1 %v15355_v9  ;;  %v18099_v7 = vadd.f32 %v10768_v2, %v10728_v38  ;;  %v10730_v15 = vadd.f32 %v10729_v59, %v18032_v23  ;;  %11053 = vmatprep.mubr.bf16.mxu0 %v16972_v19  ;;  %v15364_v19 = vld [vmem:[%s16861_s15 + $0x48c] ss:$16 sps:$4 sm:$0xff]   ;;  %v15362_v23 = vld [vmem:[%s16861_s15 + $0x488] ss:$16 sps:$4 sm:$0xff]  }
 0x3e3   : > { %11094 = vmatprep.mubr.bf16.mxu1 %v16984_v25  ;;  %v10731_v20 = vpop.f32.mrf.mxu0  ;;  %v15367_v25 = vld [vmem:[%s16861_s15 + $0x68c] ss:$16 sps:$4 sm:$0xff]   ;;  %v15368_v9 = vld [vmem:[%s16861_s15 + $0x468] ss:$16 sps:$4 sm:$0xff]  }
 0x3e4   : > { %v10772_v63 = vpop.f32.mrf.mxu1  ;;  %v18104_v45 = vadd.f32 %v10770_v3, %v10730_v15  ;;  %11024 = vmatpush1.bf16.msra.mxu0 %v15350_v36  ;;  %v15373_v42 = vld [vmem:[%s16861_s15 + $0x66c] ss:$16 sps:$4 sm:$0xff]   ;;  %v15374_v36 = vld [vmem:[%s16861_s15 + $0x448] ss:$16 sps:$4 sm:$0xff]  }
 0x3e5   : > { %11065 = vmatpush1.bf16.msra.mxu1 %v15353_v31  ;;  %v10732_v34 = vpop.f32.mrf.mxu0  ;;  %11025 = vmatprep.subr.bf16.mxu0 %v15358_v8  ;;  %v15376_v2 = vld [vmem:[%s16861_s15 + $0x44c] ss:$16 sps:$4 sm:$0xff]   ;;  %v15377_v31 = vld [vmem:[%s16861_s15 + $0x648] ss:$16 sps:$4 sm:$0xff]  }
 0x3e6   : > { %v10773_v48 = vpop.f32.mrf.mxu1  ;;  %11066 = vmatprep.subr.bf16.mxu1 %v15361_v58  ;;  %v15379_v38 = vld [vmem:[%s16861_s15 + $0x64c] ss:$16 sps:$4 sm:$0xff]   ;;  %v15380_v8 = vld [vmem:[%s16861_s15 + $0x428] ss:$16 sps:$4 sm:$0xff]  }
 0x3e7   : > { %v15382_v59 = vld [vmem:[%s16861_s15 + $0x42c] ss:$16 sps:$4 sm:$0xff]   ;;  %v15383_v58 = vld [vmem:[%s16861_s15 + $0x628] ss:$16 sps:$4 sm:$0xff]  }
 0x3e8   : > { %11026 = vmatpush1.bf16.msra.mxu0 %v15356_v37  ;;  %v15385_v3 = vld [vmem:[%s16861_s15 + $0x62c] ss:$16 sps:$4 sm:$0xff]   ;;  %v15386_v63 = vld [vmem:[%s16861_s15 + $0x408] ss:$16 sps:$4 sm:$0xff]  }
 0x3e9   : > { %11067 = vmatpush1.bf16.msra.mxu1 %v15359_v39  ;;  %11027 = vmatprep.subr.bf16.mxu0 %v15364_v19  ;;  %v15388_v15 = vld [vmem:[%s16861_s15 + $0x40c] ss:$16 sps:$4 sm:$0xff]   ;;  %v15389_v37 = vld [vmem:[%s16861_s15 + $0x608] ss:$16 sps:$4 sm:$0xff]  }
 0x3ea   : > { %11068 = vmatprep.subr.bf16.mxu1 %v15367_v25  ;;  %v15391_v20 = vld [vmem:[%s16861_s15 + $0x60c] ss:$16 sps:$4 sm:$0xff]   ;;  %v15392_v48 = vld [vmem:[%s16861_s15 + $0x5e8] ss:$16 sps:$4 sm:$0xff]  }
 0x3eb   : > { %v15394_v39 = vld [vmem:[%s16861_s15 + $0x5ec] ss:$16 sps:$4 sm:$0xff]   ;;  %v15395_v19 = vld [vmem:[%s16861_s15 + $0x7e8] ss:$16 sps:$4 sm:$0xff]  }
 0x3ec   : > { %11028 = vmatpush1.bf16.msra.mxu0 %v15362_v23  ;;  %v15397_v34 = vld [vmem:[%s16861_s15 + $0x7ec] ss:$16 sps:$4 sm:$0xff]  }
 0x3ed   : > { %11069 = vmatpush1.bf16.msra.mxu1 %v15365_v52  ;;  %11029 = vmatprep.subr.bf16.mxu0 %v15370_v51  ;;  %v15400_v25 = vld [vmem:[%s16861_s15 + $0x5cc] ss:$16 sps:$4 sm:$0xff]   ;;  %v15398_v52 = vld [vmem:[%s16861_s15 + $0x5c8] ss:$16 sps:$4 sm:$0xff]  }
 0x3ee   : > { %11070 = vmatprep.subr.bf16.mxu1 %v15373_v42  ;;  %v15403_v23 = vld [vmem:[%s16861_s15 + $0x7cc] ss:$16 sps:$4 sm:$0xff]   ;;  %v15401_v51 = vld [vmem:[%s16861_s15 + $0x7c8] ss:$16 sps:$4 sm:$0xff]  }
 0x3ef   : > { %v15406_v42 = vld [vmem:[%s16861_s15 + $0x5ac] ss:$16 sps:$4 sm:$0xff]  }
 0x3f0   : > { %11030 = vmatpush1.bf16.msra.mxu0 %v15368_v9  ;;  %v15409_v9 = vld [vmem:[%s16861_s15 + $0x7ac] ss:$16 sps:$4 sm:$0xff]  }
 0x3f1   : > { %11071 = vmatpush1.bf16.msra.mxu1 %v15371_v62  ;;  %11031 = vmatprep.subr.bf16.mxu0 %v15376_v2  ;;  %v15404_v62 = vld [vmem:[%s16861_s15 + $0x5a8] ss:$16 sps:$4 sm:$0xff]  }
 0x3f2   : > { %11072 = vmatprep.subr.bf16.mxu1 %v15379_v38  ;;  %v15407_v2 = vld [vmem:[%s16861_s15 + $0x7a8] ss:$16 sps:$4 sm:$0xff]   ;;  %v15412_v38 = vld [vmem:[%s16861_s15 + $0x58c] ss:$16 sps:$4 sm:$0xff]  }
 0x3f4   : > { %11032 = vmatpush1.bf16.msra.mxu0 %v15374_v36  ;;  %v15415_v36 = vld [vmem:[%s16861_s15 + $0x78c] ss:$16 sps:$4 sm:$0xff]  }
 0x3f5   : > { %11073 = vmatpush1.bf16.msra.mxu1 %v15377_v31  ;;  %11033 = vmatprep.subr.bf16.mxu0 %v15382_v59  ;;  %v15410_v31 = vld [vmem:[%s16861_s15 + $0x588] ss:$16 sps:$4 sm:$0xff]  }
 0x3f6   : > { %11074 = vmatprep.subr.bf16.mxu1 %v15385_v3  ;;  %v15413_v59 = vld [vmem:[%s16861_s15 + $0x788] ss:$16 sps:$4 sm:$0xff]   ;;  %v15418_v3 = vld [vmem:[%s16861_s15 + $0x56c] ss:$16 sps:$4 sm:$0xff]  }
 0x3f8   : > { %11034 = vmatpush1.bf16.msra.mxu0 %v15380_v8  ;;  %v15421_v8 = vld [vmem:[%s16861_s15 + $0x76c] ss:$16 sps:$4 sm:$0xff]  }
 0x3f9   : > { %11075 = vmatpush1.bf16.msra.mxu1 %v15383_v58  ;;  %11035 = vmatprep.subr.bf16.mxu0 %v15388_v15  ;;  %v15416_v58 = vld [vmem:[%s16861_s15 + $0x568] ss:$16 sps:$4 sm:$0xff]  }
 0x3fa   : > { %11076 = vmatprep.subr.bf16.mxu1 %v15391_v20  ;;  %v15419_v15 = vld [vmem:[%s16861_s15 + $0x768] ss:$16 sps:$4 sm:$0xff]   ;;  %v15424_v20 = vld [vmem:[%s16861_s15 + $0x54c] ss:$16 sps:$4 sm:$0xff]  }
 0x3fc   : > { %11036 = vmatpush1.bf16.msra.mxu0 %v15386_v63  ;;  %v15427_v63 = vld [vmem:[%s16861_s15 + $0x74c] ss:$16 sps:$4 sm:$0xff]  }
 0x3fd   : > { %11077 = vmatpush1.bf16.msra.mxu1 %v15389_v37  ;;  %11037 = vmatprep.subr.bf16.mxu0 %v15394_v39  ;;  %v15422_v37 = vld [vmem:[%s16861_s15 + $0x548] ss:$16 sps:$4 sm:$0xff]  }
 0x3fe   : > { %11078 = vmatprep.subr.bf16.mxu1 %v15397_v34  ;;  %v15425_v39 = vld [vmem:[%s16861_s15 + $0x748] ss:$16 sps:$4 sm:$0xff]   ;;  %v15430_v34 = vld [vmem:[%s16861_s15 + $0x52c] ss:$16 sps:$4 sm:$0xff]  }
 0x400   : > { %11038 = vmatpush2.bf16.msra.mxu0 %v15392_v48  ;;  %v15433_v48 = vld [vmem:[%s16861_s15 + $0x72c] ss:$16 sps:$4 sm:$0xff]  }
 0x401   : > { %11079 = vmatpush2.bf16.msra.mxu1 %v15395_v19  ;;  %11039 = vmatprep.subr.bf16.mxu0 %v15400_v25  ;;  %v15428_v19 = vld [vmem:[%s16861_s15 + $0x528] ss:$16 sps:$4 sm:$0xff]  }
 0x402   : > { %11080 = vmatprep.subr.bf16.mxu1 %v15403_v23  ;;  %v15431_v25 = vld [vmem:[%s16861_s15 + $0x728] ss:$16 sps:$4 sm:$0xff]   ;;  %v15436_v23 = vld [vmem:[%s16861_s15 + $0x50c] ss:$16 sps:$4 sm:$0xff]  }
 0x404   : > { %11040 = vmatpush2.bf16.msra.mxu0 %v15398_v52  ;;  %v15439_v52 = vld [vmem:[%s16861_s15 + $0x70c] ss:$16 sps:$4 sm:$0xff]  }
 0x405   : > { %11081 = vmatpush2.bf16.msra.mxu1 %v15401_v51  ;;  %11041 = vmatprep.subr.bf16.mxu0 %v15406_v42  ;;  %v15434_v51 = vld [vmem:[%s16861_s15 + $0x508] ss:$16 sps:$4 sm:$0xff]  }
 0x406   : > { %11082 = vmatprep.subr.bf16.mxu1 %v15409_v9  ;;  %v15437_v42 = vld [vmem:[%s16861_s15 + $0x708] ss:$16 sps:$4 sm:$0xff]   ;;  %v15442_v9 = vld [vmem:[%s16861_s15 + $0x8ec] ss:$16 sps:$4 sm:$0xff]  }
 0x408   : > { %11042 = vmatpush2.bf16.msra.mxu0 %v15404_v62  ;;  %v15445_v62 = vld [vmem:[%s16861_s15 + $0xaec] ss:$16 sps:$4 sm:$0xff]  }
 0x409   : > { %11083 = vmatpush2.bf16.msra.mxu1 %v15407_v2  ;;  %11043 = vmatprep.subr.bf16.mxu0 %v15412_v38  ;;  %v15440_v2 = vld [vmem:[%s16861_s15 + $0x8e8] ss:$16 sps:$4 sm:$0xff]  }
 0x40a   : > { %11084 = vmatprep.subr.bf16.mxu1 %v15415_v36  ;;  %v15443_v38 = vld [vmem:[%s16861_s15 + $0xae8] ss:$16 sps:$4 sm:$0xff]   ;;  %v15448_v36 = vld [vmem:[%s16861_s15 + $0x8cc] ss:$16 sps:$4 sm:$0xff]  }
 0x40c   : > { %11044 = vmatpush2.bf16.msra.mxu0 %v15410_v31  ;;  %v15451_v31 = vld [vmem:[%s16861_s15 + $0xacc] ss:$16 sps:$4 sm:$0xff]  }
 0x40d   : > { %11085 = vmatpush2.bf16.msra.mxu1 %v15413_v59  ;;  %11045 = vmatprep.subr.bf16.mxu0 %v15418_v3 }
 0x40e   : > { %11086 = vmatprep.subr.bf16.mxu1 %v15421_v8 }
 0x410   : > { %11046 = vmatpush2.bf16.msra.mxu0 %v15416_v58  ;;  %v15446_v58 = vld [vmem:[%s16861_s15 + $0x8c8] ss:$16 sps:$4 sm:$0xff]  }
 0x411   : > { %11087 = vmatpush2.bf16.msra.mxu1 %v15419_v15  ;;  %11047 = vmatprep.subr.bf16.mxu0 %v15424_v20  ;;  %v15449_v15 = vld [vmem:[%s16861_s15 + $0xac8] ss:$16 sps:$4 sm:$0xff]  }
 0x412   : > { %11088 = vmatprep.subr.bf16.mxu1 %v15427_v63 }
 0x414   : > { %11048 = vmatpush2.bf16.msra.mxu0 %v15422_v37  ;;  %v15454_v37 = vld [vmem:[%s16861_s15 + $0x8ac] ss:$16 sps:$4 sm:$0xff]  }
 0x415   : > { %11089 = vmatpush2.bf16.msra.mxu1 %v15425_v39  ;;  %11049 = vmatprep.subr.bf16.mxu0 %v15430_v34  ;;  %v15457_v39 = vld [vmem:[%s16861_s15 + $0xaac] ss:$16 sps:$4 sm:$0xff]  }
 0x416   : > { %11090 = vmatprep.subr.bf16.mxu1 %v15433_v48 }
 0x418   : > { %11050 = vmatpush2.bf16.msra.mxu0 %v15428_v19  ;;  %v15452_v19 = vld [vmem:[%s16861_s15 + $0x8a8] ss:$16 sps:$4 sm:$0xff]  }
 0x419   : > { %11091 = vmatpush2.bf16.msra.mxu1 %v15431_v25  ;;  %11051 = vmatprep.subr.bf16.mxu0 %v15436_v23  ;;  %v15455_v25 = vld [vmem:[%s16861_s15 + $0xaa8] ss:$16 sps:$4 sm:$0xff]  }
 0x41a   : > { %11092 = vmatprep.subr.bf16.mxu1 %v15439_v52 }
 0x41c   : > { %11052 = vmatpush2.bf16.msra.mxu0 %v15434_v51  ;;  %v15461_v51 = vld [vmem:[%s16861_s15 + $0xa88] ss:$16 sps:$4 sm:$0xff]  }
 0x41d   : > { %11093 = vmatpush2.bf16.msra.mxu1 %v15437_v42  ;;  %11103 = vmatprep.subr.bf16.mxu0 %v15442_v9  ;;  %v15466_v42 = vld [vmem:[%s16861_s15 + $0x86c] ss:$16 sps:$4 sm:$0xff]  }
 0x41e   : > { %11144 = vmatprep.subr.bf16.mxu1 %v15445_v62  ;;  %v15469_v9 = vld [vmem:[%s16861_s15 + $0xa6c] ss:$16 sps:$4 sm:$0xff]   ;;  %v15464_v62 = vld [vmem:[%s16861_s15 + $0x868] ss:$16 sps:$4 sm:$0xff]  }
 0x41f   : > { %v10809_v59 = vpop.f32.mrf.mxu0  ;;  %11054 = vmatmul.mubr.bf16.vlgmr.msra.gmra.mxu0 %v17049_v28 }
 0x420   : > { %v10850_v3 = vpop.f32.mrf.mxu1  ;;  %11095 = vmatmul.mubr.bf16.vlgmr.msra.gmra.mxu1 %v17056_v32  ;;  %v10810_v8 = vadd.f32 %v10809_v59, %v18099_v7  ;;  %11104 = vmatpush1.bf16.msra.mxu0 %v15440_v2  ;;  %v15467_v2 = vld [vmem:[%s16861_s15 + $0xa68] ss:$16 sps:$4 sm:$0xff]  }
 0x421   : > { %11145 = vmatpush1.bf16.msra.mxu1 %v15443_v38  ;;  %v10811_v20 = vpop.f32.mrf.mxu0  ;;  %11105 = vmatprep.subr.bf16.mxu0 %v15448_v36  ;;  %v15472_v38 = vld [vmem:[%s16861_s15 + $0x84c] ss:$16 sps:$4 sm:$0xff]   ;;  %v15473_v59 = vld [vmem:[%s16861_s15 + $0xa48] ss:$16 sps:$4 sm:$0xff]  }
 0x422   : > { %v10852_v63 = vpop.f32.mrf.mxu1  ;;  %11146 = vmatprep.subr.bf16.mxu1 %v15451_v31  ;;  %v18173_v34 = vadd.f32 %v10850_v3, %v10810_v8  ;;  %v10812_v28 = vadd.f32 %v10811_v20, %v18104_v45  ;;  %11135 = vmatprep.mubr.bf16.mxu0 %v17078_v43  ;;  %v15460_v43 = vld [vmem:[%s16861_s15 + $0x88c] ss:$16 sps:$4 sm:$0xff]   ;;  %v15458_v45 = vld [vmem:[%s16861_s15 + $0x888] ss:$16 sps:$4 sm:$0xff]  }
 0x423   : > { %11176 = vmatprep.mubr.bf16.mxu1 %v17083_v44  ;;  %v10813_v32 = vpop.f32.mrf.mxu0  ;;  %v15463_v44 = vld [vmem:[%s16861_s15 + $0xa8c] ss:$16 sps:$4 sm:$0xff]   ;;  %v15470_v31 = vld [vmem:[%s16861_s15 + $0x848] ss:$16 sps:$4 sm:$0xff]  }
 0x424   : > { %v10854_v7 = vpop.f32.mrf.mxu1  ;;  %v18178_v48 = vadd.f32 %v10852_v63, %v10812_v28  ;;  %11106 = vmatpush1.bf16.msra.mxu0 %v15446_v58  ;;  %v15475_v36 = vld [vmem:[%s16861_s15 + $0xa4c] ss:$16 sps:$4 sm:$0xff]   ;;  %v15476_v58 = vld [vmem:[%s16861_s15 + $0x828] ss:$16 sps:$4 sm:$0xff]  }
 0x425   : > { %11147 = vmatpush1.bf16.msra.mxu1 %v15449_v15  ;;  %v10814_v23 = vpop.f32.mrf.mxu0  ;;  %11107 = vmatprep.subr.bf16.mxu0 %v15454_v37  ;;  %v15478_v3 = vld [vmem:[%s16861_s15 + $0x82c] ss:$16 sps:$4 sm:$0xff]   ;;  %v15479_v15 = vld [vmem:[%s16861_s15 + $0xa28] ss:$16 sps:$4 sm:$0xff]  }
 0x426   : > { %v10855_v52 = vpop.f32.mrf.mxu1  ;;  %11148 = vmatprep.subr.bf16.mxu1 %v15457_v39  ;;  %v15481_v8 = vld [vmem:[%s16861_s15 + $0xa2c] ss:$16 sps:$4 sm:$0xff]   ;;  %v15482_v37 = vld [vmem:[%s16861_s15 + $0x808] ss:$16 sps:$4 sm:$0xff]  }
 0x427   : > { %v15484_v20 = vld [vmem:[%s16861_s15 + $0x80c] ss:$16 sps:$4 sm:$0xff]   ;;  %v15485_v39 = vld [vmem:[%s16861_s15 + $0xa08] ss:$16 sps:$4 sm:$0xff]  }
 0x428   : > { %11108 = vmatpush1.bf16.msra.mxu0 %v15452_v19  ;;  %v15487_v63 = vld [vmem:[%s16861_s15 + $0xa0c] ss:$16 sps:$4 sm:$0xff]   ;;  %v15488_v7 = vld [vmem:[%s16861_s15 + $0x9e8] ss:$16 sps:$4 sm:$0xff]  }
 0x429   : > { %11149 = vmatpush1.bf16.msra.mxu1 %v15455_v25  ;;  %11109 = vmatprep.subr.bf16.mxu0 %v15460_v43  ;;  %v15490_v28 = vld [vmem:[%s16861_s15 + $0x9ec] ss:$16 sps:$4 sm:$0xff]   ;;  %v15491_v19 = vld [vmem:[%s16861_s15 + $0xbe8] ss:$16 sps:$4 sm:$0xff]  }
 0x42a   : > { %11150 = vmatprep.subr.bf16.mxu1 %v15463_v44  ;;  %v15493_v32 = vld [vmem:[%s16861_s15 + $0xbec] ss:$16 sps:$4 sm:$0xff]   ;;  %v15494_v52 = vld [vmem:[%s16861_s15 + $0x9c8] ss:$16 sps:$4 sm:$0xff]  }
 0x42b   : > { %v15496_v25 = vld [vmem:[%s16861_s15 + $0x9cc] ss:$16 sps:$4 sm:$0xff]   ;;  %v15497_v43 = vld [vmem:[%s16861_s15 + $0xbc8] ss:$16 sps:$4 sm:$0xff]  }
 0x42c   : > { %11110 = vmatpush1.bf16.msra.mxu0 %v15458_v45  ;;  %v15499_v23 = vld [vmem:[%s16861_s15 + $0xbcc] ss:$16 sps:$4 sm:$0xff]  }
 0x42d   : > { %11151 = vmatpush1.bf16.msra.mxu1 %v15461_v51  ;;  %11111 = vmatprep.subr.bf16.mxu0 %v15466_v42  ;;  %v15502_v44 = vld [vmem:[%s16861_s15 + $0x9ac] ss:$16 sps:$4 sm:$0xff]   ;;  %v15500_v51 = vld [vmem:[%s16861_s15 + $0x9a8] ss:$16 sps:$4 sm:$0xff]  }
 0x42e   : > { %11152 = vmatprep.subr.bf16.mxu1 %v15469_v9  ;;  %v15505_v45 = vld [vmem:[%s16861_s15 + $0xbac] ss:$16 sps:$4 sm:$0xff]   ;;  %v15503_v42 = vld [vmem:[%s16861_s15 + $0xba8] ss:$16 sps:$4 sm:$0xff]  }
 0x42f   : > { %v15508_v9 = vld [vmem:[%s16861_s15 + $0x98c] ss:$16 sps:$4 sm:$0xff]  }
 0x430   : > { %11112 = vmatpush1.bf16.msra.mxu0 %v15464_v62  ;;  %v15511_v62 = vld [vmem:[%s16861_s15 + $0xb8c] ss:$16 sps:$4 sm:$0xff]  }
 0x431   : > { %11153 = vmatpush1.bf16.msra.mxu1 %v15467_v2  ;;  %11113 = vmatprep.subr.bf16.mxu0 %v15472_v38  ;;  %v15506_v2 = vld [vmem:[%s16861_s15 + $0x988] ss:$16 sps:$4 sm:$0xff]  }
 0x432   : > { %11154 = vmatprep.subr.bf16.mxu1 %v15475_v36  ;;  %v15509_v38 = vld [vmem:[%s16861_s15 + $0xb88] ss:$16 sps:$4 sm:$0xff]   ;;  %v15514_v36 = vld [vmem:[%s16861_s15 + $0x96c] ss:$16 sps:$4 sm:$0xff]  }
 0x434   : > { %11114 = vmatpush1.bf16.msra.mxu0 %v15470_v31  ;;  %v15517_v31 = vld [vmem:[%s16861_s15 + $0xb6c] ss:$16 sps:$4 sm:$0xff]  }
 0x435   : > { %11155 = vmatpush1.bf16.msra.mxu1 %v15473_v59  ;;  %11115 = vmatprep.subr.bf16.mxu0 %v15478_v3  ;;  %v15512_v59 = vld [vmem:[%s16861_s15 + $0x968] ss:$16 sps:$4 sm:$0xff]  }
 0x436   : > { %11156 = vmatprep.subr.bf16.mxu1 %v15481_v8  ;;  %v15515_v3 = vld [vmem:[%s16861_s15 + $0xb68] ss:$16 sps:$4 sm:$0xff]   ;;  %v15520_v8 = vld [vmem:[%s16861_s15 + $0x94c] ss:$16 sps:$4 sm:$0xff]  }
 0x438   : > { %11116 = vmatpush1.bf16.msra.mxu0 %v15476_v58  ;;  %v15523_v58 = vld [vmem:[%s16861_s15 + $0xb4c] ss:$16 sps:$4 sm:$0xff]  }
 0x439   : > { %11157 = vmatpush1.bf16.msra.mxu1 %v15479_v15  ;;  %11117 = vmatprep.subr.bf16.mxu0 %v15484_v20  ;;  %v15518_v15 = vld [vmem:[%s16861_s15 + $0x948] ss:$16 sps:$4 sm:$0xff]  }
 0x43a   : > { %11158 = vmatprep.subr.bf16.mxu1 %v15487_v63  ;;  %v15521_v20 = vld [vmem:[%s16861_s15 + $0xb48] ss:$16 sps:$4 sm:$0xff]   ;;  %v15526_v63 = vld [vmem:[%s16861_s15 + $0x92c] ss:$16 sps:$4 sm:$0xff]  }
 0x43c   : > { %11118 = vmatpush1.bf16.msra.mxu0 %v15482_v37  ;;  %v15529_v37 = vld [vmem:[%s16861_s15 + $0xb2c] ss:$16 sps:$4 sm:$0xff]  }
 0x43d   : > { %11159 = vmatpush1.bf16.msra.mxu1 %v15485_v39  ;;  %11119 = vmatprep.subr.bf16.mxu0 %v15490_v28  ;;  %v15524_v39 = vld [vmem:[%s16861_s15 + $0x928] ss:$16 sps:$4 sm:$0xff]  }
 0x43e   : > { %11160 = vmatprep.subr.bf16.mxu1 %v15493_v32  ;;  %v15527_v28 = vld [vmem:[%s16861_s15 + $0xb28] ss:$16 sps:$4 sm:$0xff]   ;;  %v15532_v32 = vld [vmem:[%s16861_s15 + $0x90c] ss:$16 sps:$4 sm:$0xff]  }
 0x440   : > { %11120 = vmatpush2.bf16.msra.mxu0 %v15488_v7  ;;  %v15535_v7 = vld [vmem:[%s16861_s15 + $0xb0c] ss:$16 sps:$4 sm:$0xff]  }
 0x441   : > { %11161 = vmatpush2.bf16.msra.mxu1 %v15491_v19  ;;  %11121 = vmatprep.subr.bf16.mxu0 %v15496_v25  ;;  %v15530_v19 = vld [vmem:[%s16861_s15 + $0x908] ss:$16 sps:$4 sm:$0xff]  }
 0x442   : > { %11162 = vmatprep.subr.bf16.mxu1 %v15499_v23  ;;  %v15533_v25 = vld [vmem:[%s16861_s15 + $0xb08] ss:$16 sps:$4 sm:$0xff]   ;;  %v15538_v23 = vld [vmem:[%s16861_s15 + $0xcec] ss:$16 sps:$4 sm:$0xff]  }
 0x444   : > { %11122 = vmatpush2.bf16.msra.mxu0 %v15494_v52  ;;  %v15541_v52 = vld [vmem:[%s16861_s15 + $0xeec] ss:$16 sps:$4 sm:$0xff]  }
 0x445   : > { %11163 = vmatpush2.bf16.msra.mxu1 %v15497_v43  ;;  %11123 = vmatprep.subr.bf16.mxu0 %v15502_v44  ;;  %v15536_v43 = vld [vmem:[%s16861_s15 + $0xce8] ss:$16 sps:$4 sm:$0xff]  }
 0x446   : > { %11164 = vmatprep.subr.bf16.mxu1 %v15505_v45  ;;  %v15539_v44 = vld [vmem:[%s16861_s15 + $0xee8] ss:$16 sps:$4 sm:$0xff]   ;;  %v15544_v45 = vld [vmem:[%s16861_s15 + $0xccc] ss:$16 sps:$4 sm:$0xff]  }
 0x448   : > { %11124 = vmatpush2.bf16.msra.mxu0 %v15500_v51  ;;  %v15547_v51 = vld [vmem:[%s16861_s15 + $0xecc] ss:$16 sps:$4 sm:$0xff]  }
 0x449   : > { %11165 = vmatpush2.bf16.msra.mxu1 %v15503_v42  ;;  %11125 = vmatprep.subr.bf16.mxu0 %v15508_v9 }
 0x44a   : > { %11166 = vmatprep.subr.bf16.mxu1 %v15511_v62 }
 0x44c   : > { %11126 = vmatpush2.bf16.msra.mxu0 %v15506_v2  ;;  %v15542_v2 = vld [vmem:[%s16861_s15 + $0xcc8] ss:$16 sps:$4 sm:$0xff]  }
 0x44d   : > { %11167 = vmatpush2.bf16.msra.mxu1 %v15509_v38  ;;  %11127 = vmatprep.subr.bf16.mxu0 %v15514_v36  ;;  %v15545_v38 = vld [vmem:[%s16861_s15 + $0xec8] ss:$16 sps:$4 sm:$0xff]  }
 0x44e   : > { %11168 = vmatprep.subr.bf16.mxu1 %v15517_v31 }
 0x450   : > { %11128 = vmatpush2.bf16.msra.mxu0 %v15512_v59  ;;  %v15550_v59 = vld [vmem:[%s16861_s15 + $0xcac] ss:$16 sps:$4 sm:$0xff]  }
 0x451   : > { %11169 = vmatpush2.bf16.msra.mxu1 %v15515_v3  ;;  %11129 = vmatprep.subr.bf16.mxu0 %v15520_v8  ;;  %v15553_v3 = vld [vmem:[%s16861_s15 + $0xeac] ss:$16 sps:$4 sm:$0xff]  }
 0x452   : > { %11170 = vmatprep.subr.bf16.mxu1 %v15523_v58 }
 0x454   : > { %11130 = vmatpush2.bf16.msra.mxu0 %v15518_v15  ;;  %v15548_v15 = vld [vmem:[%s16861_s15 + $0xca8] ss:$16 sps:$4 sm:$0xff]  }
 0x455   : > { %11171 = vmatpush2.bf16.msra.mxu1 %v15521_v20  ;;  %11131 = vmatprep.subr.bf16.mxu0 %v15526_v63  ;;  %v15551_v20 = vld [vmem:[%s16861_s15 + $0xea8] ss:$16 sps:$4 sm:$0xff]  }
 0x456   : > { %11172 = vmatprep.subr.bf16.mxu1 %v15529_v37 }
 0x458   : > { %11132 = vmatpush2.bf16.msra.mxu0 %v15524_v39  ;;  %v15554_v39 = vld [vmem:[%s16861_s15 + $0xc88] ss:$16 sps:$4 sm:$0xff]  }
 0x459   : > { %11173 = vmatpush2.bf16.msra.mxu1 %v15527_v28  ;;  %11133 = vmatprep.subr.bf16.mxu0 %v15532_v32  ;;  %v15557_v28 = vld [vmem:[%s16861_s15 + $0xe88] ss:$16 sps:$4 sm:$0xff]   ;;  %v15562_v32 = vld [vmem:[%s16861_s15 + $0xc6c] ss:$16 sps:$4 sm:$0xff]  }
 0x45a   : > { %11174 = vmatprep.subr.bf16.mxu1 %v15535_v7  ;;  %v15565_v7 = vld [vmem:[%s16861_s15 + $0xe6c] ss:$16 sps:$4 sm:$0xff]  }
 0x45c   : > { %11134 = vmatpush2.bf16.msra.mxu0 %v15530_v19  ;;  %v15560_v19 = vld [vmem:[%s16861_s15 + $0xc68] ss:$16 sps:$4 sm:$0xff]  }
 0x45d   : > { %11175 = vmatpush2.bf16.msra.mxu1 %v15533_v25  ;;  %11185 = vmatprep.subr.bf16.mxu0 %v15538_v23  ;;  %v15563_v25 = vld [vmem:[%s16861_s15 + $0xe68] ss:$16 sps:$4 sm:$0xff]   ;;  %v15568_v23 = vld [vmem:[%s16861_s15 + $0xc4c] ss:$16 sps:$4 sm:$0xff]  }
 0x45e   : > { %11226 = vmatprep.subr.bf16.mxu1 %v15541_v52  ;;  %v15571_v52 = vld [vmem:[%s16861_s15 + $0xe4c] ss:$16 sps:$4 sm:$0xff]  }
 0x45f   : > { %v10891_v42 = vpop.f32.mrf.mxu0  ;;  %11136 = vmatmul.mubr.bf16.vlgmr.msra.gmra.mxu0 %v17147_v50 }
 0x460   : > { %v10932_v9 = vpop.f32.mrf.mxu1  ;;  %11177 = vmatmul.mubr.bf16.vlgmr.msra.gmra.mxu1 %v17158_v57  ;;  %v10892_v62 = vadd.f32 %v10891_v42, %v18173_v34  ;;  %11186 = vmatpush1.bf16.msra.mxu0 %v15536_v43  ;;  %v15566_v43 = vld [vmem:[%s16861_s15 + $0xc48] ss:$16 sps:$4 sm:$0xff]  }
 0x461   : > { %11227 = vmatpush1.bf16.msra.mxu1 %v15539_v44  ;;  %v10893_v36 = vpop.f32.mrf.mxu0  ;;  %11187 = vmatprep.subr.bf16.mxu0 %v15544_v45  ;;  %v15569_v44 = vld [vmem:[%s16861_s15 + $0xe48] ss:$16 sps:$4 sm:$0xff]   ;;  %v15574_v45 = vld [vmem:[%s16861_s15 + $0xc2c] ss:$16 sps:$4 sm:$0xff]  }
 0x462   : > { %v10934_v31 = vpop.f32.mrf.mxu1  ;;  %11228 = vmatprep.subr.bf16.mxu1 %v15547_v51  ;;  %v18247_v8 = vadd.f32 %v10932_v9, %v10892_v62  ;;  %v10894_v50 = vadd.f32 %v10893_v36, %v18178_v48  ;;  %11217 = vmatprep.mubr.bf16.mxu0 %v17154_v56  ;;  %v15556_v56 = vld [vmem:[%s16861_s15 + $0xc8c] ss:$16 sps:$4 sm:$0xff]   ;;  %v15572_v42 = vld [vmem:[%s16861_s15 + $0xc28] ss:$16 sps:$4 sm:$0xff]  }
 0x463   : > { %11258 = vmatprep.mubr.bf16.mxu1 %v17166_v61  ;;  %v10895_v57 = vpop.f32.mrf.mxu0  ;;  %v15559_v61 = vld [vmem:[%s16861_s15 + $0xe8c] ss:$16 sps:$4 sm:$0xff]   ;;  %v15575_v9 = vld [vmem:[%s16861_s15 + $0xe28] ss:$16 sps:$4 sm:$0xff]  }
 0x464   : > { %v10936_v34 = vpop.f32.mrf.mxu1  ;;  %v18252_v58 = vadd.f32 %v10934_v31, %v10894_v50  ;;  %11188 = vmatpush1.bf16.msra.mxu0 %v15542_v2  ;;  %v15577_v51 = vld [vmem:[%s16861_s15 + $0xe2c] ss:$16 sps:$4 sm:$0xff]   ;;  %v15581_v36 = vld [vmem:[%s16861_s15 + $0xe08] ss:$16 sps:$4 sm:$0xff]  }
 0x465   : > { %11229 = vmatpush1.bf16.msra.mxu1 %v15545_v38  ;;  %v10896_v63 = vpop.f32.mrf.mxu0  ;;  %11189 = vmatprep.subr.bf16.mxu0 %v15550_v59  ;;  %v15580_v62 = vld [vmem:[%s16861_s15 + $0xc0c] ss:$16 sps:$4 sm:$0xff]   ;;  %v15578_v38 = vld [vmem:[%s16861_s15 + $0xc08] ss:$16 sps:$4 sm:$0xff]  }
 0x466   : > { %v10937_v37 = vpop.f32.mrf.mxu1  ;;  %11230 = vmatprep.subr.bf16.mxu1 %v15553_v3  ;;  %v11927_v48 = vcombine.low %v18247_v8, %v18252_v58  ;;  %v15583_v2 = vld [vmem:[%s16861_s15 + $0xe0c] ss:$16 sps:$4 sm:$0xff]   ;;  %v15584_v3 = vld [vmem:[%s16861_s15 + $0xde8] ss:$16 sps:$4 sm:$0xff]  }
 0x467   : > { %v15586_v31 = vld [vmem:[%s16861_s15 + $0xdec] ss:$16 sps:$4 sm:$0xff]   ;;  %v15587_v50 = vld [vmem:[%s16861_s15 + $0xfe8] ss:$16 sps:$4 sm:$0xff]  }
 0x468   : > { %11190 = vmatpush1.bf16.msra.mxu0 %v15548_v15  ;;  %v15589_v59 = vld [vmem:[%s16861_s15 + $0xfec] ss:$16 sps:$4 sm:$0xff]   ;;  %v15590_v15 = vld [vmem:[%s16861_s15 + $0xdc8] ss:$16 sps:$4 sm:$0xff]  }
 0x469   : > { %11231 = vmatpush1.bf16.msra.mxu1 %v15551_v20  ;;  %11191 = vmatprep.subr.bf16.mxu0 %v15556_v56  ;;  %v15592_v57 = vld [vmem:[%s16861_s15 + $0xdcc] ss:$16 sps:$4 sm:$0xff]   ;;  %v15593_v20 = vld [vmem:[%s16861_s15 + $0xfc8] ss:$16 sps:$4 sm:$0xff]  }
 0x46a   : > { %11232 = vmatprep.subr.bf16.mxu1 %v15559_v61  ;;  %v15595_v34 = vld [vmem:[%s16861_s15 + $0xfcc] ss:$16 sps:$4 sm:$0xff]   ;;  %v15596_v56 = vld [vmem:[%s16861_s15 + $0xda8] ss:$16 sps:$4 sm:$0xff]  }
 0x46b   : > { %v15598_v63 = vld [vmem:[%s16861_s15 + $0xdac] ss:$16 sps:$4 sm:$0xff]   ;;  %v15599_v61 = vld [vmem:[%s16861_s15 + $0xfa8] ss:$16 sps:$4 sm:$0xff]  }
 0x46c   : > { %11192 = vmatpush1.bf16.msra.mxu0 %v15554_v39  ;;  %v15601_v37 = vld [vmem:[%s16861_s15 + $0xfac] ss:$16 sps:$4 sm:$0xff]  }
 0x46d   : > { %11233 = vmatpush1.bf16.msra.mxu1 %v15557_v28  ;;  %11193 = vmatprep.subr.bf16.mxu0 %v15562_v32  ;;  %v15604_v39 = vld [vmem:[%s16861_s15 + $0xd8c] ss:$16 sps:$4 sm:$0xff]   ;;  %v15602_v32 = vld [vmem:[%s16861_s15 + $0xd88] ss:$16 sps:$4 sm:$0xff]  }
 0x46e   : > { %11234 = vmatprep.subr.bf16.mxu1 %v15565_v7  ;;  %v15607_v28 = vld [vmem:[%s16861_s15 + $0xf8c] ss:$16 sps:$4 sm:$0xff]   ;;  %v15605_v7 = vld [vmem:[%s16861_s15 + $0xf88] ss:$16 sps:$4 sm:$0xff]  }
 0x470   : > { %11194 = vmatpush1.bf16.msra.mxu0 %v15560_v19  ;;  %v15610_v19 = vld [vmem:[%s16861_s15 + $0xd6c] ss:$16 sps:$4 sm:$0xff]  }
 0x471   : > { %11235 = vmatpush1.bf16.msra.mxu1 %v15563_v25  ;;  %11195 = vmatprep.subr.bf16.mxu0 %v15568_v23  ;;  %v15613_v25 = vld [vmem:[%s16861_s15 + $0xf6c] ss:$16 sps:$4 sm:$0xff]   ;;  %v15608_v23 = vld [vmem:[%s16861_s15 + $0xd68] ss:$16 sps:$4 sm:$0xff]  }
 0x472   : > { %11236 = vmatprep.subr.bf16.mxu1 %v15571_v52  ;;  %v15611_v52 = vld [vmem:[%s16861_s15 + $0xf68] ss:$16 sps:$4 sm:$0xff]  }
 0x474   : > { %11196 = vmatpush1.bf16.msra.mxu0 %v15566_v43  ;;  %v15616_v43 = vld [vmem:[%s16861_s15 + $0xd4c] ss:$16 sps:$4 sm:$0xff]  }
 0x475   : > { %11237 = vmatpush1.bf16.msra.mxu1 %v15569_v44  ;;  %11197 = vmatprep.subr.bf16.mxu0 %v15574_v45  ;;  %v15619_v44 = vld [vmem:[%s16861_s15 + $0xf4c] ss:$16 sps:$4 sm:$0xff]   ;;  %v15614_v45 = vld [vmem:[%s16861_s15 + $0xd48] ss:$16 sps:$4 sm:$0xff]  }
 0x476   : > { %11238 = vmatprep.subr.bf16.mxu1 %v15577_v51  ;;  %v15617_v51 = vld [vmem:[%s16861_s15 + $0xf48] ss:$16 sps:$4 sm:$0xff]  }
 0x478   : > { %11198 = vmatpush1.bf16.msra.mxu0 %v15572_v42  ;;  %v15622_v42 = vld [vmem:[%s16861_s15 + $0xd2c] ss:$16 sps:$4 sm:$0xff]  }
 0x479   : > { %11239 = vmatpush1.bf16.msra.mxu1 %v15575_v9  ;;  %11199 = vmatprep.subr.bf16.mxu0 %v15580_v62  ;;  %v15625_v9 = vld [vmem:[%s16861_s15 + $0xf2c] ss:$16 sps:$4 sm:$0xff]   ;;  %v15620_v62 = vld [vmem:[%s16861_s15 + $0xd28] ss:$16 sps:$4 sm:$0xff]  }
 0x47a   : > { %11240 = vmatprep.subr.bf16.mxu1 %v15583_v2  ;;  %v15623_v2 = vld [vmem:[%s16861_s15 + $0xf28] ss:$16 sps:$4 sm:$0xff]  }
 0x47c   : > { %11200 = vmatpush1.bf16.msra.mxu0 %v15578_v38  ;;  %v15628_v38 = vld [vmem:[%s16861_s15 + $0xd0c] ss:$16 sps:$4 sm:$0xff]  }
 0x47d   : > { %11241 = vmatpush1.bf16.msra.mxu1 %v15581_v36  ;;  %11201 = vmatprep.subr.bf16.mxu0 %v15586_v31  ;;  %v15631_v36 = vld [vmem:[%s16861_s15 + $0xf0c] ss:$16 sps:$4 sm:$0xff]   ;;  %v15626_v31 = vld [vmem:[%s16861_s15 + $0xd08] ss:$16 sps:$4 sm:$0xff]  }
 0x47e   : > { %11242 = vmatprep.subr.bf16.mxu1 %v15589_v59  ;;  %v15629_v59 = vld [vmem:[%s16861_s15 + $0xf08] ss:$16 sps:$4 sm:$0xff]  }
 0x480   : > { %11202 = vmatpush2.bf16.msra.mxu0 %v15584_v3  ;;  %v15634_v3 = vld [vmem:[%s16861_s15 + $0x10ec] ss:$16 sps:$4 sm:$0xff]  }
 0x481   : > { %11243 = vmatpush2.bf16.msra.mxu1 %v15587_v50  ;;  %11203 = vmatprep.subr.bf16.mxu0 %v15592_v57  ;;  %v15637_v50 = vld [vmem:[%s16861_s15 + $0x12ec] ss:$16 sps:$4 sm:$0xff]   ;;  %v15632_v57 = vld [vmem:[%s16861_s15 + $0x10e8] ss:$16 sps:$4 sm:$0xff]  }
 0x482   : > { %11244 = vmatprep.subr.bf16.mxu1 %v15595_v34  ;;  %v15635_v34 = vld [vmem:[%s16861_s15 + $0x12e8] ss:$16 sps:$4 sm:$0xff]  }
 0x484   : > { %11204 = vmatpush2.bf16.msra.mxu0 %v15590_v15  ;;  %v15640_v15 = vld [vmem:[%s16861_s15 + $0x10cc] ss:$16 sps:$4 sm:$0xff]  }
 0x485   : > { %11245 = vmatpush2.bf16.msra.mxu1 %v15593_v20  ;;  %11205 = vmatprep.subr.bf16.mxu0 %v15598_v63  ;;  %v15643_v20 = vld [vmem:[%s16861_s15 + $0x12cc] ss:$16 sps:$4 sm:$0xff]  }
 0x486   : > { %11246 = vmatprep.subr.bf16.mxu1 %v15601_v37 }
 0x488   : > { %11206 = vmatpush2.bf16.msra.mxu0 %v15596_v56 }
 0x489   : > { %11247 = vmatpush2.bf16.msra.mxu1 %v15599_v61  ;;  %11207 = vmatprep.subr.bf16.mxu0 %v15604_v39  ;;  %v15638_v61 = vld [vmem:[%s16861_s15 + $0x10c8] ss:$16 sps:$4 sm:$0xff]  }
 0x48a   : > { %11248 = vmatprep.subr.bf16.mxu1 %v15607_v28  ;;  %v15641_v39 = vld [vmem:[%s16861_s15 + $0x12c8] ss:$16 sps:$4 sm:$0xff]  }
 0x48c   : > { %11208 = vmatpush2.bf16.msra.mxu0 %v15602_v32 }
 0x48d   : > { %11249 = vmatpush2.bf16.msra.mxu1 %v15605_v7  ;;  %11209 = vmatprep.subr.bf16.mxu0 %v15610_v19  ;;  %v15646_v7 = vld [vmem:[%s16861_s15 + $0x10ac] ss:$16 sps:$4 sm:$0xff]  }
 0x48e   : > { %11250 = vmatprep.subr.bf16.mxu1 %v15613_v25  ;;  %v15649_v19 = vld [vmem:[%s16861_s15 + $0x12ac] ss:$16 sps:$4 sm:$0xff]  }
 0x490   : > { %11210 = vmatpush2.bf16.msra.mxu0 %v15608_v23  ;;  %v15644_v23 = vld [vmem:[%s16861_s15 + $0x10a8] ss:$16 sps:$4 sm:$0xff]  }
 0x491   : > { %11251 = vmatpush2.bf16.msra.mxu1 %v15611_v52  ;;  %11211 = vmatprep.subr.bf16.mxu0 %v15616_v43  ;;  %v15647_v52 = vld [vmem:[%s16861_s15 + $0x12a8] ss:$16 sps:$4 sm:$0xff]  }
 0x492   : > { %11252 = vmatprep.subr.bf16.mxu1 %v15619_v44 }
 0x494   : > { %11212 = vmatpush2.bf16.msra.mxu0 %v15614_v45  ;;  %v15652_v45 = vld [vmem:[%s16861_s15 + $0x108c] ss:$16 sps:$4 sm:$0xff]  }
 0x495   : > { %11253 = vmatpush2.bf16.msra.mxu1 %v15617_v51  ;;  %11213 = vmatprep.subr.bf16.mxu0 %v15622_v42  ;;  %v15653_v51 = vld [vmem:[%s16861_s15 + $0x1288] ss:$16 sps:$4 sm:$0xff]   ;;  %v15658_v42 = vld [vmem:[%s16861_s15 + $0x106c] ss:$16 sps:$4 sm:$0xff]  }
 0x496   : > { %11254 = vmatprep.subr.bf16.mxu1 %v15625_v9  ;;  %v15661_v9 = vld [vmem:[%s16861_s15 + $0x126c] ss:$16 sps:$4 sm:$0xff]  }
 0x498   : > { %11214 = vmatpush2.bf16.msra.mxu0 %v15620_v62  ;;  %v15656_v62 = vld [vmem:[%s16861_s15 + $0x1068] ss:$16 sps:$4 sm:$0xff]  }
 0x499   : > { %11255 = vmatpush2.bf16.msra.mxu1 %v15623_v2  ;;  %11215 = vmatprep.subr.bf16.mxu0 %v15628_v38  ;;  %v15659_v2 = vld [vmem:[%s16861_s15 + $0x1268] ss:$16 sps:$4 sm:$0xff]   ;;  %v15664_v38 = vld [vmem:[%s16861_s15 + $0x104c] ss:$16 sps:$4 sm:$0xff]  }
 0x49a   : > { %11256 = vmatprep.subr.bf16.mxu1 %v15631_v36  ;;  %v15667_v36 = vld [vmem:[%s16861_s15 + $0x124c] ss:$16 sps:$4 sm:$0xff]  }
 0x49c   : > { %11216 = vmatpush2.bf16.msra.mxu0 %v15626_v31  ;;  %v15662_v31 = vld [vmem:[%s16861_s15 + $0x1048] ss:$16 sps:$4 sm:$0xff]  }
 0x49d   : > { %11257 = vmatpush2.bf16.msra.mxu1 %v15629_v59  ;;  %11267 = vmatprep.subr.bf16.mxu0 %v15634_v3  ;;  %v15665_v59 = vld [vmem:[%s16861_s15 + $0x1248] ss:$16 sps:$4 sm:$0xff]   ;;  %v15670_v3 = vld [vmem:[%s16861_s15 + $0x102c] ss:$16 sps:$4 sm:$0xff]  }
 0x49e   : > { %11308 = vmatprep.subr.bf16.mxu1 %v15637_v50  ;;  %v15673_v50 = vld [vmem:[%s16861_s15 + $0x122c] ss:$16 sps:$4 sm:$0xff]  }
 0x49f   : > { %v10973_v63 = vpop.f32.mrf.mxu0  ;;  %11218 = vmatmul.mubr.bf16.vlgmr.msra.gmra.mxu0 %v17240_v14 }
 0x4a0   : > { %v11014_v37 = vpop.f32.mrf.mxu1  ;;  %11259 = vmatmul.mubr.bf16.vlgmr.msra.gmra.mxu1 %v17250_v22  ;;  %11268 = vmatpush1.bf16.msra.mxu0 %v15632_v57  ;;  %v15668_v57 = vld [vmem:[%s16861_s15 + $0x1028] ss:$16 sps:$4 sm:$0xff]  }
 0x4a1   : > { %v18318_v56 = vadd.f32 %v11014_v37, %v10973_v63  ;;  %11309 = vmatpush1.bf16.msra.mxu1 %v15635_v34  ;;  %v10975_v28 = vpop.f32.mrf.mxu0  ;;  %11269 = vmatprep.subr.bf16.mxu0 %v15640_v15  ;;  %v15671_v34 = vld [vmem:[%s16861_s15 + $0x1228] ss:$16 sps:$4 sm:$0xff]   ;;  %v15676_v15 = vld [vmem:[%s16861_s15 + $0x100c] ss:$16 sps:$4 sm:$0xff]  }
 0x4a2   : > { %v11016_v32 = vpop.f32.mrf.mxu1  ;;  %11310 = vmatprep.subr.bf16.mxu1 %v15643_v20  ;;  %11299 = vmatprep.mubr.bf16.mxu0 %v17246_v21  ;;  %v15655_v21 = vld [vmem:[%s16861_s15 + $0x128c] ss:$16 sps:$4 sm:$0xff]   ;;  %v15674_v63 = vld [vmem:[%s16861_s15 + $0x1008] ss:$16 sps:$4 sm:$0xff]  }
 0x4a3   : > { %v18324_v25 = vadd.f32 %v11016_v32, %v10975_v28  ;;  %11340 = vmatprep.mubr.bf16.mxu1 %v17258_v27  ;;  %v10977_v14 = vpop.f32.mrf.mxu0  ;;  %v15650_v27 = vld [vmem:[%s16861_s15 + $0x1088] ss:$16 sps:$4 sm:$0xff]   ;;  %v15679_v20 = vld [vmem:[%s16861_s15 + $0x120c] ss:$16 sps:$4 sm:$0xff]  }
 0x4a4   : > { %v11018_v22 = vpop.f32.mrf.mxu1  ;;  %11270 = vmatpush1.bf16.msra.mxu0 %v15638_v61  ;;  %v15677_v37 = vld [vmem:[%s16861_s15 + $0x1208] ss:$16 sps:$4 sm:$0xff]   ;;  %v15682_v61 = vld [vmem:[%s16861_s15 + $0x11ec] ss:$16 sps:$4 sm:$0xff]  }
 0x4a5   : > { %11311 = vmatpush1.bf16.msra.mxu1 %v15641_v39  ;;  %v10978_v43 = vpop.f32.mrf.mxu0  ;;  %11271 = vmatprep.subr.bf16.mxu0 %v15646_v7  ;;  %v15685_v39 = vld [vmem:[%s16861_s15 + $0x13ec] ss:$16 sps:$4 sm:$0xff]   ;;  %v15680_v28 = vld [vmem:[%s16861_s15 + $0x11e8] ss:$16 sps:$4 sm:$0xff]  }
 0x4a6   : > { %v11019_v44 = vpop.f32.mrf.mxu1  ;;  %11312 = vmatprep.subr.bf16.mxu1 %v15649_v19  ;;  %v15683_v32 = vld [vmem:[%s16861_s15 + $0x13e8] ss:$16 sps:$4 sm:$0xff]   ;;  %v15688_v7 = vld [vmem:[%s16861_s15 + $0x11cc] ss:$16 sps:$4 sm:$0xff]  }
 0x4a7   : > { %v15691_v19 = vld [vmem:[%s16861_s15 + $0x13cc] ss:$16 sps:$4 sm:$0xff]   ;;  %v15686_v14 = vld [vmem:[%s16861_s15 + $0x11c8] ss:$16 sps:$4 sm:$0xff]  }
 0x4a8   : > { %11272 = vmatpush1.bf16.msra.mxu0 %v15644_v23  ;;  %v15689_v22 = vld [vmem:[%s16861_s15 + $0x13c8] ss:$16 sps:$4 sm:$0xff]   ;;  %v15694_v23 = vld [vmem:[%s16861_s15 + $0x11ac] ss:$16 sps:$4 sm:$0xff]  }
 0x4a9   : > { %11313 = vmatpush1.bf16.msra.mxu1 %v15647_v52  ;;  %11273 = vmatprep.subr.bf16.mxu0 %v15652_v45  ;;  %v15697_v52 = vld [vmem:[%s16861_s15 + $0x13ac] ss:$16 sps:$4 sm:$0xff]   ;;  %v15692_v43 = vld [vmem:[%s16861_s15 + $0x11a8] ss:$16 sps:$4 sm:$0xff]  }
 0x4aa   : > { %11314 = vmatprep.subr.bf16.mxu1 %v15655_v21  ;;  %v15695_v44 = vld [vmem:[%s16861_s15 + $0x13a8] ss:$16 sps:$4 sm:$0xff]   ;;  %v15700_v45 = vld [vmem:[%s16861_s15 + $0x118c] ss:$16 sps:$4 sm:$0xff]  }
 0x4ab   : > { %v15703_v21 = vld [vmem:[%s16861_s15 + $0x138c] ss:$16 sps:$4 sm:$0xff]  }
 0x4ac   : > { %11274 = vmatpush1.bf16.msra.mxu0 %v15650_v27  ;;  %v15698_v27 = vld [vmem:[%s16861_s15 + $0x1188] ss:$16 sps:$4 sm:$0xff]  }
 0x4ad   : > { %11315 = vmatpush1.bf16.msra.mxu1 %v15653_v51  ;;  %11275 = vmatprep.subr.bf16.mxu0 %v15658_v42  ;;  %v15701_v51 = vld [vmem:[%s16861_s15 + $0x1388] ss:$16 sps:$4 sm:$0xff]   ;;  %v15706_v42 = vld [vmem:[%s16861_s15 + $0x116c] ss:$16 sps:$4 sm:$0xff]  }
 0x4ae   : > { %11316 = vmatprep.subr.bf16.mxu1 %v15661_v9  ;;  %v15709_v9 = vld [vmem:[%s16861_s15 + $0x136c] ss:$16 sps:$4 sm:$0xff]  }
 0x4b0   : > { %11276 = vmatpush1.bf16.msra.mxu0 %v15656_v62  ;;  %v15704_v62 = vld [vmem:[%s16861_s15 + $0x1168] ss:$16 sps:$4 sm:$0xff]  }
 0x4b1   : > { %11317 = vmatpush1.bf16.msra.mxu1 %v15659_v2  ;;  %11277 = vmatprep.subr.bf16.mxu0 %v15664_v38  ;;  %v15707_v2 = vld [vmem:[%s16861_s15 + $0x1368] ss:$16 sps:$4 sm:$0xff]   ;;  %v15712_v38 = vld [vmem:[%s16861_s15 + $0x114c] ss:$16 sps:$4 sm:$0xff]  }
 0x4b2   : > { %11318 = vmatprep.subr.bf16.mxu1 %v15667_v36  ;;  %v15715_v36 = vld [vmem:[%s16861_s15 + $0x134c] ss:$16 sps:$4 sm:$0xff]  }
 0x4b4   : > { %11278 = vmatpush1.bf16.msra.mxu0 %v15662_v31  ;;  %v15710_v31 = vld [vmem:[%s16861_s15 + $0x1148] ss:$16 sps:$4 sm:$0xff]  }
 0x4b5   : > { %11319 = vmatpush1.bf16.msra.mxu1 %v15665_v59  ;;  %11279 = vmatprep.subr.bf16.mxu0 %v15670_v3  ;;  %v15713_v59 = vld [vmem:[%s16861_s15 + $0x1348] ss:$16 sps:$4 sm:$0xff]   ;;  %v15718_v3 = vld [vmem:[%s16861_s15 + $0x112c] ss:$16 sps:$4 sm:$0xff]  }
 0x4b6   : > { %11320 = vmatprep.subr.bf16.mxu1 %v15673_v50  ;;  %v15721_v50 = vld [vmem:[%s16861_s15 + $0x132c] ss:$16 sps:$4 sm:$0xff]  }
 0x4b8   : > { %11280 = vmatpush1.bf16.msra.mxu0 %v15668_v57  ;;  %v15716_v57 = vld [vmem:[%s16861_s15 + $0x1128] ss:$16 sps:$4 sm:$0xff]  }
 0x4b9   : > { %11321 = vmatpush1.bf16.msra.mxu1 %v15671_v34  ;;  %11281 = vmatprep.subr.bf16.mxu0 %v15676_v15  ;;  %v15719_v34 = vld [vmem:[%s16861_s15 + $0x1328] ss:$16 sps:$4 sm:$0xff]   ;;  %v15724_v15 = vld [vmem:[%s16861_s15 + $0x110c] ss:$16 sps:$4 sm:$0xff]  }
 0x4ba   : > { %11322 = vmatprep.subr.bf16.mxu1 %v15679_v20  ;;  %v15727_v20 = vld [vmem:[%s16861_s15 + $0x130c] ss:$16 sps:$4 sm:$0xff]  }
 0x4bc   : > { %11282 = vmatpush1.bf16.msra.mxu0 %v15674_v63  ;;  %v15722_v63 = vld [vmem:[%s16861_s15 + $0x1108] ss:$16 sps:$4 sm:$0xff]  }
 0x4bd   : > { %11323 = vmatpush1.bf16.msra.mxu1 %v15677_v37  ;;  %11283 = vmatprep.subr.bf16.mxu0 %v15682_v61  ;;  %v15725_v37 = vld [vmem:[%s16861_s15 + $0x1308] ss:$16 sps:$4 sm:$0xff]   ;;  %v15730_v61 = vld [vmem:[%s16861_s15 + $0x14ec] ss:$16 sps:$4 sm:$0xff]  }
 0x4be   : > { %11324 = vmatprep.subr.bf16.mxu1 %v15685_v39  ;;  %v15733_v39 = vld [vmem:[%s16861_s15 + $0x16ec] ss:$16 sps:$4 sm:$0xff]  }
 0x4c0   : > { %11284 = vmatpush2.bf16.msra.mxu0 %v15680_v28  ;;  %v15728_v28 = vld [vmem:[%s16861_s15 + $0x14e8] ss:$16 sps:$4 sm:$0xff]  }
 0x4c1   : > { %11325 = vmatpush2.bf16.msra.mxu1 %v15683_v32  ;;  %11285 = vmatprep.subr.bf16.mxu0 %v15688_v7  ;;  %v15731_v32 = vld [vmem:[%s16861_s15 + $0x16e8] ss:$16 sps:$4 sm:$0xff]   ;;  %v15736_v7 = vld [vmem:[%s16861_s15 + $0x14cc] ss:$16 sps:$4 sm:$0xff]  }
 0x4c2   : > { %11326 = vmatprep.subr.bf16.mxu1 %v15691_v19  ;;  %v15739_v19 = vld [vmem:[%s16861_s15 + $0x16cc] ss:$16 sps:$4 sm:$0xff]  }
 0x4c4   : > { %11286 = vmatpush2.bf16.msra.mxu0 %v15686_v14 }
 0x4c5   : > { %11327 = vmatpush2.bf16.msra.mxu1 %v15689_v22  ;;  %11287 = vmatprep.subr.bf16.mxu0 %v15694_v23 }
 0x4c6   : > { %11328 = vmatprep.subr.bf16.mxu1 %v15697_v52  ;;  %v15734_v52 = vld [vmem:[%s16861_s15 + $0x14c8] ss:$16 sps:$4 sm:$0xff]  }
 0x4c8   : > { %11288 = vmatpush2.bf16.msra.mxu0 %v15692_v43  ;;  %v15737_v43 = vld [vmem:[%s16861_s15 + $0x16c8] ss:$16 sps:$4 sm:$0xff]  }
 0x4c9   : > { %11329 = vmatpush2.bf16.msra.mxu1 %v15695_v44  ;;  %11289 = vmatprep.subr.bf16.mxu0 %v15700_v45 }
 0x4ca   : > { %11330 = vmatprep.subr.bf16.mxu1 %v15703_v21  ;;  %v15742_v21 = vld [vmem:[%s16861_s15 + $0x14ac] ss:$16 sps:$4 sm:$0xff]  }
 0x4cc   : > { %11290 = vmatpush2.bf16.msra.mxu0 %v15698_v27  ;;  %v15745_v27 = vld [vmem:[%s16861_s15 + $0x16ac] ss:$16 sps:$4 sm:$0xff]  }
 0x4cd   : > { %11331 = vmatpush2.bf16.msra.mxu1 %v15701_v51  ;;  %11291 = vmatprep.subr.bf16.mxu0 %v15706_v42 }
 0x4ce   : > { %11332 = vmatprep.subr.bf16.mxu1 %v15709_v9  ;;  %v15740_v9 = vld [vmem:[%s16861_s15 + $0x14a8] ss:$16 sps:$4 sm:$0xff]  }
 0x4d0   : > { %11292 = vmatpush2.bf16.msra.mxu0 %v15704_v62  ;;  %v15743_v62 = vld [vmem:[%s16861_s15 + $0x16a8] ss:$16 sps:$4 sm:$0xff]  }
 0x4d1   : > { %11333 = vmatpush2.bf16.msra.mxu1 %v15707_v2  ;;  %11293 = vmatprep.subr.bf16.mxu0 %v15712_v38 }
 0x4d2   : > { %11334 = vmatprep.subr.bf16.mxu1 %v15715_v36  ;;  %v15749_v36 = vld [vmem:[%s16861_s15 + $0x1688] ss:$16 sps:$4 sm:$0xff]  }
 0x4d4   : > { %11294 = vmatpush2.bf16.msra.mxu0 %v15710_v31  ;;  %v15754_v31 = vld [vmem:[%s16861_s15 + $0x146c] ss:$16 sps:$4 sm:$0xff]  }
 0x4d5   : > { %11335 = vmatpush2.bf16.msra.mxu1 %v15713_v59  ;;  %11295 = vmatprep.subr.bf16.mxu0 %v15718_v3  ;;  %v15757_v59 = vld [vmem:[%s16861_s15 + $0x166c] ss:$16 sps:$4 sm:$0xff]   ;;  %v15752_v3 = vld [vmem:[%s16861_s15 + $0x1468] ss:$16 sps:$4 sm:$0xff]  }
 0x4d6   : > { %11336 = vmatprep.subr.bf16.mxu1 %v15721_v50  ;;  %v15755_v50 = vld [vmem:[%s16861_s15 + $0x1668] ss:$16 sps:$4 sm:$0xff]  }
 0x4d8   : > { %11296 = vmatpush2.bf16.msra.mxu0 %v15716_v57  ;;  %v15760_v57 = vld [vmem:[%s16861_s15 + $0x144c] ss:$16 sps:$4 sm:$0xff]  }
 0x4d9   : > { %11337 = vmatpush2.bf16.msra.mxu1 %v15719_v34  ;;  %11297 = vmatprep.subr.bf16.mxu0 %v15724_v15  ;;  %v15763_v34 = vld [vmem:[%s16861_s15 + $0x164c] ss:$16 sps:$4 sm:$0xff]   ;;  %v15758_v15 = vld [vmem:[%s16861_s15 + $0x1448] ss:$16 sps:$4 sm:$0xff]  }
 0x4da   : > { %11338 = vmatprep.subr.bf16.mxu1 %v15727_v20  ;;  %v15761_v20 = vld [vmem:[%s16861_s15 + $0x1648] ss:$16 sps:$4 sm:$0xff]  }
 0x4dc   : > { %11298 = vmatpush2.bf16.msra.mxu0 %v15722_v63  ;;  %v15766_v63 = vld [vmem:[%s16861_s15 + $0x142c] ss:$16 sps:$4 sm:$0xff]  }
 0x4dd   : > { %11339 = vmatpush2.bf16.msra.mxu1 %v15725_v37  ;;  %11349 = vmatprep.subr.bf16.mxu0 %v15730_v61  ;;  %v15769_v37 = vld [vmem:[%s16861_s15 + $0x162c] ss:$16 sps:$4 sm:$0xff]   ;;  %v15764_v61 = vld [vmem:[%s16861_s15 + $0x1428] ss:$16 sps:$4 sm:$0xff]  }
 0x4de   : > { %11390 = vmatprep.subr.bf16.mxu1 %v15733_v39  ;;  %v15767_v39 = vld [vmem:[%s16861_s15 + $0x1628] ss:$16 sps:$4 sm:$0xff]  }
 0x4df   : > { %v11055_v14 = vpop.f32.mrf.mxu0  ;;  %11300 = vmatmul.mubr.bf16.vlgmr.msra.gmra.mxu0 %v17333_v5 }
 0x4e0   : > { %v11096_v22 = vpop.f32.mrf.mxu1  ;;  %11341 = vmatmul.mubr.bf16.vlgmr.msra.gmra.mxu1 %v17346_v6  ;;  %v11056_v23 = vadd.f32 %v11055_v14, %v18318_v56  ;;  %11350 = vmatpush1.bf16.msra.mxu0 %v15728_v28  ;;  %v15772_v28 = vld [vmem:[%s16861_s15 + $0x140c] ss:$16 sps:$4 sm:$0xff]  }
 0x4e1   : > { %11391 = vmatpush1.bf16.msra.mxu1 %v15731_v32  ;;  %v11057_v44 = vpop.f32.mrf.mxu0  ;;  %11351 = vmatprep.subr.bf16.mxu0 %v15736_v7  ;;  %v15775_v32 = vld [vmem:[%s16861_s15 + $0x160c] ss:$16 sps:$4 sm:$0xff]   ;;  %v15770_v7 = vld [vmem:[%s16861_s15 + $0x1408] ss:$16 sps:$4 sm:$0xff]  }
 0x4e2   : > { %v11098_v45 = vpop.f32.mrf.mxu1  ;;  %11392 = vmatprep.subr.bf16.mxu1 %v15739_v19  ;;  %v18395_v51 = vadd.f32 %v11096_v22, %v11056_v23  ;;  %v11058_v5 = vadd.f32 %v11057_v44, %v18324_v25  ;;  %11381 = vmatprep.mubr.bf16.mxu0 %v17342_v16  ;;  %v15748_v16 = vld [vmem:[%s16861_s15 + $0x148c] ss:$16 sps:$4 sm:$0xff]   ;;  %v15746_v25 = vld [vmem:[%s16861_s15 + $0x1488] ss:$16 sps:$4 sm:$0xff]  }
 0x4e3   : > { %11422 = vmatprep.mubr.bf16.mxu1 %v17354_v24  ;;  %v11059_v6 = vpop.f32.mrf.mxu0  ;;  %v15751_v24 = vld [vmem:[%s16861_s15 + $0x168c] ss:$16 sps:$4 sm:$0xff]   ;;  %v15773_v19 = vld [vmem:[%s16861_s15 + $0x1608] ss:$16 sps:$4 sm:$0xff]  }
 0x4e4   : > { %v11100_v56 = vpop.f32.mrf.mxu1  ;;  %v18400_v42 = vadd.f32 %v11098_v45, %v11058_v5  ;;  %11352 = vmatpush1.bf16.msra.mxu0 %v15734_v52  ;;  %v15778_v14 = vld [vmem:[%s16861_s15 + $0x15ec] ss:$16 sps:$4 sm:$0xff]   ;;  %v15776_v23 = vld [vmem:[%s16861_s15 + $0x15e8] ss:$16 sps:$4 sm:$0xff]  }
 0x4e5   : > { %11393 = vmatpush1.bf16.msra.mxu1 %v15737_v43  ;;  %v11060_v2 = vpop.f32.mrf.mxu0  ;;  %11353 = vmatprep.subr.bf16.mxu0 %v15742_v21  ;;  %v15781_v22 = vld [vmem:[%s16861_s15 + $0x17ec] ss:$16 sps:$4 sm:$0xff]   ;;  %v15779_v52 = vld [vmem:[%s16861_s15 + $0x17e8] ss:$16 sps:$4 sm:$0xff]  }
 0x4e6   : > { %v11101_v38 = vpop.f32.mrf.mxu1  ;;  %11394 = vmatprep.subr.bf16.mxu1 %v15745_v27  ;;  %v15784_v43 = vld [vmem:[%s16861_s15 + $0x15cc] ss:$16 sps:$4 sm:$0xff]   ;;  %v15782_v45 = vld [vmem:[%s16861_s15 + $0x15c8] ss:$16 sps:$4 sm:$0xff]  }
 0x4e7   : > { %v15787_v44 = vld [vmem:[%s16861_s15 + $0x17cc] ss:$16 sps:$4 sm:$0xff]   ;;  %v15785_v21 = vld [vmem:[%s16861_s15 + $0x17c8] ss:$16 sps:$4 sm:$0xff]  }
 0x4e8   : > { %11354 = vmatpush1.bf16.msra.mxu0 %v15740_v9  ;;  %v15790_v27 = vld [vmem:[%s16861_s15 + $0x15ac] ss:$16 sps:$4 sm:$0xff]   ;;  %v15788_v6 = vld [vmem:[%s16861_s15 + $0x15a8] ss:$16 sps:$4 sm:$0xff]  }
 0x4e9   : > { %11395 = vmatpush1.bf16.msra.mxu1 %v15743_v62  ;;  %11355 = vmatprep.subr.bf16.mxu0 %v15748_v16  ;;  %v15793_v5 = vld [vmem:[%s16861_s15 + $0x17ac] ss:$16 sps:$4 sm:$0xff]   ;;  %v15791_v56 = vld [vmem:[%s16861_s15 + $0x17a8] ss:$16 sps:$4 sm:$0xff]  }
 0x4ea   : > { %11396 = vmatprep.subr.bf16.mxu1 %v15751_v24  ;;  %v15796_v9 = vld [vmem:[%s16861_s15 + $0x158c] ss:$16 sps:$4 sm:$0xff]   ;;  %v15794_v2 = vld [vmem:[%s16861_s15 + $0x1588] ss:$16 sps:$4 sm:$0xff]  }
 0x4eb   : > { %v15799_v62 = vld [vmem:[%s16861_s15 + $0x178c] ss:$16 sps:$4 sm:$0xff]   ;;  %v15797_v38 = vld [vmem:[%s16861_s15 + $0x1788] ss:$16 sps:$4 sm:$0xff]  }
 0x4ec   : > { %11356 = vmatpush1.bf16.msra.mxu0 %v15746_v25  ;;  %v15802_v16 = vld [vmem:[%s16861_s15 + $0x156c] ss:$16 sps:$4 sm:$0xff]   ;;  %v15800_v25 = vld [vmem:[%s16861_s15 + $0x1568] ss:$16 sps:$4 sm:$0xff]  }
 0x4ed   : > { %11397 = vmatpush1.bf16.msra.mxu1 %v15749_v36  ;;  %11357 = vmatprep.subr.bf16.mxu0 %v15754_v31  ;;  %v15805_v24 = vld [vmem:[%s16861_s15 + $0x176c] ss:$16 sps:$4 sm:$0xff]   ;;  %v15803_v36 = vld [vmem:[%s16861_s15 + $0x1768] ss:$16 sps:$4 sm:$0xff]  }
 0x4ee   : > { %11398 = vmatprep.subr.bf16.mxu1 %v15757_v59  ;;  %v15808_v31 = vld [vmem:[%s16861_s15 + $0x154c] ss:$16 sps:$4 sm:$0xff]  }
 0x4ef   : > { %v15811_v59 = vld [vmem:[%s16861_s15 + $0x174c] ss:$16 sps:$4 sm:$0xff]  }
 0x4f0   : > { %11358 = vmatpush1.bf16.msra.mxu0 %v15752_v3  ;;  %v15806_v3 = vld [vmem:[%s16861_s15 + $0x1548] ss:$16 sps:$4 sm:$0xff]  }
 0x4f1   : > { %11399 = vmatpush1.bf16.msra.mxu1 %v15755_v50  ;;  %11359 = vmatprep.subr.bf16.mxu0 %v15760_v57  ;;  %v15809_v50 = vld [vmem:[%s16861_s15 + $0x1748] ss:$16 sps:$4 sm:$0xff]   ;;  %v15814_v57 = vld [vmem:[%s16861_s15 + $0x152c] ss:$16 sps:$4 sm:$0xff]  }
 0x4f2   : > { %11400 = vmatprep.subr.bf16.mxu1 %v15763_v34  ;;  %v15817_v34 = vld [vmem:[%s16861_s15 + $0x172c] ss:$16 sps:$4 sm:$0xff]  }
 0x4f4   : > { %11360 = vmatpush1.bf16.msra.mxu0 %v15758_v15  ;;  %v15812_v15 = vld [vmem:[%s16861_s15 + $0x1528] ss:$16 sps:$4 sm:$0xff]  }
 0x4f5   : > { %11401 = vmatpush1.bf16.msra.mxu1 %v15761_v20  ;;  %11361 = vmatprep.subr.bf16.mxu0 %v15766_v63  ;;  %v15815_v20 = vld [vmem:[%s16861_s15 + $0x1728] ss:$16 sps:$4 sm:$0xff]   ;;  %v15820_v63 = vld [vmem:[%s16861_s15 + $0x150c] ss:$16 sps:$4 sm:$0xff]  }
 0x4f6   : > { %11402 = vmatprep.subr.bf16.mxu1 %v15769_v37  ;;  %v15823_v37 = vld [vmem:[%s16861_s15 + $0x170c] ss:$16 sps:$4 sm:$0xff]  }
 0x4f8   : > { %11362 = vmatpush1.bf16.msra.mxu0 %v15764_v61  ;;  %v15818_v61 = vld [vmem:[%s16861_s15 + $0x1508] ss:$16 sps:$4 sm:$0xff]  }
 0x4f9   : > { %11403 = vmatpush1.bf16.msra.mxu1 %v15767_v39  ;;  %11363 = vmatprep.subr.bf16.mxu0 %v15772_v28  ;;  %v15821_v39 = vld [vmem:[%s16861_s15 + $0x1708] ss:$16 sps:$4 sm:$0xff]   ;;  %v15826_v28 = vld [vmem:[%s16861_s15 + $0x18ec] ss:$16 sps:$4 sm:$0xff]  }
 0x4fa   : > { %11404 = vmatprep.subr.bf16.mxu1 %v15775_v32  ;;  %v15829_v32 = vld [vmem:[%s16861_s15 + $0x1aec] ss:$16 sps:$4 sm:$0xff]  }
 0x4fc   : > { %11364 = vmatpush1.bf16.msra.mxu0 %v15770_v7  ;;  %v15824_v7 = vld [vmem:[%s16861_s15 + $0x18e8] ss:$16 sps:$4 sm:$0xff]  }
 0x4fd   : > { %11405 = vmatpush1.bf16.msra.mxu1 %v15773_v19  ;;  %11365 = vmatprep.subr.bf16.mxu0 %v15778_v14  ;;  %v15827_v19 = vld [vmem:[%s16861_s15 + $0x1ae8] ss:$16 sps:$4 sm:$0xff]   ;;  %v15832_v14 = vld [vmem:[%s16861_s15 + $0x18cc] ss:$16 sps:$4 sm:$0xff]  }
 0x4fe   : > { %11406 = vmatprep.subr.bf16.mxu1 %v15781_v22  ;;  %v15835_v22 = vld [vmem:[%s16861_s15 + $0x1acc] ss:$16 sps:$4 sm:$0xff]  }
 0x500   : > { %11366 = vmatpush2.bf16.msra.mxu0 %v15776_v23 }
 0x501   : > { %11407 = vmatpush2.bf16.msra.mxu1 %v15779_v52  ;;  %11367 = vmatprep.subr.bf16.mxu0 %v15784_v43 }
 0x502   : > { %11408 = vmatprep.subr.bf16.mxu1 %v15787_v44  ;;  %v15830_v44 = vld [vmem:[%s16861_s15 + $0x18c8] ss:$16 sps:$4 sm:$0xff]  }
 0x504   : > { %11368 = vmatpush2.bf16.msra.mxu0 %v15782_v45  ;;  %v15833_v45 = vld [vmem:[%s16861_s15 + $0x1ac8] ss:$16 sps:$4 sm:$0xff]  }
 0x505   : > { %11409 = vmatpush2.bf16.msra.mxu1 %v15785_v21  ;;  %11369 = vmatprep.subr.bf16.mxu0 %v15790_v27 }
 0x506   : > { %11410 = vmatprep.subr.bf16.mxu1 %v15793_v5  ;;  %v15838_v5 = vld [vmem:[%s16861_s15 + $0x18ac] ss:$16 sps:$4 sm:$0xff]  }
 0x508   : > { %11370 = vmatpush2.bf16.msra.mxu0 %v15788_v6  ;;  %v15841_v6 = vld [vmem:[%s16861_s15 + $0x1aac] ss:$16 sps:$4 sm:$0xff]  }
 0x509   : > { %11411 = vmatpush2.bf16.msra.mxu1 %v15791_v56  ;;  %11371 = vmatprep.subr.bf16.mxu0 %v15796_v9 }
 0x50a   : > { %11412 = vmatprep.subr.bf16.mxu1 %v15799_v62  ;;  %v15836_v62 = vld [vmem:[%s16861_s15 + $0x18a8] ss:$16 sps:$4 sm:$0xff]  }
 0x50c   : > { %11372 = vmatpush2.bf16.msra.mxu0 %v15794_v2  ;;  %v15839_v2 = vld [vmem:[%s16861_s15 + $0x1aa8] ss:$16 sps:$4 sm:$0xff]  }
 0x50d   : > { %11413 = vmatpush2.bf16.msra.mxu1 %v15797_v38  ;;  %11373 = vmatprep.subr.bf16.mxu0 %v15802_v16 }
 0x50e   : > { %11414 = vmatprep.subr.bf16.mxu1 %v15805_v24  ;;  %v15845_v24 = vld [vmem:[%s16861_s15 + $0x1a88] ss:$16 sps:$4 sm:$0xff]  }
 0x510   : > { %11374 = vmatpush2.bf16.msra.mxu0 %v15800_v25  ;;  %v15850_v25 = vld [vmem:[%s16861_s15 + $0x186c] ss:$16 sps:$4 sm:$0xff]  }
 0x511   : > { %11415 = vmatpush2.bf16.msra.mxu1 %v15803_v36  ;;  %11375 = vmatprep.subr.bf16.mxu0 %v15808_v31  ;;  %v15853_v36 = vld [vmem:[%s16861_s15 + $0x1a6c] ss:$16 sps:$4 sm:$0xff]   ;;  %v15848_v31 = vld [vmem:[%s16861_s15 + $0x1868] ss:$16 sps:$4 sm:$0xff]  }
 0x512   : > { %11416 = vmatprep.subr.bf16.mxu1 %v15811_v59  ;;  %v15851_v59 = vld [vmem:[%s16861_s15 + $0x1a68] ss:$16 sps:$4 sm:$0xff]  }
 0x514   : > { %11376 = vmatpush2.bf16.msra.mxu0 %v15806_v3  ;;  %v15856_v3 = vld [vmem:[%s16861_s15 + $0x184c] ss:$16 sps:$4 sm:$0xff]  }
 0x515   : > { %11417 = vmatpush2.bf16.msra.mxu1 %v15809_v50  ;;  %11377 = vmatprep.subr.bf16.mxu0 %v15814_v57  ;;  %v15859_v50 = vld [vmem:[%s16861_s15 + $0x1a4c] ss:$16 sps:$4 sm:$0xff]   ;;  %v15854_v57 = vld [vmem:[%s16861_s15 + $0x1848] ss:$16 sps:$4 sm:$0xff]  }
 0x516   : > { %11418 = vmatprep.subr.bf16.mxu1 %v15817_v34  ;;  %v15857_v34 = vld [vmem:[%s16861_s15 + $0x1a48] ss:$16 sps:$4 sm:$0xff]  }
 0x518   : > { %11378 = vmatpush2.bf16.msra.mxu0 %v15812_v15  ;;  %v15862_v15 = vld [vmem:[%s16861_s15 + $0x182c] ss:$16 sps:$4 sm:$0xff]  }
 0x519   : > { %11419 = vmatpush2.bf16.msra.mxu1 %v15815_v20  ;;  %11379 = vmatprep.subr.bf16.mxu0 %v15820_v63  ;;  %v15865_v20 = vld [vmem:[%s16861_s15 + $0x1a2c] ss:$16 sps:$4 sm:$0xff]   ;;  %v15860_v63 = vld [vmem:[%s16861_s15 + $0x1828] ss:$16 sps:$4 sm:$0xff]  }
 0x51a   : > { %11420 = vmatprep.subr.bf16.mxu1 %v15823_v37  ;;  %v15863_v37 = vld [vmem:[%s16861_s15 + $0x1a28] ss:$16 sps:$4 sm:$0xff]  }
 0x51c   : > { %11380 = vmatpush2.bf16.msra.mxu0 %v15818_v61  ;;  %v15868_v61 = vld [vmem:[%s16861_s15 + $0x180c] ss:$16 sps:$4 sm:$0xff]  }
 0x51d   : > { %11421 = vmatpush2.bf16.msra.mxu1 %v15821_v39  ;;  %11431 = vmatprep.subr.bf16.mxu0 %v15826_v28  ;;  %v15871_v39 = vld [vmem:[%s16861_s15 + $0x1a0c] ss:$16 sps:$4 sm:$0xff]   ;;  %v15866_v28 = vld [vmem:[%s16861_s15 + $0x1808] ss:$16 sps:$4 sm:$0xff]  }
 0x51e   : > { %11472 = vmatprep.subr.bf16.mxu1 %v15829_v32  ;;  %v15869_v32 = vld [vmem:[%s16861_s15 + $0x1a08] ss:$16 sps:$4 sm:$0xff]  }
 0x51f   : > { %v11137_v23 = vpop.f32.mrf.mxu0  ;;  %11382 = vmatmul.mubr.bf16.vlgmr.msra.gmra.mxu0 %v17431_v11 }
 0x520   : > { %v11178_v52 = vpop.f32.mrf.mxu1  ;;  %11423 = vmatmul.mubr.bf16.vlgmr.msra.gmra.mxu1 %v17444_v60  ;;  %v11138_v43 = vadd.f32 %v11137_v23, %v18395_v51  ;;  %11432 = vmatpush1.bf16.msra.mxu0 %v15824_v7  ;;  %v15874_v7 = vld [vmem:[%s16861_s15 + $0x19ec] ss:$16 sps:$4 sm:$0xff]  }
 0x521   : > { %11473 = vmatpush1.bf16.msra.mxu1 %v15827_v19  ;;  %v11139_v21 = vpop.f32.mrf.mxu0  ;;  %11433 = vmatprep.subr.bf16.mxu0 %v15832_v14  ;;  %v15877_v19 = vld [vmem:[%s16861_s15 + $0x1bec] ss:$16 sps:$4 sm:$0xff]   ;;  %v15872_v14 = vld [vmem:[%s16861_s15 + $0x19e8] ss:$16 sps:$4 sm:$0xff]  }
 0x522   : > { %v11180_v27 = vpop.f32.mrf.mxu1  ;;  %11474 = vmatprep.subr.bf16.mxu1 %v15835_v22  ;;  %v18469_v56 = vadd.f32 %v11178_v52, %v11138_v43  ;;  %v11140_v11 = vadd.f32 %v11139_v21, %v18400_v42  ;;  %11463 = vmatprep.mubr.bf16.mxu0 %v17440_v26  ;;  %v15844_v26 = vld [vmem:[%s16861_s15 + $0x188c] ss:$16 sps:$4 sm:$0xff]   ;;  %v15842_v42 = vld [vmem:[%s16861_s15 + $0x1888] ss:$16 sps:$4 sm:$0xff]  }
 0x523   : > { %11504 = vmatprep.mubr.bf16.mxu1 %v17452_v35  ;;  %v11141_v60 = vpop.f32.mrf.mxu0  ;;  %v15847_v35 = vld [vmem:[%s16861_s15 + $0x1a8c] ss:$16 sps:$4 sm:$0xff]   ;;  %v15875_v22 = vld [vmem:[%s16861_s15 + $0x1be8] ss:$16 sps:$4 sm:$0xff]  }
 0x524   : > { %v11182_v51 = vpop.f32.mrf.mxu1  ;;  %v18474_v9 = vadd.f32 %v11180_v27, %v11140_v11  ;;  %11434 = vmatpush1.bf16.msra.mxu0 %v15830_v44  ;;  %v15880_v23 = vld [vmem:[%s16861_s15 + $0x19cc] ss:$16 sps:$4 sm:$0xff]   ;;  %v15878_v43 = vld [vmem:[%s16861_s15 + $0x19c8] ss:$16 sps:$4 sm:$0xff]  }
 0x525   : > { %11475 = vmatpush1.bf16.msra.mxu1 %v15833_v45  ;;  %v11142_v38 = vpop.f32.mrf.mxu0  ;;  %11435 = vmatprep.subr.bf16.mxu0 %v15838_v5  ;;  %v15883_v52 = vld [vmem:[%s16861_s15 + $0x1bcc] ss:$16 sps:$4 sm:$0xff]   ;;  %v15881_v44 = vld [vmem:[%s16861_s15 + $0x1bc8] ss:$16 sps:$4 sm:$0xff]  }
 0x526   : > { %v11183_v16 = vpop.f32.mrf.mxu1  ;;  %11476 = vmatprep.subr.bf16.mxu1 %v15841_v6  ;;  %v15886_v45 = vld [vmem:[%s16861_s15 + $0x19ac] ss:$16 sps:$4 sm:$0xff]   ;;  %v15884_v27 = vld [vmem:[%s16861_s15 + $0x19a8] ss:$16 sps:$4 sm:$0xff]  }
 0x527   : > { %v15889_v21 = vld [vmem:[%s16861_s15 + $0x1bac] ss:$16 sps:$4 sm:$0xff]   ;;  %v15887_v5 = vld [vmem:[%s16861_s15 + $0x1ba8] ss:$16 sps:$4 sm:$0xff]  }
 0x528   : > { %11436 = vmatpush1.bf16.msra.mxu0 %v15836_v62  ;;  %v15892_v6 = vld [vmem:[%s16861_s15 + $0x198c] ss:$16 sps:$4 sm:$0xff]   ;;  %v15890_v60 = vld [vmem:[%s16861_s15 + $0x1988] ss:$16 sps:$4 sm:$0xff]  }
 0x529   : > { %11477 = vmatpush1.bf16.msra.mxu1 %v15839_v2  ;;  %11437 = vmatprep.subr.bf16.mxu0 %v15844_v26  ;;  %v15895_v11 = vld [vmem:[%s16861_s15 + $0x1b8c] ss:$16 sps:$4 sm:$0xff]   ;;  %v15893_v51 = vld [vmem:[%s16861_s15 + $0x1b88] ss:$16 sps:$4 sm:$0xff]  }
 0x52a   : > { %11478 = vmatprep.subr.bf16.mxu1 %v15847_v35  ;;  %v15898_v62 = vld [vmem:[%s16861_s15 + $0x196c] ss:$16 sps:$4 sm:$0xff]   ;;  %v15896_v38 = vld [vmem:[%s16861_s15 + $0x1968] ss:$16 sps:$4 sm:$0xff]  }
 0x52b   : > { %v15901_v2 = vld [vmem:[%s16861_s15 + $0x1b6c] ss:$16 sps:$4 sm:$0xff]   ;;  %v15899_v16 = vld [vmem:[%s16861_s15 + $0x1b68] ss:$16 sps:$4 sm:$0xff]  }
 0x52c   : > { %11438 = vmatpush1.bf16.msra.mxu0 %v15842_v42  ;;  %v15904_v26 = vld [vmem:[%s16861_s15 + $0x194c] ss:$16 sps:$4 sm:$0xff]   ;;  %v15902_v42 = vld [vmem:[%s16861_s15 + $0x1948] ss:$16 sps:$4 sm:$0xff]  }
 0x52d   : > { %11479 = vmatpush1.bf16.msra.mxu1 %v15845_v24  ;;  %11439 = vmatprep.subr.bf16.mxu0 %v15850_v25  ;;  %v15907_v35 = vld [vmem:[%s16861_s15 + $0x1b4c] ss:$16 sps:$4 sm:$0xff]   ;;  %v15905_v24 = vld [vmem:[%s16861_s15 + $0x1b48] ss:$16 sps:$4 sm:$0xff]  }
 0x52e   : > { %11480 = vmatprep.subr.bf16.mxu1 %v15853_v36  ;;  %v15910_v25 = vld [vmem:[%s16861_s15 + $0x192c] ss:$16 sps:$4 sm:$0xff]  }
 0x52f   : > { %v15913_v36 = vld [vmem:[%s16861_s15 + $0x1b2c] ss:$16 sps:$4 sm:$0xff]  }
 0x530   : > { %11440 = vmatpush1.bf16.msra.mxu0 %v15848_v31  ;;  %v15908_v31 = vld [vmem:[%s16861_s15 + $0x1928] ss:$16 sps:$4 sm:$0xff]  }
 0x531   : > { %11481 = vmatpush1.bf16.msra.mxu1 %v15851_v59  ;;  %11441 = vmatprep.subr.bf16.mxu0 %v15856_v3  ;;  %v15911_v59 = vld [vmem:[%s16861_s15 + $0x1b28] ss:$16 sps:$4 sm:$0xff]   ;;  %v15916_v3 = vld [vmem:[%s16861_s15 + $0x190c] ss:$16 sps:$4 sm:$0xff]  }
 0x532   : > { %11482 = vmatprep.subr.bf16.mxu1 %v15859_v50  ;;  %v15919_v50 = vld [vmem:[%s16861_s15 + $0x1b0c] ss:$16 sps:$4 sm:$0xff]  }
 0x534   : > { %11442 = vmatpush1.bf16.msra.mxu0 %v15854_v57  ;;  %v15914_v57 = vld [vmem:[%s16861_s15 + $0x1908] ss:$16 sps:$4 sm:$0xff]  }
 0x535   : > { %11483 = vmatpush1.bf16.msra.mxu1 %v15857_v34  ;;  %11443 = vmatprep.subr.bf16.mxu0 %v15862_v15  ;;  %v15917_v34 = vld [vmem:[%s16861_s15 + $0x1b08] ss:$16 sps:$4 sm:$0xff]   ;;  %v15922_v15 = vld [vmem:[%s16861_s15 + $0x1cec] ss:$16 sps:$4 sm:$0xff]  }
 0x536   : > { %11484 = vmatprep.subr.bf16.mxu1 %v15865_v20  ;;  %v15925_v20 = vld [vmem:[%s16861_s15 + $0x1eec] ss:$16 sps:$4 sm:$0xff]  }
 0x538   : > { %11444 = vmatpush1.bf16.msra.mxu0 %v15860_v63  ;;  %v15920_v63 = vld [vmem:[%s16861_s15 + $0x1ce8] ss:$16 sps:$4 sm:$0xff]  }
 0x539   : > { %11485 = vmatpush1.bf16.msra.mxu1 %v15863_v37  ;;  %11445 = vmatprep.subr.bf16.mxu0 %v15868_v61  ;;  %v15923_v37 = vld [vmem:[%s16861_s15 + $0x1ee8] ss:$16 sps:$4 sm:$0xff]   ;;  %v15928_v61 = vld [vmem:[%s16861_s15 + $0x1ccc] ss:$16 sps:$4 sm:$0xff]  }
 0x53a   : > { %11486 = vmatprep.subr.bf16.mxu1 %v15871_v39  ;;  %v15931_v39 = vld [vmem:[%s16861_s15 + $0x1ecc] ss:$16 sps:$4 sm:$0xff]  }
 0x53c   : > { %11446 = vmatpush1.bf16.msra.mxu0 %v15866_v28 }
 0x53d   : > { %11487 = vmatpush1.bf16.msra.mxu1 %v15869_v32  ;;  %11447 = vmatprep.subr.bf16.mxu0 %v15874_v7 }
 0x53e   : > { %11488 = vmatprep.subr.bf16.mxu1 %v15877_v19  ;;  %v15926_v19 = vld [vmem:[%s16861_s15 + $0x1cc8] ss:$16 sps:$4 sm:$0xff]  }
 0x540   : > { %11448 = vmatpush2.bf16.msra.mxu0 %v15872_v14  ;;  %v15929_v14 = vld [vmem:[%s16861_s15 + $0x1ec8] ss:$16 sps:$4 sm:$0xff]  }
 0x541   : > { %11489 = vmatpush2.bf16.msra.mxu1 %v15875_v22  ;;  %11449 = vmatprep.subr.bf16.mxu0 %v15880_v23 }
 0x542   : > { %11490 = vmatprep.subr.bf16.mxu1 %v15883_v52  ;;  %v15934_v52 = vld [vmem:[%s16861_s15 + $0x1cac] ss:$16 sps:$4 sm:$0xff]  }
 0x544   : > { %11450 = vmatpush2.bf16.msra.mxu0 %v15878_v43  ;;  %v15937_v43 = vld [vmem:[%s16861_s15 + $0x1eac] ss:$16 sps:$4 sm:$0xff]  }
 0x545   : > { %11491 = vmatpush2.bf16.msra.mxu1 %v15881_v44  ;;  %11451 = vmatprep.subr.bf16.mxu0 %v15886_v45 }
 0x546   : > { %11492 = vmatprep.subr.bf16.mxu1 %v15889_v21  ;;  %v15932_v21 = vld [vmem:[%s16861_s15 + $0x1ca8] ss:$16 sps:$4 sm:$0xff]  }
 0x548   : > { %11452 = vmatpush2.bf16.msra.mxu0 %v15884_v27  ;;  %v15935_v27 = vld [vmem:[%s16861_s15 + $0x1ea8] ss:$16 sps:$4 sm:$0xff]  }
 0x549   : > { %11493 = vmatpush2.bf16.msra.mxu1 %v15887_v5  ;;  %11453 = vmatprep.subr.bf16.mxu0 %v15892_v6 }
 0x54a   : > { %11494 = vmatprep.subr.bf16.mxu1 %v15895_v11  ;;  %v15941_v11 = vld [vmem:[%s16861_s15 + $0x1e88] ss:$16 sps:$4 sm:$0xff]  }
 0x54c   : > { %11454 = vmatpush2.bf16.msra.mxu0 %v15890_v60  ;;  %v15946_v60 = vld [vmem:[%s16861_s15 + $0x1c6c] ss:$16 sps:$4 sm:$0xff]  }
 0x54d   : > { %11495 = vmatpush2.bf16.msra.mxu1 %v15893_v51  ;;  %11455 = vmatprep.subr.bf16.mxu0 %v15898_v62  ;;  %v15949_v51 = vld [vmem:[%s16861_s15 + $0x1e6c] ss:$16 sps:$4 sm:$0xff]   ;;  %v15944_v62 = vld [vmem:[%s16861_s15 + $0x1c68] ss:$16 sps:$4 sm:$0xff]  }
 0x54e   : > { %11496 = vmatprep.subr.bf16.mxu1 %v15901_v2  ;;  %v15947_v2 = vld [vmem:[%s16861_s15 + $0x1e68] ss:$16 sps:$4 sm:$0xff]  }
 0x550   : > { %11456 = vmatpush2.bf16.msra.mxu0 %v15896_v38  ;;  %v15952_v38 = vld [vmem:[%s16861_s15 + $0x1c4c] ss:$16 sps:$4 sm:$0xff]  }
 0x551   : > { %11497 = vmatpush2.bf16.msra.mxu1 %v15899_v16  ;;  %11457 = vmatprep.subr.bf16.mxu0 %v15904_v26  ;;  %v15955_v16 = vld [vmem:[%s16861_s15 + $0x1e4c] ss:$16 sps:$4 sm:$0xff]   ;;  %v15950_v26 = vld [vmem:[%s16861_s15 + $0x1c48] ss:$16 sps:$4 sm:$0xff]  }
 0x552   : > { %11498 = vmatprep.subr.bf16.mxu1 %v15907_v35  ;;  %v15953_v35 = vld [vmem:[%s16861_s15 + $0x1e48] ss:$16 sps:$4 sm:$0xff]  }
 0x554   : > { %11458 = vmatpush2.bf16.msra.mxu0 %v15902_v42  ;;  %v15958_v42 = vld [vmem:[%s16861_s15 + $0x1c2c] ss:$16 sps:$4 sm:$0xff]  }
 0x555   : > { %11499 = vmatpush2.bf16.msra.mxu1 %v15905_v24  ;;  %11459 = vmatprep.subr.bf16.mxu0 %v15910_v25  ;;  %v15961_v24 = vld [vmem:[%s16861_s15 + $0x1e2c] ss:$16 sps:$4 sm:$0xff]   ;;  %v15956_v25 = vld [vmem:[%s16861_s15 + $0x1c28] ss:$16 sps:$4 sm:$0xff]  }
 0x556   : > { %11500 = vmatprep.subr.bf16.mxu1 %v15913_v36  ;;  %v15959_v36 = vld [vmem:[%s16861_s15 + $0x1e28] ss:$16 sps:$4 sm:$0xff]  }
 0x558   : > { %11460 = vmatpush2.bf16.msra.mxu0 %v15908_v31  ;;  %v15964_v31 = vld [vmem:[%s16861_s15 + $0x1c0c] ss:$16 sps:$4 sm:$0xff]  }
 0x559   : > { %11501 = vmatpush2.bf16.msra.mxu1 %v15911_v59  ;;  %11461 = vmatprep.subr.bf16.mxu0 %v15916_v3  ;;  %v15967_v59 = vld [vmem:[%s16861_s15 + $0x1e0c] ss:$16 sps:$4 sm:$0xff]   ;;  %v15962_v3 = vld [vmem:[%s16861_s15 + $0x1c08] ss:$16 sps:$4 sm:$0xff]  }
 0x55a   : > { %11502 = vmatprep.subr.bf16.mxu1 %v15919_v50  ;;  %v15965_v50 = vld [vmem:[%s16861_s15 + $0x1e08] ss:$16 sps:$4 sm:$0xff]  }
 0x55c   : > { %11462 = vmatpush2.bf16.msra.mxu0 %v15914_v57  ;;  %v15970_v57 = vld [vmem:[%s16861_s15 + $0x1dec] ss:$16 sps:$4 sm:$0xff]  }
 0x55d   : > { %11503 = vmatpush2.bf16.msra.mxu1 %v15917_v34  ;;  %11513 = vmatprep.subr.bf16.mxu0 %v15922_v15  ;;  %v15973_v34 = vld [vmem:[%s16861_s15 + $0x1fec] ss:$16 sps:$4 sm:$0xff]   ;;  %v15968_v15 = vld [vmem:[%s16861_s15 + $0x1de8] ss:$16 sps:$4 sm:$0xff]  }
 0x55e   : > { %11554 = vmatprep.subr.bf16.mxu1 %v15925_v20  ;;  %v15971_v20 = vld [vmem:[%s16861_s15 + $0x1fe8] ss:$16 sps:$4 sm:$0xff]  }
 0x55f   : > { %v11219_v28 = vpop.f32.mrf.mxu0  ;;  %11464 = vmatmul.mubr.bf16.vlgmr.msra.gmra.mxu0 %v17527_v41 }
 0x560   : > { %v11260_v32 = vpop.f32.mrf.mxu1  ;;  %11505 = vmatmul.mubr.bf16.vlgmr.msra.gmra.mxu1 %v17540_v0  ;;  %v11220_v7 = vadd.f32 %v11219_v28, %v18469_v56  ;;  %11514 = vmatpush1.bf16.msra.mxu0 %v15920_v63  ;;  %v15976_v63 = vld [vmem:[%s16861_s15 + $0x1dcc] ss:$16 sps:$4 sm:$0xff]  }
 0x561   : > { %11555 = vmatpush1.bf16.msra.mxu1 %v15923_v37  ;;  %v11221_v22 = vpop.f32.mrf.mxu0  ;;  %11515 = vmatprep.subr.bf16.mxu0 %v15928_v61  ;;  %v15979_v37 = vld [vmem:[%s16861_s15 + $0x1fcc] ss:$16 sps:$4 sm:$0xff]   ;;  %v15974_v61 = vld [vmem:[%s16861_s15 + $0x1dc8] ss:$16 sps:$4 sm:$0xff]  }
 0x562   : > { %v11262_v23 = vpop.f32.mrf.mxu1  ;;  %11556 = vmatprep.subr.bf16.mxu1 %v15931_v39  ;;  %v18543_v44 = vadd.f32 %v11260_v32, %v11220_v7  ;;  %v11222_v41 = vadd.f32 %v11221_v22, %v18474_v9  ;;  %11545 = vmatprep.mubr.bf16.mxu0 %v17536_v53  ;;  %v15940_v53 = vld [vmem:[%s16861_s15 + $0x1c8c] ss:$16 sps:$4 sm:$0xff]   ;;  %v15938_v9 = vld [vmem:[%s16861_s15 + $0x1c88] ss:$16 sps:$4 sm:$0xff]  }
 0x563   : > { %11586 = vmatprep.mubr.bf16.mxu1 %v17548_v47  ;;  %v11223_v0 = vpop.f32.mrf.mxu0  ;;  %v15943_v47 = vld [vmem:[%s16861_s15 + $0x1e8c] ss:$16 sps:$4 sm:$0xff]   ;;  %v15977_v39 = vld [vmem:[%s16861_s15 + $0x1fc8] ss:$16 sps:$4 sm:$0xff]  }
 0x564   : > { %v11264_v56 = vpop.f32.mrf.mxu1  ;;  %v18548_v45 = vadd.f32 %v11262_v23, %v11222_v41  ;;  %11516 = vmatpush1.bf16.msra.mxu0 %v15926_v19  ;;  %v15982_v28 = vld [vmem:[%s16861_s15 + $0x1dac] ss:$16 sps:$4 sm:$0xff]   ;;  %v15980_v7 = vld [vmem:[%s16861_s15 + $0x1da8] ss:$16 sps:$4 sm:$0xff]  }
 0x565   : > { %11557 = vmatpush1.bf16.msra.mxu1 %v15929_v14  ;;  %v11224_v5 = vpop.f32.mrf.mxu0  ;;  %11517 = vmatprep.subr.bf16.mxu0 %v15934_v52  ;;  %v15985_v32 = vld [vmem:[%s16861_s15 + $0x1fac] ss:$16 sps:$4 sm:$0xff]   ;;  %v15983_v19 = vld [vmem:[%s16861_s15 + $0x1fa8] ss:$16 sps:$4 sm:$0xff]  }
 0x566   : > { %v11265_v6 = vpop.f32.mrf.mxu1  ;;  %11558 = vmatprep.subr.bf16.mxu1 %v15937_v43  ;;  %v15988_v14 = vld [vmem:[%s16861_s15 + $0x1d8c] ss:$16 sps:$4 sm:$0xff]   ;;  %v15986_v23 = vld [vmem:[%s16861_s15 + $0x1d88] ss:$16 sps:$4 sm:$0xff]  }
 0x567   : > { %v15991_v22 = vld [vmem:[%s16861_s15 + $0x1f8c] ss:$16 sps:$4 sm:$0xff]   ;;  %v15989_v52 = vld [vmem:[%s16861_s15 + $0x1f88] ss:$16 sps:$4 sm:$0xff]  }
 0x568   : > { %11518 = vmatpush1.bf16.msra.mxu0 %v15932_v21  ;;  %v15994_v43 = vld [vmem:[%s16861_s15 + $0x1d6c] ss:$16 sps:$4 sm:$0xff]   ;;  %v15992_v0 = vld [vmem:[%s16861_s15 + $0x1d68] ss:$16 sps:$4 sm:$0xff]  }
 0x569   : > { %11559 = vmatpush1.bf16.msra.mxu1 %v15935_v27  ;;  %11519 = vmatprep.subr.bf16.mxu0 %v15940_v53  ;;  %v15997_v41 = vld [vmem:[%s16861_s15 + $0x1f6c] ss:$16 sps:$4 sm:$0xff]   ;;  %v15995_v56 = vld [vmem:[%s16861_s15 + $0x1f68] ss:$16 sps:$4 sm:$0xff]  }
 0x56a   : > { %11560 = vmatprep.subr.bf16.mxu1 %v15943_v47  ;;  %v16000_v21 = vld [vmem:[%s16861_s15 + $0x1d4c] ss:$16 sps:$4 sm:$0xff]   ;;  %v15998_v5 = vld [vmem:[%s16861_s15 + $0x1d48] ss:$16 sps:$4 sm:$0xff]  }
 0x56b   : > { %v16003_v27 = vld [vmem:[%s16861_s15 + $0x1f4c] ss:$16 sps:$4 sm:$0xff]   ;;  %v16001_v6 = vld [vmem:[%s16861_s15 + $0x1f48] ss:$16 sps:$4 sm:$0xff]  }
 0x56c   : > { %11520 = vmatpush1.bf16.msra.mxu0 %v15938_v9  ;;  %v16006_v53 = vld [vmem:[%s16861_s15 + $0x1d2c] ss:$16 sps:$4 sm:$0xff]   ;;  %v16004_v9 = vld [vmem:[%s16861_s15 + $0x1d28] ss:$16 sps:$4 sm:$0xff]  }
 0x56d   : > { %11561 = vmatpush1.bf16.msra.mxu1 %v15941_v11  ;;  %11521 = vmatprep.subr.bf16.mxu0 %v15946_v60  ;;  %v16009_v47 = vld [vmem:[%s16861_s15 + $0x1f2c] ss:$16 sps:$4 sm:$0xff]   ;;  %v16007_v11 = vld [vmem:[%s16861_s15 + $0x1f28] ss:$16 sps:$4 sm:$0xff]  }
 0x56e   : > { %11562 = vmatprep.subr.bf16.mxu1 %v15949_v51  ;;  %v16012_v60 = vld [vmem:[%s16861_s15 + $0x1d0c] ss:$16 sps:$4 sm:$0xff]  }
 0x56f   : > { %v16015_v51 = vld [vmem:[%s16861_s15 + $0x1f0c] ss:$16 sps:$4 sm:$0xff]  }
 0x570   : > { %11522 = vmatpush1.bf16.msra.mxu0 %v15944_v62  ;;  %v16010_v62 = vld [vmem:[%s16861_s15 + $0x1d08] ss:$16 sps:$4 sm:$0xff]  }
 0x571   : > { %11563 = vmatpush1.bf16.msra.mxu1 %v15947_v2  ;;  %11523 = vmatprep.subr.bf16.mxu0 %v15952_v38  ;;  %v16013_v2 = vld [vmem:[%s16861_s15 + $0x1f08] ss:$16 sps:$4 sm:$0xff]   ;;  %v16018_v38 = vld [vmem:[%s16861_s15 + $0x20ec] ss:$16 sps:$4 sm:$0xff]  }
 0x572   : > { %11564 = vmatprep.subr.bf16.mxu1 %v15955_v16  ;;  %v16021_v16 = vld [vmem:[%s16861_s15 + $0x22ec] ss:$16 sps:$4 sm:$0xff]  }
 0x574   : > { %11524 = vmatpush1.bf16.msra.mxu0 %v15950_v26  ;;  %v16016_v26 = vld [vmem:[%s16861_s15 + $0x20e8] ss:$16 sps:$4 sm:$0xff]  }
 0x575   : > { %11565 = vmatpush1.bf16.msra.mxu1 %v15953_v35  ;;  %11525 = vmatprep.subr.bf16.mxu0 %v15958_v42  ;;  %v16019_v35 = vld [vmem:[%s16861_s15 + $0x22e8] ss:$16 sps:$4 sm:$0xff]   ;;  %v16024_v42 = vld [vmem:[%s16861_s15 + $0x20cc] ss:$16 sps:$4 sm:$0xff]  }
 0x576   : > { %11566 = vmatprep.subr.bf16.mxu1 %v15961_v24  ;;  %v16027_v24 = vld [vmem:[%s16861_s15 + $0x22cc] ss:$16 sps:$4 sm:$0xff]  }
 0x578   : > { %11526 = vmatpush1.bf16.msra.mxu0 %v15956_v25 }
 0x579   : > { %11567 = vmatpush1.bf16.msra.mxu1 %v15959_v36  ;;  %11527 = vmatprep.subr.bf16.mxu0 %v15964_v31 }
 0x57a   : > { %11568 = vmatprep.subr.bf16.mxu1 %v15967_v59  ;;  %v16022_v59 = vld [vmem:[%s16861_s15 + $0x20c8] ss:$16 sps:$4 sm:$0xff]  }
 0x57c   : > { %11528 = vmatpush1.bf16.msra.mxu0 %v15962_v3  ;;  %v16025_v3 = vld [vmem:[%s16861_s15 + $0x22c8] ss:$16 sps:$4 sm:$0xff]  }
 0x57d   : > { %11569 = vmatpush1.bf16.msra.mxu1 %v15965_v50  ;;  %11529 = vmatprep.subr.bf16.mxu0 %v15970_v57 }
 0x57e   : > { %11570 = vmatprep.subr.bf16.mxu1 %v15973_v34  ;;  %v16030_v34 = vld [vmem:[%s16861_s15 + $0x20ac] ss:$16 sps:$4 sm:$0xff]  }
 0x580   : > { %11530 = vmatpush2.bf16.msra.mxu0 %v15968_v15  ;;  %v16033_v15 = vld [vmem:[%s16861_s15 + $0x22ac] ss:$16 sps:$4 sm:$0xff]  }
 0x581   : > { %11571 = vmatpush2.bf16.msra.mxu1 %v15971_v20  ;;  %11531 = vmatprep.subr.bf16.mxu0 %v15976_v63 }
 0x582   : > { %11572 = vmatprep.subr.bf16.mxu1 %v15979_v37  ;;  %v16028_v37 = vld [vmem:[%s16861_s15 + $0x20a8] ss:$16 sps:$4 sm:$0xff]  }
 0x584   : > { %11532 = vmatpush2.bf16.msra.mxu0 %v15974_v61  ;;  %v16031_v61 = vld [vmem:[%s16861_s15 + $0x22a8] ss:$16 sps:$4 sm:$0xff]  }
 0x585   : > { %11573 = vmatpush2.bf16.msra.mxu1 %v15977_v39  ;;  %11533 = vmatprep.subr.bf16.mxu0 %v15982_v28 }
 0x586   : > { %11574 = vmatprep.subr.bf16.mxu1 %v15985_v32  ;;  %v16037_v32 = vld [vmem:[%s16861_s15 + $0x2288] ss:$16 sps:$4 sm:$0xff]  }
 0x588   : > { %11534 = vmatpush2.bf16.msra.mxu0 %v15980_v7  ;;  %v16042_v7 = vld [vmem:[%s16861_s15 + $0x206c] ss:$16 sps:$4 sm:$0xff]  }
 0x589   : > { %11575 = vmatpush2.bf16.msra.mxu1 %v15983_v19  ;;  %11535 = vmatprep.subr.bf16.mxu0 %v15988_v14  ;;  %v16045_v19 = vld [vmem:[%s16861_s15 + $0x226c] ss:$16 sps:$4 sm:$0xff]   ;;  %v16040_v14 = vld [vmem:[%s16861_s15 + $0x2068] ss:$16 sps:$4 sm:$0xff]  }
 0x58a   : > { %11576 = vmatprep.subr.bf16.mxu1 %v15991_v22  ;;  %v16043_v22 = vld [vmem:[%s16861_s15 + $0x2268] ss:$16 sps:$4 sm:$0xff]  }
 0x58c   : > { %11536 = vmatpush2.bf16.msra.mxu0 %v15986_v23  ;;  %v16048_v23 = vld [vmem:[%s16861_s15 + $0x204c] ss:$16 sps:$4 sm:$0xff]  }
 0x58d   : > { %11577 = vmatpush2.bf16.msra.mxu1 %v15989_v52  ;;  %11537 = vmatprep.subr.bf16.mxu0 %v15994_v43  ;;  %v16051_v52 = vld [vmem:[%s16861_s15 + $0x224c] ss:$16 sps:$4 sm:$0xff]   ;;  %v16046_v43 = vld [vmem:[%s16861_s15 + $0x2048] ss:$16 sps:$4 sm:$0xff]  }
 0x58e   : > { %11578 = vmatprep.subr.bf16.mxu1 %v15997_v41  ;;  %v16049_v41 = vld [vmem:[%s16861_s15 + $0x2248] ss:$16 sps:$4 sm:$0xff]  }
 0x590   : > { %11538 = vmatpush2.bf16.msra.mxu0 %v15992_v0  ;;  %v16054_v0 = vld [vmem:[%s16861_s15 + $0x202c] ss:$16 sps:$4 sm:$0xff]  }
 0x591   : > { %11579 = vmatpush2.bf16.msra.mxu1 %v15995_v56  ;;  %11539 = vmatprep.subr.bf16.mxu0 %v16000_v21  ;;  %v16057_v56 = vld [vmem:[%s16861_s15 + $0x222c] ss:$16 sps:$4 sm:$0xff]   ;;  %v16052_v21 = vld [vmem:[%s16861_s15 + $0x2028] ss:$16 sps:$4 sm:$0xff]  }
 0x592   : > { %11580 = vmatprep.subr.bf16.mxu1 %v16003_v27  ;;  %v16055_v27 = vld [vmem:[%s16861_s15 + $0x2228] ss:$16 sps:$4 sm:$0xff]  }
 0x594   : > { %11540 = vmatpush2.bf16.msra.mxu0 %v15998_v5  ;;  %v16060_v5 = vld [vmem:[%s16861_s15 + $0x200c] ss:$16 sps:$4 sm:$0xff]  }
 0x595   : > { %11581 = vmatpush2.bf16.msra.mxu1 %v16001_v6  ;;  %11541 = vmatprep.subr.bf16.mxu0 %v16006_v53  ;;  %v16063_v6 = vld [vmem:[%s16861_s15 + $0x220c] ss:$16 sps:$4 sm:$0xff]   ;;  %v16058_v53 = vld [vmem:[%s16861_s15 + $0x2008] ss:$16 sps:$4 sm:$0xff]  }
 0x596   : > { %11582 = vmatprep.subr.bf16.mxu1 %v16009_v47  ;;  %v16061_v47 = vld [vmem:[%s16861_s15 + $0x2208] ss:$16 sps:$4 sm:$0xff]  }
 0x598   : > { %11542 = vmatpush2.bf16.msra.mxu0 %v16004_v9  ;;  %v16066_v9 = vld [vmem:[%s16861_s15 + $0x21ec] ss:$16 sps:$4 sm:$0xff]  }
 0x599   : > { %11583 = vmatpush2.bf16.msra.mxu1 %v16007_v11  ;;  %11543 = vmatprep.subr.bf16.mxu0 %v16012_v60  ;;  %v16069_v11 = vld [vmem:[%s16861_s15 + $0x23ec] ss:$16 sps:$4 sm:$0xff]   ;;  %v16064_v60 = vld [vmem:[%s16861_s15 + $0x21e8] ss:$16 sps:$4 sm:$0xff]  }
 0x59a   : > { %11584 = vmatprep.subr.bf16.mxu1 %v16015_v51  ;;  %v16067_v51 = vld [vmem:[%s16861_s15 + $0x23e8] ss:$16 sps:$4 sm:$0xff]  }
 0x59c   : > { %11544 = vmatpush2.bf16.msra.mxu0 %v16010_v62  ;;  %v16072_v62 = vld [vmem:[%s16861_s15 + $0x21cc] ss:$16 sps:$4 sm:$0xff]  }
 0x59d   : > { %11585 = vmatpush2.bf16.msra.mxu1 %v16013_v2  ;;  %11595 = vmatprep.subr.bf16.mxu0 %v16018_v38  ;;  %v16075_v2 = vld [vmem:[%s16861_s15 + $0x23cc] ss:$16 sps:$4 sm:$0xff]   ;;  %v16070_v38 = vld [vmem:[%s16861_s15 + $0x21c8] ss:$16 sps:$4 sm:$0xff]  }
 0x59e   : > { %11636 = vmatprep.subr.bf16.mxu1 %v16021_v16  ;;  %v16073_v16 = vld [vmem:[%s16861_s15 + $0x23c8] ss:$16 sps:$4 sm:$0xff]  }
 0x59f   : > { %v11301_v25 = vpop.f32.mrf.mxu0  ;;  %11546 = vmatmul.mubr.bf16.vlgmr.msra.gmra.mxu0 %v17625_v18 }
 0x5a0   : > { %v11342_v36 = vpop.f32.mrf.mxu1  ;;  %11587 = vmatmul.mubr.bf16.vlgmr.msra.gmra.mxu1 %v17638_v30  ;;  %v11302_v31 = vadd.f32 %v11301_v25, %v18543_v44  ;;  %11596 = vmatpush1.bf16.msra.mxu0 %v16016_v26  ;;  %v16078_v26 = vld [vmem:[%s16861_s15 + $0x21ac] ss:$16 sps:$4 sm:$0xff]  }
 0x5a1   : > { %11637 = vmatpush1.bf16.msra.mxu1 %v16019_v35  ;;  %v11303_v50 = vpop.f32.mrf.mxu0  ;;  %11597 = vmatprep.subr.bf16.mxu0 %v16024_v42  ;;  %v16081_v35 = vld [vmem:[%s16861_s15 + $0x23ac] ss:$16 sps:$4 sm:$0xff]   ;;  %v16076_v42 = vld [vmem:[%s16861_s15 + $0x21a8] ss:$16 sps:$4 sm:$0xff]  }
 0x5a2   : > { %v11344_v57 = vpop.f32.mrf.mxu1  ;;  %11638 = vmatprep.subr.bf16.mxu1 %v16027_v24  ;;  %v18617_v20 = vadd.f32 %v11342_v36, %v11302_v31  ;;  %v11304_v18 = vadd.f32 %v11303_v50, %v18548_v45  ;;  %11627 = vmatprep.mubr.bf16.mxu0 %v17634_v33  ;;  %v16036_v33 = vld [vmem:[%s16861_s15 + $0x208c] ss:$16 sps:$4 sm:$0xff]   ;;  %v16034_v45 = vld [vmem:[%s16861_s15 + $0x2088] ss:$16 sps:$4 sm:$0xff]  }
 0x5a3   : > { %11668 = vmatprep.mubr.bf16.mxu1 %v17646_v46  ;;  %v11305_v30 = vpop.f32.mrf.mxu0  ;;  %v16039_v46 = vld [vmem:[%s16861_s15 + $0x228c] ss:$16 sps:$4 sm:$0xff]   ;;  %v16079_v24 = vld [vmem:[%s16861_s15 + $0x23a8] ss:$16 sps:$4 sm:$0xff]  }
 0x5a4   : > { %v11346_v44 = vpop.f32.mrf.mxu1  ;;  %v18622_v63 = vadd.f32 %v11344_v57, %v11304_v18  ;;  %11598 = vmatpush1.bf16.msra.mxu0 %v16022_v59  ;;  %v16084_v25 = vld [vmem:[%s16861_s15 + $0x218c] ss:$16 sps:$4 sm:$0xff]   ;;  %v16082_v31 = vld [vmem:[%s16861_s15 + $0x2188] ss:$16 sps:$4 sm:$0xff]  }
 0x5a5   : > { %11639 = vmatpush1.bf16.msra.mxu1 %v16025_v3  ;;  %v11306_v39 = vpop.f32.mrf.mxu0  ;;  %11599 = vmatprep.subr.bf16.mxu0 %v16030_v34  ;;  %v16087_v36 = vld [vmem:[%s16861_s15 + $0x238c] ss:$16 sps:$4 sm:$0xff]   ;;  %v16085_v59 = vld [vmem:[%s16861_s15 + $0x2388] ss:$16 sps:$4 sm:$0xff]  }
 0x5a6   : > { %v11347_v28 = vpop.f32.mrf.mxu1  ;;  %11640 = vmatprep.subr.bf16.mxu1 %v16033_v15  ;;  %v16090_v3 = vld [vmem:[%s16861_s15 + $0x216c] ss:$16 sps:$4 sm:$0xff]   ;;  %v16088_v57 = vld [vmem:[%s16861_s15 + $0x2168] ss:$16 sps:$4 sm:$0xff]  }
 0x5a7   : > { %v16093_v50 = vld [vmem:[%s16861_s15 + $0x236c] ss:$16 sps:$4 sm:$0xff]   ;;  %v16091_v34 = vld [vmem:[%s16861_s15 + $0x2368] ss:$16 sps:$4 sm:$0xff]  }
 0x5a8   : > { %11600 = vmatpush1.bf16.msra.mxu0 %v16028_v37  ;;  %v16096_v15 = vld [vmem:[%s16861_s15 + $0x214c] ss:$16 sps:$4 sm:$0xff]   ;;  %v16094_v30 = vld [vmem:[%s16861_s15 + $0x2148] ss:$16 sps:$4 sm:$0xff]  }
 0x5a9   : > { %11641 = vmatpush1.bf16.msra.mxu1 %v16031_v61  ;;  %11601 = vmatprep.subr.bf16.mxu0 %v16036_v33  ;;  %v16099_v18 = vld [vmem:[%s16861_s15 + $0x234c] ss:$16 sps:$4 sm:$0xff]   ;;  %v16097_v44 = vld [vmem:[%s16861_s15 + $0x2348] ss:$16 sps:$4 sm:$0xff]  }
 0x5aa   : > { %11642 = vmatprep.subr.bf16.mxu1 %v16039_v46  ;;  %v16102_v37 = vld [vmem:[%s16861_s15 + $0x212c] ss:$16 sps:$4 sm:$0xff]   ;;  %v16100_v39 = vld [vmem:[%s16861_s15 + $0x2128] ss:$16 sps:$4 sm:$0xff]  }
 0x5ab   : > { %v16105_v61 = vld [vmem:[%s16861_s15 + $0x232c] ss:$16 sps:$4 sm:$0xff]   ;;  %v16103_v28 = vld [vmem:[%s16861_s15 + $0x2328] ss:$16 sps:$4 sm:$0xff]  }
 0x5ac   : > { %11602 = vmatpush1.bf16.msra.mxu0 %v16034_v45  ;;  %v16108_v33 = vld [vmem:[%s16861_s15 + $0x210c] ss:$16 sps:$4 sm:$0xff]   ;;  %v16106_v45 = vld [vmem:[%s16861_s15 + $0x2108] ss:$16 sps:$4 sm:$0xff]  }
 0x5ad   : > { %11643 = vmatpush1.bf16.msra.mxu1 %v16037_v32  ;;  %11603 = vmatprep.subr.bf16.mxu0 %v16042_v7  ;;  %v16111_v46 = vld [vmem:[%s16861_s15 + $0x230c] ss:$16 sps:$4 sm:$0xff]   ;;  %v16109_v32 = vld [vmem:[%s16861_s15 + $0x2308] ss:$16 sps:$4 sm:$0xff]  }
 0x5ae   : > { %11644 = vmatprep.subr.bf16.mxu1 %v16045_v19  ;;  %v16114_v7 = vld [vmem:[%s16861_s15 + $0x24ec] ss:$16 sps:$4 sm:$0xff]  }
 0x5af   : > { %v16117_v19 = vld [vmem:[%s16861_s15 + $0x26ec] ss:$16 sps:$4 sm:$0xff]  }
 0x5b0   : > { %11604 = vmatpush1.bf16.msra.mxu0 %v16040_v14  ;;  %v16112_v14 = vld [vmem:[%s16861_s15 + $0x24e8] ss:$16 sps:$4 sm:$0xff]  }
 0x5b1   : > { %11645 = vmatpush1.bf16.msra.mxu1 %v16043_v22  ;;  %11605 = vmatprep.subr.bf16.mxu0 %v16048_v23  ;;  %v16115_v22 = vld [vmem:[%s16861_s15 + $0x26e8] ss:$16 sps:$4 sm:$0xff]   ;;  %v16120_v23 = vld [vmem:[%s16861_s15 + $0x24cc] ss:$16 sps:$4 sm:$0xff]  }
 0x5b2   : > { %11646 = vmatprep.subr.bf16.mxu1 %v16051_v52  ;;  %v16123_v52 = vld [vmem:[%s16861_s15 + $0x26cc] ss:$16 sps:$4 sm:$0xff]  }
 0x5b4   : > { %11606 = vmatpush1.bf16.msra.mxu0 %v16046_v43 }
 0x5b5   : > { %11647 = vmatpush1.bf16.msra.mxu1 %v16049_v41  ;;  %11607 = vmatprep.subr.bf16.mxu0 %v16054_v0 }
 0x5b6   : > { %11648 = vmatprep.subr.bf16.mxu1 %v16057_v56  ;;  %v16118_v56 = vld [vmem:[%s16861_s15 + $0x24c8] ss:$16 sps:$4 sm:$0xff]  }
 0x5b8   : > { %11608 = vmatpush1.bf16.msra.mxu0 %v16052_v21  ;;  %v16121_v21 = vld [vmem:[%s16861_s15 + $0x26c8] ss:$16 sps:$4 sm:$0xff]  }
 0x5b9   : > { %11649 = vmatpush1.bf16.msra.mxu1 %v16055_v27  ;;  %11609 = vmatprep.subr.bf16.mxu0 %v16060_v5 }
 0x5ba   : > { %11650 = vmatprep.subr.bf16.mxu1 %v16063_v6  ;;  %v16126_v6 = vld [vmem:[%s16861_s15 + $0x24ac] ss:$16 sps:$4 sm:$0xff]  }
 0x5bc   : > { %11610 = vmatpush1.bf16.msra.mxu0 %v16058_v53  ;;  %v16129_v53 = vld [vmem:[%s16861_s15 + $0x26ac] ss:$16 sps:$4 sm:$0xff]  }
 0x5bd   : > { %11651 = vmatpush1.bf16.msra.mxu1 %v16061_v47  ;;  %11611 = vmatprep.subr.bf16.mxu0 %v16066_v9 }
 0x5be   : > { %11652 = vmatprep.subr.bf16.mxu1 %v16069_v11  ;;  %v16124_v11 = vld [vmem:[%s16861_s15 + $0x24a8] ss:$16 sps:$4 sm:$0xff]  }
 0x5c0   : > { %11612 = vmatpush2.bf16.msra.mxu0 %v16064_v60  ;;  %v16127_v60 = vld [vmem:[%s16861_s15 + $0x26a8] ss:$16 sps:$4 sm:$0xff]  }
 0x5c1   : > { %11653 = vmatpush2.bf16.msra.mxu1 %v16067_v51  ;;  %11613 = vmatprep.subr.bf16.mxu0 %v16072_v62 }
 0x5c2   : > { %11654 = vmatprep.subr.bf16.mxu1 %v16075_v2  ;;  %v16133_v2 = vld [vmem:[%s16861_s15 + $0x2688] ss:$16 sps:$4 sm:$0xff]  }
 0x5c4   : > { %11614 = vmatpush2.bf16.msra.mxu0 %v16070_v38  ;;  %v16138_v38 = vld [vmem:[%s16861_s15 + $0x246c] ss:$16 sps:$4 sm:$0xff]  }
 0x5c5   : > { %11655 = vmatpush2.bf16.msra.mxu1 %v16073_v16  ;;  %11615 = vmatprep.subr.bf16.mxu0 %v16078_v26  ;;  %v16141_v16 = vld [vmem:[%s16861_s15 + $0x266c] ss:$16 sps:$4 sm:$0xff]   ;;  %v16136_v26 = vld [vmem:[%s16861_s15 + $0x2468] ss:$16 sps:$4 sm:$0xff]  }
 0x5c6   : > { %11656 = vmatprep.subr.bf16.mxu1 %v16081_v35  ;;  %v16139_v35 = vld [vmem:[%s16861_s15 + $0x2668] ss:$16 sps:$4 sm:$0xff]  }
 0x5c8   : > { %11616 = vmatpush2.bf16.msra.mxu0 %v16076_v42  ;;  %v16144_v42 = vld [vmem:[%s16861_s15 + $0x244c] ss:$16 sps:$4 sm:$0xff]  }
 0x5c9   : > { %11657 = vmatpush2.bf16.msra.mxu1 %v16079_v24  ;;  %11617 = vmatprep.subr.bf16.mxu0 %v16084_v25  ;;  %v16147_v24 = vld [vmem:[%s16861_s15 + $0x264c] ss:$16 sps:$4 sm:$0xff]   ;;  %v16142_v25 = vld [vmem:[%s16861_s15 + $0x2448] ss:$16 sps:$4 sm:$0xff]  }
 0x5ca   : > { %11658 = vmatprep.subr.bf16.mxu1 %v16087_v36  ;;  %v16145_v36 = vld [vmem:[%s16861_s15 + $0x2648] ss:$16 sps:$4 sm:$0xff]  }
 0x5cc   : > { %11618 = vmatpush2.bf16.msra.mxu0 %v16082_v31  ;;  %v16150_v31 = vld [vmem:[%s16861_s15 + $0x242c] ss:$16 sps:$4 sm:$0xff]  }
 0x5cd   : > { %11659 = vmatpush2.bf16.msra.mxu1 %v16085_v59  ;;  %11619 = vmatprep.subr.bf16.mxu0 %v16090_v3  ;;  %v16153_v59 = vld [vmem:[%s16861_s15 + $0x262c] ss:$16 sps:$4 sm:$0xff]   ;;  %v16148_v3 = vld [vmem:[%s16861_s15 + $0x2428] ss:$16 sps:$4 sm:$0xff]  }
 0x5ce   : > { %11660 = vmatprep.subr.bf16.mxu1 %v16093_v50  ;;  %v16151_v50 = vld [vmem:[%s16861_s15 + $0x2628] ss:$16 sps:$4 sm:$0xff]  }
 0x5d0   : > { %11620 = vmatpush2.bf16.msra.mxu0 %v16088_v57  ;;  %v16156_v57 = vld [vmem:[%s16861_s15 + $0x240c] ss:$16 sps:$4 sm:$0xff]  }
 0x5d1   : > { %11661 = vmatpush2.bf16.msra.mxu1 %v16091_v34  ;;  %11621 = vmatprep.subr.bf16.mxu0 %v16096_v15  ;;  %v16159_v34 = vld [vmem:[%s16861_s15 + $0x260c] ss:$16 sps:$4 sm:$0xff]   ;;  %v16154_v15 = vld [vmem:[%s16861_s15 + $0x2408] ss:$16 sps:$4 sm:$0xff]  }
 0x5d2   : > { %11662 = vmatprep.subr.bf16.mxu1 %v16099_v18  ;;  %v16157_v18 = vld [vmem:[%s16861_s15 + $0x2608] ss:$16 sps:$4 sm:$0xff]  }
 0x5d4   : > { %11622 = vmatpush2.bf16.msra.mxu0 %v16094_v30  ;;  %v16162_v30 = vld [vmem:[%s16861_s15 + $0x25ec] ss:$16 sps:$4 sm:$0xff]  }
 0x5d5   : > { %11663 = vmatpush2.bf16.msra.mxu1 %v16097_v44  ;;  %11623 = vmatprep.subr.bf16.mxu0 %v16102_v37  ;;  %v16165_v44 = vld [vmem:[%s16861_s15 + $0x27ec] ss:$16 sps:$4 sm:$0xff]   ;;  %v16160_v37 = vld [vmem:[%s16861_s15 + $0x25e8] ss:$16 sps:$4 sm:$0xff]  }
 0x5d6   : > { %11664 = vmatprep.subr.bf16.mxu1 %v16105_v61  ;;  %v16163_v61 = vld [vmem:[%s16861_s15 + $0x27e8] ss:$16 sps:$4 sm:$0xff]  }
 0x5d8   : > { %11624 = vmatpush2.bf16.msra.mxu0 %v16100_v39  ;;  %v16168_v39 = vld [vmem:[%s16861_s15 + $0x25cc] ss:$16 sps:$4 sm:$0xff]  }
 0x5d9   : > { %11665 = vmatpush2.bf16.msra.mxu1 %v16103_v28  ;;  %11625 = vmatprep.subr.bf16.mxu0 %v16108_v33  ;;  %v16171_v28 = vld [vmem:[%s16861_s15 + $0x27cc] ss:$16 sps:$4 sm:$0xff]   ;;  %v16166_v33 = vld [vmem:[%s16861_s15 + $0x25c8] ss:$16 sps:$4 sm:$0xff]  }
 0x5da   : > { %11666 = vmatprep.subr.bf16.mxu1 %v16111_v46  ;;  %v16169_v46 = vld [vmem:[%s16861_s15 + $0x27c8] ss:$16 sps:$4 sm:$0xff]  }
 0x5dc   : > { %11626 = vmatpush2.bf16.msra.mxu0 %v16106_v45  ;;  %v16174_v45 = vld [vmem:[%s16861_s15 + $0x25ac] ss:$16 sps:$4 sm:$0xff]  }
 0x5dd   : > { %11667 = vmatpush2.bf16.msra.mxu1 %v16109_v32  ;;  %11677 = vmatprep.subr.bf16.mxu0 %v16114_v7  ;;  %v16177_v32 = vld [vmem:[%s16861_s15 + $0x27ac] ss:$16 sps:$4 sm:$0xff]   ;;  %v16172_v7 = vld [vmem:[%s16861_s15 + $0x25a8] ss:$16 sps:$4 sm:$0xff]  }
 0x5de   : > { %11718 = vmatprep.subr.bf16.mxu1 %v16117_v19  ;;  %v16175_v19 = vld [vmem:[%s16861_s15 + $0x27a8] ss:$16 sps:$4 sm:$0xff]  }
 0x5df   : > { %v11383_v43 = vpop.f32.mrf.mxu0  ;;  %11628 = vmatmul.mubr.bf16.vlgmr.msra.gmra.mxu0 %v17721_v55 }
 0x5e0   : > { %v11424_v41 = vpop.f32.mrf.mxu1  ;;  %11669 = vmatmul.mubr.bf16.vlgmr.msra.gmra.mxu1 %v17734_v4  ;;  %v11384_v0 = vadd.f32 %v11383_v43, %v18617_v20  ;;  %11678 = vmatpush1.bf16.msra.mxu0 %v16112_v14  ;;  %v16180_v14 = vld [vmem:[%s16861_s15 + $0x258c] ss:$16 sps:$4 sm:$0xff]  }
 0x5e1   : > { %11719 = vmatpush1.bf16.msra.mxu1 %v16115_v22  ;;  %v11385_v27 = vpop.f32.mrf.mxu0  ;;  %11679 = vmatprep.subr.bf16.mxu0 %v16120_v23  ;;  %v16183_v22 = vld [vmem:[%s16861_s15 + $0x278c] ss:$16 sps:$4 sm:$0xff]   ;;  %v16178_v23 = vld [vmem:[%s16861_s15 + $0x2588] ss:$16 sps:$4 sm:$0xff]  }
 0x5e2   : > { %v11426_v5 = vpop.f32.mrf.mxu1  ;;  %11720 = vmatprep.subr.bf16.mxu1 %v16123_v52  ;;  %v18691_v47 = vadd.f32 %v11424_v41, %v11384_v0  ;;  %v11386_v55 = vadd.f32 %v11385_v27, %v18622_v63  ;;  %11709 = vmatprep.mubr.bf16.mxu0 %v17730_v40  ;;  %v16132_v40 = vld [vmem:[%s16861_s15 + $0x248c] ss:$16 sps:$4 sm:$0xff]   ;;  %v16130_v63 = vld [vmem:[%s16861_s15 + $0x2488] ss:$16 sps:$4 sm:$0xff]  }
 0x5e3   : > { %11750 = vmatprep.mubr.bf16.mxu1 %v17742_v1  ;;  %v11387_v4 = vpop.f32.mrf.mxu0  ;;  %v16135_v1 = vld [vmem:[%s16861_s15 + $0x268c] ss:$16 sps:$4 sm:$0xff]   ;;  %v16181_v52 = vld [vmem:[%s16861_s15 + $0x2788] ss:$16 sps:$4 sm:$0xff]  }
 0x5e4   : > { %v11428_v20 = vpop.f32.mrf.mxu1  ;;  %v18696_v9 = vadd.f32 %v11426_v5, %v11386_v55  ;;  %11680 = vmatpush1.bf16.msra.mxu0 %v16118_v56  ;;  %v16186_v43 = vld [vmem:[%s16861_s15 + $0x256c] ss:$16 sps:$4 sm:$0xff]   ;;  %v16184_v0 = vld [vmem:[%s16861_s15 + $0x2568] ss:$16 sps:$4 sm:$0xff]  }
 0x5e5   : > { %11721 = vmatpush1.bf16.msra.mxu1 %v16121_v21  ;;  %v11388_v51 = vpop.f32.mrf.mxu0  ;;  %11681 = vmatprep.subr.bf16.mxu0 %v16126_v6  ;;  %v16189_v41 = vld [vmem:[%s16861_s15 + $0x276c] ss:$16 sps:$4 sm:$0xff]   ;;  %v16187_v56 = vld [vmem:[%s16861_s15 + $0x2768] ss:$16 sps:$4 sm:$0xff]  }
 0x5e6   : > { %v11429_v62 = vpop.f32.mrf.mxu1  ;;  %11722 = vmatprep.subr.bf16.mxu1 %v16129_v53  ;;  %v16192_v21 = vld [vmem:[%s16861_s15 + $0x254c] ss:$16 sps:$4 sm:$0xff]   ;;  %v16190_v5 = vld [vmem:[%s16861_s15 + $0x2548] ss:$16 sps:$4 sm:$0xff]  }
 0x5e7   : > { %v16195_v27 = vld [vmem:[%s16861_s15 + $0x274c] ss:$16 sps:$4 sm:$0xff]   ;;  %v16193_v6 = vld [vmem:[%s16861_s15 + $0x2748] ss:$16 sps:$4 sm:$0xff]  }
 0x5e8   : > { %11682 = vmatpush1.bf16.msra.mxu0 %v16124_v11  ;;  %v16198_v53 = vld [vmem:[%s16861_s15 + $0x252c] ss:$16 sps:$4 sm:$0xff]   ;;  %v16196_v4 = vld [vmem:[%s16861_s15 + $0x2528] ss:$16 sps:$4 sm:$0xff]  }
 0x5e9   : > { %11723 = vmatpush1.bf16.msra.mxu1 %v16127_v60  ;;  %11683 = vmatprep.subr.bf16.mxu0 %v16132_v40  ;;  %v16201_v55 = vld [vmem:[%s16861_s15 + $0x272c] ss:$16 sps:$4 sm:$0xff]   ;;  %v16199_v20 = vld [vmem:[%s16861_s15 + $0x2728] ss:$16 sps:$4 sm:$0xff]  }
 0x5ea   : > { %11724 = vmatprep.subr.bf16.mxu1 %v16135_v1  ;;  %v16204_v11 = vld [vmem:[%s16861_s15 + $0x250c] ss:$16 sps:$4 sm:$0xff]   ;;  %v16202_v51 = vld [vmem:[%s16861_s15 + $0x2508] ss:$16 sps:$4 sm:$0xff]  }
 0x5eb   : > { %v16207_v60 = vld [vmem:[%s16861_s15 + $0x270c] ss:$16 sps:$4 sm:$0xff]   ;;  %v16205_v62 = vld [vmem:[%s16861_s15 + $0x2708] ss:$16 sps:$4 sm:$0xff]  }
 0x5ec   : > { %11684 = vmatpush1.bf16.msra.mxu0 %v16130_v63  ;;  %v16210_v40 = vld [vmem:[%s16861_s15 + $0x28ec] ss:$16 sps:$4 sm:$0xff]   ;;  %v16208_v63 = vld [vmem:[%s16861_s15 + $0x28e8] ss:$16 sps:$4 sm:$0xff]  }
 0x5ed   : > { %11725 = vmatpush1.bf16.msra.mxu1 %v16133_v2  ;;  %11685 = vmatprep.subr.bf16.mxu0 %v16138_v38  ;;  %v16213_v1 = vld [vmem:[%s16861_s15 + $0x2aec] ss:$16 sps:$4 sm:$0xff]   ;;  %v16211_v2 = vld [vmem:[%s16861_s15 + $0x2ae8] ss:$16 sps:$4 sm:$0xff]  }
 0x5ee   : > { %11726 = vmatprep.subr.bf16.mxu1 %v16141_v16  ;;  %v16216_v38 = vld [vmem:[%s16861_s15 + $0x28cc] ss:$16 sps:$4 sm:$0xff]  }
 0x5ef   : > { %v16219_v16 = vld [vmem:[%s16861_s15 + $0x2acc] ss:$16 sps:$4 sm:$0xff]  }
 0x5f0   : > { %11686 = vmatpush1.bf16.msra.mxu0 %v16136_v26 }
 0x5f1   : > { %11727 = vmatpush1.bf16.msra.mxu1 %v16139_v35  ;;  %11687 = vmatprep.subr.bf16.mxu0 %v16144_v42 }
 0x5f2   : > { %11728 = vmatprep.subr.bf16.mxu1 %v16147_v24  ;;  %v16214_v24 = vld [vmem:[%s16861_s15 + $0x28c8] ss:$16 sps:$4 sm:$0xff]  }
 0x5f4   : > { %11688 = vmatpush1.bf16.msra.mxu0 %v16142_v25  ;;  %v16217_v25 = vld [vmem:[%s16861_s15 + $0x2ac8] ss:$16 sps:$4 sm:$0xff]  }
 0x5f5   : > { %11729 = vmatpush1.bf16.msra.mxu1 %v16145_v36  ;;  %11689 = vmatprep.subr.bf16.mxu0 %v16150_v31 }
 0x5f6   : > { %11730 = vmatprep.subr.bf16.mxu1 %v16153_v59  ;;  %v16222_v59 = vld [vmem:[%s16861_s15 + $0x28ac] ss:$16 sps:$4 sm:$0xff]  }
 0x5f8   : > { %11690 = vmatpush1.bf16.msra.mxu0 %v16148_v3  ;;  %v16225_v3 = vld [vmem:[%s16861_s15 + $0x2aac] ss:$16 sps:$4 sm:$0xff]  }
 0x5f9   : > { %11731 = vmatpush1.bf16.msra.mxu1 %v16151_v50  ;;  %11691 = vmatprep.subr.bf16.mxu0 %v16156_v57 }
 0x5fa   : > { %11732 = vmatprep.subr.bf16.mxu1 %v16159_v34 }
 0x5fc   : > { %11692 = vmatpush1.bf16.msra.mxu0 %v16154_v15 }
 0x5fd   : > { %11733 = vmatpush1.bf16.msra.mxu1 %v16157_v18  ;;  %11693 = vmatprep.subr.bf16.mxu0 %v16162_v30  ;;  %v16220_v18 = vld [vmem:[%s16861_s15 + $0x28a8] ss:$16 sps:$4 sm:$0xff]  }
 0x5fe   : > { %11734 = vmatprep.subr.bf16.mxu1 %v16165_v44  ;;  %v16223_v30 = vld [vmem:[%s16861_s15 + $0x2aa8] ss:$16 sps:$4 sm:$0xff]  }
 0x600   : > { %11694 = vmatpush2.bf16.msra.mxu0 %v16160_v37 }
 0x601   : > { %11735 = vmatpush2.bf16.msra.mxu1 %v16163_v61  ;;  %11695 = vmatprep.subr.bf16.mxu0 %v16168_v39  ;;  %v16231_v61 = vld [vmem:[%s16861_s15 + $0x2a8c] ss:$16 sps:$4 sm:$0xff]   ;;  %v16226_v39 = vld [vmem:[%s16861_s15 + $0x2888] ss:$16 sps:$4 sm:$0xff]  }
 0x602   : > { %11736 = vmatprep.subr.bf16.mxu1 %v16171_v28  ;;  %v16229_v28 = vld [vmem:[%s16861_s15 + $0x2a88] ss:$16 sps:$4 sm:$0xff]  }
 0x604   : > { %11696 = vmatpush2.bf16.msra.mxu0 %v16166_v33  ;;  %v16234_v33 = vld [vmem:[%s16861_s15 + $0x286c] ss:$16 sps:$4 sm:$0xff]  }
 0x605   : > { %11737 = vmatpush2.bf16.msra.mxu1 %v16169_v46  ;;  %11697 = vmatprep.subr.bf16.mxu0 %v16174_v45  ;;  %v16237_v46 = vld [vmem:[%s16861_s15 + $0x2a6c] ss:$16 sps:$4 sm:$0xff]   ;;  %v16232_v45 = vld [vmem:[%s16861_s15 + $0x2868] ss:$16 sps:$4 sm:$0xff]  }
 0x606   : > { %11738 = vmatprep.subr.bf16.mxu1 %v16177_v32  ;;  %v16235_v32 = vld [vmem:[%s16861_s15 + $0x2a68] ss:$16 sps:$4 sm:$0xff]  }
 0x608   : > { %11698 = vmatpush2.bf16.msra.mxu0 %v16172_v7  ;;  %v16240_v7 = vld [vmem:[%s16861_s15 + $0x284c] ss:$16 sps:$4 sm:$0xff]  }
 0x609   : > { %11739 = vmatpush2.bf16.msra.mxu1 %v16175_v19  ;;  %11699 = vmatprep.subr.bf16.mxu0 %v16180_v14  ;;  %v16243_v19 = vld [vmem:[%s16861_s15 + $0x2a4c] ss:$16 sps:$4 sm:$0xff]   ;;  %v16238_v14 = vld [vmem:[%s16861_s15 + $0x2848] ss:$16 sps:$4 sm:$0xff]  }
 0x60a   : > { %11740 = vmatprep.subr.bf16.mxu1 %v16183_v22  ;;  %v16241_v22 = vld [vmem:[%s16861_s15 + $0x2a48] ss:$16 sps:$4 sm:$0xff]  }
 0x60c   : > { %11700 = vmatpush2.bf16.msra.mxu0 %v16178_v23  ;;  %v16246_v23 = vld [vmem:[%s16861_s15 + $0x282c] ss:$16 sps:$4 sm:$0xff]  }
 0x60d   : > { %11741 = vmatpush2.bf16.msra.mxu1 %v16181_v52  ;;  %11701 = vmatprep.subr.bf16.mxu0 %v16186_v43  ;;  %v16249_v52 = vld [vmem:[%s16861_s15 + $0x2a2c] ss:$16 sps:$4 sm:$0xff]   ;;  %v16244_v43 = vld [vmem:[%s16861_s15 + $0x2828] ss:$16 sps:$4 sm:$0xff]  }
 0x60e   : > { %11742 = vmatprep.subr.bf16.mxu1 %v16189_v41  ;;  %v16247_v41 = vld [vmem:[%s16861_s15 + $0x2a28] ss:$16 sps:$4 sm:$0xff]  }
 0x610   : > { %11702 = vmatpush2.bf16.msra.mxu0 %v16184_v0  ;;  %v16252_v0 = vld [vmem:[%s16861_s15 + $0x280c] ss:$16 sps:$4 sm:$0xff]  }
 0x611   : > { %11743 = vmatpush2.bf16.msra.mxu1 %v16187_v56  ;;  %11703 = vmatprep.subr.bf16.mxu0 %v16192_v21  ;;  %v16255_v56 = vld [vmem:[%s16861_s15 + $0x2a0c] ss:$16 sps:$4 sm:$0xff]   ;;  %v16250_v21 = vld [vmem:[%s16861_s15 + $0x2808] ss:$16 sps:$4 sm:$0xff]  }
 0x612   : > { %11744 = vmatprep.subr.bf16.mxu1 %v16195_v27  ;;  %v16253_v27 = vld [vmem:[%s16861_s15 + $0x2a08] ss:$16 sps:$4 sm:$0xff]  }
 0x614   : > { %11704 = vmatpush2.bf16.msra.mxu0 %v16190_v5  ;;  %v16258_v5 = vld [vmem:[%s16861_s15 + $0x29ec] ss:$16 sps:$4 sm:$0xff]  }
 0x615   : > { %11745 = vmatpush2.bf16.msra.mxu1 %v16193_v6  ;;  %11705 = vmatprep.subr.bf16.mxu0 %v16198_v53  ;;  %v16261_v6 = vld [vmem:[%s16861_s15 + $0x2bec] ss:$16 sps:$4 sm:$0xff]   ;;  %v16256_v53 = vld [vmem:[%s16861_s15 + $0x29e8] ss:$16 sps:$4 sm:$0xff]  }
 0x616   : > { %11746 = vmatprep.subr.bf16.mxu1 %v16201_v55  ;;  %v16259_v55 = vld [vmem:[%s16861_s15 + $0x2be8] ss:$16 sps:$4 sm:$0xff]  }
 0x618   : > { %11706 = vmatpush2.bf16.msra.mxu0 %v16196_v4  ;;  %v16264_v4 = vld [vmem:[%s16861_s15 + $0x29cc] ss:$16 sps:$4 sm:$0xff]  }
 0x619   : > { %11747 = vmatpush2.bf16.msra.mxu1 %v16199_v20  ;;  %11707 = vmatprep.subr.bf16.mxu0 %v16204_v11  ;;  %v16267_v20 = vld [vmem:[%s16861_s15 + $0x2bcc] ss:$16 sps:$4 sm:$0xff]   ;;  %v16262_v11 = vld [vmem:[%s16861_s15 + $0x29c8] ss:$16 sps:$4 sm:$0xff]  }
 0x61a   : > { %11748 = vmatprep.subr.bf16.mxu1 %v16207_v60  ;;  %v16265_v60 = vld [vmem:[%s16861_s15 + $0x2bc8] ss:$16 sps:$4 sm:$0xff]  }
 0x61c   : > { %11708 = vmatpush2.bf16.msra.mxu0 %v16202_v51  ;;  %v16270_v51 = vld [vmem:[%s16861_s15 + $0x29ac] ss:$16 sps:$4 sm:$0xff]  }
 0x61d   : > { %11749 = vmatpush2.bf16.msra.mxu1 %v16205_v62  ;;  %11759 = vmatprep.subr.bf16.mxu0 %v16210_v40  ;;  %v16273_v62 = vld [vmem:[%s16861_s15 + $0x2bac] ss:$16 sps:$4 sm:$0xff]   ;;  %v16268_v40 = vld [vmem:[%s16861_s15 + $0x29a8] ss:$16 sps:$4 sm:$0xff]  }
 0x61e   : > { %11800 = vmatprep.subr.bf16.mxu1 %v16213_v1  ;;  %v16271_v1 = vld [vmem:[%s16861_s15 + $0x2ba8] ss:$16 sps:$4 sm:$0xff]  }
 0x61f   : > { %v11465_v26 = vpop.f32.mrf.mxu0  ;;  %11710 = vmatmul.mubr.bf16.vlgmr.msra.gmra.mxu0 %v17819_v10 }
 0x620   : > { %v11506_v35 = vpop.f32.mrf.mxu1  ;;  %11751 = vmatmul.mubr.bf16.vlgmr.msra.gmra.mxu1 %v17832_v49  ;;  %v11466_v42 = vadd.f32 %v11465_v26, %v18691_v47  ;;  %11760 = vmatpush1.bf16.msra.mxu0 %v16208_v63  ;;  %v18982_v49 = vld [vmem:[#allocation20_spill] sm:$0xff]  ;;  %v18983_v47 = vld [vmem:[#allocation21_spill] sm:$0xff] }
 0x621   : > { %11801 = vmatpush1.bf16.msra.mxu1 %v16211_v2  ;;  %v11467_v36 = vpop.f32.mrf.mxu0  ;;  %11761 = vmatprep.subr.bf16.mxu0 %v16216_v38  ;;  %v16276_v63 = vld [vmem:[%s16861_s15 + $0x298c] ss:$16 sps:$4 sm:$0xff]   ;;  %v16274_v38 = vld [vmem:[%s16861_s15 + $0x2988] ss:$16 sps:$4 sm:$0xff]  }
 0x622   : > { %v11508_v31 = vpop.f32.mrf.mxu1  ;;  %11802 = vmatprep.subr.bf16.mxu1 %v16219_v16  ;;  %v18765_v50 = vadd.f32 %v11506_v35, %v11466_v42  ;;  %v11468_v10 = vadd.f32 %v11467_v36, %v18696_v9  ;;  %11791 = vmatprep.mubr.bf16.mxu0 %v18982_v49  ;;  %v16228_v9 = vld [vmem:[%s16861_s15 + $0x288c] ss:$16 sps:$4 sm:$0xff]   ;;  %v16277_v16 = vld [vmem:[%s16861_s15 + $0x2b88] ss:$16 sps:$4 sm:$0xff]  }
 0x623   : > { %11832 = vmatprep.mubr.bf16.mxu1 %v18983_v47  ;;  %v11469_v57 = vpop.f32.mrf.mxu0  ;;  %v16279_v2 = vld [vmem:[%s16861_s15 + $0x2b8c] ss:$16 sps:$4 sm:$0xff]   ;;  %v16280_v42 = vld [vmem:[%s16861_s15 + $0x2968] ss:$16 sps:$4 sm:$0xff]  }
 0x624   : > { %v11510_v34 = vpop.f32.mrf.mxu1  ;;  %v18770_v15 = vadd.f32 %v11508_v31, %v11468_v10  ;;  %11762 = vmatpush1.bf16.msra.mxu0 %v16214_v24  ;;  %v16282_v26 = vld [vmem:[%s16861_s15 + $0x296c] ss:$16 sps:$4 sm:$0xff]   ;;  %v16283_v24 = vld [vmem:[%s16861_s15 + $0x2b68] ss:$16 sps:$4 sm:$0xff]  }
 0x625   : > { %11803 = vmatpush1.bf16.msra.mxu1 %v16217_v25  ;;  %v11470_v44 = vpop.f32.mrf.mxu0  ;;  %11763 = vmatprep.subr.bf16.mxu0 %v16222_v59  ;;  %v16285_v35 = vld [vmem:[%s16861_s15 + $0x2b6c] ss:$16 sps:$4 sm:$0xff]   ;;  %v16286_v31 = vld [vmem:[%s16861_s15 + $0x2948] ss:$16 sps:$4 sm:$0xff]  }
 0x626   : > { %v11511_v37 = vpop.f32.mrf.mxu1  ;;  %11804 = vmatprep.subr.bf16.mxu1 %v16225_v3  ;;  %v16288_v25 = vld [vmem:[%s16861_s15 + $0x294c] ss:$16 sps:$4 sm:$0xff]   ;;  %v16289_v59 = vld [vmem:[%s16861_s15 + $0x2b48] ss:$16 sps:$4 sm:$0xff]  }
 0x627   : > { %v16291_v36 = vld [vmem:[%s16861_s15 + $0x2b4c] ss:$16 sps:$4 sm:$0xff]   ;;  %v16292_v49 = vld [vmem:[%s16861_s15 + $0x2928] ss:$16 sps:$4 sm:$0xff]  }
 0x628   : > { %11764 = vmatpush1.bf16.msra.mxu0 %v16220_v18  ;;  %v16294_v3 = vld [vmem:[%s16861_s15 + $0x292c] ss:$16 sps:$4 sm:$0xff]   ;;  %v16295_v47 = vld [vmem:[%s16861_s15 + $0x2b28] ss:$16 sps:$4 sm:$0xff]  }
 0x629   : > { %11805 = vmatpush1.bf16.msra.mxu1 %v16223_v30  ;;  %11765 = vmatprep.subr.bf16.mxu0 %v16228_v9  ;;  %v16297_v10 = vld [vmem:[%s16861_s15 + $0x2b2c] ss:$16 sps:$4 sm:$0xff]   ;;  %v16298_v18 = vld [vmem:[%s16861_s15 + $0x2908] ss:$16 sps:$4 sm:$0xff]  }
 0x62a   : > { %11806 = vmatprep.subr.bf16.mxu1 %v16231_v61  ;;  %v16300_v57 = vld [vmem:[%s16861_s15 + $0x290c] ss:$16 sps:$4 sm:$0xff]   ;;  %v16301_v30 = vld [vmem:[%s16861_s15 + $0x2b08] ss:$16 sps:$4 sm:$0xff]  }
 0x62b   : > { %v16303_v34 = vld [vmem:[%s16861_s15 + $0x2b0c] ss:$16 sps:$4 sm:$0xff]   ;;  %v16304_v9 = vld [vmem:[%s16861_s15 + $0x2ce8] ss:$16 sps:$4 sm:$0xff]  }
 0x62c   : > { %11766 = vmatpush1.bf16.msra.mxu0 %v16226_v39  ;;  %v16306_v44 = vld [vmem:[%s16861_s15 + $0x2cec] ss:$16 sps:$4 sm:$0xff]   ;;  %v16307_v61 = vld [vmem:[%s16861_s15 + $0x2ee8] ss:$16 sps:$4 sm:$0xff]  }
 0x62d   : > { %11807 = vmatpush1.bf16.msra.mxu1 %v16229_v28  ;;  %11767 = vmatprep.subr.bf16.mxu0 %v16234_v33  ;;  %v16309_v37 = vld [vmem:[%s16861_s15 + $0x2eec] ss:$16 sps:$4 sm:$0xff]  }
 0x62e   : > { %11808 = vmatprep.subr.bf16.mxu1 %v16237_v46  ;;  %v16312_v39 = vld [vmem:[%s16861_s15 + $0x2ccc] ss:$16 sps:$4 sm:$0xff]  }
 0x62f   : > { %v16315_v28 = vld [vmem:[%s16861_s15 + $0x2ecc] ss:$16 sps:$4 sm:$0xff]  }
 0x630   : > { %11768 = vmatpush1.bf16.msra.mxu0 %v16232_v45  ;;  %v18984_v45 = vld [vmem:[#allocation22_spill] sm:$0xff] }
 0x631   : > { %11809 = vmatpush1.bf16.msra.mxu1 %v16235_v32  ;;  %11769 = vmatprep.subr.bf16.mxu0 %v16240_v7  ;;  %v16310_v7 = vld [vmem:[%s16861_s15 + $0x2cc8] ss:$16 sps:$4 sm:$0xff]  }
 0x632   : > { %11810 = vmatprep.subr.bf16.mxu1 %v16243_v19  ;;  %v16313_v19 = vld [vmem:[%s16861_s15 + $0x2ec8] ss:$16 sps:$4 sm:$0xff]  }
 0x634   : > { %11770 = vmatpush1.bf16.msra.mxu0 %v16238_v14 }
 0x635   : > { %11811 = vmatpush1.bf16.msra.mxu1 %v16241_v22  ;;  %11771 = vmatprep.subr.bf16.mxu0 %v16246_v23  ;;  %v16318_v23 = vld [vmem:[%s16861_s15 + $0x2cac] ss:$16 sps:$4 sm:$0xff]  }
 0x636   : > { %11812 = vmatprep.subr.bf16.mxu1 %v16249_v52  ;;  %v16321_v52 = vld [vmem:[%s16861_s15 + $0x2eac] ss:$16 sps:$4 sm:$0xff]  }
 0x638   : > { %11772 = vmatpush1.bf16.msra.mxu0 %v16244_v43 }
 0x639   : > { %11813 = vmatpush1.bf16.msra.mxu1 %v16247_v41  ;;  %11773 = vmatprep.subr.bf16.mxu0 %v16252_v0 }
 0x63a   : > { %11814 = vmatprep.subr.bf16.mxu1 %v16255_v56  ;;  %v16316_v56 = vld [vmem:[%s16861_s15 + $0x2ca8] ss:$16 sps:$4 sm:$0xff]  }
 0x63c   : > { %11774 = vmatpush1.bf16.msra.mxu0 %v16250_v21  ;;  %v16319_v21 = vld [vmem:[%s16861_s15 + $0x2ea8] ss:$16 sps:$4 sm:$0xff]  }
 0x63d   : > { %11815 = vmatpush1.bf16.msra.mxu1 %v16253_v27  ;;  %11775 = vmatprep.subr.bf16.mxu0 %v16258_v5 }
 0x63e   : > { %11816 = vmatprep.subr.bf16.mxu1 %v16261_v6  ;;  %v16325_v6 = vld [vmem:[%s16861_s15 + $0x2e88] ss:$16 sps:$4 sm:$0xff]  }
 0x640   : > { %11776 = vmatpush2.bf16.msra.mxu0 %v16256_v53  ;;  %v16330_v53 = vld [vmem:[%s16861_s15 + $0x2c6c] ss:$16 sps:$4 sm:$0xff]  }
 0x641   : > { %11817 = vmatpush2.bf16.msra.mxu1 %v16259_v55  ;;  %11777 = vmatprep.subr.bf16.mxu0 %v16264_v4  ;;  %v16333_v55 = vld [vmem:[%s16861_s15 + $0x2e6c] ss:$16 sps:$4 sm:$0xff]   ;;  %v16328_v4 = vld [vmem:[%s16861_s15 + $0x2c68] ss:$16 sps:$4 sm:$0xff]  }
 0x642   : > { %11818 = vmatprep.subr.bf16.mxu1 %v16267_v20  ;;  %v16331_v20 = vld [vmem:[%s16861_s15 + $0x2e68] ss:$16 sps:$4 sm:$0xff]  }
 0x644   : > { %11778 = vmatpush2.bf16.msra.mxu0 %v16262_v11  ;;  %v16336_v11 = vld [vmem:[%s16861_s15 + $0x2c4c] ss:$16 sps:$4 sm:$0xff]  }
 0x645   : > { %11819 = vmatpush2.bf16.msra.mxu1 %v16265_v60  ;;  %11779 = vmatprep.subr.bf16.mxu0 %v16270_v51  ;;  %v16339_v60 = vld [vmem:[%s16861_s15 + $0x2e4c] ss:$16 sps:$4 sm:$0xff]   ;;  %v16334_v51 = vld [vmem:[%s16861_s15 + $0x2c48] ss:$16 sps:$4 sm:$0xff]  }
 0x646   : > { %11820 = vmatprep.subr.bf16.mxu1 %v16273_v62  ;;  %v16337_v62 = vld [vmem:[%s16861_s15 + $0x2e48] ss:$16 sps:$4 sm:$0xff]  }
 0x648   : > { %11780 = vmatpush2.bf16.msra.mxu0 %v16268_v40  ;;  %v16342_v40 = vld [vmem:[%s16861_s15 + $0x2c2c] ss:$16 sps:$4 sm:$0xff]  }
 0x649   : > { %11821 = vmatpush2.bf16.msra.mxu1 %v16271_v1  ;;  %11781 = vmatprep.subr.bf16.mxu0 %v16276_v63  ;;  %v16345_v1 = vld [vmem:[%s16861_s15 + $0x2e2c] ss:$16 sps:$4 sm:$0xff]   ;;  %v16340_v63 = vld [vmem:[%s16861_s15 + $0x2c28] ss:$16 sps:$4 sm:$0xff]  }
 0x64a   : > { %11822 = vmatprep.subr.bf16.mxu1 %v16279_v2  ;;  %v16343_v2 = vld [vmem:[%s16861_s15 + $0x2e28] ss:$16 sps:$4 sm:$0xff]  }
 0x64c   : > { %11782 = vmatpush2.bf16.msra.mxu0 %v16274_v38  ;;  %v16348_v38 = vld [vmem:[%s16861_s15 + $0x2c0c] ss:$16 sps:$4 sm:$0xff]  }
 0x64d   : > { %11823 = vmatpush2.bf16.msra.mxu1 %v16277_v16  ;;  %11783 = vmatprep.subr.bf16.mxu0 %v16282_v26  ;;  %v16351_v16 = vld [vmem:[%s16861_s15 + $0x2e0c] ss:$16 sps:$4 sm:$0xff]   ;;  %v16346_v26 = vld [vmem:[%s16861_s15 + $0x2c08] ss:$16 sps:$4 sm:$0xff]  }
 0x64e   : > { %11824 = vmatprep.subr.bf16.mxu1 %v16285_v35  ;;  %v16349_v35 = vld [vmem:[%s16861_s15 + $0x2e08] ss:$16 sps:$4 sm:$0xff]  }
 0x650   : > { %11784 = vmatpush2.bf16.msra.mxu0 %v16280_v42  ;;  %v16354_v42 = vld [vmem:[%s16861_s15 + $0x2dec] ss:$16 sps:$4 sm:$0xff]  }
 0x651   : > { %11825 = vmatpush2.bf16.msra.mxu1 %v16283_v24  ;;  %11785 = vmatprep.subr.bf16.mxu0 %v16288_v25  ;;  %v16357_v24 = vld [vmem:[%s16861_s15 + $0x2fec] ss:$16 sps:$4 sm:$0xff]   ;;  %v16352_v25 = vld [vmem:[%s16861_s15 + $0x2de8] ss:$16 sps:$4 sm:$0xff]  }
 0x652   : > { %11826 = vmatprep.subr.bf16.mxu1 %v16291_v36  ;;  %v16355_v36 = vld [vmem:[%s16861_s15 + $0x2fe8] ss:$16 sps:$4 sm:$0xff]  }
 0x654   : > { %11786 = vmatpush2.bf16.msra.mxu0 %v16286_v31  ;;  %v16360_v31 = vld [vmem:[%s16861_s15 + $0x2dcc] ss:$16 sps:$4 sm:$0xff]  }
 0x655   : > { %11827 = vmatpush2.bf16.msra.mxu1 %v16289_v59  ;;  %11787 = vmatprep.subr.bf16.mxu0 %v16294_v3  ;;  %v16363_v59 = vld [vmem:[%s16861_s15 + $0x2fcc] ss:$16 sps:$4 sm:$0xff]   ;;  %v16358_v3 = vld [vmem:[%s16861_s15 + $0x2dc8] ss:$16 sps:$4 sm:$0xff]  }
 0x656   : > { %11828 = vmatprep.subr.bf16.mxu1 %v16297_v10  ;;  %v16361_v10 = vld [vmem:[%s16861_s15 + $0x2fc8] ss:$16 sps:$4 sm:$0xff]  }
 0x658   : > { %11788 = vmatpush2.bf16.msra.mxu0 %v16292_v49  ;;  %v16366_v49 = vld [vmem:[%s16861_s15 + $0x2dac] ss:$16 sps:$4 sm:$0xff]  }
 0x659   : > { %11829 = vmatpush2.bf16.msra.mxu1 %v16295_v47  ;;  %11789 = vmatprep.subr.bf16.mxu0 %v16300_v57  ;;  %v16369_v47 = vld [vmem:[%s16861_s15 + $0x2fac] ss:$16 sps:$4 sm:$0xff]   ;;  %v16364_v57 = vld [vmem:[%s16861_s15 + $0x2da8] ss:$16 sps:$4 sm:$0xff]  }
 0x65a   : > { %11830 = vmatprep.subr.bf16.mxu1 %v16303_v34  ;;  %v16367_v34 = vld [vmem:[%s16861_s15 + $0x2fa8] ss:$16 sps:$4 sm:$0xff]  }
 0x65c   : > { %11790 = vmatpush2.bf16.msra.mxu0 %v16298_v18  ;;  %v16372_v18 = vld [vmem:[%s16861_s15 + $0x2d8c] ss:$16 sps:$4 sm:$0xff]  }
 0x65d   : > { %11831 = vmatpush2.bf16.msra.mxu1 %v16301_v30  ;;  %11841 = vmatprep.subr.bf16.mxu0 %v16306_v44  ;;  %v16375_v30 = vld [vmem:[%s16861_s15 + $0x2f8c] ss:$16 sps:$4 sm:$0xff]   ;;  %v16370_v44 = vld [vmem:[%s16861_s15 + $0x2d88] ss:$16 sps:$4 sm:$0xff]  }
 0x65e   : > { %11882 = vmatprep.subr.bf16.mxu1 %v16309_v37  ;;  %v16373_v37 = vld [vmem:[%s16861_s15 + $0x2f88] ss:$16 sps:$4 sm:$0xff]  }
 0x65f   : > { %v11547_v33 = vpop.f32.mrf.mxu0  ;;  %11792 = vmatmul.mubr.bf16.vlgmr.msra.gmra.mxu0 %v18984_v45  ;;  %v16382_v45 = vld [vmem:[%s16861_s15 + $0x2d48] ss:$16 sps:$4 sm:$0xff]  }
 0x660   : > { %v11588_v46 = vpop.f32.mrf.mxu1  ;;  %11833 = vmatmul.mubr.bf16.vlgmr.msra.gmra.mxu1 %v17928_v54  ;;  %v11548_v32 = vadd.f32 %v11547_v33, %v18765_v50  ;;  %11842 = vmatpush1.bf16.msra.mxu0 %v16304_v9  ;;  %v16378_v9 = vld [vmem:[%s16861_s15 + $0x2d6c] ss:$16 sps:$4 sm:$0xff]  }
 0x661   : > { %11883 = vmatpush1.bf16.msra.mxu1 %v16307_v61  ;;  %v11549_v14 = vpop.f32.mrf.mxu0  ;;  %11843 = vmatprep.subr.bf16.mxu0 %v16312_v39  ;;  %v16381_v61 = vld [vmem:[%s16861_s15 + $0x2f6c] ss:$16 sps:$4 sm:$0xff]   ;;  %v16376_v39 = vld [vmem:[%s16861_s15 + $0x2d68] ss:$16 sps:$4 sm:$0xff]  }
 0x662   : > { %v11590_v22 = vpop.f32.mrf.mxu1  ;;  %11884 = vmatprep.subr.bf16.mxu1 %v16315_v28  ;;  %v18839_v43 = vadd.f32 %v11588_v46, %v11548_v32  ;;  %v11550_v54 = vadd.f32 %v11549_v14, %v18770_v15  ;;  %11873 = vmatprep.mubr.bf16.mxu0 %v17924_v12  ;;  %v16324_v12 = vld [vmem:[%s16861_s15 + $0x2c8c] ss:$16 sps:$4 sm:$0xff]   ;;  %v16322_v15 = vld [vmem:[%s16861_s15 + $0x2c88] ss:$16 sps:$4 sm:$0xff]  }
 0x663   : > { %11914 = vmatprep.mubr.bf16.mxu1 %v17936_v13  ;;  %v11551_v50 = vpop.f32.mrf.mxu0  ;;  %v16327_v13 = vld [vmem:[%s16861_s15 + $0x2e8c] ss:$16 sps:$4 sm:$0xff]   ;;  %v16379_v28 = vld [vmem:[%s16861_s15 + $0x2f68] ss:$16 sps:$4 sm:$0xff]  }
 0x664   : > { %v11592_v41 = vpop.f32.mrf.mxu1  ;;  %v18844_v0 = vadd.f32 %v11590_v22, %v11550_v54  ;;  %11844 = vmatpush1.bf16.msra.mxu0 %v16310_v7  ;;  %v16384_v33 = vld [vmem:[%s16861_s15 + $0x2d4c] ss:$16 sps:$4 sm:$0xff]   ;;  %v16385_v32 = vld [vmem:[%s16861_s15 + $0x2f48] ss:$16 sps:$4 sm:$0xff]  }
 0x665   : > { %11885 = vmatpush1.bf16.msra.mxu1 %v16313_v19  ;;  %v11552_v27 = vpop.f32.mrf.mxu0  ;;  %11845 = vmatprep.subr.bf16.mxu0 %v16318_v23  ;;  %v16387_v46 = vld [vmem:[%s16861_s15 + $0x2f4c] ss:$16 sps:$4 sm:$0xff]   ;;  %v16388_v14 = vld [vmem:[%s16861_s15 + $0x2d28] ss:$16 sps:$4 sm:$0xff]  }
 0x666   : > { %v11593_v5 = vpop.f32.mrf.mxu1  ;;  %11886 = vmatprep.subr.bf16.mxu1 %v16321_v52  ;;  %v16390_v7 = vld [vmem:[%s16861_s15 + $0x2d2c] ss:$16 sps:$4 sm:$0xff]   ;;  %v16391_v22 = vld [vmem:[%s16861_s15 + $0x2f28] ss:$16 sps:$4 sm:$0xff]  }
 0x667   : > { %v16393_v19 = vld [vmem:[%s16861_s15 + $0x2f2c] ss:$16 sps:$4 sm:$0xff]   ;;  %v16394_v54 = vld [vmem:[%s16861_s15 + $0x2d08] ss:$16 sps:$4 sm:$0xff]  }
 0x668   : > { %11846 = vmatpush1.bf16.msra.mxu0 %v16316_v56  ;;  %v16396_v23 = vld [vmem:[%s16861_s15 + $0x2d0c] ss:$16 sps:$4 sm:$0xff]   ;;  %v16397_v50 = vld [vmem:[%s16861_s15 + $0x2f08] ss:$16 sps:$4 sm:$0xff]  }
 0x669   : > { %11887 = vmatpush1.bf16.msra.mxu1 %v16319_v21  ;;  %11847 = vmatprep.subr.bf16.mxu0 %v16324_v12  ;;  %v16399_v52 = vld [vmem:[%s16861_s15 + $0x2f0c] ss:$16 sps:$4 sm:$0xff]  }
 0x66a   : > { %11888 = vmatprep.subr.bf16.mxu1 %v16327_v13 }
 0x66c   : > { %11848 = vmatpush1.bf16.msra.mxu0 %v16322_v15 }
 0x66d   : > { %11889 = vmatpush1.bf16.msra.mxu1 %v16325_v6  ;;  %11849 = vmatprep.subr.bf16.mxu0 %v16330_v53 }
 0x66e   : > { %11890 = vmatprep.subr.bf16.mxu1 %v16333_v55 }
 0x670   : > { %11850 = vmatpush1.bf16.msra.mxu0 %v16328_v4 }
 0x671   : > { %11891 = vmatpush1.bf16.msra.mxu1 %v16331_v20  ;;  %11851 = vmatprep.subr.bf16.mxu0 %v16336_v11 }
 0x672   : > { %11892 = vmatprep.subr.bf16.mxu1 %v16339_v60 }
 0x674   : > { %11852 = vmatpush1.bf16.msra.mxu0 %v16334_v51 }
 0x675   : > { %11893 = vmatpush1.bf16.msra.mxu1 %v16337_v62  ;;  %11853 = vmatprep.subr.bf16.mxu0 %v16342_v40 }
 0x676   : > { %11894 = vmatprep.subr.bf16.mxu1 %v16345_v1 }
 0x678   : > { %11854 = vmatpush1.bf16.msra.mxu0 %v16340_v63 }
 0x679   : > { %11895 = vmatpush1.bf16.msra.mxu1 %v16343_v2  ;;  %11855 = vmatprep.subr.bf16.mxu0 %v16348_v38 }
 0x67a   : > { %11896 = vmatprep.subr.bf16.mxu1 %v16351_v16 }
 0x67c   : > { %11856 = vmatpush1.bf16.msra.mxu0 %v16346_v26 }
 0x67d   : > { %11897 = vmatpush1.bf16.msra.mxu1 %v16349_v35  ;;  %11857 = vmatprep.subr.bf16.mxu0 %v16354_v42 }
 0x67e   : > { %11898 = vmatprep.subr.bf16.mxu1 %v16357_v24 }
 0x680   : > { %11858 = vmatpush2.bf16.msra.mxu0 %v16352_v25 }
 0x681   : > { %11899 = vmatpush2.bf16.msra.mxu1 %v16355_v36  ;;  %11859 = vmatprep.subr.bf16.mxu0 %v16360_v31 }
 0x682   : > { %11900 = vmatprep.subr.bf16.mxu1 %v16363_v59  ;;  %v16624_v59 = vmov 1983009808  }
 0x684   : > { %11860 = vmatpush2.bf16.msra.mxu0 %v16358_v3  ;;  %v11930_v3 = vunpack.c.l.s4 %v16624_v59 }
 0x685   : > { %11901 = vmatpush2.bf16.msra.mxu1 %v16361_v10  ;;  %11861 = vmatprep.subr.bf16.mxu0 %v16366_v49 }
 0x686   : > { %11902 = vmatprep.subr.bf16.mxu1 %v16369_v47 }
 0x688   : > { %11862 = vmatpush2.bf16.msra.mxu0 %v16364_v57  ;;  %v11931_v57 = vunpack.c.0.s8 %v11930_v3 }
 0x689   : > { %11903 = vmatpush2.bf16.msra.mxu1 %v16367_v34  ;;  %11863 = vmatprep.subr.bf16.mxu0 %v16372_v18 }
 0x68a   : > { %11904 = vmatprep.subr.bf16.mxu1 %v16375_v30 }
 0x68c   : > { %11864 = vmatpush2.bf16.msra.mxu0 %v16370_v44 }
 0x68d   : > { %11905 = vmatpush2.bf16.msra.mxu1 %v16373_v37  ;;  %11865 = vmatprep.subr.bf16.mxu0 %v16378_v9 }
 0x68e   : > { %11906 = vmatprep.subr.bf16.mxu1 %v16381_v61 }
 0x690   : > { %11866 = vmatpush2.bf16.msra.mxu0 %v16376_v39  ;;  %v18985_v39 = vld [vmem:[#allocation19_spill] sm:$0xff] }
 0x691   : > { %11907 = vmatpush2.bf16.msra.mxu1 %v16379_v28  ;;  %11867 = vmatprep.subr.bf16.mxu0 %v16384_v33  ;;  %v18905_v28 = vsub.s32 %v11931_v57, %v18985_v39 }
 0x692   : > { %11908 = vmatprep.subr.bf16.mxu1 %v16387_v46 }
 0x694   : > { %11868 = vmatpush2.bf16.msra.mxu0 %v16382_v45 }
 0x695   : > { %11909 = vmatpush2.bf16.msra.mxu1 %v16385_v32  ;;  %11869 = vmatprep.subr.bf16.mxu0 %v16390_v7 }
 0x696   : > { %11910 = vmatprep.subr.bf16.mxu1 %v16393_v19  ;;  %v11935_v19 = vrot.slane %v11927_v48, %v18905_v28 }
 0x698   : > { %11870 = vmatpush2.bf16.msra.mxu0 %v16388_v14 }
 0x699   : > { %11911 = vmatpush2.bf16.msra.mxu1 %v16391_v22  ;;  %11871 = vmatprep.subr.bf16.mxu0 %v16396_v23  ;;  %v384_v22 = vld [vmem:[#allocation2] sm:$0xff] }
 0x69a   : > { %11912 = vmatprep.subr.bf16.mxu1 %v16399_v52 }
 0x69c   : > { %11872 = vmatpush2.bf16.msra.mxu0 %v16394_v54 }
 0x69d   : > { %11913 = vmatpush2.bf16.msra.mxu1 %v16397_v50 }
 0x69f   : > { %v11629_v41 = vpop.f32.mrf.mxu0  ;;  %11874 = vmatmul.mubr.bf16.vlgmr.msra.gmra.mxu0 %v18004_v17 }
 0x6a0   : > { %v11670_v56 = vpop.f32.mrf.mxu1  ;;  %11915 = vmatmul.mubr.bf16.vlgmr.msra.gmra.mxu1 %v18014_v29  ;;  %v11630_v21 = vadd.f32 %v11629_v41, %v18839_v43 }
 0x6a1   : > { %v11631_v27 = vpop.f32.mrf.mxu0 }
 0x6a2   : > { %v11672_v5 = vpop.f32.mrf.mxu1  ;;  %v11671_v12 = vadd.f32 %v11670_v56, %v11630_v21  ;;  %v11632_v13 = vadd.f32 %v11631_v27, %v18844_v0 }
 0x6a3   : > { %v11633_v15 = vpop.f32.mrf.mxu0 }
 0x6a4   : > { %v11674_v6 = vpop.f32.mrf.mxu1  ;;  %v11673_v53 = vadd.f32 %v11672_v5, %v11632_v13 }
 0x6a5   : > { %v11634_v55 = vpop.f32.mrf.mxu0 }
 0x6a6   : > { %v11675_v4 = vpop.f32.mrf.mxu1 }
 0x6df   : > { %v11711_v20 = vpop.f32.mrf.mxu0 }
 0x6e0   : > { %v11752_v11 = vpop.f32.mrf.mxu1  ;;  %v11712_v60 = vadd.f32 %v11711_v20, %v11671_v12 }
 0x6e1   : > { %v11713_v51 = vpop.f32.mrf.mxu0 }
 0x6e2   : > { %v11754_v62 = vpop.f32.mrf.mxu1  ;;  %v11753_v17 = vadd.f32 %v11752_v11, %v11712_v60  ;;  %v11714_v40 = vadd.f32 %v11713_v51, %v11673_v53 }
 0x6e3   : > { %v11715_v29 = vpop.f32.mrf.mxu0 }
 0x6e4   : > { %v11756_v1 = vpop.f32.mrf.mxu1  ;;  %v11755_v43 = vadd.f32 %v11754_v62, %v11714_v40 }
 0x6e5   : > { %v11716_v63 = vpop.f32.mrf.mxu0 }
 0x6e6   : > { %v11757_v2 = vpop.f32.mrf.mxu1 }
 0x71f   : > { %v11793_v38 = vpop.f32.mrf.mxu0 }
 0x720   : > { %v11834_v16 = vpop.f32.mrf.mxu1  ;;  %v11794_v0 = vadd.f32 %v11793_v38, %v11753_v17 }
 0x721   : > { %v11795_v26 = vpop.f32.mrf.mxu0 }
 0x722   : > { %v11836_v35 = vpop.f32.mrf.mxu1  ;;  %v11835_v42 = vadd.f32 %v11834_v16, %v11794_v0  ;;  %v11796_v10 = vadd.f32 %v11795_v26, %v11755_v43 }
 0x723   : > { %v11797_v24 = vpop.f32.mrf.mxu0 }
 0x724   : > { %v11838_v25 = vpop.f32.mrf.mxu1  ;;  %v11837_v34 = vadd.f32 %v11836_v35, %v11796_v10 }
 0x725   : > { %v11798_v36 = vpop.f32.mrf.mxu0 }
 0x726   : > { %v11839_v31 = vpop.f32.mrf.mxu1 }
 0x75f   : > { %v11875_v49 = vpop.f32.mrf.mxu0 }
 0x760   : > { %v11916_v47 = vpop.f32.mrf.mxu1  ;;  %v11876_v18 = vadd.f32 %v11875_v49, %v11835_v42 }
 0x761   : > { %v11877_v30 = vpop.f32.mrf.mxu0 }
 0x762   : > { %v11918_v44 = vpop.f32.mrf.mxu1  ;;  %v11878_v37 = vadd.f32 %v11877_v30, %v11837_v34  ;;  %v11917_v33 = vadd.f32 %v11916_v47, %v11876_v18 }
 0x763   : > { %v11879_v9 = vpop.f32.mrf.mxu0 }
 0x764   : > { %v11920_v61 = vpop.f32.mrf.mxu1  ;;  %v11919_v46 = vadd.f32 %v11918_v44, %v11878_v37 }
 0x765   : > { %v11880_v45 = vpop.f32.mrf.mxu0 }
 0x766   : > { %v11921_v32 = vpop.f32.mrf.mxu1  ;;  %v11928_v7 = vcombine.low %v11917_v33, %v11919_v46 }
 0x768   : > { %v11942_v14 = vrot.slane %v11928_v7, %v18905_v28 }
 0x76a   : > { %v11943_v23 = vcombine.low %v11935_v19, %v11942_v14  ;;  %11950 = sbr.rel (%p13988_p13) target bundleno = 2337 (0x921), region = 80 }
 0x76c   : > { %v11945_v52 = vadd.f32 %v11943_v23, %v384_v22 }
 0x76e   : > { %11946 = vst [vmem:[#allocation2] sm:$0xff] %v11945_v52 }
 0x76f   : > { %v12023_v54 = vld [vmem:[#allocation9 + $0xf8] sm:$0xff]  ;;  %v12022_v41 = vld [vmem:[#allocation9 + $0xf0] sm:$0xff]  ;;  %v12021_v21 = vld [vmem:[#allocation9 + $0xe8] sm:$0xff]  ;;  %vm12316_vm3 = vcmask 1041408   ;;  %vm12334_vm4 = vcmask 1024  }
 0x770   : > { %v12087_v50 = vld [vmem:[#allocation9 + $0x2f8] sm:$0xff]  ;;  %12154 = vmatprep.subr.mxu0 %v12023_v54  ;;  %v12086_v56 = vld [vmem:[#allocation9 + $0x2f0] sm:$0xff]  ;;  %v12085_v27 = vld [vmem:[#allocation9 + $0x2e8] sm:$0xff] }
 0x771   : > { %12225 = vmatprep.subr.mxu1 %v12087_v50  ;;  %12155 = vmatpush1.msra.mxu0 %v12022_v41  ;;  %v12020_v8 = vld [vmem:[#allocation9 + $0xe0] sm:$0xff]  ;;  %v12019_v48 = vld [vmem:[#allocation9 + $0xd8] sm:$0xff]  ;;  %v12018_v12 = vld [vmem:[#allocation9 + $0xd0] sm:$0xff] }
 0x772   : > { %12226 = vmatpush1.msra.mxu1 %v12086_v56  ;;  %v12084_v58 = vld [vmem:[#allocation9 + $0x2e0] sm:$0xff]  ;;  %12156 = vmatprep.subr.mxu0 %v12021_v21  ;;  %v12083_v5 = vld [vmem:[#allocation9 + $0x2d8] sm:$0xff]  ;;  %v12082_v13 = vld [vmem:[#allocation9 + $0x2d0] sm:$0xff] }
 0x773   : > { %12227 = vmatprep.subr.mxu1 %v12085_v27  ;;  %12157 = vmatpush1.msra.mxu0 %v12020_v8  ;;  %v12017_v15 = vld [vmem:[#allocation9 + $0xc8] sm:$0xff]  ;;  %v12016_v53 = vld [vmem:[#allocation9 + $0xc0] sm:$0xff]  ;;  %v12015_v4 = vld [vmem:[#allocation9 + $0xb8] sm:$0xff] }
 0x774   : > { %12228 = vmatpush1.msra.mxu1 %v12084_v58  ;;  %v12081_v6 = vld [vmem:[#allocation9 + $0x2c8] sm:$0xff]  ;;  %12158 = vmatprep.subr.mxu0 %v12019_v48  ;;  %v12080_v55 = vld [vmem:[#allocation9 + $0x2c0] sm:$0xff]  ;;  %v12079_v20 = vld [vmem:[#allocation9 + $0x2b8] sm:$0xff] }
 0x775   : > { %12229 = vmatprep.subr.mxu1 %v12083_v5  ;;  %12159 = vmatpush1.msra.mxu0 %v12018_v12  ;;  %v12014_v11 = vld [vmem:[#allocation9 + $0xb0] sm:$0xff]  ;;  %v12013_v51 = vld [vmem:[#allocation9 + $0xa8] sm:$0xff]  ;;  %v12012_v17 = vld [vmem:[#allocation9 + $0xa0] sm:$0xff] }
 0x776   : > { %12230 = vmatpush1.msra.mxu1 %v12082_v13  ;;  %12160 = vmatprep.subr.mxu0 %v12017_v15  ;;  %v12078_v60 = vld [vmem:[#allocation9 + $0x2b0] sm:$0xff]  ;;  %v12077_v62 = vld [vmem:[#allocation9 + $0x2a8] sm:$0xff]  ;;  %v12076_v40 = vld [vmem:[#allocation9 + $0x2a0] sm:$0xff] }
 0x777   : > { %12231 = vmatprep.subr.mxu1 %v12081_v6  ;;  %12161 = vmatpush1.msra.mxu0 %v12016_v53  ;;  %v12011_v29 = vld [vmem:[#allocation9 + $0x98] sm:$0xff]  ;;  %v12010_v43 = vld [vmem:[#allocation9 + $0x90] sm:$0xff]  ;;  %v12009_v2 = vld [vmem:[#allocation9 + $0x88] sm:$0xff] }
 0x778   : > { %12232 = vmatpush1.msra.mxu1 %v12080_v55  ;;  %12162 = vmatprep.subr.mxu0 %v12015_v4  ;;  %v12075_v1 = vld [vmem:[#allocation9 + $0x298] sm:$0xff]  ;;  %v12074_v63 = vld [vmem:[#allocation9 + $0x290] sm:$0xff]  ;;  %v12073_v38 = vld [vmem:[#allocation9 + $0x288] sm:$0xff] }
 0x779   : > { %12233 = vmatprep.subr.mxu1 %v12079_v20  ;;  %12163 = vmatpush1.msra.mxu0 %v12014_v11  ;;  %v12008_v16 = vld [vmem:[#allocation9 + $0x80] sm:$0xff]  ;;  %v12007_v26 = vld [vmem:[#allocation9 + $0x78] sm:$0xff]  ;;  %v12006_v42 = vld [vmem:[#allocation9 + $0x70] sm:$0xff] }
 0x77a   : > { %12234 = vmatpush1.msra.mxu1 %v12078_v60  ;;  %12164 = vmatprep.subr.mxu0 %v12013_v51  ;;  %v12072_v0 = vld [vmem:[#allocation9 + $0x280] sm:$0xff]  ;;  %v12071_v35 = vld [vmem:[#allocation9 + $0x278] sm:$0xff]  ;;  %v12070_v24 = vld [vmem:[#allocation9 + $0x270] sm:$0xff] }
 0x77b   : > { %12235 = vmatprep.subr.mxu1 %v12077_v62  ;;  %12165 = vmatpush1.msra.mxu0 %v12012_v17  ;;  %v12005_v25 = vld [vmem:[#allocation9 + $0x68] sm:$0xff]  ;;  %v12004_v31 = vld [vmem:[#allocation9 + $0x60] sm:$0xff]  ;;  %v12003_v3 = vld [vmem:[#allocation9 + $0x58] sm:$0xff] }
 0x77c   : > { %12236 = vmatpush1.msra.mxu1 %v12076_v40  ;;  %12166 = vmatprep.subr.mxu0 %v12011_v29  ;;  %v12069_v36 = vld [vmem:[#allocation9 + $0x268] sm:$0xff]  ;;  %v12068_v59 = vld [vmem:[#allocation9 + $0x260] sm:$0xff]  ;;  %v12067_v10 = vld [vmem:[#allocation9 + $0x258] sm:$0xff] }
 0x77d   : > { %12237 = vmatprep.subr.mxu1 %v12075_v1  ;;  %12167 = vmatpush1.msra.mxu0 %v12010_v43  ;;  %v12002_v49 = vld [vmem:[#allocation9 + $0x50] sm:$0xff]  ;;  %v12001_v57 = vld [vmem:[#allocation9 + $0x48] sm:$0xff]  ;;  %v12000_v18 = vld [vmem:[#allocation9 + $0x40] sm:$0xff] }
 0x77e   : > { %12238 = vmatpush1.msra.mxu1 %v12074_v63  ;;  %12168 = vmatprep.subr.mxu0 %v12009_v2  ;;  %v12066_v47 = vld [vmem:[#allocation9 + $0x250] sm:$0xff]  ;;  %v12065_v34 = vld [vmem:[#allocation9 + $0x248] sm:$0xff]  ;;  %v12064_v30 = vld [vmem:[#allocation9 + $0x240] sm:$0xff] }
 0x77f   : > { %12239 = vmatprep.subr.mxu1 %v12073_v38  ;;  %12169 = vmatpush1.msra.mxu0 %v12008_v16  ;;  %v11999_v44 = vld [vmem:[#allocation9 + $0x38] sm:$0xff]  ;;  %v11998_v9 = vld [vmem:[#allocation9 + $0x30] sm:$0xff]  ;;  %v11997_v39 = vld [vmem:[#allocation9 + $0x28] sm:$0xff] }
 0x780   : > { %12240 = vmatpush1.msra.mxu1 %v12072_v0  ;;  %12170 = vmatprep.subr.mxu0 %v12007_v26  ;;  %v12063_v37 = vld [vmem:[#allocation9 + $0x238] sm:$0xff]  ;;  %v12062_v61 = vld [vmem:[#allocation9 + $0x230] sm:$0xff]  ;;  %v12061_v33 = vld [vmem:[#allocation9 + $0x228] sm:$0xff] }
 0x781   : > { %12241 = vmatprep.subr.mxu1 %v12071_v35  ;;  %12171 = vmatpush1.msra.mxu0 %v12006_v42  ;;  %v11996_v46 = vld [vmem:[#allocation9 + $0x20] sm:$0xff]  ;;  %v11995_v32 = vld [vmem:[#allocation9 + $0x18] sm:$0xff]  ;;  %v11994_v19 = vld [vmem:[#allocation9 + $0x10] sm:$0xff] }
 0x782   : > { %12242 = vmatpush1.msra.mxu1 %v12070_v24  ;;  %12172 = vmatprep.subr.mxu0 %v12005_v25  ;;  %v12060_v45 = vld [vmem:[#allocation9 + $0x220] sm:$0xff]  ;;  %v12059_v7 = vld [vmem:[#allocation9 + $0x218] sm:$0xff]  ;;  %v12058_v14 = vld [vmem:[#allocation9 + $0x210] sm:$0xff] }
 0x783   : > { %12243 = vmatprep.subr.mxu1 %v12069_v36  ;;  %12173 = vmatpush1.msra.mxu0 %v12004_v31  ;;  %v11993_v22 = vld [vmem:[#allocation9 + $0x8] sm:$0xff]  ;;  %v11992_v52 = vld [vmem:[#allocation9] sm:$0xff]  ;;  %v12055_v50 = vld [vmem:[#allocation9 + $0x1f8] sm:$0xff] }
 0x784   : > { %12244 = vmatpush1.msra.mxu1 %v12068_v59  ;;  %12174 = vmatprep.subr.mxu0 %v12003_v3  ;;  %v12057_v23 = vld [vmem:[#allocation9 + $0x208] sm:$0xff]  ;;  %v12056_v54 = vld [vmem:[#allocation9 + $0x200] sm:$0xff]  ;;  %v12119_v41 = vld [vmem:[#allocation9 + $0x3f8] sm:$0xff] }
 0x785   : > { %12245 = vmatprep.subr.mxu1 %v12067_v10  ;;  %12175 = vmatpush1.msra.mxu0 %v12002_v49  ;;  %v12054_v56 = vld [vmem:[#allocation9 + $0x1f0] sm:$0xff]  ;;  %v12053_v27 = vld [vmem:[#allocation9 + $0x1e8] sm:$0xff]  ;;  %v12052_v58 = vld [vmem:[#allocation9 + $0x1e0] sm:$0xff] }
 0x786   : > { %12246 = vmatpush1.msra.mxu1 %v12066_v47  ;;  %12176 = vmatprep.subr.mxu0 %v12001_v57  ;;  %v12118_v21 = vld [vmem:[#allocation9 + $0x3f0] sm:$0xff]  ;;  %v12117_v8 = vld [vmem:[#allocation9 + $0x3e8] sm:$0xff]  ;;  %v12116_v48 = vld [vmem:[#allocation9 + $0x3e0] sm:$0xff] }
 0x787   : > { %12247 = vmatprep.subr.mxu1 %v12065_v34  ;;  %12177 = vmatpush1.msra.mxu0 %v12000_v18  ;;  %v12051_v5 = vld [vmem:[#allocation9 + $0x1d8] sm:$0xff]  ;;  %v12050_v13 = vld [vmem:[#allocation9 + $0x1d0] sm:$0xff]  ;;  %v12049_v6 = vld [vmem:[#allocation9 + $0x1c8] sm:$0xff] }
 0x788   : > { %12248 = vmatpush1.msra.mxu1 %v12064_v30  ;;  %12178 = vmatprep.subr.mxu0 %v11999_v44  ;;  %v12115_v12 = vld [vmem:[#allocation9 + $0x3d8] sm:$0xff]  ;;  %v12114_v15 = vld [vmem:[#allocation9 + $0x3d0] sm:$0xff]  ;;  %v12113_v53 = vld [vmem:[#allocation9 + $0x3c8] sm:$0xff] }
 0x789   : > { %12249 = vmatprep.subr.mxu1 %v12063_v37  ;;  %12179 = vmatpush1.msra.mxu0 %v11998_v9  ;;  %v12048_v55 = vld [vmem:[#allocation9 + $0x1c0] sm:$0xff]  ;;  %v12047_v20 = vld [vmem:[#allocation9 + $0x1b8] sm:$0xff]  ;;  %v12046_v60 = vld [vmem:[#allocation9 + $0x1b0] sm:$0xff] }
 0x78a   : > { %12250 = vmatpush1.msra.mxu1 %v12062_v61  ;;  %12180 = vmatprep.subr.mxu0 %v11997_v39  ;;  %v12112_v4 = vld [vmem:[#allocation9 + $0x3c0] sm:$0xff]  ;;  %v12111_v11 = vld [vmem:[#allocation9 + $0x3b8] sm:$0xff]  ;;  %v12110_v51 = vld [vmem:[#allocation9 + $0x3b0] sm:$0xff] }
 0x78b   : > { %12251 = vmatprep.subr.mxu1 %v12061_v33  ;;  %12181 = vmatpush1.msra.mxu0 %v11996_v46  ;;  %v18986_v62 = vld [vmem:[#allocation19_spill] sm:$0xff]  ;;  %v12043_v16 = vld [vmem:[#allocation9 + $0x198] sm:$0xff]  ;;  %v12042_v35 = vld [vmem:[#allocation9 + $0x190] sm:$0xff] }
 0x78c   : > { %12252 = vmatpush1.msra.mxu1 %v12060_v45  ;;  %12182 = vmatprep.subr.mxu0 %v11995_v32  ;;  %v18914_v17 = vsub.s32 0, %v18986_v62  ;;  %v18917_v40 = vsub.s32 1, %v18986_v62  ;;  %v11964_v29 = vsub.s32 2, %v18986_v62  ;;  %v12045_v1 = vld [vmem:[#allocation9 + $0x1a8] sm:$0xff]  ;;  %v11968_v63 = vsub.s32 3, %v18986_v62  ;;  %v12044_v2 = vld [vmem:[#allocation9 + $0x1a0] sm:$0xff] }
 0x78d   : > { %12253 = vmatprep.subr.mxu1 %v12059_v7  ;;  %12183 = vmatpush1.msra.mxu0 %v11994_v19  ;;  %v12109_v43 = vld [vmem:[#allocation9 + $0x3a8] sm:$0xff]  ;;  %v12108_v38 = vld [vmem:[#allocation9 + $0x3a0] sm:$0xff]  ;;  %v12107_v0 = vld [vmem:[#allocation9 + $0x398] sm:$0xff] }
 0x78e   : > { %12254 = vmatpush1.msra.mxu1 %v12058_v14  ;;  %12184 = vmatprep.subr.mxu0 %v11993_v22  ;;  %v11952_v26 = vld [vmem:[#allocation8] sm:$0xf]  ;;  %v12106_v42 = vld [vmem:[#allocation9 + $0x390] sm:$0xff]  ;;  %v12041_v31 = vld [vmem:[#allocation9 + $0x188] sm:$0xff] }
 0x78f   : > { %12255 = vmatprep.subr.mxu1 %v12057_v23  ;;  %12185 = vmatpush1.msra.mxu0 %v11992_v52  ;;  %v11957_v24 = vrot.slane %v11952_v26, %v18914_v17  ;;  %v11961_v25 = vrot.slane %v11952_v26, %v18917_v40  ;;  %v11965_v36 = vrot.slane %v11952_v26, %v11964_v29  ;;  %v12105_v59 = vld [vmem:[#allocation9 + $0x388] sm:$0xff]  ;;  %v12040_v10 = vld [vmem:[#allocation9 + $0x180] sm:$0xff]  ;;  %v12039_v57 = vld [vmem:[#allocation9 + $0x178] sm:$0xff] }
 0x790   : > { %12256 = vmatpush1.msra.mxu1 %v12056_v54  ;;  %12186 = vmatprep.subr.mxu0 %v12055_v50  ;;  %v11969_v3 = vrot.slane %v11952_v26, %v11968_v63  ;;  %v12104_v49 = vld [vmem:[#allocation9 + $0x380] sm:$0xff]  ;;  %v12103_v34 = vld [vmem:[#allocation9 + $0x378] sm:$0xff]  ;;  %v12038_v30 = vld [vmem:[#allocation9 + $0x170] sm:$0xff] }
 0x791   : > { %12257 = vmatprep.subr.mxu1 %v12119_v41  ;;  %12187 = vmatpush2.msra.mxu0 %v12054_v56  ;;  %v11970_v47 = vcombine.low %v11957_v24, %v11961_v25  ;;  %v12102_v44 = vld [vmem:[#allocation9 + $0x370] sm:$0xff]  ;;  %v12037_v9 = vld [vmem:[#allocation9 + $0x168] sm:$0xff]  ;;  %v12036_v33 = vld [vmem:[#allocation9 + $0x160] sm:$0xff] }
 0x792   : > { %12258 = vmatpush2.msra.mxu1 %v12118_v21  ;;  %12188 = vmatprep.subr.mxu0 %v12053_v27  ;;  %v11971_v18 = vcombine.low %v11965_v36, %v11969_v3  ;;  %v12101_v61 = vld [vmem:[#allocation9 + $0x368] sm:$0xff]  ;;  %v12100_v46 = vld [vmem:[#allocation9 + $0x360] sm:$0xff]  ;;  %v11951_v45 = vld [vmem:[#allocation2] sm:$0xff] }
 0x793   : > { %12259 = vmatprep.subr.mxu1 %v12117_v8  ;;  %12189 = vmatpush2.msra.mxu0 %v12052_v58  ;;  %v11978_v37 = vrot.slane %v11970_v47, %v18905_v28  ;;  %v12035_v32 = vld [vmem:[#allocation9 + $0x158] sm:$0xff]  ;;  %v12034_v14 = vld [vmem:[#allocation9 + $0x150] sm:$0xff]  ;;  %v12033_v23 = vld [vmem:[#allocation9 + $0x148] sm:$0xff] }
 0x794   : > { %12260 = vmatpush2.msra.mxu1 %v12116_v48  ;;  %12190 = vmatprep.subr.mxu0 %v12051_v5  ;;  %v11985_v39 = vrot.slane %v11971_v18, %v18905_v28  ;;  %v12099_v7 = vld [vmem:[#allocation9 + $0x358] sm:$0xff]  ;;  %v12098_v22 = vld [vmem:[#allocation9 + $0x350] sm:$0xff]  ;;  %v12097_v52 = vld [vmem:[#allocation9 + $0x348] sm:$0xff] }
 0x795   : > { %12261 = vmatprep.subr.mxu1 %v12115_v12  ;;  %12191 = vmatpush2.msra.mxu0 %v12050_v13  ;;  %v12032_v50 = vld [vmem:[#allocation9 + $0x140] sm:$0xff]  ;;  %v12031_v56 = vld [vmem:[#allocation9 + $0x138] sm:$0xff]  ;;  %v12030_v8 = vld [vmem:[#allocation9 + $0x130] sm:$0xff] }
 0x796   : > { %12262 = vmatpush2.msra.mxu1 %v12114_v15  ;;  %12192 = vmatprep.subr.mxu0 %v12049_v6  ;;  %v11986_v19 = vcombine.low %v11978_v37, %v11985_v39  ;;  %v12096_v41 = vld [vmem:[#allocation9 + $0x340] sm:$0xff]  ;;  %v12095_v21 = vld [vmem:[#allocation9 + $0x338] sm:$0xff]  ;;  %v12094_v58 = vld [vmem:[#allocation9 + $0x330] sm:$0xff] }
 0x797   : > { %12263 = vmatprep.subr.mxu1 %v12113_v53  ;;  %12193 = vmatpush2.msra.mxu0 %v12048_v55  ;;  %v12029_v48 = vld [vmem:[#allocation9 + $0x128] sm:$0xff]  ;;  %v12028_v13 = vld [vmem:[#allocation9 + $0x120] sm:$0xff]  ;;  %v12027_v55 = vld [vmem:[#allocation9 + $0x118] sm:$0xff] }
 0x798   : > { %12264 = vmatpush2.msra.mxu1 %v12112_v4  ;;  %12194 = vmatprep.subr.mxu0 %v12047_v20  ;;  %v11988_v54 = vadd.f32 %v11986_v19, %v11951_v45  ;;  %v12093_v5 = vld [vmem:[#allocation9 + $0x328] sm:$0xff]  ;;  %v12092_v15 = vld [vmem:[#allocation9 + $0x320] sm:$0xff]  ;;  %v12091_v4 = vld [vmem:[#allocation9 + $0x318] sm:$0xff] }
 0x799   : > { %12265 = vmatprep.subr.mxu1 %v12111_v11  ;;  %12195 = vmatpush2.msra.mxu0 %v12046_v60  ;;  %v12026_v20 = vld [vmem:[#allocation9 + $0x110] sm:$0xff]  ;;  %v12089_v62 = vld [vmem:[#allocation9 + $0x308] sm:$0xff]  ;;  %v12088_v63 = vld [vmem:[#allocation9 + $0x300] sm:$0xff] }
 0x79a   : > { %12266 = vmatpush2.msra.mxu1 %v12110_v51  ;;  %12196 = vmatprep.subr.mxu0 %v12045_v1  ;;  %vm11989_vm0 = vcmp.gt.f32.partialorder %v11988_v54, 0.0  ;;  %v11990_v27 = vmul.f32 0.2, %v11988_v54  ;;  %v12090_v11 = vld [vmem:[#allocation9 + $0x310] sm:$0xff]  ;;  %v12025_v51 = vld [vmem:[#allocation9 + $0x108] sm:$0xff]  ;;  %v12024_v1 = vld [vmem:[#allocation9 + $0x100] sm:$0xff] }
 0x79b   : > { %12267 = vmatprep.subr.mxu1 %v12109_v43  ;;  %12197 = vmatpush2.msra.mxu0 %v12044_v2 }
 0x79c   : > { %12268 = vmatpush2.msra.mxu1 %v12108_v38  ;;  %12198 = vmatprep.subr.mxu0 %v12043_v16  ;;  %v11991_v12 = vsel %vm11989_vm0, %v11988_v54, %v11990_v27 }
 0x79d   : > { %12269 = vmatprep.subr.mxu1 %v12107_v0  ;;  %12199 = vmatpush2.msra.mxu0 %v12042_v35  ;;  %v12140_v6 = vrot.slane %v11991_v12, %v18905_v28  ;;  %v12133_v53 = vcombine.high %v11991_v12, %v11991_v12  ;;  %v12302_v35 = vld [vmem:[#allocation12] sm:$0x3] }
 0x79e   : > { %12270 = vmatpush2.msra.mxu1 %v12106_v42  ;;  %12200 = vmatprep.subr.mxu0 %v12041_v31  ;;  %v12307_v31 = vrot.slane %v12302_v35, %v18914_v17 }
 0x79f   : > { %12271 = vmatprep.subr.mxu1 %v12105_v59  ;;  %12201 = vmatpush2.msra.mxu0 %v12040_v10  ;;  %v12147_v60 = vrot.slane %v12133_v53, %v18905_v28  ;;  %v12148_v29 = vcombine.high %v12140_v6, %v12140_v6  ;;  %v12120_v28 = vld [vmem:[#allocation11] sm:$0x3]  ;;  %v12311_v10 = vrot.slane %v12302_v35, %v18917_v40 }
 0x7a0   : > { %12272 = vmatpush2.msra.mxu1 %v12104_v49  ;;  %12202 = vmatprep.subr.mxu0 %v12039_v57  ;;  %v12125_v2 = vrot.slane %v12120_v28, %v18914_v17  ;;  %v12129_v38 = vrot.slane %v12120_v28, %v18917_v40 }
 0x7a1   : > { %12273 = vmatprep.subr.mxu1 %v12103_v34  ;;  %12203 = vmatpush2.msra.mxu0 %v12038_v30  ;;  %v12149_v43 = vcombine.high %v12147_v60, %v12147_v60 }
 0x7a2   : > { %12274 = vmatpush2.msra.mxu1 %v12102_v44  ;;  %12204 = vmatprep.subr.mxu0 %v12037_v9  ;;  %v13989_v9 = vld [vmem:[#allocation3] ss:$0 sm:$0xff] }
 0x7a3   : > { %12275 = vmatprep.subr.mxu1 %v12101_v61  ;;  %12205 = vmatpush2.msra.mxu0 %v12036_v33 }
 0x7a4   : > { %12276 = vmatpush2.msra.mxu1 %v12100_v46  ;;  %12206 = vmatprep.subr.mxu0 %v12035_v32 }
 0x7a5   : > { %12277 = vmatprep.subr.mxu1 %v12099_v7  ;;  %12207 = vmatpush2.msra.mxu0 %v12034_v14 }
 0x7a6   : > { %12278 = vmatpush2.msra.mxu1 %v12098_v22  ;;  %12208 = vmatprep.subr.mxu0 %v12033_v23 }
 0x7a7   : > { %12279 = vmatprep.subr.mxu1 %v12097_v52  ;;  %12209 = vmatpush2.msra.mxu0 %v12032_v50 }
 0x7a8   : > { %12280 = vmatpush2.msra.mxu1 %v12096_v41  ;;  %12210 = vmatprep.subr.mxu0 %v12031_v56 }
 0x7a9   : > { %12281 = vmatprep.subr.mxu1 %v12095_v21  ;;  %12211 = vmatpush2.msra.mxu0 %v12030_v8 }
 0x7aa   : > { %12282 = vmatpush2.msra.mxu1 %v12094_v58  ;;  %12212 = vmatprep.subr.mxu0 %v12029_v48 }
 0x7ab   : > { %12283 = vmatprep.subr.mxu1 %v12093_v5  ;;  %12213 = vmatpush2.msra.mxu0 %v12028_v13 }
 0x7ac   : > { %12284 = vmatpush2.msra.mxu1 %v12092_v15  ;;  %12214 = vmatprep.subr.mxu0 %v12027_v55 }
 0x7ad   : > { %12285 = vmatprep.subr.mxu1 %v12091_v4  ;;  %12215 = vmatpush2.msra.mxu0 %v12026_v20 }
 0x7ae   : > { %12286 = vmatpush2.msra.mxu1 %v12090_v11  ;;  %12216 = vmatprep.subr.mxu0 %v12025_v51 }
 0x7af   : > { %12287 = vmatprep.subr.mxu1 %v12089_v62  ;;  %12217 = vmatpush2.msra.mxu0 %v12024_v1 }
 0x7b0   : > { %12218 = vmatprep.mubr.f32.mxu0 %v12148_v29  ;;  %12288 = vmatpush2.msra.mxu1 %v12088_v63 }
 0x7b1   : > { %12289 = vmatprep.mubr.f32.mxu1 %v12149_v43  ;;  %12219 = vmatmul.mubr.f32.vlgmr.msra.gmra.mxu0 %v12140_v6 }
 0x7b2   : > { %12290 = vmatmul.mubr.f32.vlgmr.msra.gmra.mxu1 %v12147_v60 }
 0x871   : > { %v12220_v16 = vpop.f32.mrf.mxu0 }
 0x872   : > { %v12291_v0 = vpop.f32.mrf.mxu1  ;;  %v12221_v26 = vadd.f32 %v12220_v16, %v12125_v2 }
 0x873   : > { %v12222_v42 = vpop.f32.mrf.mxu0 }
 0x874   : > { %v12292_v24 = vadd.f32 %v12291_v0, %v12221_v26  ;;  %v12223_v25 = vadd.f32 %v12222_v42, %v12129_v38  ;;  %v12293_v36 = vpop.f32.mrf.mxu1 }
 0x876   : > { %vm12296_vm1 = vcmp.gt.f32.partialorder %v12292_v24, 0.0  ;;  %v12298_v59 = vmul.f32 0.2, %v12292_v24  ;;  %v12294_v3 = vadd.f32 %v12293_v36, %v12223_v25 }
 0x878   : > { %vm12297_vm2 = vcmp.gt.f32.partialorder %v12294_v3, 0.0  ;;  %v12299_v49 = vmul.f32 0.2, %v12294_v3  ;;  %v12300_v47 = vsel %vm12296_vm1, %v12292_v24, %v12298_v59 }
 0x879   : > { %v12314_v57 = vmul.f32 %v12307_v31, %v12300_v47 }
 0x87a   : > { %v12301_v34 = vsel %vm12297_vm2, %v12294_v3, %v12299_v49 }
 0x87b   : > { %v12315_v18 = vmul.f32 %v12311_v10, %v12301_v34  ;;  %v12317_v30 = vsel %vm12316_vm3, %v12314_v57, 0.0 }
 0x87d   : > { %v12318_v44 = vsel %vm12316_vm3, %v12315_v18, 0.0 }
 0x87e   : > { %v12319_v37 = vadd.f32 %v12318_v44, %v12317_v30 }
 0x880   : > { %12320 = vadd.xlane.f32.xlu0 %v12319_v37 }
 0x909   : > { %v12321_v61 = vpop.xlane.xlu0 %12320 }
 0x90a   : > { %v12329_v39 = vadd.f32 %v13989_v9, %v12321_v61 }
 0x90c   : > { %v12330_v17 = vmul.f32 0.5, %v12329_v39 }
 0x90e   : > { %16400 = vtanh.f32 %v12330_v17 }
 0x91b   : > { %v16401_v33 = vpop.eup %16400 }
 0x91c   : > { %v12332_v46 = vadd.f32 1.0, %v16401_v33 }
 0x91e   : > { %v12333_v40 = vmul.f32 0.5, %v12332_v46 }
 0x920   : > { %12335 = vst.msk [vmem:[%s18954_s7] sm:$0x3] %vm12334_vm4, %v12333_v40 }
 0x921 PF: > { %p24_p2 = scmp.ge.s32.totalorder %s16759_s14, 4   ;;  %s18987_s26 = smov %s16604_s27 }
 0x922   : > { %s18988_s27 = smov %s16608_s28  ;;  %s18989_s28 = smov %s16771_s16 }
 0x923   : > { %s18990_s29 = smov %s16759_s14  ;;  %26 = sbr.rel (!%p24_p2) target bundleno = 10 (0xa), region = 121 }
 0x928   :  { %12347 = vsyncpa [#allocation5], 1 }
 0x929   :  { %12349 = vsyncpa [#allocation5 + $0x1], 1 }
 0x92a   :  { %12350 = vsyncpa [#allocation7], 1 }
 0x92b   :  { %12352 = vsyncpa [#allocation7 + $0x1], 1 }
 0x92c   :  { %12353 = vsyncpa [#allocation10], 1 }
 0x92d   :  { %12354 = vsyncpa [#allocation13], 1 }

</bundles_post_ra>
